<compile_context>
chip_gen: v6e
topology: v6e:2x2x1
jax: 0.10.0
libtpu: 0.0.40
codegen_flags: <defaults>
</compile_context>

<pallas_src>
import functools

import jax
import jax.numpy as jnp
from jax.experimental import pallas as pl
from jax.experimental.pallas import tpu as pltpu


_PARALLEL = pltpu.CompilerParams(dimension_semantics=("parallel",))
_ROW_TILE = 512     # merged (batch x spatial) rows per conv grid step
_FC_TILE = 256      # batch rows per fc grid step


def _const_spec(a):
    """Full-extent block fetched at block index 0 on every grid step."""
    zeros = (0,) * a.ndim
    return pl.BlockSpec(a.shape, lambda r, _z=zeros: _z)


# ----------------------------- Pallas kernels -------------------------------

def _conv_lrn_bn_kernel(x_ref, w_ref, b_ref, band_ref, s_ref, t_ref, o_ref, *,
                        lrn_k):
    """Row tile: bn_scale * LRN2(relu(patches @ w + b)) + bn_shift."""
    acc = jnp.dot(x_ref[...], w_ref[...], preferred_element_type=jnp.float32)
    acc = jnp.maximum(acc + b_ref[...], 0.0)                    # bias + ReLU
    sq = acc * acc
    # band folds alpha/size, so t[:, c] = k + alpha/2 * (sq_c + sq_{c-1}).
    t = lrn_k + jnp.dot(sq, band_ref[...], preferred_element_type=jnp.float32)
    inv = jax.lax.rsqrt(t)                                      # EUP
    acc = acc * (inv * jnp.sqrt(inv))                           # acc / t**0.75
    o_ref[...] = (acc * s_ref[...] + t_ref[...]).astype(o_ref.dtype)


def _conv_bn_kernel(x_ref, w_ref, b_ref, s_ref, t_ref, o_ref):
    """Row tile: bn_scale * relu(patches @ w + b) + bn_shift."""
    acc = jnp.dot(x_ref[...], w_ref[...], preferred_element_type=jnp.float32)
    acc = jnp.maximum(acc + b_ref[...], 0.0)
    o_ref[...] = (acc * s_ref[...] + t_ref[...]).astype(o_ref.dtype)


def _fc_fused_kernel(x_ref, w1, b1, s1, t1, w2, b2, s2, t2, w3, b3, o_ref):
    """fc1+ReLU+BN6 -> fc2+ReLU+BN7 -> fc3, all VMEM resident."""
    h = jnp.dot(x_ref[...], w1[...], preferred_element_type=jnp.float32)
    h = jnp.maximum(h + b1[...], 0.0) * s1[...] + t1[...]
    h = jnp.dot(h.astype(w2.dtype), w2[...], preferred_element_type=jnp.float32)
    h = jnp.maximum(h + b2[...], 0.0) * s2[...] + t2[...]
    out = jnp.dot(h.astype(w3.dtype), w3[...], preferred_element_type=jnp.float32)
    o_ref[...] = (out + b3[...]).astype(o_ref.dtype)


# ----------------------------- Pallas wrappers ------------------------------

def conv_block(patches, w, b, s, t, band=None, *, lrn_k=1.0,
               row_tile=_ROW_TILE):
    """patches:(R,K) bf16, w:(K,Co) bf16, b/s/t:(1,Co) f32 -> (R,Co) bf16.

    Rows = batch x spatial positions, tiled by `row_tile` (parallel grid) so
    both v7x TensorCores get work regardless of batch size.  Small layers use
    one full-extent block; weights use constant index_maps (fetched once).
    """
    R, K = patches.shape
    Co = w.shape[1]
    tile = R if R <= row_tile else row_tile

    in_specs = [pl.BlockSpec((tile, K), lambda r: (r, 0)),
                _const_spec(w), _const_spec(b)]
    args = [patches, w, b]
    if band is not None:
        kern = functools.partial(_conv_lrn_bn_kernel, lrn_k=lrn_k)
        in_specs.append(_const_spec(band))
        args.append(band)
    else:
        kern = _conv_bn_kernel
    in_specs += [_const_spec(s), _const_spec(t)]
    args += [s, t]

    return pl.pallas_call(
        kern,
        out_shape=jax.ShapeDtypeStruct((R, Co), jnp.bfloat16),
        grid=(pl.cdiv(R, tile),),
        in_specs=in_specs,
        out_specs=pl.BlockSpec((tile, Co), lambda r: (r, 0)),
        compiler_params=_PARALLEL,
    )(*args)


def fc_fused(x, fcp, *, row_tile=_FC_TILE):
    """x:(N,576) bf16 -> logits (N, n_out) f32; one pallas_call for fc1-3."""
    N, F = x.shape
    n_out = fcp["w3"].shape[1]
    tile = N if N <= row_tile else row_tile
    args = [x, fcp["w1"], fcp["b1"], fcp["s6"], fcp["t6"],
            fcp["w2"], fcp["b2"], fcp["s7"], fcp["t7"],
            fcp["w3"], fcp["b3"]]
    in_specs = ([pl.BlockSpec((tile, F), lambda r: (r, 0))]
                + [_const_spec(a) for a in args[1:]])
    return pl.pallas_call(
        _fc_fused_kernel,
        out_shape=jax.ShapeDtypeStruct((N, n_out), jnp.float32),
        grid=(pl.cdiv(N, tile),),
        in_specs=in_specs,
        out_specs=pl.BlockSpec((tile, n_out), lambda r: (r, 0)),
        compiler_params=_PARALLEL,
    )(*args)


# ----------------------------- XLA glue --------------------------------------

def _im2col(x_nhwc, kh, kw, pad):
    # TODO(synk): im2col stays XLA-side; an in-kernel tap loop would remove
    # this (small) HBM pass but needs riskier in-kernel spatial reshapes.
    N, H, W, C = x_nhwc.shape
    xp = jnp.pad(x_nhwc, ((0, 0), (pad, pad), (pad, pad), (0, 0)))
    Ho = H + 2 * pad - kh + 1
    Wo = W + 2 * pad - kw + 1
    cols = [xp[:, i:i + Ho, j:j + Wo, :] for i in range(kh) for j in range(kw)]
    patches = jnp.stack(cols, axis=3)                  # (N, Ho, Wo, kh*kw, C)
    return patches.reshape(N, Ho * Wo, kh * kw * C), (Ho, Wo)


def maxpool_3x3_s2(y):
    # TODO(synk): 3x3/s2 max-pool stays in XLA as a single fused slice+max op;
    # folding it into the conv kernel needs in-kernel strided reads.
    N, H, W, C = y.shape
    Ho, Wo = (H - 3) // 2 + 1, (W - 3) // 2 + 1
    out = None
    for i in range(3):
        for j in range(3):
            s = y[:, i:i + 2 * Ho - 1:2, j:j + 2 * Wo - 1:2, :]
            out = s if out is None else jnp.maximum(out, s)
    return out


# ----------------------------- parameters -----------------------------------

def init_params(key, n_channels=3, n_outputs=10):
    ks = iter(jax.random.split(key, 40))
    nxt = lambda: next(ks)

    def conv_w(cin, cout, k):
        fan_in = cin * k * k
        return (jax.random.normal(nxt(), (k, k, cin, cout), jnp.float32)
                / jnp.sqrt(fan_in))

    def lin_w(fin, fout):
        return jax.random.normal(nxt(), (fin, fout), jnp.float32) / jnp.sqrt(fin)

    def bn(c, eps=1e-3):                      # eval-mode BN folded to scale/shift
        gamma = jax.random.uniform(nxt(), (c,), jnp.float32, 0.5, 1.5)
        beta = 0.1 * jax.random.normal(nxt(), (c,), jnp.float32)
        mean = 0.1 * jax.random.normal(nxt(), (c,), jnp.float32)
        var = jax.random.uniform(nxt(), (c,), jnp.float32, 0.5, 1.5)
        scale = gamma / jnp.sqrt(var + eps)
        shift = beta - mean * scale
        return scale, shift

    p = {}
    p["conv1_w"] = conv_w(n_channels, 24, 5)
    p["conv1_b"] = jnp.zeros((24,), jnp.float32)            # bias.fill_(0)
    p["conv2_w"] = conv_w(24, 64, 5)
    p["conv2_b"] = jnp.full((64,), 1.0, jnp.float32)        # bias.fill_(1.0)
    p["conv3_w"] = conv_w(64, 96, 3)
    p["conv3_b"] = jnp.zeros((96,), jnp.float32)
    p["conv4_w"] = conv_w(96, 96, 3)
    p["conv4_b"] = jnp.full((96,), 1.0, jnp.float32)
    p["conv5_w"] = conv_w(96, 64, 3)
    p["conv5_b"] = jnp.full((64,), 1.0, jnp.float32)
    p["bn1"], p["bn2"], p["bn3"] = bn(24), bn(64), bn(96)
    p["bn4"], p["bn5"] = bn(96), bn(64)
    p["fc1_w"], p["fc1_b"] = lin_w(576, 256), jnp.zeros((256,), jnp.float32)
    p["fc2_w"], p["fc2_b"] = lin_w(256, 128), jnp.zeros((128,), jnp.float32)
    p["fc3_w"], p["fc3_b"] = lin_w(128, n_outputs), jnp.zeros((n_outputs,),
                                                              jnp.float32)
    p["bn6"], p["bn7"] = bn(256), bn(128)
    return p


def _lrn_band(c, alpha=1e-4, size=2):
    """(c,c) band matrix so that (sq @ B)[:, k] = alpha/size*(sq_k + sq_{k-1})."""
    return (alpha / size) * (jnp.eye(c, dtype=jnp.float32)
                             + jnp.eye(c, k=1, dtype=jnp.float32))


def prepare_params(p):
    """Pack / cast / permute parameters once (called eagerly, outside jit)."""
    f32, bf16 = jnp.float32, jnp.bfloat16
    row = lambda v: jnp.asarray(v, f32).reshape(1, -1)

    # BN1/BN2/BN5 are applied before the maxpool inside the conv kernel; that
    # commutation is only valid for strictly positive per-channel scales.
    for name in ("bn1", "bn2", "bn5"):
        assert float(jnp.min(p[name][0])) > 0.0, f"{name} scale must be > 0"

    def conv_pack(w, b, bn, band=None):
        k, _, cin, cout = w.shape
        d = {"w": w.reshape(k * k * cin, cout).astype(bf16),
             "b": row(b), "s": row(bn[0]), "t": row(bn[1])}
        if band is not None:
            d["band"] = band
        return d

    q = {
        "c1": conv_pack(p["conv1_w"], p["conv1_b"], p["bn1"], _lrn_band(24)),
        "c2": conv_pack(p["conv2_w"], p["conv2_b"], p["bn2"], _lrn_band(64)),
        "c3": conv_pack(p["conv3_w"], p["conv3_b"], p["bn3"]),
        "c4": conv_pack(p["conv4_w"], p["conv4_b"], p["bn4"]),
        "c5": conv_pack(p["conv5_w"], p["conv5_b"], p["bn5"]),
    }
    # torch flattens NCHW: flat[c*9 + h*3 + w].  Our activations are NHWC, so
    # pre-permute fc1 weight rows to accept the (h*3 + w)*64 + c ordering.
    hw = jnp.arange(9)[:, None]
    cc = jnp.arange(64)[None, :]
    perm = (cc * 9 + hw).reshape(-1)          # perm[(h*3+w)*64 + c] = c*9+h*3+w
    q["fc"] = {
        "w1": p["fc1_w"][perm].astype(bf16), "b1": row(p["fc1_b"]),
        "s6": row(p["bn6"][0]), "t6": row(p["bn6"][1]),
        "w2": p["fc2_w"].astype(bf16), "b2": row(p["fc2_b"]),
        "s7": row(p["bn7"][0]), "t7": row(p["bn7"][1]),
        "w3": p["fc3_w"].astype(bf16), "b3": row(p["fc3_b"]),
    }
    return q


# ----------------------------- forward ---------------------------------------

def half_alexnet_forward(pp, x_nchw):
    x = jnp.transpose(x_nchw, (0, 2, 3, 1)).astype(jnp.bfloat16)  # NCHW -> NHWC

    def conv_layer(y, cp, k, pad, lrn):
        N = y.shape[0]
        patches, (Ho, Wo) = _im2col(y, k, k, pad)
        rows = patches.reshape(N * Ho * Wo, patches.shape[-1])
        out = conv_block(rows, cp["w"], cp["b"], cp["s"], cp["t"],
                         band=cp.get("band") if lrn else None)
        return out.reshape(N, Ho, Wo, cp["w"].shape[1])

    y = conv_layer(x, pp["c1"], 5, 2, lrn=True)      # conv1+ReLU+LRN+BN1
    y = maxpool_3x3_s2(y)                            # 32x32 -> 15x15
    y = conv_layer(y, pp["c2"], 5, 2, lrn=True)      # conv2+ReLU+LRN+BN2
    y = maxpool_3x3_s2(y)                            # 15x15 -> 7x7
    y = conv_layer(y, pp["c3"], 3, 1, lrn=False)     # conv3+ReLU+BN3
    y = conv_layer(y, pp["c4"], 3, 1, lrn=False)     # conv4+ReLU+BN4
    y = conv_layer(y, pp["c5"], 3, 1, lrn=False)     # conv5+ReLU+BN5
    y = maxpool_3x3_s2(y)                            # 7x7 -> 3x3

    N = y.shape[0]
    flat = y.reshape(N, 3 * 3 * 64)                  # HWC order; fc1 pre-permuted
    # TODO(synk): dropout is eval-mode identity, so it is omitted.
    return fc_fused(flat, pp["fc"])                  # fc1+BN6 / fc2+BN7 / fc3


if __name__ == "__main__":
    key = jax.random.PRNGKey(0)
    pkey, xkey = jax.random.split(key)
    params = init_params(pkey, n_channels=3, n_outputs=10)
    pp = prepare_params(params)                      # pack weights once, outside jit
    # 32x32 input is required by the architecture (flatten expects 64*3*3=576).
    x = jax.random.normal(xkey, (2, 3, 32, 32), jnp.float32)   # NCHW like torch

    fwd = jax.jit(half_alexnet_forward)
    logits = fwd(pp, x)
    jax.block_until_ready(logits)
    assert logits.shape == (2, 10) and logits.dtype == jnp.float32
    print("KERNEL_OK")
</pallas_src>

<mosaic_0001>
module attributes {stable_mosaic.version = 11 : i64} {
  func.func @_conv_lrn_bn_kernel(%arg0: i32, %arg1: memref<512x75xbf16, #tpu.memory_space<vmem>>, %arg2: memref<75x24xbf16, #tpu.memory_space<vmem>>, %arg3: memref<1x24xf32, #tpu.memory_space<vmem>>, %arg4: memref<24x24xf32, #tpu.memory_space<vmem>>, %arg5: memref<1x24xf32, #tpu.memory_space<vmem>>, %arg6: memref<1x24xf32, #tpu.memory_space<vmem>>, %arg7: memref<512x24xbf16, #tpu.memory_space<vmem>>) attributes {dimension_semantics = [#tpu.dimension_semantics<parallel>], iteration_bounds = array<i64: 4>, scalar_prefetch = 0 : i64, scratch_operands = 0 : i64, tpu.core_type = #tpu.core_type<tc>, window_params = [{transform_indices = @transform_0, window_bounds = array<i64: 512, 75>}, {pipeline_mode = #tpu.pipeline_mode<synchronous>, transform_indices = @transform_1, window_bounds = array<i64: 75, 24>}, {pipeline_mode = #tpu.pipeline_mode<synchronous>, transform_indices = @transform_2, window_bounds = array<i64: 1, 24>}, {pipeline_mode = #tpu.pipeline_mode<synchronous>, transform_indices = @transform_3, window_bounds = array<i64: 24, 24>}, {pipeline_mode = #tpu.pipeline_mode<synchronous>, transform_indices = @transform_4, window_bounds = array<i64: 1, 24>}, {pipeline_mode = #tpu.pipeline_mode<synchronous>, transform_indices = @transform_5, window_bounds = array<i64: 1, 24>}, {transform_indices = @transform_6, window_bounds = array<i64: 512, 24>}]} {
    %c0 = arith.constant 0 : index
    %c0_0 = arith.constant 0 : index
    %0 = vector.load %arg1[%c0, %c0_0] : memref<512x75xbf16, #tpu.memory_space<vmem>>, vector<512x75xbf16>
    %c0_1 = arith.constant 0 : index
    %c0_2 = arith.constant 0 : index
    %1 = vector.load %arg2[%c0_1, %c0_2] : memref<75x24xbf16, #tpu.memory_space<vmem>>, vector<75x24xbf16>
    %cst = arith.constant dense<0.000000e+00> : vector<512x24xf32>
    %2 = tpu.matmul %0, %1, %cst {dimension_numbers = #tpu.dot_dimension_numbers<[1], [0], [0], [1], [0, 0, 1, 1], [], []>} : vector<512x75xbf16>, vector<75x24xbf16>, vector<512x24xf32> -> vector<512x24xf32>
    %c0_3 = arith.constant 0 : index
    %c0_4 = arith.constant 0 : index
    %3 = vector.load %arg3[%c0_3, %c0_4] : memref<1x24xf32, #tpu.memory_space<vmem>>, vector<1x24xf32>
    %4 = vector.broadcast %3 : vector<1x24xf32> to vector<512x24xf32>
    %5 = arith.addf %2, %4 : vector<512x24xf32>
    %cst_5 = arith.constant 0.000000e+00 : f32
    %6 = vector.broadcast %cst_5 : f32 to vector<512x24xf32>
    %7 = arith.maximumf %5, %6 : vector<512x24xf32>
    %8 = arith.mulf %7, %7 : vector<512x24xf32>
    %c0_6 = arith.constant 0 : index
    %c0_7 = arith.constant 0 : index
    %9 = vector.load %arg4[%c0_6, %c0_7] : memref<24x24xf32, #tpu.memory_space<vmem>>, vector<24x24xf32>
    %cst_8 = arith.constant dense<0.000000e+00> : vector<512x24xf32>
    %10 = tpu.matmul %8, %9, %cst_8 {dimension_numbers = #tpu.dot_dimension_numbers<[1], [0], [0], [1], [0, 0, 1, 1], [], []>} : vector<512x24xf32>, vector<24x24xf32>, vector<512x24xf32> -> vector<512x24xf32>
    %cst_9 = arith.constant 1.000000e+00 : f32
    %11 = vector.broadcast %cst_9 : f32 to vector<512x24xf32>
    %12 = arith.addf %11, %10 : vector<512x24xf32>
    %13 = math.rsqrt %12 : vector<512x24xf32>
    %14 = math.sqrt %13 : vector<512x24xf32>
    %15 = arith.mulf %13, %14 : vector<512x24xf32>
    %16 = arith.mulf %7, %15 : vector<512x24xf32>
    %c0_10 = arith.constant 0 : index
    %c0_11 = arith.constant 0 : index
    %17 = vector.load %arg5[%c0_10, %c0_11] : memref<1x24xf32, #tpu.memory_space<vmem>>, vector<1x24xf32>
    %18 = vector.broadcast %17 : vector<1x24xf32> to vector<512x24xf32>
    %19 = arith.mulf %16, %18 : vector<512x24xf32>
    %c0_12 = arith.constant 0 : index
    %c0_13 = arith.constant 0 : index
    %20 = vector.load %arg6[%c0_12, %c0_13] : memref<1x24xf32, #tpu.memory_space<vmem>>, vector<1x24xf32>
    %21 = vector.broadcast %20 : vector<1x24xf32> to vector<512x24xf32>
    %22 = arith.addf %19, %21 : vector<512x24xf32>
    %23 = arith.truncf %22 : vector<512x24xf32> to vector<512x24xbf16>
    %c0_14 = arith.constant 0 : index
    %c0_15 = arith.constant 0 : index
    %24 = vector.load %arg7[%c0_14, %c0_15] : memref<512x24xbf16, #tpu.memory_space<vmem>>, vector<512x24xbf16>
    tpu.vector_store %arg7[%c0_14, %c0_15], %23 {strides = array<i32>} : memref<512x24xbf16, #tpu.memory_space<vmem>>, vector<512x24xbf16>,
    return
  }
  func.func @transform_0(%arg0: i32) -> (i32, i32) {
    %c0_i32 = arith.constant 0 : i32
    %c0_i32_0 = arith.constant 0 : i32
    return %arg0, %c0_i32 : i32, i32
  }
  func.func @transform_1(%arg0: i32) -> (i32, i32) {
    %c0_i32 = arith.constant 0 : i32
    %c0_i32_0 = arith.constant 0 : i32
    %c0_i32_1 = arith.constant 0 : i32
    return %c0_i32, %c0_i32_0 : i32, i32
  }
  func.func @transform_2(%arg0: i32) -> (i32, i32) {
    %c0_i32 = arith.constant 0 : i32
    %c0_i32_0 = arith.constant 0 : i32
    %c0_i32_1 = arith.constant 0 : i32
    return %c0_i32, %c0_i32_0 : i32, i32
  }
  func.func @transform_3(%arg0: i32) -> (i32, i32) {
    %c0_i32 = arith.constant 0 : i32
    %c0_i32_0 = arith.constant 0 : i32
    %c0_i32_1 = arith.constant 0 : i32
    return %c0_i32, %c0_i32_0 : i32, i32
  }
  func.func @transform_4(%arg0: i32) -> (i32, i32) {
    %c0_i32 = arith.constant 0 : i32
    %c0_i32_0 = arith.constant 0 : i32
    %c0_i32_1 = arith.constant 0 : i32
    return %c0_i32, %c0_i32_0 : i32, i32
  }
  func.func @transform_5(%arg0: i32) -> (i32, i32) {
    %c0_i32 = arith.constant 0 : i32
    %c0_i32_0 = arith.constant 0 : i32
    %c0_i32_1 = arith.constant 0 : i32
    return %c0_i32, %c0_i32_0 : i32, i32
  }
  func.func @transform_6(%arg0: i32) -> (i32, i32) {
    %c0_i32 = arith.constant 0 : i32
    %c0_i32_0 = arith.constant 0 : i32
    return %arg0, %c0_i32 : i32, i32
  }
}

module attributes {stable_mosaic.version = 11 : i64} {
  func.func @_conv_lrn_bn_kernel(%arg0: i32, %arg1: memref<450x600xbf16, #tpu.memory_space<vmem>>, %arg2: memref<600x64xbf16, #tpu.memory_space<vmem>>, %arg3: memref<1x64xf32, #tpu.memory_space<vmem>>, %arg4: memref<64x64xf32, #tpu.memory_space<vmem>>, %arg5: memref<1x64xf32, #tpu.memory_space<vmem>>, %arg6: memref<1x64xf32, #tpu.memory_space<vmem>>, %arg7: memref<450x64xbf16, #tpu.memory_space<vmem>>) attributes {dimension_semantics = [#tpu.dimension_semantics<parallel>], iteration_bounds = array<i64: 1>, scalar_prefetch = 0 : i64, scratch_operands = 0 : i64, tpu.core_type = #tpu.core_type<tc>, window_params = [{transform_indices = @transform_0, window_bounds = array<i64: 450, 600>}, {pipeline_mode = #tpu.pipeline_mode<synchronous>, transform_indices = @transform_1, window_bounds = array<i64: 600, 64>}, {pipeline_mode = #tpu.pipeline_mode<synchronous>, transform_indices = @transform_2, window_bounds = array<i64: 1, 64>}, {pipeline_mode = #tpu.pipeline_mode<synchronous>, transform_indices = @transform_3, window_bounds = array<i64: 64, 64>}, {pipeline_mode = #tpu.pipeline_mode<synchronous>, transform_indices = @transform_4, window_bounds = array<i64: 1, 64>}, {pipeline_mode = #tpu.pipeline_mode<synchronous>, transform_indices = @transform_5, window_bounds = array<i64: 1, 64>}, {transform_indices = @transform_6, window_bounds = array<i64: 450, 64>}]} {
    %c0 = arith.constant 0 : index
    %c0_0 = arith.constant 0 : index
    %0 = vector.load %arg1[%c0, %c0_0] : memref<450x600xbf16, #tpu.memory_space<vmem>>, vector<450x600xbf16>
    %c0_1 = arith.constant 0 : index
    %c0_2 = arith.constant 0 : index
    %1 = vector.load %arg2[%c0_1, %c0_2] : memref<600x64xbf16, #tpu.memory_space<vmem>>, vector<600x64xbf16>
    %cst = arith.constant dense<0.000000e+00> : vector<450x64xf32>
    %2 = tpu.matmul %0, %1, %cst {dimension_numbers = #tpu.dot_dimension_numbers<[1], [0], [0], [1], [0, 0, 1, 1], [], []>} : vector<450x600xbf16>, vector<600x64xbf16>, vector<450x64xf32> -> vector<450x64xf32>
    %c0_3 = arith.constant 0 : index
    %c0_4 = arith.constant 0 : index
    %3 = vector.load %arg3[%c0_3, %c0_4] : memref<1x64xf32, #tpu.memory_space<vmem>>, vector<1x64xf32>
    %4 = vector.broadcast %3 : vector<1x64xf32> to vector<450x64xf32>
    %5 = arith.addf %2, %4 : vector<450x64xf32>
    %cst_5 = arith.constant 0.000000e+00 : f32
    %6 = vector.broadcast %cst_5 : f32 to vector<450x64xf32>
    %7 = arith.maximumf %5, %6 : vector<450x64xf32>
    %8 = arith.mulf %7, %7 : vector<450x64xf32>
    %c0_6 = arith.constant 0 : index
    %c0_7 = arith.constant 0 : index
    %9 = vector.load %arg4[%c0_6, %c0_7] : memref<64x64xf32, #tpu.memory_space<vmem>>, vector<64x64xf32>
    %cst_8 = arith.constant dense<0.000000e+00> : vector<450x64xf32>
    %10 = tpu.matmul %8, %9, %cst_8 {dimension_numbers = #tpu.dot_dimension_numbers<[1], [0], [0], [1], [0, 0, 1, 1], [], []>} : vector<450x64xf32>, vector<64x64xf32>, vector<450x64xf32> -> vector<450x64xf32>
    %cst_9 = arith.constant 1.000000e+00 : f32
    %11 = vector.broadcast %cst_9 : f32 to vector<450x64xf32>
    %12 = arith.addf %11, %10 : vector<450x64xf32>
    %13 = math.rsqrt %12 : vector<450x64xf32>
    %14 = math.sqrt %13 : vector<450x64xf32>
    %15 = arith.mulf %13, %14 : vector<450x64xf32>
    %16 = arith.mulf %7, %15 : vector<450x64xf32>
    %c0_10 = arith.constant 0 : index
    %c0_11 = arith.constant 0 : index
    %17 = vector.load %arg5[%c0_10, %c0_11] : memref<1x64xf32, #tpu.memory_space<vmem>>, vector<1x64xf32>
    %18 = vector.broadcast %17 : vector<1x64xf32> to vector<450x64xf32>
    %19 = arith.mulf %16, %18 : vector<450x64xf32>
    %c0_12 = arith.constant 0 : index
    %c0_13 = arith.constant 0 : index
    %20 = vector.load %arg6[%c0_12, %c0_13] : memref<1x64xf32, #tpu.memory_space<vmem>>, vector<1x64xf32>
    %21 = vector.broadcast %20 : vector<1x64xf32> to vector<450x64xf32>
    %22 = arith.addf %19, %21 : vector<450x64xf32>
    %23 = arith.truncf %22 : vector<450x64xf32> to vector<450x64xbf16>
    %c0_14 = arith.constant 0 : index
    %c0_15 = arith.constant 0 : index
    %24 = vector.load %arg7[%c0_14, %c0_15] : memref<450x64xbf16, #tpu.memory_space<vmem>>, vector<450x64xbf16>
    tpu.vector_store %arg7[%c0_14, %c0_15], %23 {strides = array<i32>} : memref<450x64xbf16, #tpu.memory_space<vmem>>, vector<450x64xbf16>,
    return
  }
  func.func @transform_0(%arg0: i32) -> (i32, i32) {
    %c0_i32 = arith.constant 0 : i32
    %c0_i32_0 = arith.constant 0 : i32
    return %arg0, %c0_i32 : i32, i32
  }
  func.func @transform_1(%arg0: i32) -> (i32, i32) {
    %c0_i32 = arith.constant 0 : i32
    %c0_i32_0 = arith.constant 0 : i32
    %c0_i32_1 = arith.constant 0 : i32
    return %c0_i32, %c0_i32_0 : i32, i32
  }
  func.func @transform_2(%arg0: i32) -> (i32, i32) {
    %c0_i32 = arith.constant 0 : i32
    %c0_i32_0 = arith.constant 0 : i32
    %c0_i32_1 = arith.constant 0 : i32
    return %c0_i32, %c0_i32_0 : i32, i32
  }
  func.func @transform_3(%arg0: i32) -> (i32, i32) {
    %c0_i32 = arith.constant 0 : i32
    %c0_i32_0 = arith.constant 0 : i32
    %c0_i32_1 = arith.constant 0 : i32
    return %c0_i32, %c0_i32_0 : i32, i32
  }
  func.func @transform_4(%arg0: i32) -> (i32, i32) {
    %c0_i32 = arith.constant 0 : i32
    %c0_i32_0 = arith.constant 0 : i32
    %c0_i32_1 = arith.constant 0 : i32
    return %c0_i32, %c0_i32_0 : i32, i32
  }
  func.func @transform_5(%arg0: i32) -> (i32, i32) {
    %c0_i32 = arith.constant 0 : i32
    %c0_i32_0 = arith.constant 0 : i32
    %c0_i32_1 = arith.constant 0 : i32
    return %c0_i32, %c0_i32_0 : i32, i32
  }
  func.func @transform_6(%arg0: i32) -> (i32, i32) {
    %c0_i32 = arith.constant 0 : i32
    %c0_i32_0 = arith.constant 0 : i32
    return %arg0, %c0_i32 : i32, i32
  }
}

module attributes {stable_mosaic.version = 11 : i64} {
  func.func @_conv_bn_kernel(%arg0: i32, %arg1: memref<98x576xbf16, #tpu.memory_space<vmem>>, %arg2: memref<576x96xbf16, #tpu.memory_space<vmem>>, %arg3: memref<1x96xf32, #tpu.memory_space<vmem>>, %arg4: memref<1x96xf32, #tpu.memory_space<vmem>>, %arg5: memref<1x96xf32, #tpu.memory_space<vmem>>, %arg6: memref<98x96xbf16, #tpu.memory_space<vmem>>) attributes {dimension_semantics = [#tpu.dimension_semantics<parallel>], iteration_bounds = array<i64: 1>, scalar_prefetch = 0 : i64, scratch_operands = 0 : i64, tpu.core_type = #tpu.core_type<tc>, window_params = [{transform_indices = @transform_0, window_bounds = array<i64: 98, 576>}, {pipeline_mode = #tpu.pipeline_mode<synchronous>, transform_indices = @transform_1, window_bounds = array<i64: 576, 96>}, {pipeline_mode = #tpu.pipeline_mode<synchronous>, transform_indices = @transform_2, window_bounds = array<i64: 1, 96>}, {pipeline_mode = #tpu.pipeline_mode<synchronous>, transform_indices = @transform_3, window_bounds = array<i64: 1, 96>}, {pipeline_mode = #tpu.pipeline_mode<synchronous>, transform_indices = @transform_4, window_bounds = array<i64: 1, 96>}, {transform_indices = @transform_5, window_bounds = array<i64: 98, 96>}]} {
    %c0 = arith.constant 0 : index
    %c0_0 = arith.constant 0 : index
    %0 = vector.load %arg1[%c0, %c0_0] : memref<98x576xbf16, #tpu.memory_space<vmem>>, vector<98x576xbf16>
    %c0_1 = arith.constant 0 : index
    %c0_2 = arith.constant 0 : index
    %1 = vector.load %arg2[%c0_1, %c0_2] : memref<576x96xbf16, #tpu.memory_space<vmem>>, vector<576x96xbf16>
    %cst = arith.constant dense<0.000000e+00> : vector<98x96xf32>
    %2 = tpu.matmul %0, %1, %cst {dimension_numbers = #tpu.dot_dimension_numbers<[1], [0], [0], [1], [0, 0, 1, 1], [], []>} : vector<98x576xbf16>, vector<576x96xbf16>, vector<98x96xf32> -> vector<98x96xf32>
    %c0_3 = arith.constant 0 : index
    %c0_4 = arith.constant 0 : index
    %3 = vector.load %arg3[%c0_3, %c0_4] : memref<1x96xf32, #tpu.memory_space<vmem>>, vector<1x96xf32>
    %4 = vector.broadcast %3 : vector<1x96xf32> to vector<98x96xf32>
    %5 = arith.addf %2, %4 : vector<98x96xf32>
    %cst_5 = arith.constant 0.000000e+00 : f32
    %6 = vector.broadcast %cst_5 : f32 to vector<98x96xf32>
    %7 = arith.maximumf %5, %6 : vector<98x96xf32>
    %c0_6 = arith.constant 0 : index
    %c0_7 = arith.constant 0 : index
    %8 = vector.load %arg4[%c0_6, %c0_7] : memref<1x96xf32, #tpu.memory_space<vmem>>, vector<1x96xf32>
    %9 = vector.broadcast %8 : vector<1x96xf32> to vector<98x96xf32>
    %10 = arith.mulf %7, %9 : vector<98x96xf32>
    %c0_8 = arith.constant 0 : index
    %c0_9 = arith.constant 0 : index
    %11 = vector.load %arg5[%c0_8, %c0_9] : memref<1x96xf32, #tpu.memory_space<vmem>>, vector<1x96xf32>
    %12 = vector.broadcast %11 : vector<1x96xf32> to vector<98x96xf32>
    %13 = arith.addf %10, %12 : vector<98x96xf32>
    %14 = arith.truncf %13 : vector<98x96xf32> to vector<98x96xbf16>
    %c0_10 = arith.constant 0 : index
    %c0_11 = arith.constant 0 : index
    %15 = vector.load %arg6[%c0_10, %c0_11] : memref<98x96xbf16, #tpu.memory_space<vmem>>, vector<98x96xbf16>
    tpu.vector_store %arg6[%c0_10, %c0_11], %14 {strides = array<i32>} : memref<98x96xbf16, #tpu.memory_space<vmem>>, vector<98x96xbf16>,
    return
  }
  func.func @transform_0(%arg0: i32) -> (i32, i32) {
    %c0_i32 = arith.constant 0 : i32
    %c0_i32_0 = arith.constant 0 : i32
    return %arg0, %c0_i32 : i32, i32
  }
  func.func @transform_1(%arg0: i32) -> (i32, i32) {
    %c0_i32 = arith.constant 0 : i32
    %c0_i32_0 = arith.constant 0 : i32
    %c0_i32_1 = arith.constant 0 : i32
    return %c0_i32, %c0_i32_0 : i32, i32
  }
  func.func @transform_2(%arg0: i32) -> (i32, i32) {
    %c0_i32 = arith.constant 0 : i32
    %c0_i32_0 = arith.constant 0 : i32
    %c0_i32_1 = arith.constant 0 : i32
    return %c0_i32, %c0_i32_0 : i32, i32
  }
  func.func @transform_3(%arg0: i32) -> (i32, i32) {
    %c0_i32 = arith.constant 0 : i32
    %c0_i32_0 = arith.constant 0 : i32
    %c0_i32_1 = arith.constant 0 : i32
    return %c0_i32, %c0_i32_0 : i32, i32
  }
  func.func @transform_4(%arg0: i32) -> (i32, i32) {
    %c0_i32 = arith.constant 0 : i32
    %c0_i32_0 = arith.constant 0 : i32
    %c0_i32_1 = arith.constant 0 : i32
    return %c0_i32, %c0_i32_0 : i32, i32
  }
  func.func @transform_5(%arg0: i32) -> (i32, i32) {
    %c0_i32 = arith.constant 0 : i32
    %c0_i32_0 = arith.constant 0 : i32
    return %arg0, %c0_i32 : i32, i32
  }
}

module attributes {stable_mosaic.version = 11 : i64} {
  func.func @_conv_bn_kernel(%arg0: i32, %arg1: memref<98x864xbf16, #tpu.memory_space<vmem>>, %arg2: memref<864x96xbf16, #tpu.memory_space<vmem>>, %arg3: memref<1x96xf32, #tpu.memory_space<vmem>>, %arg4: memref<1x96xf32, #tpu.memory_space<vmem>>, %arg5: memref<1x96xf32, #tpu.memory_space<vmem>>, %arg6: memref<98x96xbf16, #tpu.memory_space<vmem>>) attributes {dimension_semantics = [#tpu.dimension_semantics<parallel>], iteration_bounds = array<i64: 1>, scalar_prefetch = 0 : i64, scratch_operands = 0 : i64, tpu.core_type = #tpu.core_type<tc>, window_params = [{transform_indices = @transform_0, window_bounds = array<i64: 98, 864>}, {pipeline_mode = #tpu.pipeline_mode<synchronous>, transform_indices = @transform_1, window_bounds = array<i64: 864, 96>}, {pipeline_mode = #tpu.pipeline_mode<synchronous>, transform_indices = @transform_2, window_bounds = array<i64: 1, 96>}, {pipeline_mode = #tpu.pipeline_mode<synchronous>, transform_indices = @transform_3, window_bounds = array<i64: 1, 96>}, {pipeline_mode = #tpu.pipeline_mode<synchronous>, transform_indices = @transform_4, window_bounds = array<i64: 1, 96>}, {transform_indices = @transform_5, window_bounds = array<i64: 98, 96>}]} {
    %c0 = arith.constant 0 : index
    %c0_0 = arith.constant 0 : index
    %0 = vector.load %arg1[%c0, %c0_0] : memref<98x864xbf16, #tpu.memory_space<vmem>>, vector<98x864xbf16>
    %c0_1 = arith.constant 0 : index
    %c0_2 = arith.constant 0 : index
    %1 = vector.load %arg2[%c0_1, %c0_2] : memref<864x96xbf16, #tpu.memory_space<vmem>>, vector<864x96xbf16>
    %cst = arith.constant dense<0.000000e+00> : vector<98x96xf32>
    %2 = tpu.matmul %0, %1, %cst {dimension_numbers = #tpu.dot_dimension_numbers<[1], [0], [0], [1], [0, 0, 1, 1], [], []>} : vector<98x864xbf16>, vector<864x96xbf16>, vector<98x96xf32> -> vector<98x96xf32>
    %c0_3 = arith.constant 0 : index
    %c0_4 = arith.constant 0 : index
    %3 = vector.load %arg3[%c0_3, %c0_4] : memref<1x96xf32, #tpu.memory_space<vmem>>, vector<1x96xf32>
    %4 = vector.broadcast %3 : vector<1x96xf32> to vector<98x96xf32>
    %5 = arith.addf %2, %4 : vector<98x96xf32>
    %cst_5 = arith.constant 0.000000e+00 : f32
    %6 = vector.broadcast %cst_5 : f32 to vector<98x96xf32>
    %7 = arith.maximumf %5, %6 : vector<98x96xf32>
    %c0_6 = arith.constant 0 : index
    %c0_7 = arith.constant 0 : index
    %8 = vector.load %arg4[%c0_6, %c0_7] : memref<1x96xf32, #tpu.memory_space<vmem>>, vector<1x96xf32>
    %9 = vector.broadcast %8 : vector<1x96xf32> to vector<98x96xf32>
    %10 = arith.mulf %7, %9 : vector<98x96xf32>
    %c0_8 = arith.constant 0 : index
    %c0_9 = arith.constant 0 : index
    %11 = vector.load %arg5[%c0_8, %c0_9] : memref<1x96xf32, #tpu.memory_space<vmem>>, vector<1x96xf32>
    %12 = vector.broadcast %11 : vector<1x96xf32> to vector<98x96xf32>
    %13 = arith.addf %10, %12 : vector<98x96xf32>
    %14 = arith.truncf %13 : vector<98x96xf32> to vector<98x96xbf16>
    %c0_10 = arith.constant 0 : index
    %c0_11 = arith.constant 0 : index
    %15 = vector.load %arg6[%c0_10, %c0_11] : memref<98x96xbf16, #tpu.memory_space<vmem>>, vector<98x96xbf16>
    tpu.vector_store %arg6[%c0_10, %c0_11], %14 {strides = array<i32>} : memref<98x96xbf16, #tpu.memory_space<vmem>>, vector<98x96xbf16>,
    return
  }
  func.func @transform_0(%arg0: i32) -> (i32, i32) {
    %c0_i32 = arith.constant 0 : i32
    %c0_i32_0 = arith.constant 0 : i32
    return %arg0, %c0_i32 : i32, i32
  }
  func.func @transform_1(%arg0: i32) -> (i32, i32) {
    %c0_i32 = arith.constant 0 : i32
    %c0_i32_0 = arith.constant 0 : i32
    %c0_i32_1 = arith.constant 0 : i32
    return %c0_i32, %c0_i32_0 : i32, i32
  }
  func.func @transform_2(%arg0: i32) -> (i32, i32) {
    %c0_i32 = arith.constant 0 : i32
    %c0_i32_0 = arith.constant 0 : i32
    %c0_i32_1 = arith.constant 0 : i32
    return %c0_i32, %c0_i32_0 : i32, i32
  }
  func.func @transform_3(%arg0: i32) -> (i32, i32) {
    %c0_i32 = arith.constant 0 : i32
    %c0_i32_0 = arith.constant 0 : i32
    %c0_i32_1 = arith.constant 0 : i32
    return %c0_i32, %c0_i32_0 : i32, i32
  }
  func.func @transform_4(%arg0: i32) -> (i32, i32) {
    %c0_i32 = arith.constant 0 : i32
    %c0_i32_0 = arith.constant 0 : i32
    %c0_i32_1 = arith.constant 0 : i32
    return %c0_i32, %c0_i32_0 : i32, i32
  }
  func.func @transform_5(%arg0: i32) -> (i32, i32) {
    %c0_i32 = arith.constant 0 : i32
    %c0_i32_0 = arith.constant 0 : i32
    return %arg0, %c0_i32 : i32, i32
  }
}

module attributes {stable_mosaic.version = 11 : i64} {
  func.func @_conv_bn_kernel(%arg0: i32, %arg1: memref<98x864xbf16, #tpu.memory_space<vmem>>, %arg2: memref<864x64xbf16, #tpu.memory_space<vmem>>, %arg3: memref<1x64xf32, #tpu.memory_space<vmem>>, %arg4: memref<1x64xf32, #tpu.memory_space<vmem>>, %arg5: memref<1x64xf32, #tpu.memory_space<vmem>>, %arg6: memref<98x64xbf16, #tpu.memory_space<vmem>>) attributes {dimension_semantics = [#tpu.dimension_semantics<parallel>], iteration_bounds = array<i64: 1>, scalar_prefetch = 0 : i64, scratch_operands = 0 : i64, tpu.core_type = #tpu.core_type<tc>, window_params = [{transform_indices = @transform_0, window_bounds = array<i64: 98, 864>}, {pipeline_mode = #tpu.pipeline_mode<synchronous>, transform_indices = @transform_1, window_bounds = array<i64: 864, 64>}, {pipeline_mode = #tpu.pipeline_mode<synchronous>, transform_indices = @transform_2, window_bounds = array<i64: 1, 64>}, {pipeline_mode = #tpu.pipeline_mode<synchronous>, transform_indices = @transform_3, window_bounds = array<i64: 1, 64>}, {pipeline_mode = #tpu.pipeline_mode<synchronous>, transform_indices = @transform_4, window_bounds = array<i64: 1, 64>}, {transform_indices = @transform_5, window_bounds = array<i64: 98, 64>}]} {
    %c0 = arith.constant 0 : index
    %c0_0 = arith.constant 0 : index
    %0 = vector.load %arg1[%c0, %c0_0] : memref<98x864xbf16, #tpu.memory_space<vmem>>, vector<98x864xbf16>
    %c0_1 = arith.constant 0 : index
    %c0_2 = arith.constant 0 : index
    %1 = vector.load %arg2[%c0_1, %c0_2] : memref<864x64xbf16, #tpu.memory_space<vmem>>, vector<864x64xbf16>
    %cst = arith.constant dense<0.000000e+00> : vector<98x64xf32>
    %2 = tpu.matmul %0, %1, %cst {dimension_numbers = #tpu.dot_dimension_numbers<[1], [0], [0], [1], [0, 0, 1, 1], [], []>} : vector<98x864xbf16>, vector<864x64xbf16>, vector<98x64xf32> -> vector<98x64xf32>
    %c0_3 = arith.constant 0 : index
    %c0_4 = arith.constant 0 : index
    %3 = vector.load %arg3[%c0_3, %c0_4] : memref<1x64xf32, #tpu.memory_space<vmem>>, vector<1x64xf32>
    %4 = vector.broadcast %3 : vector<1x64xf32> to vector<98x64xf32>
    %5 = arith.addf %2, %4 : vector<98x64xf32>
    %cst_5 = arith.constant 0.000000e+00 : f32
    %6 = vector.broadcast %cst_5 : f32 to vector<98x64xf32>
    %7 = arith.maximumf %5, %6 : vector<98x64xf32>
    %c0_6 = arith.constant 0 : index
    %c0_7 = arith.constant 0 : index
    %8 = vector.load %arg4[%c0_6, %c0_7] : memref<1x64xf32, #tpu.memory_space<vmem>>, vector<1x64xf32>
    %9 = vector.broadcast %8 : vector<1x64xf32> to vector<98x64xf32>
    %10 = arith.mulf %7, %9 : vector<98x64xf32>
    %c0_8 = arith.constant 0 : index
    %c0_9 = arith.constant 0 : index
    %11 = vector.load %arg5[%c0_8, %c0_9] : memref<1x64xf32, #tpu.memory_space<vmem>>, vector<1x64xf32>
    %12 = vector.broadcast %11 : vector<1x64xf32> to vector<98x64xf32>
    %13 = arith.addf %10, %12 : vector<98x64xf32>
    %14 = arith.truncf %13 : vector<98x64xf32> to vector<98x64xbf16>
    %c0_10 = arith.constant 0 : index
    %c0_11 = arith.constant 0 : index
    %15 = vector.load %arg6[%c0_10, %c0_11] : memref<98x64xbf16, #tpu.memory_space<vmem>>, vector<98x64xbf16>
    tpu.vector_store %arg6[%c0_10, %c0_11], %14 {strides = array<i32>} : memref<98x64xbf16, #tpu.memory_space<vmem>>, vector<98x64xbf16>,
    return
  }
  func.func @transform_0(%arg0: i32) -> (i32, i32) {
    %c0_i32 = arith.constant 0 : i32
    %c0_i32_0 = arith.constant 0 : i32
    return %arg0, %c0_i32 : i32, i32
  }
  func.func @transform_1(%arg0: i32) -> (i32, i32) {
    %c0_i32 = arith.constant 0 : i32
    %c0_i32_0 = arith.constant 0 : i32
    %c0_i32_1 = arith.constant 0 : i32
    return %c0_i32, %c0_i32_0 : i32, i32
  }
  func.func @transform_2(%arg0: i32) -> (i32, i32) {
    %c0_i32 = arith.constant 0 : i32
    %c0_i32_0 = arith.constant 0 : i32
    %c0_i32_1 = arith.constant 0 : i32
    return %c0_i32, %c0_i32_0 : i32, i32
  }
  func.func @transform_3(%arg0: i32) -> (i32, i32) {
    %c0_i32 = arith.constant 0 : i32
    %c0_i32_0 = arith.constant 0 : i32
    %c0_i32_1 = arith.constant 0 : i32
    return %c0_i32, %c0_i32_0 : i32, i32
  }
  func.func @transform_4(%arg0: i32) -> (i32, i32) {
    %c0_i32 = arith.constant 0 : i32
    %c0_i32_0 = arith.constant 0 : i32
    %c0_i32_1 = arith.constant 0 : i32
    return %c0_i32, %c0_i32_0 : i32, i32
  }
  func.func @transform_5(%arg0: i32) -> (i32, i32) {
    %c0_i32 = arith.constant 0 : i32
    %c0_i32_0 = arith.constant 0 : i32
    return %arg0, %c0_i32 : i32, i32
  }
}

module attributes {stable_mosaic.version = 11 : i64} {
  func.func @_fc_fused_kernel(%arg0: i32, %arg1: memref<2x576xbf16, #tpu.memory_space<vmem>>, %arg2: memref<576x256xbf16, #tpu.memory_space<vmem>>, %arg3: memref<1x256xf32, #tpu.memory_space<vmem>>, %arg4: memref<1x256xf32, #tpu.memory_space<vmem>>, %arg5: memref<1x256xf32, #tpu.memory_space<vmem>>, %arg6: memref<256x128xbf16, #tpu.memory_space<vmem>>, %arg7: memref<1x128xf32, #tpu.memory_space<vmem>>, %arg8: memref<1x128xf32, #tpu.memory_space<vmem>>, %arg9: memref<1x128xf32, #tpu.memory_space<vmem>>, %arg10: memref<128x10xbf16, #tpu.memory_space<vmem>>, %arg11: memref<1x10xf32, #tpu.memory_space<vmem>>, %arg12: memref<2x10xf32, #tpu.memory_space<vmem>>) attributes {dimension_semantics = [#tpu.dimension_semantics<parallel>], iteration_bounds = array<i64: 1>, scalar_prefetch = 0 : i64, scratch_operands = 0 : i64, tpu.core_type = #tpu.core_type<tc>, window_params = [{transform_indices = @transform_0, window_bounds = array<i64: 2, 576>}, {pipeline_mode = #tpu.pipeline_mode<synchronous>, transform_indices = @transform_1, window_bounds = array<i64: 576, 256>}, {pipeline_mode = #tpu.pipeline_mode<synchronous>, transform_indices = @transform_2, window_bounds = array<i64: 1, 256>}, {pipeline_mode = #tpu.pipeline_mode<synchronous>, transform_indices = @transform_3, window_bounds = array<i64: 1, 256>}, {pipeline_mode = #tpu.pipeline_mode<synchronous>, transform_indices = @transform_4, window_bounds = array<i64: 1, 256>}, {pipeline_mode = #tpu.pipeline_mode<synchronous>, transform_indices = @transform_5, window_bounds = array<i64: 256, 128>}, {pipeline_mode = #tpu.pipeline_mode<synchronous>, transform_indices = @transform_6, window_bounds = array<i64: 1, 128>}, {pipeline_mode = #tpu.pipeline_mode<synchronous>, transform_indices = @transform_7, window_bounds = array<i64: 1, 128>}, {pipeline_mode = #tpu.pipeline_mode<synchronous>, transform_indices = @transform_8, window_bounds = array<i64: 1, 128>}, {pipeline_mode = #tpu.pipeline_mode<synchronous>, transform_indices = @transform_9, window_bounds = array<i64: 128, 10>}, {pipeline_mode = #tpu.pipeline_mode<synchronous>, transform_indices = @transform_10, window_bounds = array<i64: 1, 10>}, {transform_indices = @transform_11, window_bounds = array<i64: 2, 10>}]} {
    %c0 = arith.constant 0 : index
    %c0_0 = arith.constant 0 : index
    %0 = vector.load %arg1[%c0, %c0_0] : memref<2x576xbf16, #tpu.memory_space<vmem>>, vector<2x576xbf16>
    %c0_1 = arith.constant 0 : index
    %c0_2 = arith.constant 0 : index
    %1 = vector.load %arg2[%c0_1, %c0_2] : memref<576x256xbf16, #tpu.memory_space<vmem>>, vector<576x256xbf16>
    %cst = arith.constant dense<0.000000e+00> : vector<2x256xf32>
    %2 = tpu.matmul %0, %1, %cst {dimension_numbers = #tpu.dot_dimension_numbers<[1], [0], [0], [1], [0, 0, 1, 1], [], []>} : vector<2x576xbf16>, vector<576x256xbf16>, vector<2x256xf32> -> vector<2x256xf32>
    %c0_3 = arith.constant 0 : index
    %c0_4 = arith.constant 0 : index
    %3 = vector.load %arg3[%c0_3, %c0_4] : memref<1x256xf32, #tpu.memory_space<vmem>>, vector<1x256xf32>
    %4 = vector.broadcast %3 : vector<1x256xf32> to vector<2x256xf32>
    %5 = arith.addf %2, %4 : vector<2x256xf32>
    %cst_5 = arith.constant 0.000000e+00 : f32
    %6 = vector.broadcast %cst_5 : f32 to vector<2x256xf32>
    %7 = arith.maximumf %5, %6 : vector<2x256xf32>
    %c0_6 = arith.constant 0 : index
    %c0_7 = arith.constant 0 : index
    %8 = vector.load %arg4[%c0_6, %c0_7] : memref<1x256xf32, #tpu.memory_space<vmem>>, vector<1x256xf32>
    %9 = vector.broadcast %8 : vector<1x256xf32> to vector<2x256xf32>
    %10 = arith.mulf %7, %9 : vector<2x256xf32>
    %c0_8 = arith.constant 0 : index
    %c0_9 = arith.constant 0 : index
    %11 = vector.load %arg5[%c0_8, %c0_9] : memref<1x256xf32, #tpu.memory_space<vmem>>, vector<1x256xf32>
    %12 = vector.broadcast %11 : vector<1x256xf32> to vector<2x256xf32>
    %13 = arith.addf %10, %12 : vector<2x256xf32>
    %14 = arith.truncf %13 : vector<2x256xf32> to vector<2x256xbf16>
    %c0_10 = arith.constant 0 : index
    %c0_11 = arith.constant 0 : index
    %15 = vector.load %arg6[%c0_10, %c0_11] : memref<256x128xbf16, #tpu.memory_space<vmem>>, vector<256x128xbf16>
    %cst_12 = arith.constant dense<0.000000e+00> : vector<2x128xf32>
    %16 = tpu.matmul %14, %15, %cst_12 {dimension_numbers = #tpu.dot_dimension_numbers<[1], [0], [0], [1], [0, 0, 1, 1], [], []>} : vector<2x256xbf16>, vector<256x128xbf16>, vector<2x128xf32> -> vector<2x128xf32>
    %c0_13 = arith.constant 0 : index
    %c0_14 = arith.constant 0 : index
    %17 = vector.load %arg7[%c0_13, %c0_14] : memref<1x128xf32, #tpu.memory_space<vmem>>, vector<1x128xf32>
    %18 = vector.broadcast %17 : vector<1x128xf32> to vector<2x128xf32>
    %19 = arith.addf %16, %18 : vector<2x128xf32>
    %cst_15 = arith.constant 0.000000e+00 : f32
    %20 = vector.broadcast %cst_15 : f32 to vector<2x128xf32>
    %21 = arith.maximumf %19, %20 : vector<2x128xf32>
    %c0_16 = arith.constant 0 : index
    %c0_17 = arith.constant 0 : index
    %22 = vector.load %arg8[%c0_16, %c0_17] : memref<1x128xf32, #tpu.memory_space<vmem>>, vector<1x128xf32>
    %23 = vector.broadcast %22 : vector<1x128xf32> to vector<2x128xf32>
    %24 = arith.mulf %21, %23 : vector<2x128xf32>
    %c0_18 = arith.constant 0 : index
    %c0_19 = arith.constant 0 : index
    %25 = vector.load %arg9[%c0_18, %c0_19] : memref<1x128xf32, #tpu.memory_space<vmem>>, vector<1x128xf32>
    %26 = vector.broadcast %25 : vector<1x128xf32> to vector<2x128xf32>
    %27 = arith.addf %24, %26 : vector<2x128xf32>
    %28 = arith.truncf %27 : vector<2x128xf32> to vector<2x128xbf16>
    %c0_20 = arith.constant 0 : index
    %c0_21 = arith.constant 0 : index
    %29 = vector.load %arg10[%c0_20, %c0_21] : memref<128x10xbf16, #tpu.memory_space<vmem>>, vector<128x10xbf16>
    %cst_22 = arith.constant dense<0.000000e+00> : vector<2x10xf32>
    %30 = tpu.matmul %28, %29, %cst_22 {dimension_numbers = #tpu.dot_dimension_numbers<[1], [0], [0], [1], [0, 0, 1, 1], [], []>} : vector<2x128xbf16>, vector<128x10xbf16>, vector<2x10xf32> -> vector<2x10xf32>
    %c0_23 = arith.constant 0 : index
    %c0_24 = arith.constant 0 : index
    %31 = vector.load %arg11[%c0_23, %c0_24] : memref<1x10xf32, #tpu.memory_space<vmem>>, vector<1x10xf32>
    %32 = vector.broadcast %31 : vector<1x10xf32> to vector<2x10xf32>
    %33 = arith.addf %30, %32 : vector<2x10xf32>
    %c0_25 = arith.constant 0 : index
    %c0_26 = arith.constant 0 : index
    %34 = vector.load %arg12[%c0_25, %c0_26] : memref<2x10xf32, #tpu.memory_space<vmem>>, vector<2x10xf32>
    tpu.vector_store %arg12[%c0_25, %c0_26], %33 {strides = array<i32>} : memref<2x10xf32, #tpu.memory_space<vmem>>, vector<2x10xf32>,
    return
  }
  func.func @transform_0(%arg0: i32) -> (i32, i32) {
    %c0_i32 = arith.constant 0 : i32
    %c0_i32_0 = arith.constant 0 : i32
    return %arg0, %c0_i32 : i32, i32
  }
  func.func @transform_1(%arg0: i32) -> (i32, i32) {
    %c0_i32 = arith.constant 0 : i32
    %c0_i32_0 = arith.constant 0 : i32
    %c0_i32_1 = arith.constant 0 : i32
    return %c0_i32, %c0_i32_0 : i32, i32
  }
  func.func @transform_2(%arg0: i32) -> (i32, i32) {
    %c0_i32 = arith.constant 0 : i32
    %c0_i32_0 = arith.constant 0 : i32
    %c0_i32_1 = arith.constant 0 : i32
    return %c0_i32, %c0_i32_0 : i32, i32
  }
  func.func @transform_3(%arg0: i32) -> (i32, i32) {
    %c0_i32 = arith.constant 0 : i32
    %c0_i32_0 = arith.constant 0 : i32
    %c0_i32_1 = arith.constant 0 : i32
    return %c0_i32, %c0_i32_0 : i32, i32
  }
  func.func @transform_4(%arg0: i32) -> (i32, i32) {
    %c0_i32 = arith.constant 0 : i32
    %c0_i32_0 = arith.constant 0 : i32
    %c0_i32_1 = arith.constant 0 : i32
    return %c0_i32, %c0_i32_0 : i32, i32
  }
  func.func @transform_5(%arg0: i32) -> (i32, i32) {
    %c0_i32 = arith.constant 0 : i32
    %c0_i32_0 = arith.constant 0 : i32
    %c0_i32_1 = arith.constant 0 : i32
    return %c0_i32, %c0_i32_0 : i32, i32
  }
  func.func @transform_6(%arg0: i32) -> (i32, i32) {
    %c0_i32 = arith.constant 0 : i32
    %c0_i32_0 = arith.constant 0 : i32
    %c0_i32_1 = arith.constant 0 : i32
    return %c0_i32, %c0_i32_0 : i32, i32
  }
  func.func @transform_7(%arg0: i32) -> (i32, i32) {
    %c0_i32 = arith.constant 0 : i32
    %c0_i32_0 = arith.constant 0 : i32
    %c0_i32_1 = arith.constant 0 : i32
    return %c0_i32, %c0_i32_0 : i32, i32
  }
  func.func @transform_8(%arg0: i32) -> (i32, i32) {
    %c0_i32 = arith.constant 0 : i32
    %c0_i32_0 = arith.constant 0 : i32
    %c0_i32_1 = arith.constant 0 : i32
    return %c0_i32, %c0_i32_0 : i32, i32
  }
  func.func @transform_9(%arg0: i32) -> (i32, i32) {
    %c0_i32 = arith.constant 0 : i32
    %c0_i32_0 = arith.constant 0 : i32
    %c0_i32_1 = arith.constant 0 : i32
    return %c0_i32, %c0_i32_0 : i32, i32
  }
  func.func @transform_10(%arg0: i32) -> (i32, i32) {
    %c0_i32 = arith.constant 0 : i32
    %c0_i32_0 = arith.constant 0 : i32
    %c0_i32_1 = arith.constant 0 : i32
    return %c0_i32, %c0_i32_0 : i32, i32
  }
  func.func @transform_11(%arg0: i32) -> (i32, i32) {
    %c0_i32 = arith.constant 0 : i32
    %c0_i32_0 = arith.constant 0 : i32
    return %arg0, %c0_i32 : i32, i32
  }
}

</mosaic_0001>

<bundles_post_ra>
// kernel: half_alexnet_forward.6
= control target key start
LH: loop header
LB: loop body
LE: loop exit
PB: predicated region body
PF: predicated region fallthrough
CT: control target
= control target key end

     0   :  { %s3692_s21 = smov 0   ;;  %s5499_s0 = inlined_call_operand.vmem [shape: bf16[2048,75], index: 0, kind: input, shape index: {}]   ;;  %s5500_s1 = inlined_call_operand.vmem [shape: bf16[75,24], index: 1, kind: input, shape index: {}]   ;;  %s5501_s2 = inlined_call_operand.vmem [shape: f32[1,24], index: 2, kind: input, shape index: {}]   ;;  %s5502_s3 = inlined_call_operand.vmem [shape: f32[24,24], index: 3, kind: input, shape index: {}]   ;;  %s5503_s4 = inlined_call_operand.vmem [shape: f32[1,24], index: 4, kind: input, shape index: {}]   ;;  %s5504_s5 = inlined_call_operand.vmem [shape: f32[1,24], index: 5, kind: input, shape index: {}]   ;;  %s5505_s6 = inlined_call_operand.vmem [shape: bf16[2048,24], index: 6, kind: output, shape index: {}]  }
   0x1 LB: > { %s2787_s22 = sadd.s32 4294967295, %s3654_s21   ;;  %p2791_p0 = scmp.ge.s32.totalorder %s3654_s21, 1  ;;  %s3654_s21 = sphi %s3692_s21, %s16_s21  }
   0x2   : > { %p213_p1 = scmp.lt.s32.totalorder %s3654_s21, 5 }
   0x4   : > { %p214_p2 = pnand %p2791_p0, %p213_p1 }
   0x6   : > { %217 = sbr.rel (%p214_p2) target bundleno = 707 (0x2c3), region = 44 }
   0xb   : > { %v3351_v0 = vld [vmem:[%s5500_s1 + $0x20] sm:$0x3f]   ;;  %vm623_vm0 = vcmask 1044480   ;;  %vm624_vm1 = vcmask 1045504   ;;  %v3656_v1 = vmov 65535   ;;  %v3352_v4 = vld [vmem:[%s5500_s1 + $0x18] sm:$0xff]  }
   0xc   : > { %v625_v2 = vsel %vm623_vm0, 4294967295, %v3656_v1  ;;  %s2792_s27 = sshll.u32 %s2787_s22, 6  ;;  %v3353_v6 = vld [vmem:[%s5500_s1 + $0x10] sm:$0xff]   ;;  %v3354_v7 = vld [vmem:[%s5500_s1 + $0x8] sm:$0xff]   ;;  %vm526_vm2 = vcmask 613376   ;;  %v3355_v9 = vld [vmem:[%s5500_s1] sm:$0xff]  }
   0xd   : > { %v626_v3 = vsel %vm624_vm1, %v625_v2, 0  ;;  %p244_p3 = scmp.lt.s32.totalorder %s2792_s27, 255  ;;  %v1049_v30 = vld [vmem:[%s5502_s3 + $0x10] sm:$0xff]  ;;  %v1048_v31 = vld [vmem:[%s5502_s3 + $0x8] sm:$0xff]  ;;  %v1047_v32 = vld [vmem:[%s5502_s3] sm:$0xff]  ;;  %vm1050_vm3 = vcmask 195584  }
   0xe   : > { %v628_v5 = vand.u32 %v3351_v0, %v626_v3  ;;  %3240 = vmatprep.subr.mxu1 %v1049_v30  ;;  %v3801_v45 = vld [vmem:[%s5501_s2] ss:$0 sm:$0xff]  ;;  %vm2666_vm12 = vcmask 191488  }
   0xf   : > { %s5614_s27 = smov (!%p244_p3, %s2792_s27), 255  ;;  %3241 = vmatpush3.msra.mxu1 %v1049_v30 }
  0x10   : > { %3166 = vmatprep.subr.bf16.mxu0 %v628_v5  ;;  %s2793_s30 = sshll.u32 %s5614_s27, 2  ;;  %3242 = vmatprep.subr.mxu1 %v1048_v31 }
  0x11   : > { %3167 = vmatpush3.bf16.msra.mxu0 %v628_v5  ;;  %s3720_s11 = scalar_lea.vmem %s5499_s0, %s2793_s30  ;;  %3243 = vmatpush3.msra.mxu1 %v1048_v31  ;;  %s4309_s7 = scalar_lea.vmem %s5505_s6, %s2793_s30 }
  0x12   : > { %3168 = vmatprep.subr.bf16.mxu0 %v3352_v4  ;;  %v3356_v8 = vld [vmem:[%s3720_s11] sm:$0xff]   ;;  %v3357_v10 = vld [vmem:[%s3720_s11 + $0x8] sm:$0xff]   ;;  %v3358_v11 = vld [vmem:[%s3720_s11 + $0x10] sm:$0xff]   ;;  %3244 = vmatprep.subr.mxu1 %v1047_v32 }
  0x13   : > { %3176 = vmatprep.mubr.msk.bf16.mxu0 %vm526_vm2, %v3356_v8  ;;  %v3359_v12 = vld [vmem:[%s3720_s11 + $0x18] sm:$0xff]   ;;  %v3360_v13 = vld [vmem:[%s3720_s11 + $0x20] sm:$0xff]   ;;  %v3361_v14 = vld [vmem:[%s3720_s11 + $0x28] sm:$0xff]   ;;  %3245 = vmatpush3.msra.mxu1 %v1047_v32 }
  0x14   : > { %v3362_v15 = vld [vmem:[%s3720_s11 + $0x30] sm:$0xff]   ;;  %v3363_v16 = vld [vmem:[%s3720_s11 + $0x38] sm:$0xff]   ;;  %v3364_v17 = vld [vmem:[%s3720_s11 + $0x40] sm:$0xff]  }
  0x15   : > { %3169 = vmatpush3.bf16.msra.mxu0 %v3352_v4  ;;  %v3365_v18 = vld [vmem:[%s3720_s11 + $0x48] sm:$0xff]   ;;  %v3366_v19 = vld [vmem:[%s3720_s11 + $0x50] sm:$0xff]   ;;  %v3367_v20 = vld [vmem:[%s3720_s11 + $0x58] sm:$0xff]  }
  0x16   : > { %3170 = vmatprep.subr.bf16.mxu0 %v3353_v6  ;;  %v3368_v21 = vld [vmem:[%s3720_s11 + $0x60] sm:$0xff]   ;;  %v3369_v22 = vld [vmem:[%s3720_s11 + $0x68] sm:$0xff]   ;;  %v3370_v23 = vld [vmem:[%s3720_s11 + $0x70] sm:$0xff]  }
  0x17   : > { %v3371_v24 = vld [vmem:[%s3720_s11 + $0x78] sm:$0xff]   ;;  %v3372_v25 = vld [vmem:[%s3720_s11 + $0x80] sm:$0xff]   ;;  %v3373_v26 = vld [vmem:[%s3720_s11 + $0x88] sm:$0xff]  }
  0x18   : > { %v3374_v27 = vld [vmem:[%s3720_s11 + $0x90] sm:$0xff]   ;;  %v3375_v28 = vld [vmem:[%s3720_s11 + $0x98] sm:$0xff]   ;;  %v3376_v29 = vld [vmem:[%s3720_s11 + $0xa0] sm:$0xff]  }
  0x19   : > { %3171 = vmatpush3.bf16.msra.mxu0 %v3353_v6  ;;  %v3377_v33 = vld [vmem:[%s3720_s11 + $0xa8] sm:$0xff]   ;;  %v3378_v34 = vld [vmem:[%s3720_s11 + $0xb0] sm:$0xff]   ;;  %v3379_v35 = vld [vmem:[%s3720_s11 + $0xb8] sm:$0xff]  }
  0x1a   : > { %3172 = vmatprep.subr.bf16.mxu0 %v3354_v7  ;;  %v3380_v36 = vld [vmem:[%s3720_s11 + $0xc0] sm:$0xff]   ;;  %v3381_v37 = vld [vmem:[%s3720_s11 + $0xc8] sm:$0xff]   ;;  %v3382_v38 = vld [vmem:[%s3720_s11 + $0xd0] sm:$0xff]  }
  0x1b   : > { %v3383_v39 = vld [vmem:[%s3720_s11 + $0xd8] sm:$0xff]   ;;  %v3384_v40 = vld [vmem:[%s3720_s11 + $0xe0] sm:$0xff]   ;;  %v3385_v41 = vld [vmem:[%s3720_s11 + $0xe8] sm:$0xff]  }
  0x1c   : > { %v3386_v42 = vld [vmem:[%s3720_s11 + $0xf0] sm:$0xff]   ;;  %v3387_v43 = vld [vmem:[%s3720_s11 + $0xf8] sm:$0xff]  }
  0x1d   : > { %3173 = vmatpush3.bf16.msra.mxu0 %v3354_v7 }
  0x1e   : > { %3174 = vmatprep.subr.bf16.mxu0 %v3355_v9 }
  0x21   : > { %3175 = vmatpush3.bf16.msra.mxu0 %v3355_v9 }
  0x24   : > { %3177 = vmatmul.mubr.msk.bf16.vlgmr.msra.gmra.mxu0 %vm526_vm2, %v3357_v10 }
  0x25   : > { %3180 = vmatprep.mubr.msk.bf16.mxu0 %vm526_vm2, %v3358_v11 }
  0x2c   : > { %3181 = vmatmul.mubr.msk.bf16.gmra.mxu0 %vm526_vm2, %v3359_v12 }
  0x2d   : > { %3184 = vmatprep.mubr.msk.bf16.mxu0 %vm526_vm2, %v3360_v13 }
  0x34   : > { %3185 = vmatmul.mubr.msk.bf16.gmra.mxu0 %vm526_vm2, %v3361_v14 }
  0x35   : > { %3188 = vmatprep.mubr.msk.bf16.mxu0 %vm526_vm2, %v3362_v15 }
  0x3c   : > { %3189 = vmatmul.mubr.msk.bf16.gmra.mxu0 %vm526_vm2, %v3363_v16 }
  0x3d   : > { %3192 = vmatprep.mubr.msk.bf16.mxu0 %vm526_vm2, %v3364_v17 }
  0x44   : > { %3193 = vmatmul.mubr.msk.bf16.gmra.mxu0 %vm526_vm2, %v3365_v18 }
  0x45   : > { %3196 = vmatprep.mubr.msk.bf16.mxu0 %vm526_vm2, %v3366_v19 }
  0x4c   : > { %3197 = vmatmul.mubr.msk.bf16.gmra.mxu0 %vm526_vm2, %v3367_v20 }
  0x4d   : > { %3200 = vmatprep.mubr.msk.bf16.mxu0 %vm526_vm2, %v3368_v21 }
  0x54   : > { %3201 = vmatmul.mubr.msk.bf16.gmra.mxu0 %vm526_vm2, %v3369_v22 }
  0x55   : > { %3204 = vmatprep.mubr.msk.bf16.mxu0 %vm526_vm2, %v3370_v23 }
  0x5c   : > { %3205 = vmatmul.mubr.msk.bf16.gmra.mxu0 %vm526_vm2, %v3371_v24 }
  0x5d   : > { %3208 = vmatprep.mubr.msk.bf16.mxu0 %vm526_vm2, %v3372_v25 }
  0x64   : > { %3209 = vmatmul.mubr.msk.bf16.gmra.mxu0 %vm526_vm2, %v3373_v26 }
  0x65   : > { %3212 = vmatprep.mubr.msk.bf16.mxu0 %vm526_vm2, %v3374_v27 }
  0x6c   : > { %3213 = vmatmul.mubr.msk.bf16.gmra.mxu0 %vm526_vm2, %v3375_v28 }
  0x6d   : > { %3216 = vmatprep.mubr.msk.bf16.mxu0 %vm526_vm2, %v3376_v29 }
  0x74   : > { %3217 = vmatmul.mubr.msk.bf16.gmra.mxu0 %vm526_vm2, %v3377_v33 }
  0x75   : > { %3220 = vmatprep.mubr.msk.bf16.mxu0 %vm526_vm2, %v3378_v34 }
  0x7c   : > { %3221 = vmatmul.mubr.msk.bf16.gmra.mxu0 %vm526_vm2, %v3379_v35 }
  0x7d   : > { %3224 = vmatprep.mubr.msk.bf16.mxu0 %vm526_vm2, %v3380_v36 }
  0x84   : > { %3225 = vmatmul.mubr.msk.bf16.gmra.mxu0 %vm526_vm2, %v3381_v37 }
  0x85   : > { %3228 = vmatprep.mubr.msk.bf16.mxu0 %vm526_vm2, %v3382_v38 }
  0x8c   : > { %3229 = vmatmul.mubr.msk.bf16.gmra.mxu0 %vm526_vm2, %v3383_v39 }
  0x8d   : > { %3232 = vmatprep.mubr.msk.bf16.mxu0 %vm526_vm2, %v3384_v40 }
  0x94   : > { %3233 = vmatmul.mubr.msk.bf16.gmra.mxu0 %vm526_vm2, %v3385_v41 }
  0x95   : > { %3236 = vmatprep.mubr.msk.bf16.mxu0 %vm526_vm2, %v3386_v42 }
  0x9c   : > { %3237 = vmatmul.mubr.msk.bf16.gmra.mxu0 %vm526_vm2, %v3387_v43 }
  0xe4   : > { %v3178_v44 = vpop.f32.mrf.mxu0 }
  0xe5   : > { %v673_v48 = vadd.f32 %v3178_v44, %v3801_v45 }
  0xe6   : > { %v664_v46 = vpop.f32.mrf.mxu0 }
  0xe7   : > { %v665_v47 = vadd.f32 %v3801_v45, %v664_v46  ;;  %v3811_v55 = vmax.f32 %v673_v48, 0.0 }
  0xe8   : > { %v3179_v49 = vpop.f32.mrf.mxu0 }
  0xe9   : > { %v3805_v50 = vmax.f32 %v665_v47, 0.0  ;;  %v676_v52 = vadd.f32 %v3179_v49, %v3801_v45  ;;  %v985_v62 = vmul.f32 %v3811_v55, %v3811_v55 }
  0xea   : > { %v667_v51 = vpop.f32.mrf.mxu0 }
  0xeb   : > { %v668_v53 = vadd.f32 %v3801_v45, %v667_v51  ;;  %v983_v54 = vmul.f32 %v3805_v50, %v3805_v50  ;;  %v3816_v59 = vmax.f32 %v676_v52, 0.0 }
  0xec   : > { %v3182_v56 = vpop.f32.mrf.mxu0 }
  0xed   : > { %v3813_v57 = vmax.f32 %v668_v53, 0.0  ;;  %3246 = vmatprep.mubr.msk.f32.mxu1 %vm1050_vm3, %v983_v54  ;;  %v689_v63 = vadd.f32 %v3182_v56, %v3801_v45  ;;  %v986_v3 = vmul.f32 %v3816_v59, %v3816_v59 }
  0xee   : > { %v680_v58 = vpop.f32.mrf.mxu0 }
  0xef   : > { %v984_v60 = vmul.f32 %v3813_v57, %v3813_v57  ;;  %v681_v61 = vadd.f32 %v3801_v45, %v680_v58  ;;  %v3834_v7 = vmax.f32 %v689_v63, 0.0 }
  0xf0   : > { %v3183_v0 = vpop.f32.mrf.mxu0 }
  0xf1   : > { %v3824_v1 = vmax.f32 %v681_v61, 0.0  ;;  %3247 = vmatmul.mubr.msk.f32.vlgmr.msra.gmra.mxu1 %vm1050_vm3, %v984_v60  ;;  %v692_v5 = vadd.f32 %v3183_v0, %v3801_v45  ;;  %v989_v14 = vmul.f32 %v3834_v7, %v3834_v7 }
  0xf2   : > { %v683_v2 = vpop.f32.mrf.mxu0  ;;  %3249 = vmatprep.mubr.msk.f32.mxu1 %vm1050_vm3, %v985_v62 }
  0xf3   : > { %v987_v4 = vmul.f32 %v3824_v1, %v3824_v1  ;;  %v684_v6 = vadd.f32 %v3801_v45, %v683_v2  ;;  %v3840_v11 = vmax.f32 %v692_v5, 0.0 }
  0xf4   : > { %v3186_v8 = vpop.f32.mrf.mxu0 }
  0xf5   : > { %v3836_v9 = vmax.f32 %v684_v6, 0.0  ;;  %3250 = vmatmul.mubr.msk.f32.gmra.mxu1 %vm1050_vm3, %v986_v3  ;;  %v705_v15 = vadd.f32 %v3186_v8, %v3801_v45  ;;  %v990_v19 = vmul.f32 %v3840_v11, %v3840_v11 }
  0xf6   : > { %v696_v10 = vpop.f32.mrf.mxu0  ;;  %3252 = vmatprep.mubr.msk.f32.mxu1 %vm1050_vm3, %v987_v4 }
  0xf7   : > { %v988_v12 = vmul.f32 %v3836_v9, %v3836_v9  ;;  %v697_v13 = vadd.f32 %v3801_v45, %v696_v10  ;;  %v3858_v23 = vmax.f32 %v705_v15, 0.0 }
  0xf8   : > { %v3187_v16 = vpop.f32.mrf.mxu0 }
  0xf9   : > { %v3848_v17 = vmax.f32 %v697_v13, 0.0  ;;  %3253 = vmatmul.mubr.msk.f32.gmra.mxu1 %vm1050_vm3, %v988_v12  ;;  %v708_v21 = vadd.f32 %v3187_v16, %v3801_v45  ;;  %v993_v30 = vmul.f32 %v3858_v23, %v3858_v23 }
  0xfa   : > { %v699_v18 = vpop.f32.mrf.mxu0  ;;  %3255 = vmatprep.mubr.msk.f32.mxu1 %vm1050_vm3, %v989_v14 }
  0xfb   : > { %v991_v20 = vmul.f32 %v3848_v17, %v3848_v17  ;;  %v700_v22 = vadd.f32 %v3801_v45, %v699_v18  ;;  %v3864_v27 = vmax.f32 %v708_v21, 0.0 }
  0xfc   : > { %v3190_v24 = vpop.f32.mrf.mxu0 }
  0xfd   : > { %v3860_v25 = vmax.f32 %v700_v22, 0.0  ;;  %3256 = vmatmul.mubr.msk.f32.gmra.mxu1 %vm1050_vm3, %v990_v19  ;;  %v721_v31 = vadd.f32 %v3190_v24, %v3801_v45  ;;  %v994_v35 = vmul.f32 %v3864_v27, %v3864_v27 }
  0xfe   : > { %v712_v26 = vpop.f32.mrf.mxu0  ;;  %3258 = vmatprep.mubr.msk.f32.mxu1 %vm1050_vm3, %v991_v20 }
  0xff   : > { %v992_v28 = vmul.f32 %v3860_v25, %v3860_v25  ;;  %v713_v29 = vadd.f32 %v3801_v45, %v712_v26  ;;  %v3882_v39 = vmax.f32 %v721_v31, 0.0 }
 0x100   : > { %v3191_v32 = vpop.f32.mrf.mxu0 }
 0x101   : > { %v3872_v33 = vmax.f32 %v713_v29, 0.0  ;;  %3259 = vmatmul.mubr.msk.f32.gmra.mxu1 %vm1050_vm3, %v992_v28  ;;  %v724_v37 = vadd.f32 %v3191_v32, %v3801_v45  ;;  %v997_v47 = vmul.f32 %v3882_v39, %v3882_v39 }
 0x102   : > { %v715_v34 = vpop.f32.mrf.mxu0  ;;  %3261 = vmatprep.mubr.msk.f32.mxu1 %vm1050_vm3, %v993_v30 }
 0x103   : > { %v995_v36 = vmul.f32 %v3872_v33, %v3872_v33  ;;  %v716_v38 = vadd.f32 %v3801_v45, %v715_v34  ;;  %v3888_v43 = vmax.f32 %v724_v37, 0.0 }
 0x104   : > { %v3194_v40 = vpop.f32.mrf.mxu0 }
 0x105   : > { %v3884_v41 = vmax.f32 %v716_v38, 0.0  ;;  %3262 = vmatmul.mubr.msk.f32.gmra.mxu1 %vm1050_vm3, %v994_v35  ;;  %v737_v48 = vadd.f32 %v3194_v40, %v3801_v45  ;;  %v998_v53 = vmul.f32 %v3888_v43, %v3888_v43 }
 0x106   : > { %v728_v42 = vpop.f32.mrf.mxu0  ;;  %3264 = vmatprep.mubr.msk.f32.mxu1 %vm1050_vm3, %v995_v36 }
 0x107   : > { %v996_v44 = vmul.f32 %v3884_v41, %v3884_v41  ;;  %v729_v46 = vadd.f32 %v3801_v45, %v728_v42  ;;  %v3906_v60 = vmax.f32 %v737_v48, 0.0 }
 0x108   : > { %v3195_v49 = vpop.f32.mrf.mxu0 }
 0x109   : > { %v3896_v51 = vmax.f32 %v729_v46, 0.0  ;;  %3265 = vmatmul.mubr.msk.f32.gmra.mxu1 %vm1050_vm3, %v996_v44  ;;  %v740_v56 = vadd.f32 %v3195_v49, %v3801_v45  ;;  %v1001_v4 = vmul.f32 %v3906_v60, %v3906_v60 }
 0x10a   : > { %v731_v52 = vpop.f32.mrf.mxu0  ;;  %3267 = vmatprep.mubr.msk.f32.mxu1 %vm1050_vm3, %v997_v47 }
 0x10b   : > { %v999_v54 = vmul.f32 %v3896_v51, %v3896_v51  ;;  %v732_v58 = vadd.f32 %v3801_v45, %v731_v52  ;;  %v3912_v0 = vmax.f32 %v740_v56, 0.0 }
 0x10c   : > { %v3198_v61 = vpop.f32.mrf.mxu0 }
 0x10d   : > { %v3908_v62 = vmax.f32 %v732_v58, 0.0  ;;  %3268 = vmatmul.mubr.msk.f32.gmra.mxu1 %vm1050_vm3, %v998_v53  ;;  %v753_v5 = vadd.f32 %v3198_v61, %v3801_v45  ;;  %v1002_v12 = vmul.f32 %v3912_v0, %v3912_v0 }
 0x10e   : > { %v744_v63 = vpop.f32.mrf.mxu0  ;;  %3270 = vmatprep.mubr.msk.f32.mxu1 %vm1050_vm3, %v999_v54 }
 0x10f   : > { %v1000_v2 = vmul.f32 %v3908_v62, %v3908_v62  ;;  %v745_v3 = vadd.f32 %v3801_v45, %v744_v63  ;;  %v3930_v16 = vmax.f32 %v753_v5, 0.0 }
 0x110   : > { %v3199_v6 = vpop.f32.mrf.mxu0 }
 0x111   : > { %v3920_v8 = vmax.f32 %v745_v3, 0.0  ;;  %3271 = vmatmul.mubr.msk.f32.gmra.mxu1 %vm1050_vm3, %v1000_v2  ;;  %v756_v14 = vadd.f32 %v3199_v6, %v3801_v45  ;;  %v1005_v26 = vmul.f32 %v3930_v16, %v3930_v16 }
 0x112   : > { %v747_v10 = vpop.f32.mrf.mxu0  ;;  %3273 = vmatprep.mubr.msk.f32.mxu1 %vm1050_vm3, %v1001_v4 }
 0x113   : > { %v1003_v13 = vmul.f32 %v3920_v8, %v3920_v8  ;;  %v748_v15 = vadd.f32 %v3801_v45, %v747_v10  ;;  %v3936_v21 = vmax.f32 %v756_v14, 0.0 }
 0x114   : > { %v3202_v18 = vpop.f32.mrf.mxu0 }
 0x115   : > { %v3932_v19 = vmax.f32 %v748_v15, 0.0  ;;  %3274 = vmatmul.mubr.msk.f32.gmra.mxu1 %vm1050_vm3, %v1002_v12  ;;  %v769_v28 = vadd.f32 %v3202_v18, %v3801_v45  ;;  %v1006_v32 = vmul.f32 %v3936_v21, %v3936_v21 }
 0x116   : > { %v760_v20 = vpop.f32.mrf.mxu0  ;;  %3276 = vmatprep.mubr.msk.f32.mxu1 %vm1050_vm3, %v1003_v13 }
 0x117   : > { %v1004_v22 = vmul.f32 %v3932_v19, %v3932_v19  ;;  %v761_v24 = vadd.f32 %v3801_v45, %v760_v20  ;;  %v3954_v37 = vmax.f32 %v769_v28, 0.0 }
 0x118   : > { %v3203_v29 = vpop.f32.mrf.mxu0 }
 0x119   : > { %v3944_v30 = vmax.f32 %v761_v24, 0.0  ;;  %3277 = vmatmul.mubr.msk.f32.gmra.mxu1 %vm1050_vm3, %v1004_v22  ;;  %v772_v35 = vadd.f32 %v3203_v29, %v3801_v45  ;;  %v1009_v48 = vmul.f32 %v3954_v37, %v3954_v37 }
 0x11a   : > { %v763_v31 = vpop.f32.mrf.mxu0  ;;  %3279 = vmatprep.mubr.msk.f32.mxu1 %vm1050_vm3, %v1005_v26 }
 0x11b   : > { %v1007_v34 = vmul.f32 %v3944_v30, %v3944_v30  ;;  %v764_v36 = vadd.f32 %v3801_v45, %v763_v31  ;;  %v3960_v44 = vmax.f32 %v772_v35, 0.0 }
 0x11c   : > { %v3206_v38 = vpop.f32.mrf.mxu0 }
 0x11d   : > { %v3956_v40 = vmax.f32 %v764_v36, 0.0  ;;  %3280 = vmatmul.mubr.msk.f32.gmra.mxu1 %vm1050_vm3, %v1006_v32  ;;  %v785_v49 = vadd.f32 %v3206_v38, %v3801_v45  ;;  %v1010_v56 = vmul.f32 %v3960_v44, %v3960_v44 }
 0x11e   : > { %v776_v42 = vpop.f32.mrf.mxu0  ;;  %3282 = vmatprep.mubr.msk.f32.mxu1 %vm1050_vm3, %v1007_v34 }
 0x11f   : > { %v1008_v46 = vmul.f32 %v3956_v40, %v3956_v40  ;;  %v777_v47 = vadd.f32 %v3801_v45, %v776_v42  ;;  %v3978_v2 = vmax.f32 %v785_v49, 0.0 }
 0x120   : > { %v3207_v52 = vpop.f32.mrf.mxu0 }
 0x121   : > { %v3968_v53 = vmax.f32 %v777_v47, 0.0  ;;  %3283 = vmatmul.mubr.msk.f32.gmra.mxu1 %vm1050_vm3, %v1008_v46  ;;  %v788_v61 = vadd.f32 %v3207_v52, %v3801_v45  ;;  %5542 = vst [vmem:[#allocation3_spill] sm:$0xff] %v3978_v2  ;;  %v1013_v13 = vmul.f32 %v3978_v2, %v3978_v2 }
 0x122   : > { %v779_v54 = vpop.f32.mrf.mxu0  ;;  %3285 = vmatprep.mubr.msk.f32.mxu1 %vm1050_vm3, %v1009_v48 }
 0x123   : > { %5541 = vst [vmem:[#allocation2_spill] sm:$0xff] %v3968_v53  ;;  %v1011_v58 = vmul.f32 %v3968_v53, %v3968_v53  ;;  %v780_v63 = vadd.f32 %v3801_v45, %v779_v54  ;;  %v3984_v6 = vmax.f32 %v788_v61, 0.0 }
 0x124   : > { %v3210_v3 = vpop.f32.mrf.mxu0 }
 0x125   : > { %v3980_v4 = vmax.f32 %v780_v63, 0.0  ;;  %3286 = vmatmul.mubr.msk.f32.gmra.mxu1 %vm1050_vm3, %v1010_v56  ;;  %5543 = vst [vmem:[#allocation4_spill] sm:$0xff] %v3984_v6  ;;  %v801_v14 = vadd.f32 %v3210_v3, %v3801_v45  ;;  %v1014_v22 = vmul.f32 %v3984_v6, %v3984_v6 }
 0x126   : > { %v792_v5 = vpop.f32.mrf.mxu0  ;;  %3288 = vmatprep.mubr.msk.f32.mxu1 %vm1050_vm3, %v1011_v58 }
 0x127   : > { %v1012_v10 = vmul.f32 %v3980_v4, %v3980_v4  ;;  %v793_v12 = vadd.f32 %v3801_v45, %v792_v5  ;;  %v4002_v29 = vmax.f32 %v801_v14, 0.0 }
 0x128   : > { %v3211_v15 = vpop.f32.mrf.mxu0 }
 0x129   : > { %v3992_v18 = vmax.f32 %v793_v12, 0.0  ;;  %3289 = vmatmul.mubr.msk.f32.gmra.mxu1 %vm1050_vm3, %v1012_v10  ;;  %v804_v26 = vadd.f32 %v3211_v15, %v3801_v45  ;;  %5545 = vst [vmem:[#allocation6_spill] sm:$0xff] %v4002_v29  ;;  %v1017_v42 = vmul.f32 %v4002_v29, %v4002_v29 }
 0x12a   : > { %v795_v20 = vpop.f32.mrf.mxu0  ;;  %3291 = vmatprep.mubr.msk.f32.mxu1 %vm1050_vm3, %v1013_v13 }
 0x12b   : > { %5544 = vst [vmem:[#allocation5_spill] sm:$0xff] %v3992_v18  ;;  %v1015_v24 = vmul.f32 %v3992_v18, %v3992_v18  ;;  %v796_v28 = vadd.f32 %v3801_v45, %v795_v20  ;;  %v4008_v35 = vmax.f32 %v804_v26, 0.0 }
 0x12c   : > { %v3214_v31 = vpop.f32.mrf.mxu0 }
 0x12d   : > { %v4004_v32 = vmax.f32 %v796_v28, 0.0  ;;  %3292 = vmatmul.mubr.msk.f32.gmra.mxu1 %vm1050_vm3, %v1014_v22  ;;  %5547 = vst [vmem:[#allocation8_spill] sm:$0xff] %v4008_v35  ;;  %v817_v46 = vadd.f32 %v3214_v31, %v3801_v45  ;;  %v1018_v52 = vmul.f32 %v4008_v35, %v4008_v35 }
 0x12e   : > { %v808_v34 = vpop.f32.mrf.mxu0  ;;  %3294 = vmatprep.mubr.msk.f32.mxu1 %vm1050_vm3, %v1015_v24 }
 0x12f   : > { %5546 = vst [vmem:[#allocation7_spill] sm:$0xff] %v4004_v32  ;;  %v1016_v36 = vmul.f32 %v4004_v32, %v4004_v32  ;;  %v809_v38 = vadd.f32 %v3801_v45, %v808_v34  ;;  %v4026_v61 = vmax.f32 %v817_v46, 0.0 }
 0x130   : > { %v3215_v47 = vpop.f32.mrf.mxu0 }
 0x131   : > { %v4016_v48 = vmax.f32 %v809_v38, 0.0  ;;  %3295 = vmatmul.mubr.msk.f32.gmra.mxu1 %vm1050_vm3, %v1016_v36  ;;  %v820_v56 = vadd.f32 %v3215_v47, %v3801_v45  ;;  %5549 = vst [vmem:[#allocation10_spill] sm:$0xff] %v4026_v61  ;;  %v1021_v14 = vmul.f32 %v4026_v61, %v4026_v61 }
 0x132   : > { %v811_v49 = vpop.f32.mrf.mxu0  ;;  %3297 = vmatprep.mubr.msk.f32.mxu1 %vm1050_vm3, %v1017_v42 }
 0x133   : > { %5548 = vst [vmem:[#allocation9_spill] sm:$0xff] %v4016_v48  ;;  %v1019_v54 = vmul.f32 %v4016_v48, %v4016_v48  ;;  %v812_v58 = vadd.f32 %v3801_v45, %v811_v49  ;;  %v4032_v10 = vmax.f32 %v820_v56, 0.0 }
 0x134   : > { %v3218_v63 = vpop.f32.mrf.mxu0 }
 0x135   : > { %v4028_v3 = vmax.f32 %v812_v58, 0.0  ;;  %3298 = vmatmul.mubr.msk.f32.gmra.mxu1 %vm1050_vm3, %v1018_v52  ;;  %5551 = vst [vmem:[#allocation12_spill] sm:$0xff] %v4032_v10  ;;  %v833_v15 = vadd.f32 %v3218_v63, %v3801_v45  ;;  %v1022_v26 = vmul.f32 %v4032_v10, %v4032_v10 }
 0x136   : > { %v824_v5 = vpop.f32.mrf.mxu0  ;;  %3300 = vmatprep.mubr.msk.f32.mxu1 %vm1050_vm3, %v1019_v54 }
 0x137   : > { %5550 = vst [vmem:[#allocation11_spill] sm:$0xff] %v4028_v3  ;;  %v1020_v12 = vmul.f32 %v4028_v3, %v4028_v3  ;;  %v825_v13 = vadd.f32 %v3801_v45, %v824_v5  ;;  %v4050_v36 = vmax.f32 %v833_v15, 0.0 }
 0x138   : > { %v3219_v20 = vpop.f32.mrf.mxu0 }
 0x139   : > { %v4040_v22 = vmax.f32 %v825_v13, 0.0  ;;  %3301 = vmatmul.mubr.msk.f32.gmra.mxu1 %vm1050_vm3, %v1020_v12  ;;  %v836_v31 = vadd.f32 %v3219_v20, %v3801_v45  ;;  %5553 = vst [vmem:[#allocation14_spill] sm:$0xff] %v4050_v36  ;;  %v1025_v54 = vmul.f32 %v4050_v36, %v4050_v36 }
 0x13a   : > { %v827_v24 = vpop.f32.mrf.mxu0  ;;  %3303 = vmatprep.mubr.msk.f32.mxu1 %vm1050_vm3, %v1021_v14 }
 0x13b   : > { %5552 = vst [vmem:[#allocation13_spill] sm:$0xff] %v4040_v22  ;;  %v1023_v28 = vmul.f32 %v4040_v22, %v4040_v22  ;;  %v828_v34 = vadd.f32 %v3801_v45, %v827_v24  ;;  %v4056_v47 = vmax.f32 %v836_v31, 0.0 }
 0x13c   : > { %v3222_v38 = vpop.f32.mrf.mxu0 }
 0x13d   : > { %v4052_v42 = vmax.f32 %v828_v34, 0.0  ;;  %3304 = vmatmul.mubr.msk.f32.gmra.mxu1 %vm1050_vm3, %v1022_v26  ;;  %5555 = vst [vmem:[#allocation16_spill] sm:$0xff] %v4056_v47  ;;  %v849_v56 = vadd.f32 %v3222_v38, %v3801_v45  ;;  %v1026_v12 = vmul.f32 %v4056_v47, %v4056_v47 }
 0x13e   : > { %v840_v46 = vpop.f32.mrf.mxu0  ;;  %3306 = vmatprep.mubr.msk.f32.mxu1 %vm1050_vm3, %v1023_v28 }
 0x13f   : > { %5554 = vst [vmem:[#allocation15_spill] sm:$0xff] %v4052_v42  ;;  %v1024_v49 = vmul.f32 %v4052_v42, %v4052_v42  ;;  %v841_v52 = vadd.f32 %v3801_v45, %v840_v46  ;;  %v4074_v20 = vmax.f32 %v849_v56, 0.0 }
 0x140   : > { %v3223_v58 = vpop.f32.mrf.mxu0 }
 0x141   : > { %v4064_v63 = vmax.f32 %v841_v52, 0.0  ;;  %3307 = vmatmul.mubr.msk.f32.gmra.mxu1 %vm1050_vm3, %v1024_v49  ;;  %v852_v14 = vadd.f32 %v3223_v58, %v3801_v45  ;;  %5557 = vst [vmem:[#allocation18_spill] sm:$0xff] %v4074_v20  ;;  %v1029_v46 = vmul.f32 %v4074_v20, %v4074_v20 }
 0x142   : > { %v843_v5 = vpop.f32.mrf.mxu0  ;;  %3309 = vmatprep.mubr.msk.f32.mxu1 %vm1050_vm3, %v1025_v54 }
 0x143   : > { %5556 = vst [vmem:[#allocation17_spill] sm:$0xff] %v4064_v63  ;;  %v1027_v13 = vmul.f32 %v4064_v63, %v4064_v63  ;;  %v844_v15 = vadd.f32 %v3801_v45, %v843_v5  ;;  %v4080_v31 = vmax.f32 %v852_v14, 0.0 }
 0x144   : > { %v3226_v24 = vpop.f32.mrf.mxu0 }
 0x145   : > { %v4076_v26 = vmax.f32 %v844_v15, 0.0  ;;  %3310 = vmatmul.mubr.msk.f32.gmra.mxu1 %vm1050_vm3, %v1026_v12  ;;  %5559 = vst [vmem:[#allocation20_spill] sm:$0xff] %v4080_v31  ;;  %v865_v49 = vadd.f32 %v3226_v24, %v3801_v45  ;;  %v1030_v58 = vmul.f32 %v4080_v31, %v4080_v31 }
 0x146   : > { %v856_v28 = vpop.f32.mrf.mxu0  ;;  %3312 = vmatprep.mubr.msk.f32.mxu1 %vm1050_vm3, %v1027_v13 }
 0x147   : > { %5558 = vst [vmem:[#allocation19_spill] sm:$0xff] %v4076_v26  ;;  %v1028_v34 = vmul.f32 %v4076_v26, %v4076_v26  ;;  %v857_v38 = vadd.f32 %v3801_v45, %v856_v28  ;;  %v4098_v14 = vmax.f32 %v865_v49, 0.0 }
 0x148   : > { %v3227_v52 = vpop.f32.mrf.mxu0 }
 0x149   : > { %v4088_v54 = vmax.f32 %v857_v38, 0.0  ;;  %3313 = vmatmul.mubr.msk.f32.gmra.mxu1 %vm1050_vm3, %v1028_v34  ;;  %v868_v12 = vadd.f32 %v3227_v52, %v3801_v45  ;;  %5561 = vst [vmem:[#allocation22_spill] sm:$0xff] %v4098_v14  ;;  %v1033_v52 = vmul.f32 %v4098_v14, %v4098_v14 }
 0x14a   : > { %v859_v56 = vpop.f32.mrf.mxu0  ;;  %3315 = vmatprep.mubr.msk.f32.mxu1 %vm1050_vm3, %v1029_v46 }
 0x14b   : > { %5560 = vst [vmem:[#allocation21_spill] sm:$0xff] %v4088_v54  ;;  %v1031_v5 = vmul.f32 %v4088_v54, %v4088_v54  ;;  %v860_v13 = vadd.f32 %v3801_v45, %v859_v56  ;;  %v4104_v34 = vmax.f32 %v868_v12, 0.0 }
 0x14c   : > { %v3230_v15 = vpop.f32.mrf.mxu0 }
 0x14d   : > { %v4100_v24 = vmax.f32 %v860_v13, 0.0  ;;  %3316 = vmatmul.mubr.msk.f32.gmra.mxu1 %vm1050_vm3, %v1030_v58  ;;  %5563 = vst [vmem:[#allocation24_spill] sm:$0xff] %v4104_v34  ;;  %v881_v49 = vadd.f32 %v3230_v15, %v3801_v45 }
 0x14e   : > { %v872_v28 = vpop.f32.mrf.mxu0  ;;  %3318 = vmatprep.mubr.msk.f32.mxu1 %vm1050_vm3, %v1031_v5  ;;  %v1034_v5 = vmul.f32 %v4104_v34, %v4104_v34 }
 0x14f   : > { %5562 = vst [vmem:[#allocation23_spill] sm:$0xff] %v4100_v24  ;;  %v1032_v38 = vmul.f32 %v4100_v24, %v4100_v24  ;;  %v873_v46 = vadd.f32 %v3801_v45, %v872_v28  ;;  %v4122_v54 = vmax.f32 %v881_v49, 0.0 }
 0x150   : > { %v3231_v56 = vpop.f32.mrf.mxu0 }
 0x151   : > { %v4112_v13 = vmax.f32 %v873_v46, 0.0  ;;  %3319 = vmatmul.mubr.msk.f32.gmra.mxu1 %vm1050_vm3, %v1032_v38  ;;  %v884_v28 = vadd.f32 %v3231_v56, %v3801_v45  ;;  %5565 = vst [vmem:[#allocation26_spill] sm:$0xff] %v4122_v54  ;;  %v1037_v56 = vmul.f32 %v4122_v54, %v4122_v54 }
 0x152   : > { %v875_v58 = vpop.f32.mrf.mxu0  ;;  %3321 = vmatprep.mubr.msk.f32.mxu1 %vm1050_vm3, %v1033_v52 }
 0x153   : > { %5564 = vst [vmem:[#allocation25_spill] sm:$0xff] %v4112_v13  ;;  %v1035_v12 = vmul.f32 %v4112_v13, %v4112_v13  ;;  %v876_v14 = vadd.f32 %v3801_v45, %v875_v58  ;;  %v4128_v52 = vmax.f32 %v884_v28, 0.0 }
 0x154   : > { %v3234_v15 = vpop.f32.mrf.mxu0 }
 0x155   : > { %v4124_v46 = vmax.f32 %v876_v14, 0.0  ;;  %3322 = vmatmul.mubr.msk.f32.gmra.mxu1 %vm1050_vm3, %v1034_v5  ;;  %5567 = vst [vmem:[#allocation28_spill] sm:$0xff] %v4128_v52  ;;  %v897_v49 = vadd.f32 %v3234_v15, %v3801_v45 }
 0x156   : > { %v888_v38 = vpop.f32.mrf.mxu0  ;;  %3324 = vmatprep.mubr.msk.f32.mxu1 %vm1050_vm3, %v1035_v12  ;;  %v1038_v12 = vmul.f32 %v4128_v52, %v4128_v52 }
 0x157   : > { %5566 = vst [vmem:[#allocation27_spill] sm:$0xff] %v4124_v46  ;;  %v1036_v34 = vmul.f32 %v4124_v46, %v4124_v46  ;;  %v889_v13 = vadd.f32 %v3801_v45, %v888_v38  ;;  %v4146_v46 = vmax.f32 %v897_v49, 0.0 }
 0x158   : > { %v3235_v58 = vpop.f32.mrf.mxu0 }
 0x159   : > { %v4136_v14 = vmax.f32 %v889_v13, 0.0  ;;  %3325 = vmatmul.mubr.msk.f32.gmra.mxu1 %vm1050_vm3, %v1036_v34  ;;  %v900_v38 = vadd.f32 %v3235_v58, %v3801_v45  ;;  %5569 = vst [vmem:[#allocation30_spill] sm:$0xff] %v4146_v46  ;;  %v1041_v58 = vmul.f32 %v4146_v46, %v4146_v46 }
 0x15a   : > { %v891_v5 = vpop.f32.mrf.mxu0  ;;  %3327 = vmatprep.mubr.msk.f32.mxu1 %vm1050_vm3, %v1037_v56 }
 0x15b   : > { %5568 = vst [vmem:[#allocation29_spill] sm:$0xff] %v4136_v14  ;;  %v1039_v28 = vmul.f32 %v4136_v14, %v4136_v14  ;;  %v892_v54 = vadd.f32 %v3801_v45, %v891_v5  ;;  %v4152_v56 = vmax.f32 %v900_v38, 0.0 }
 0x15c   : > { %v3238_v15 = vpop.f32.mrf.mxu0 }
 0x15d   : > { %v4148_v13 = vmax.f32 %v892_v54, 0.0  ;;  %3328 = vmatmul.mubr.msk.f32.gmra.mxu1 %vm1050_vm3, %v1038_v12  ;;  %5571 = vst [vmem:[#allocation32_spill] sm:$0xff] %v4152_v56  ;;  %v913_v49 = vadd.f32 %v3238_v15, %v3801_v45 }
 0x15e   : > { %v904_v34 = vpop.f32.mrf.mxu0  ;;  %3330 = vmatprep.mubr.msk.f32.mxu1 %vm1050_vm3, %v1039_v28  ;;  %v1042_v28 = vmul.f32 %v4152_v56, %v4152_v56 }
 0x15f   : > { %5570 = vst [vmem:[#allocation31_spill] sm:$0xff] %v4148_v13  ;;  %v1040_v52 = vmul.f32 %v4148_v13, %v4148_v13  ;;  %v905_v14 = vadd.f32 %v3801_v45, %v904_v34  ;;  %v4170_v13 = vmax.f32 %v913_v49, 0.0 }
 0x160   : > { %v3239_v5 = vpop.f32.mrf.mxu0 }
 0x161   : > { %v4160_v54 = vmax.f32 %v905_v14, 0.0  ;;  %3331 = vmatmul.mubr.msk.f32.gmra.mxu1 %vm1050_vm3, %v1040_v52  ;;  %v916_v34 = vadd.f32 %v3239_v5, %v3801_v45  ;;  %5573 = vst [vmem:[#allocation34_spill] sm:$0xff] %v4170_v13 }
 0x162   : > { %v907_v12 = vpop.f32.mrf.mxu0  ;;  %3333 = vmatprep.mubr.msk.f32.mxu1 %vm1050_vm3, %v1041_v58  ;;  %v1045_v58 = vmul.f32 %v4170_v13, %v4170_v13 }
 0x163   : > { %5572 = vst [vmem:[#allocation33_spill] sm:$0xff] %v4160_v54  ;;  %v1043_v38 = vmul.f32 %v4160_v54, %v4160_v54  ;;  %v908_v46 = vadd.f32 %v3801_v45, %v907_v12  ;;  %v4176_v52 = vmax.f32 %v916_v34, 0.0 }
 0x165   : > { %v4172_v15 = vmax.f32 %v908_v46, 0.0  ;;  %3334 = vmatmul.mubr.msk.f32.gmra.mxu1 %vm1050_vm3, %v1042_v28  ;;  %5575 = vst [vmem:[#allocation36_spill] sm:$0xff] %v4176_v52  ;;  %v1046_v45 = vmul.f32 %v4176_v52, %v4176_v52 }
 0x166   : > { %3336 = vmatprep.mubr.msk.f32.mxu1 %vm1050_vm3, %v1043_v38 }
 0x167   : > { %5574 = vst [vmem:[#allocation35_spill] sm:$0xff] %v4172_v15  ;;  %v1044_v14 = vmul.f32 %v4172_v15, %v4172_v15 }
 0x169   : > { %3337 = vmatmul.mubr.msk.f32.gmra.mxu1 %vm1050_vm3, %v1044_v14 }
 0x16a   : > { %3339 = vmatprep.mubr.msk.f32.mxu1 %vm1050_vm3, %v1045_v58 }
 0x16d   : > { %3340 = vmatmul.mubr.msk.f32.gmra.mxu1 %vm1050_vm3, %v1046_v45 }
 0x1b1   : > { %v3248_v46 = vpop.f32.mrf.mxu1 }
 0x1b2   : > { %v1315_v49 = vadd.f32 1.0, %v3248_v46 }
 0x1b3   : > { %v1309_v5 = vpop.f32.mrf.mxu1 }
 0x1b4   : > { %3388 = vrsqrt.f32 %v1315_v49  ;;  %v1310_v12 = vadd.f32 1.0, %v1309_v5 }
 0x1b5   : > { %v3251_v28 = vpop.f32.mrf.mxu1 }
 0x1b6   : > { %3390 = vrsqrt.f32 %v1310_v12  ;;  %v1325_v38 = vadd.f32 1.0, %v3251_v28 }
 0x1b7   : > { %v1319_v34 = vpop.f32.mrf.mxu1 }
 0x1b8   : > { %3392 = vrsqrt.f32 %v1325_v38  ;;  %v1320_v13 = vadd.f32 1.0, %v1319_v34 }
 0x1b9   : > { %v3254_v54 = vpop.f32.mrf.mxu1 }
 0x1ba   : > { %3394 = vrsqrt.f32 %v1320_v13  ;;  %v1335_v14 = vadd.f32 1.0, %v3254_v54 }
 0x1bb   : > { %v1329_v58 = vpop.f32.mrf.mxu1 }
 0x1bc   : > { %3396 = vrsqrt.f32 %v1335_v14  ;;  %v1330_v15 = vadd.f32 1.0, %v1329_v58 }
 0x1bd   : > { %v3257_v52 = vpop.f32.mrf.mxu1 }
 0x1be   : > { %3398 = vrsqrt.f32 %v1330_v15  ;;  %v1345_v45 = vadd.f32 1.0, %v3257_v52 }
 0x1bf   : > { %v1339_v56 = vpop.f32.mrf.mxu1 }
 0x1c0   : > { %3400 = vrsqrt.f32 %v1345_v45  ;;  %v1340_v46 = vadd.f32 1.0, %v1339_v56 }
 0x1c1   : > { %v4187_v49 = vpop.eup %3388  ;;  %v3260_v5 = vpop.f32.mrf.mxu1 }
 0x1c2   : > { %3402 = vrsqrt.f32 %v4187_v49  ;;  %v1355_v28 = vadd.f32 1.0, %v3260_v5  ;;  %vm1701_vm4 = vcmp.eq.f32.partialorder %v4187_v49, inf  ;;  %vm1703_vm5 = vcmp.eq.f32.partialorder %v4187_v49, 0.0 }
 0x1c3   : > { %v4190_v12 = vpop.eup %3390  ;;  %3404 = vrsqrt.f32 %v1340_v46  ;;  %v1349_v13 = vpop.f32.mrf.mxu1 }
 0x1c4   : > { %3406 = vrsqrt.f32 %v4190_v12  ;;  %v1350_v15 = vadd.f32 1.0, %v1349_v13  ;;  %vm1694_vm6 = vcmp.eq.f32.partialorder %v4190_v12, inf  ;;  %vm1696_vm7 = vcmp.eq.f32.partialorder %v4190_v12, 0.0 }
 0x1c5   : > { %v4193_v54 = vpop.eup %3392  ;;  %3408 = vrsqrt.f32 %v1355_v28  ;;  %v3263_v52 = vpop.f32.mrf.mxu1 }
 0x1c6   : > { %3410 = vrsqrt.f32 %v4193_v54  ;;  %v1365_v38 = vadd.f32 1.0, %v3263_v52  ;;  %vm1715_vm8 = vcmp.eq.f32.partialorder %v4193_v54, inf  ;;  %vm1717_vm9 = vcmp.eq.f32.partialorder %v4193_v54, 0.0 }
 0x1c7   : > { %v4196_v56 = vpop.eup %3394  ;;  %3412 = vrsqrt.f32 %v1350_v15  ;;  %v1359_v34 = vpop.f32.mrf.mxu1  ;;  %v1718_v63 = vand.u32 2147483648, %v4193_v54 }
 0x1c8   : > { %3414 = vrsqrt.f32 %v4196_v56  ;;  %v1360_v58 = vadd.f32 1.0, %v1359_v34  ;;  %v1697_v34 = vand.u32 2147483648, %v4190_v12  ;;  %vm1708_vm10 = vcmp.eq.f32.partialorder %v4196_v56, inf }
 0x1c9   : > { %v4199_v14 = vpop.eup %3396  ;;  %3416 = vrsqrt.f32 %v1365_v38  ;;  %v3266_v45 = vpop.f32.mrf.mxu1  ;;  %v1704_v38 = vand.u32 2147483648, %v4187_v49  ;;  %vm1710_vm11 = vcmp.eq.f32.partialorder %v4196_v56, 0.0 }
 0x1ca   : > { %3418 = vrsqrt.f32 %v4199_v14  ;;  %v1375_v28 = vadd.f32 1.0, %v3266_v45  ;;  %vm1729_vm13 = vcmp.eq.f32.partialorder %v4199_v14, inf  ;;  %vm1731_vm14 = vcmp.eq.f32.partialorder %v4199_v14, 0.0 }
 0x1cb   : > { %v4202_v46 = vpop.eup %3398  ;;  %3420 = vrsqrt.f32 %v1360_v58  ;;  %v1369_v5 = vpop.f32.mrf.mxu1 }
 0x1cc   : > { %3422 = vrsqrt.f32 %v4202_v46  ;;  %v1370_v20 = vadd.f32 1.0, %v1369_v5  ;;  %v1711_v5 = vand.u32 2147483648, %v4196_v56  ;;  %vm1722_vm15 = vcmp.eq.f32.partialorder %v4202_v46, inf }
 0x1cd   : > { %v4205_v13 = vpop.eup %3400  ;;  %v3269_v15 = vpop.f32.mrf.mxu1  ;;  %vm1724_vm0 = vcmp.eq.f32.partialorder %v4202_v46, 0.0 }
 0x1ce   : > { %3424 = vrsqrt.f32 %v4205_v13  ;;  %vm1743_vm1 = vcmp.eq.f32.partialorder %v4205_v13, inf  ;;  %vm1745_vm2 = vcmp.eq.f32.partialorder %v4205_v13, 0.0 }
 0x1cf   : > { %v3403_v52 = vpop.eup %3402  ;;  %v4214_v58 = vpop.f32.mrf.mxu1  ;;  %3426 = vrsqrt.f32 %v1375_v28 }
 0x1d0   : > { %v4216_v45 = vpop.eup %3404  ;;  %v1700_v24 = vmul.f32 %v3403_v52, %v4187_v49 }
 0x1d1   : > { %v3407_v31 = vpop.eup %3406  ;;  %3428 = vrsqrt.f32 %v4216_v45  ;;  %v4224_v26 = vpop.f32.mrf.mxu1  ;;  %vm1736_vm3 = vcmp.eq.f32.partialorder %v4216_v45, inf }
 0x1d2   : > { %v4226_v36 = vpop.eup %3408  ;;  %v1702_v52 = vsel %vm1701_vm4, %v4187_v49, %v1700_v24  ;;  %v1693_v28 = vmul.f32 %v3407_v31, %v4190_v12  ;;  %vm1738_vm4 = vcmp.eq.f32.partialorder %v4216_v45, 0.0 }
 0x1d3   : > { %v3411_v47 = vpop.eup %3410  ;;  %v1705_v22 = vsel %vm1703_vm5, %v1704_v38, %v1702_v52  ;;  %3430 = vrsqrt.f32 %v4226_v36  ;;  %v4239_v61 = vpop.f32.mrf.mxu1  ;;  %v4253_v52 = vld [vmem:[%s5503_s4] ss:$0 sm:$0xff]  ;;  %vm1757_vm5 = vcmp.eq.f32.partialorder %v4226_v36, inf }
 0x1d4   : > { %v4241_v24 = vpop.eup %3412  ;;  %v2141_v31 = vmul.f32 %v4187_v49, %v1705_v22  ;;  %v1695_v10 = vsel %vm1694_vm6, %v4190_v12, %v1693_v28  ;;  %v1714_v48 = vmul.f32 %v3411_v47, %v4193_v54  ;;  %3432 = vrsqrt.f32 %v1370_v20 }
 0x1d5   : > { %v3415_v38 = vpop.eup %3414  ;;  %v1698_v22 = vsel %vm1696_vm7, %v1697_v34, %v1695_v10  ;;  %3434 = vrsqrt.f32 %v4241_v24  ;;  %v1385_v28 = vadd.f32 1.0, %v3269_v15  ;;  %v4259_v47 = vpop.f32.mrf.mxu1  ;;  %v4273_v15 = vld [vmem:[%s5504_s5] ss:$0 sm:$0xff]  ;;  %vm1759_vm6 = vcmp.eq.f32.partialorder %v4226_v36, 0.0 }
 0x1d6   : > { %v4261_v42 = vpop.eup %3416  ;;  %v2205_v20 = vmul.f32 %v2141_v31, %v3813_v57  ;;  %v2140_v3 = vmul.f32 %v4190_v12, %v1698_v22  ;;  %v1716_v29 = vsel %vm1715_vm8, %v4193_v54, %v1714_v48  ;;  %v1707_v35 = vmul.f32 %v3415_v38, %v4196_v56 }
 0x1d7   : > { %v3419_v10 = vpop.eup %3418  ;;  %v1719_v34 = vsel %vm1717_vm9, %v1718_v63, %v1716_v29  ;;  %v1746_v57 = vand.u32 2147483648, %v4205_v13  ;;  %3436 = vrsqrt.f32 %v4261_v42  ;;  %v4280_v48 = vpop.f32.mrf.mxu1  ;;  %vm1750_vm7 = vcmp.eq.f32.partialorder %v4241_v24, inf }
 0x1d8   : > { %v4282_v12 = vpop.eup %3420  ;;  %v2276_v31 = vmul.f32 %v4253_v52, %v2205_v20  ;;  %v2204_v38 = vmul.f32 %v2140_v3, %v3805_v50  ;;  %v2143_v22 = vmul.f32 %v4193_v54, %v1719_v34  ;;  %v1709_v29 = vsel %vm1708_vm10, %v4196_v56, %v1707_v35 }
 0x1d9   : > { %v3423_v63 = vpop.eup %3422  ;;  %v1712_v49 = vsel %vm1710_vm11, %v1711_v5, %v1709_v29  ;;  %v1728_v18 = vmul.f32 %v3419_v10, %v4199_v14  ;;  %v1739_v20 = vand.u32 2147483648, %v4216_v45  ;;  %3438 = vrsqrt.f32 %v1385_v28  ;;  %v4296_v50 = vpop.f32.mrf.mxu1 }
 0x1da   : > { %v2347_v3 = vadd.f32 %v4273_v15, %v2276_v31  ;;  %v2275_v35 = vmul.f32 %v4253_v52, %v2204_v38  ;;  %v2207_v54 = vmul.f32 %v2143_v22, %v3816_v59  ;;  %v2142_v34 = vmul.f32 %v4196_v56, %v1712_v49 }
 0x1db   : > { %v3425_v5 = vpop.eup %3424  ;;  %v1730_v28 = vsel %vm1729_vm13, %v4199_v14, %v1728_v18  ;;  %v1721_v10 = vmul.f32 %v3423_v63, %v4202_v46  ;;  %v1760_v59 = vand.u32 2147483648, %v4226_v36  ;;  %3440 = vrsqrt.f32 %v4282_v12  ;;  %v4317_v56 = vpop.f32.mrf.mxu1 }
 0x1dc   : > { %v2999_v49 = vpack.c.bf16 %v2347_v3, %v2347_v3  ;;  %v2346_v31 = vadd.f32 %v4273_v15, %v2275_v35  ;;  %v2278_v38 = vmul.f32 %v4253_v52, %v2207_v54  ;;  %v2206_v22 = vmul.f32 %v2142_v34, %v3811_v55  ;;  %v4324_v18 = vpop.eup %3426 }
 0x1dd   : > { %v5576_v29 = vand.u32 2147483648, %v4199_v14  ;;  %v1723_v3 = vsel %vm1722_vm15, %v4202_v46, %v1721_v10  ;;  %v1742_v35 = vmul.f32 %v3425_v5, %v4205_v13  ;;  %v1753_v55 = vand.u32 2147483648, %v4241_v24  ;;  %v4335_v54 = vpop.f32.mrf.mxu1 }
 0x1de   : > { %v3429_v34 = vpop.eup %3428  ;;  %2668 = vst.msk [vmem:[%s4309_s7 + $0x4] sm:$0xf] %vm2666_vm12, %v2999_v49  ;;  %v2998_v32 = vpack.c.bf16 %v2346_v31, %v2346_v31  ;;  %v2349_v2 = vadd.f32 %v4273_v15, %v2278_v38  ;;  %v2277_v6 = vmul.f32 %v4253_v52, %v2206_v22  ;;  %vm1752_vm8 = vcmp.eq.f32.partialorder %v4241_v24, 0.0 }
 0x1df   : > { %v1733_v63 = vsel %vm1731_vm14, %v5576_v29, %v1730_v28  ;;  %v5577_v10 = vand.u32 2147483648, %v4202_v46  ;;  %v1744_v29 = vsel %vm1743_vm1, %v4205_v13, %v1742_v35  ;;  %v1735_v49 = vmul.f32 %v3429_v34, %v4216_v45  ;;  %v4352_v31 = vpop.f32.mrf.mxu1 }
 0x1e0   : > { %v2145_v28 = vmul.f32 %v4199_v14, %v1733_v63  ;;  %vm1771_vm9 = vcmp.eq.f32.partialorder %v4261_v42, inf  ;;  %v3431_v38 = vpop.eup %3430  ;;  %2667 = vst.msk [vmem:[%s4309_s7] sm:$0xf] %vm2666_vm12, %v2998_v32  ;;  %v3001_v14 = vpack.c.bf16 %v2349_v2, %v2349_v2  ;;  %v2348_v22 = vadd.f32 %v4273_v15, %v2277_v6 }
 0x1e1   : > { %v1726_v5 = vsel %vm1724_vm0, %v5577_v10, %v1723_v3  ;;  %vm1773_vm10 = vcmp.eq.f32.partialorder %v4261_v42, 0.0  ;;  %v4360_v35 = vpop.eup %3432  ;;  %v1747_v34 = vsel %vm1745_vm2, %v1746_v57, %v1744_v29  ;;  %v1737_v10 = vsel %vm1736_vm3, %v4216_v45, %v1735_v49  ;;  %v4369_v6 = vpop.f32.mrf.mxu1 }
 0x1e2   : > { %v2209_v63 = vmul.f32 %v2145_v28, %v3836_v9  ;;  %v2144_v3 = vmul.f32 %v4202_v46, %v1726_v5  ;;  %v1756_v2 = vmul.f32 %v3431_v38, %v4226_v36  ;;  %3442 = vrsqrt.f32 %v4324_v18  ;;  %v3435_v9 = vpop.eup %3434  ;;  %2670 = vst.msk [vmem:[%s4309_s7 + $0xc] sm:$0xf] %vm2666_vm12, %v3001_v14 }
 0x1e3   : > { %v3000_v32 = vpack.c.bf16 %v2348_v22, %v2348_v22  ;;  %v2147_v57 = vmul.f32 %v4205_v13, %v1747_v34  ;;  %v1740_v5 = vsel %vm1738_vm4, %v1739_v20, %v1737_v10  ;;  %v1749_v49 = vmul.f32 %v3435_v9, %v4241_v24  ;;  %v4383_v53 = vpop.f32.mrf.mxu1 }
 0x1e4   : > { %v2280_v46 = vmul.f32 %v4253_v52, %v2209_v63  ;;  %v2208_v28 = vmul.f32 %v2144_v3, %v3824_v1  ;;  %v1758_v29 = vsel %vm1757_vm5, %v4226_v36, %v1756_v2  ;;  %v1774_v38 = vand.u32 2147483648, %v4261_v42  ;;  %v3437_v14 = vpop.eup %3436 }
 0x1e5   : > { %2669 = vst.msk [vmem:[%s4309_s7 + $0x8] sm:$0xf] %vm2666_vm12, %v3000_v32  ;;  %v2211_v22 = vmul.f32 %v2147_v57, %v3840_v11  ;;  %v2146_v20 = vmul.f32 %v4216_v45, %v1740_v5  ;;  %v1761_v63 = vsel %vm1759_vm6, %v1760_v59, %v1758_v29  ;;  %v1751_v3 = vsel %vm1750_vm7, %v4241_v24, %v1749_v49  ;;  %v4403_v32 = vpop.f32.mrf.mxu1 }
 0x1e6   : > { %v2351_v1 = vadd.f32 %v4273_v15, %v2280_v46  ;;  %v2279_v13 = vmul.f32 %v4253_v52, %v2208_v28  ;;  %v1770_v34 = vmul.f32 %v3437_v14, %v4261_v42  ;;  %vm1764_vm11 = vcmp.eq.f32.partialorder %v4282_v12, inf  ;;  %v4398_v10 = vpop.eup %3438 }
 0x1e7   : > { %v2282_v11 = vmul.f32 %v4253_v52, %v2211_v22  ;;  %v2210_v45 = vmul.f32 %v2146_v20, %v3834_v7  ;;  %v2149_v59 = vmul.f32 %v4226_v36, %v1761_v63  ;;  %v1754_v46 = vsel %vm1752_vm8, %v1753_v55, %v1751_v3 }
 0x1e8   : > { %v3003_v2 = vpack.c.bf16 %v2351_v1, %v2351_v1  ;;  %v2350_v9 = vadd.f32 %v4273_v15, %v2279_v13  ;;  %v1772_v28 = vsel %vm1771_vm9, %v4261_v42, %v1770_v34  ;;  %v1767_v57 = vand.u32 2147483648, %v4282_v12  ;;  %v3441_v5 = vpop.eup %3440 }
 0x1e9   : > { %v2353_v7 = vadd.f32 %v4273_v15, %v2282_v11  ;;  %v2281_v49 = vmul.f32 %v4253_v52, %v2210_v45  ;;  %v2148_v36 = vmul.f32 %v4241_v24, %v1754_v46  ;;  %v2213_v14 = vmul.f32 %v2149_v59, %v3860_v25  ;;  %v4427_v24 = vpop.f32.mrf.mxu1 }
 0x1ea   : > { %2672 = vst.msk [vmem:[%s4309_s7 + $0x14] sm:$0xf] %vm2666_vm12, %v3003_v2  ;;  %v3002_v29 = vpack.c.bf16 %v2350_v9, %v2350_v9  ;;  %v1775_v55 = vsel %vm1773_vm10, %v1774_v38, %v1772_v28  ;;  %v1763_v1 = vmul.f32 %v3441_v5, %v4282_v12  ;;  %3444 = vrsqrt.f32 %v4360_v35 }
 0x1eb   : > { %v3005_v13 = vpack.c.bf16 %v2353_v7, %v2353_v7  ;;  %v2352_v22 = vadd.f32 %v4273_v15, %v2281_v49  ;;  %v2212_v20 = vmul.f32 %v2148_v36, %v3848_v17  ;;  %v2151_v63 = vmul.f32 %v4261_v42, %v1775_v55 }
 0x1ec   : > { %2671 = vst.msk [vmem:[%s4309_s7 + $0x10] sm:$0xf] %vm2666_vm12, %v3002_v29  ;;  %v2284_v25 = vmul.f32 %v4253_v52, %v2213_v14  ;;  %v1765_v38 = vsel %vm1764_vm11, %v4282_v12, %v1763_v1  ;;  %vm1766_vm13 = vcmp.eq.f32.partialorder %v4282_v12, 0.0  ;;  %v1380_v3 = vadd.f32 1.0, %v4214_v58 }
 0x1ed   : > { %2674 = vst.msk [vmem:[%s4309_s7 + $0x1c] sm:$0xf] %vm2666_vm12, %v3005_v13  ;;  %v3004_v34 = vpack.c.bf16 %v2352_v22, %v2352_v22  ;;  %v2283_v17 = vmul.f32 %v4253_v52, %v2212_v20  ;;  %v2215_v42 = vmul.f32 %v2151_v63, %v3864_v27  ;;  %v1768_v2 = vsel %vm1766_vm13, %v1767_v57, %v1765_v38  ;;  %v3290_v27 = vpop.f32.mrf.mxu1 }
 0x1ee   : > { %v2355_v9 = vadd.f32 %v4273_v15, %v2284_v25  ;;  %v2150_v11 = vmul.f32 %v4282_v12, %v1768_v2  ;;  %3446 = vrsqrt.f32 %v4398_v10  ;;  %v1395_v45 = vadd.f32 1.0, %v4224_v26 }
 0x1ef   : > { %v3443_v59 = vpop.eup %3442  ;;  %2673 = vst.msk [vmem:[%s4309_s7 + $0x18] sm:$0xf] %vm2666_vm12, %v3004_v34  ;;  %v2354_v58 = vadd.f32 %v4273_v15, %v2283_v17  ;;  %v2286_v46 = vmul.f32 %v4253_v52, %v2215_v42  ;;  %vm1785_vm14 = vcmp.eq.f32.partialorder %v4324_v18, inf  ;;  %vm1787_vm15 = vcmp.eq.f32.partialorder %v4324_v18, 0.0 }
 0x1f0   : > { %v3007_v28 = vpack.c.bf16 %v2355_v9, %v2355_v9  ;;  %v2214_v12 = vmul.f32 %v2150_v11, %v3858_v23  ;;  %v1784_v57 = vmul.f32 %v3443_v59, %v4324_v18  ;;  %v1788_v26 = vand.u32 2147483648, %v4324_v18 }
 0x1f1   : > { %v3006_v5 = vpack.c.bf16 %v2354_v58, %v2354_v58  ;;  %v2357_v29 = vadd.f32 %v4273_v15, %v2286_v46  ;;  %3448 = vrsqrt.f32 %v1380_v3  ;;  %v1390_v7 = vadd.f32 1.0, %v4239_v61  ;;  %v4464_v61 = vpop.f32.mrf.mxu1 }
 0x1f2   : > { %2676 = vst.msk [vmem:[%s4309_s7 + $0x24] sm:$0xf] %vm2666_vm12, %v3007_v28  ;;  %v2285_v49 = vmul.f32 %v4253_v52, %v2214_v12  ;;  %v1786_v36 = vsel %vm1785_vm14, %v4324_v18, %v1784_v57  ;;  %3450 = vrsqrt.f32 %v1395_v45  ;;  %v1405_v23 = vadd.f32 1.0, %v4259_v47 }
 0x1f3   : > { %2675 = vst.msk [vmem:[%s4309_s7 + $0x20] sm:$0xf] %vm2666_vm12, %v3006_v5  ;;  %v3009_v14 = vpack.c.bf16 %v2357_v29, %v2357_v29  ;;  %v1789_v55 = vsel %vm1787_vm15, %v1788_v26, %v1786_v36  ;;  %3452 = vrsqrt.f32 %v1390_v7  ;;  %v1400_v1 = vadd.f32 1.0, %v4280_v48  ;;  %v3293_v34 = vpop.f32.mrf.mxu1 }
 0x1f4   : > { %v2356_v13 = vadd.f32 %v4273_v15, %v2285_v49  ;;  %v2153_v22 = vmul.f32 %v4324_v18, %v1789_v55  ;;  %3454 = vrsqrt.f32 %v1405_v23  ;;  %v1415_v20 = vadd.f32 1.0, %v4296_v50 }
 0x1f5   : > { %2678 = vst.msk [vmem:[%s4309_s7 + $0x2c] sm:$0xf] %vm2666_vm12, %v3009_v14  ;;  %3456 = vrsqrt.f32 %v1400_v1  ;;  %v1410_v47 = vadd.f32 1.0, %v4317_v56  ;;  %v1425_v63 = vadd.f32 1.0, %v4335_v54  ;;  %v1420_v25 = vadd.f32 1.0, %v4352_v31  ;;  %v1459_v11 = vpop.f32.mrf.mxu1 }
 0x1f6   : > { %v3008_v48 = vpack.c.bf16 %v2356_v13, %v2356_v13  ;;  %v2217_v38 = vmul.f32 %v2153_v22, %v3884_v41  ;;  %3458 = vrsqrt.f32 %v1415_v20  ;;  %v1435_v3 = vadd.f32 1.0, %v4369_v6 }
 0x1f7   : > { %v3445_v18 = vpop.eup %3444  ;;  %vm1778_vm0 = vcmp.eq.f32.partialorder %v4360_v35, inf  ;;  %3460 = vrsqrt.f32 %v1410_v47  ;;  %v1430_v50 = vadd.f32 1.0, %v4383_v53  ;;  %v1445_v31 = vadd.f32 1.0, %v4403_v32  ;;  %v4502_v12 = vpop.f32.mrf.mxu1 }
 0x1f8   : > { %2677 = vst.msk [vmem:[%s4309_s7 + $0x28] sm:$0xf] %vm2666_vm12, %v3008_v48  ;;  %v2288_v56 = vmul.f32 %v4253_v52, %v2217_v38  ;;  %v1777_v54 = vmul.f32 %v3445_v18, %v4360_v35  ;;  %3462 = vrsqrt.f32 %v1425_v63  ;;  %vm1780_vm1 = vcmp.eq.f32.partialorder %v4360_v35, 0.0 }
 0x1f9   : > { %v1781_v41 = vand.u32 2147483648, %v4360_v35  ;;  %3464 = vrsqrt.f32 %v1420_v25  ;;  %v1440_v6 = vadd.f32 1.0, %v4427_v24  ;;  %v1455_v42 = vadd.f32 1.0, %v3290_v27  ;;  %v4519_v23 = vpop.f32.mrf.mxu1 }
 0x1fa   : > { %v2359_v17 = vadd.f32 %v4273_v15, %v2288_v56  ;;  %v1779_v53 = vsel %vm1778_vm0, %v4360_v35, %v1777_v54  ;;  %3466 = vrsqrt.f32 %v1435_v3  ;;  %vm1799_vm2 = vcmp.eq.f32.partialorder %v4398_v10, inf }
 0x1fb   : > { %v3447_v2 = vpop.eup %3446  ;;  %v1782_v9 = vsel %vm1780_vm1, %v1781_v41, %v1779_v53  ;;  %3468 = vrsqrt.f32 %v1430_v50  ;;  %v1802_v24 = vand.u32 2147483648, %v4398_v10  ;;  %vm1801_vm3 = vcmp.eq.f32.partialorder %v4398_v10, 0.0  ;;  %v4542_v25 = vpop.f32.mrf.mxu1 }
 0x1fc   : > { %v3011_v45 = vpack.c.bf16 %v2359_v17, %v2359_v17  ;;  %v2152_v32 = vmul.f32 %v4360_v35, %v1782_v9  ;;  %v1798_v59 = vmul.f32 %v3447_v2, %v4398_v10  ;;  %3470 = vrsqrt.f32 %v1445_v31 }
 0x1fd   : > { %3472 = vrsqrt.f32 %v1440_v6  ;;  %v1450_v22 = vadd.f32 1.0, %v4464_v61  ;;  %v4538_v47 = vadd.f32 1.0, %v3293_v34  ;;  %v4540_v63 = vadd.f32 1.0, %v1459_v11  ;;  %v4570_v41 = vpop.f32.mrf.mxu1 }
 0x1fe   : > { %v4492_v58 = vpop.eup %3448  ;;  %2680 = vst.msk [vmem:[%s4309_s7 + $0x34] sm:$0xf] %vm2666_vm12, %v3011_v45  ;;  %v2216_v46 = vmul.f32 %v2152_v32, %v3872_v33  ;;  %v1800_v27 = vsel %vm1799_vm2, %v4398_v10, %v1798_v59  ;;  %3474 = vrsqrt.f32 %v1455_v42 }
 0x1ff   : > { %v4499_v35 = vpop.eup %3450  ;;  %v1803_v28 = vsel %vm1801_vm3, %v1802_v24, %v1800_v27  ;;  %3476 = vrsqrt.f32 %v4492_v58  ;;  %vm1792_vm4 = vcmp.eq.f32.partialorder %v4492_v58, inf  ;;  %vm1794_vm5 = vcmp.eq.f32.partialorder %v4492_v58, 0.0 }
 0x200   : > { %v4504_v57 = vpop.eup %3452  ;;  %v2287_v26 = vmul.f32 %v4253_v52, %v2216_v46  ;;  %v2155_v5 = vmul.f32 %v4398_v10, %v1803_v28  ;;  %3478 = vrsqrt.f32 %v4499_v35  ;;  %v1795_v61 = vand.u32 2147483648, %v4492_v58 }
 0x201   : > { %v4509_v33 = vpop.eup %3454  ;;  %3480 = vrsqrt.f32 %v4504_v57  ;;  %vm1813_vm6 = vcmp.eq.f32.partialorder %v4499_v35, inf  ;;  %vm1815_vm7 = vcmp.eq.f32.partialorder %v4499_v35, 0.0  ;;  %v1816_v18 = vand.u32 2147483648, %v4499_v35 }
 0x202   : > { %v4512_v29 = vpop.eup %3456  ;;  %v2358_v7 = vadd.f32 %v4273_v15, %v2287_v26  ;;  %v2219_v49 = vmul.f32 %v2155_v5, %v3888_v43  ;;  %3482 = vrsqrt.f32 %v4509_v33  ;;  %vm1806_vm8 = vcmp.eq.f32.partialorder %v4504_v57, inf  ;;  %v4594_v5 = vpop.f32.mrf.mxu1 }
 0x203   : > { %v4516_v36 = vpop.eup %3458  ;;  %3484 = vrsqrt.f32 %v4512_v29  ;;  %vm1808_vm9 = vcmp.eq.f32.partialorder %v4504_v57, 0.0  ;;  %v1809_v34 = vand.u32 2147483648, %v4504_v57  ;;  %vm1827_vm10 = vcmp.eq.f32.partialorder %v4509_v33, inf }
 0x204   : > { %v4521_v10 = vpop.eup %3460  ;;  %v3010_v14 = vpack.c.bf16 %v2358_v7, %v2358_v7  ;;  %v2290_v55 = vmul.f32 %v4253_v52, %v2219_v49  ;;  %3486 = vrsqrt.f32 %v4516_v36  ;;  %vm1829_vm11 = vcmp.eq.f32.partialorder %v4509_v33, 0.0 }
 0x205   : > { %v4525_v1 = vpop.eup %3462  ;;  %3488 = vrsqrt.f32 %v4521_v10  ;;  %v1830_v54 = vand.u32 2147483648, %v4509_v33  ;;  %vm1820_vm13 = vcmp.eq.f32.partialorder %v4512_v29, inf  ;;  %v1823_v31 = vand.u32 2147483648, %v4512_v29 }
 0x206   : > { %v4528_v13 = vpop.eup %3464  ;;  %2679 = vst.msk [vmem:[%s4309_s7 + $0x30] sm:$0xf] %vm2666_vm12, %v3010_v14  ;;  %v2361_v43 = vadd.f32 %v4273_v15, %v2290_v55  ;;  %3490 = vrsqrt.f32 %v4525_v1  ;;  %vm1822_vm14 = vcmp.eq.f32.partialorder %v4512_v29, 0.0  ;;  %v1844_v17 = vand.u32 2147483648, %v4516_v36 }
 0x207   : > { %v4534_v20 = vpop.eup %3466  ;;  %3492 = vrsqrt.f32 %v4528_v13  ;;  %v1837_v53 = vand.u32 2147483648, %v4521_v10  ;;  %v1858_v42 = vand.u32 2147483648, %v4525_v1  ;;  %vm1841_vm15 = vcmp.eq.f32.partialorder %v4516_v36, inf }
 0x208   : > { %v4544_v48 = vpop.eup %3468  ;;  %v3013_v38 = vpack.c.bf16 %v2361_v43, %v2361_v43  ;;  %3494 = vrsqrt.f32 %v4534_v20  ;;  %v1851_v11 = vand.u32 2147483648, %v4528_v13  ;;  %v1872_v45 = vand.u32 2147483648, %v4534_v20 }
 0x209   : > { %v4549_v3 = vpop.eup %3470  ;;  %3496 = vrsqrt.f32 %v4544_v48  ;;  %vm1843_vm0 = vcmp.eq.f32.partialorder %v4516_v36, 0.0  ;;  %v1865_v24 = vand.u32 2147483648, %v4544_v48  ;;  %vm1834_vm1 = vcmp.eq.f32.partialorder %v4521_v10, inf }
 0x20a   : > { %v4555_v50 = vpop.eup %3472  ;;  %2682 = vst.msk [vmem:[%s4309_s7 + $0x3c] sm:$0xf] %vm2666_vm12, %v3013_v38  ;;  %3498 = vrsqrt.f32 %v4549_v3  ;;  %v1886_v46 = vand.u32 2147483648, %v4549_v3  ;;  %vm1836_vm2 = vcmp.eq.f32.partialorder %v4521_v10, 0.0  ;;  %vm1855_vm3 = vcmp.eq.f32.partialorder %v4525_v1, inf }
 0x20b   : > { %v4563_v56 = vpop.eup %3474  ;;  %3500 = vrsqrt.f32 %v4555_v50  ;;  %v1879_v26 = vand.u32 2147483648, %v4555_v50 }
 0x20c   : > { %v3477_v6 = vpop.eup %3476  ;;  %3502 = vrsqrt.f32 %v4563_v56  ;;  %v1900_v55 = vand.u32 2147483648, %v4563_v56 }
 0x20d   : > { %v3479_v2 = vpop.eup %3478  ;;  %v1791_v9 = vmul.f32 %v3477_v6, %v4492_v58  ;;  %3504 = vrsqrt.f32 %v1450_v22 }
 0x20e   : > { %v3481_v32 = vpop.eup %3480  ;;  %v1812_v59 = vmul.f32 %v3479_v2, %v4499_v35  ;;  %3506 = vrsqrt.f32 %v4538_v47 }
 0x20f   : > { %v1793_v27 = vsel %vm1792_vm4, %v4492_v58, %v1791_v9  ;;  %v1805_v28 = vmul.f32 %v3481_v32, %v4504_v57  ;;  %v3483_v7 = vpop.eup %3482  ;;  %vm1848_vm4 = vcmp.eq.f32.partialorder %v4528_v13, inf  ;;  %3508 = vrsqrt.f32 %v4540_v63 }
 0x210   : > { %v1796_v49 = vsel %vm1794_vm5, %v1795_v61, %v1793_v27  ;;  %v1814_v14 = vsel %vm1813_vm6, %v4499_v35, %v1812_v59  ;;  %v3485_v43 = vpop.eup %3484  ;;  %v1826_v61 = vmul.f32 %v3483_v7, %v4509_v33  ;;  %v4621_v7 = vpop.f32.mrf.mxu1  ;;  %vm1857_vm5 = vcmp.eq.f32.partialorder %v4525_v1, 0.0 }
 0x211   : > { %v2154_v38 = vmul.f32 %v4492_v58, %v1796_v49  ;;  %v1817_v6 = vsel %vm1815_vm7, %v1816_v18, %v1814_v14  ;;  %v1807_v2 = vsel %vm1806_vm8, %v4504_v57, %v1805_v28  ;;  %v3487_v9 = vpop.eup %3486  ;;  %v1819_v22 = vmul.f32 %v3485_v43, %v4512_v29 }
 0x212   : > { %v2157_v32 = vmul.f32 %v4499_v35, %v1817_v6  ;;  %v1810_v59 = vsel %vm1808_vm9, %v1809_v34, %v1807_v2  ;;  %v1828_v27 = vsel %vm1827_vm10, %v4509_v33, %v1826_v61  ;;  %v1840_v28 = vmul.f32 %v3487_v9, %v4516_v36  ;;  %v3489_v35 = vpop.eup %3488  ;;  %v4655_v61 = vpop.f32.mrf.mxu1 }
 0x213   : > { %v2218_v58 = vmul.f32 %v2154_v38, %v3882_v39  ;;  %v2156_v18 = vmul.f32 %v4504_v57, %v1810_v59  ;;  %v1831_v34 = vsel %vm1829_vm11, %v1830_v54, %v1828_v27  ;;  %v1821_v39 = vsel %vm1820_vm13, %v4512_v29, %v1819_v22  ;;  %v3491_v54 = vpop.eup %3490 }
 0x214   : > { %v2221_v49 = vmul.f32 %v2157_v32, %v3908_v62  ;;  %v2159_v14 = vmul.f32 %v4509_v33, %v1831_v34  ;;  %v1824_v62 = vsel %vm1822_vm14, %v1823_v31, %v1821_v39  ;;  %v1842_v63 = vsel %vm1841_vm15, %v4516_v36, %v1840_v28 }
 0x215   : > { %v2289_v57 = vmul.f32 %v4253_v52, %v2218_v58  ;;  %v2220_v47 = vmul.f32 %v2156_v18, %v3896_v51  ;;  %v2158_v38 = vmul.f32 %v4512_v29, %v1824_v62  ;;  %v1833_v6 = vmul.f32 %v3489_v35, %v4521_v10  ;;  %v3493_v51 = vpop.eup %3492 }
 0x216   : > { %v2292_v43 = vmul.f32 %v4253_v52, %v2221_v49  ;;  %vm1850_vm6 = vcmp.eq.f32.partialorder %v4528_v13, 0.0  ;;  %vm1869_vm7 = vcmp.eq.f32.partialorder %v4534_v20, inf  ;;  %vm1862_vm8 = vcmp.eq.f32.partialorder %v4544_v48, inf  ;;  %v3495_v9 = vpop.eup %3494 }
 0x217   : > { %v2360_v33 = vadd.f32 %v4273_v15, %v2289_v57  ;;  %v2291_v31 = vmul.f32 %v4253_v52, %v2220_v47  ;;  %v2223_v2 = vmul.f32 %v2159_v14, %v3912_v0  ;;  %v1845_v29 = vsel %vm1843_vm0, %v1844_v17, %v1842_v63  ;;  %v3497_v58 = vpop.eup %3496 }
 0x218   : > { %vm1871_vm9 = vcmp.eq.f32.partialorder %v4534_v20, 0.0  ;;  %v2363_v32 = vadd.f32 %v4273_v15, %v2292_v43  ;;  %v2222_v59 = vmul.f32 %v2158_v38, %v3906_v60  ;;  %v2161_v22 = vmul.f32 %v4516_v36, %v1845_v29  ;;  %v3499_v28 = vpop.eup %3498 }
 0x219   : > { %v1835_v0 = vsel %vm1834_vm1, %v4521_v10, %v1833_v6  ;;  %vm1864_vm10 = vcmp.eq.f32.partialorder %v4544_v48, 0.0  ;;  %v3012_v17 = vpack.c.bf16 %v2360_v33, %v2360_v33  ;;  %v2362_v18 = vadd.f32 %v4273_v15, %v2291_v31  ;;  %v3501_v39 = vpop.eup %3500 }
 0x21a   : > { %v2294_v27 = vmul.f32 %v4253_v52, %v2223_v2  ;;  %v1838_v60 = vsel %vm1836_vm2, %v1837_v53, %v1835_v0  ;;  %v3015_v36 = vpack.c.bf16 %v2363_v32, %v2363_v32  ;;  %v2293_v35 = vmul.f32 %v4253_v52, %v2222_v59 }
 0x21b   : > { %v2225_v49 = vmul.f32 %v2161_v22, %v3932_v19  ;;  %v2160_v34 = vmul.f32 %v4521_v10, %v1838_v60  ;;  %vm1883_vm11 = vcmp.eq.f32.partialorder %v4549_v3, inf  ;;  %2681 = vst.msk [vmem:[%s4309_s7 + $0x38] sm:$0xf] %vm2666_vm12, %v3012_v17  ;;  %v3014_v57 = vpack.c.bf16 %v2362_v18, %v2362_v18  ;;  %v4681_v19 = vpop.f32.mrf.mxu1  ;;  %v3503_v10 = vpop.eup %3502 }
 0x21c   : > { %v2365_v47 = vadd.f32 %v4273_v15, %v2294_v27  ;;  %v1854_v53 = vmul.f32 %v3491_v54, %v4525_v1  ;;  %v1847_v14 = vmul.f32 %v3493_v51, %v4528_v13  ;;  %vm1885_vm13 = vcmp.eq.f32.partialorder %v4549_v3, 0.0  ;;  %2684 = vst.msk [vmem:[%s4309_s7 + $0x44] sm:$0xf] %vm2666_vm12, %v3015_v36  ;;  %v4690_v63 = vpop.eup %3504 }
 0x21d   : > { %vm1876_vm14 = vcmp.eq.f32.partialorder %v4555_v50, inf  ;;  %v2364_v62 = vadd.f32 %v4273_v15, %v2293_v35  ;;  %v2296_v43 = vmul.f32 %v4253_v52, %v2225_v49  ;;  %v2224_v38 = vmul.f32 %v2160_v34, %v3920_v8  ;;  %2683 = vst.msk [vmem:[%s4309_s7 + $0x40] sm:$0xf] %vm2666_vm12, %v3014_v57  ;;  %v4709_v32 = vpop.eup %3506 }
 0x21e   : > { %v1868_v54 = vmul.f32 %v3495_v9, %v4534_v20  ;;  %vm1878_vm15 = vcmp.eq.f32.partialorder %v4555_v50, 0.0  ;;  %v3017_v6 = vpack.c.bf16 %v2365_v47, %v2365_v47  ;;  %v1856_v51 = vsel %vm1855_vm3, %v4525_v1, %v1854_v53  ;;  %v4734_v27 = vpop.eup %3508 }
 0x21f   : > { %v1849_v33 = vsel %vm1848_vm4, %v4528_v13, %v1847_v14  ;;  %v1861_v8 = vmul.f32 %v3497_v58, %v4544_v48  ;;  %vm1897_vm0 = vcmp.eq.f32.partialorder %v4563_v56, inf  ;;  %v3016_v31 = vpack.c.bf16 %v2364_v62, %v2364_v62  ;;  %v4724_v58 = vpop.f32.mrf.mxu1 }
 0x220   : > { %v2367_v2 = vadd.f32 %v4273_v15, %v2296_v43  ;;  %v2295_v29 = vmul.f32 %v4253_v52, %v2224_v38  ;;  %v1859_v9 = vsel %vm1857_vm5, %v1858_v42, %v1856_v51  ;;  %vm1899_vm1 = vcmp.eq.f32.partialorder %v4563_v56, 0.0  ;;  %2686 = vst.msk [vmem:[%s4309_s7 + $0x4c] sm:$0xf] %vm2666_vm12, %v3017_v6 }
 0x221   : > { %v2163_v59 = vmul.f32 %v4525_v1, %v1859_v9  ;;  %v1852_v22 = vsel %vm1850_vm6, %v1851_v11, %v1849_v33  ;;  %v1870_v0 = vsel %vm1869_vm7, %v4534_v20, %v1868_v54  ;;  %v1863_v42 = vsel %vm1862_vm8, %v4544_v48, %v1861_v8  ;;  %2685 = vst.msk [vmem:[%s4309_s7 + $0x48] sm:$0xf] %vm2666_vm12, %v3016_v31 }
 0x222   : > { %v3019_v17 = vpack.c.bf16 %v2367_v2, %v2367_v2  ;;  %v2366_v1 = vadd.f32 %v4273_v15, %v2295_v29  ;;  %v2162_v18 = vmul.f32 %v4528_v13, %v1852_v22  ;;  %v1873_v11 = vsel %vm1871_vm9, %v1872_v45, %v1870_v0 }
 0x223   : > { %v2227_v60 = vmul.f32 %v2163_v59, %v3936_v21  ;;  %v2165_v36 = vmul.f32 %v4534_v20, %v1873_v11  ;;  %v1866_v35 = vsel %vm1864_vm10, %v1865_v24, %v1863_v42  ;;  %v1882_v49 = vmul.f32 %v3499_v28, %v4549_v3  ;;  %v1509_v28 = vpop.f32.mrf.mxu1 }
 0x224   : > { %2688 = vst.msk [vmem:[%s4309_s7 + $0x54] sm:$0xf] %vm2666_vm12, %v3019_v17  ;;  %v3018_v13 = vpack.c.bf16 %v2366_v1, %v2366_v1  ;;  %v2226_v34 = vmul.f32 %v2162_v18, %v3930_v16  ;;  %v2164_v45 = vmul.f32 %v4544_v48, %v1866_v35  ;;  %v1875_v57 = vmul.f32 %v3501_v39, %v4555_v50 }
 0x225   : > { %v2298_v21 = vmul.f32 %v4253_v52, %v2227_v60  ;;  %v2229_v20 = vmul.f32 %v2165_v36, %v3956_v40  ;;  %v1884_v47 = vsel %vm1883_vm11, %v4549_v3, %v1882_v49  ;;  %v1896_v24 = vmul.f32 %v3503_v10, %v4563_v56  ;;  %v3311_v51 = vpop.f32.mrf.mxu1 }
 0x226   : > { %2687 = vst.msk [vmem:[%s4309_s7 + $0x50] sm:$0xf] %vm2666_vm12, %v3018_v13  ;;  %v2297_v53 = vmul.f32 %v4253_v52, %v2226_v34  ;;  %v2228_v16 = vmul.f32 %v2164_v45, %v3944_v30  ;;  %v1887_v48 = vsel %vm1885_vm13, %v1886_v46, %v1884_v47  ;;  %v1877_v40 = vsel %vm1876_vm14, %v4555_v50, %v1875_v57 }
 0x227   : > { %v2369_v39 = vadd.f32 %v4273_v15, %v2298_v21  ;;  %v2300_v14 = vmul.f32 %v4253_v52, %v2229_v20  ;;  %v2167_v10 = vmul.f32 %v4549_v3, %v1887_v48  ;;  %v1880_v30 = vsel %vm1878_vm15, %v1879_v26, %v1877_v40  ;;  %v1519_v22 = vpop.f32.mrf.mxu1 }
 0x228   : > { %v2368_v62 = vadd.f32 %v4273_v15, %v2297_v53  ;;  %v2299_v46 = vmul.f32 %v4253_v52, %v2228_v16  ;;  %v2166_v43 = vmul.f32 %v4555_v50, %v1880_v30  ;;  %v1898_v38 = vsel %vm1897_vm0, %v4563_v56, %v1896_v24 }
 0x229   : > { %v3021_v54 = vpack.c.bf16 %v2369_v39, %v2369_v39  ;;  %v2371_v6 = vadd.f32 %v4273_v15, %v2300_v14  ;;  %v2231_v3 = vmul.f32 %v2167_v10, %v3960_v44  ;;  %v1901_v26 = vsel %vm1899_vm1, %v1900_v55, %v1898_v38  ;;  %v3314_v11 = vpop.f32.mrf.mxu1 }
 0x22a   : > { %v3020_v33 = vpack.c.bf16 %v2368_v62, %v2368_v62  ;;  %v2370_v8 = vadd.f32 %v4273_v15, %v2299_v46  ;;  %v2230_v50 = vmul.f32 %v2166_v43, %v3954_v37  ;;  %v2169_v31 = vmul.f32 %v4563_v56, %v1901_v26 }
 0x22b   : > { %2690 = vst.msk [vmem:[%s4309_s7 + $0x5c] sm:$0xf] %vm2666_vm12, %v3021_v54  ;;  %v3023_v2 = vpack.c.bf16 %v2371_v6, %v2371_v6  ;;  %v2302_v44 = vmul.f32 %v4253_v52, %v2231_v3  ;;  %3510 = vrsqrt.f32 %v4690_v63  ;;  %v1475_v59 = vadd.f32 1.0, %v4502_v12  ;;  %v1529_v60 = vpop.f32.mrf.mxu1  ;;  %v4859_v3 = vld [vmem:[%s5503_s4] ss:$0 sm:$0xff] }
 0x22c   : > { %2689 = vst.msk [vmem:[%s4309_s7 + $0x58] sm:$0xf] %vm2666_vm12, %v3020_v33  ;;  %v3022_v29 = vpack.c.bf16 %v2370_v8, %v2370_v8  ;;  %v2301_v55 = vmul.f32 %v4253_v52, %v2230_v50  ;;  %v2233_v9 = vmul.f32 %v2169_v31, %v3980_v4  ;;  %3512 = vrsqrt.f32 %v4709_v32  ;;  %v4870_v31 = vld [vmem:[%s5504_s5] ss:$0 sm:$0xff] }
 0x22d   : > { %2692 = vst.msk [vmem:[%s4309_s7 + $0x64] sm:$0xf] %vm2666_vm12, %v3023_v2  ;;  %v2373_v37 = vadd.f32 %v4273_v15, %v2302_v44  ;;  %v1470_v56 = vadd.f32 1.0, %v4519_v23  ;;  %v1485_v4 = vadd.f32 1.0, %v4542_v25  ;;  %3514 = vrsqrt.f32 %v4734_v27  ;;  %v3317_v34 = vpop.f32.mrf.mxu1 }
 0x22e   : > { %2691 = vst.msk [vmem:[%s4309_s7 + $0x60] sm:$0xf] %vm2666_vm12, %v3022_v29  ;;  %v2372_v0 = vadd.f32 %v4273_v15, %v2301_v55  ;;  %v2304_v42 = vmul.f32 %v4253_v52, %v2233_v9  ;;  %v1480_v17 = vadd.f32 1.0, %v4570_v41  ;;  %3516 = vrsqrt.f32 %v1475_v59  ;;  %v5580_v29 = vld [vmem:[#allocation3_spill] sm:$0xff] }
 0x22f   : > { %v3025_v12 = vpack.c.bf16 %v2373_v37, %v2373_v37  ;;  %v1495_v23 = vadd.f32 1.0, %v4594_v5  ;;  %3518 = vrsqrt.f32 %v1470_v56  ;;  %v1490_v25 = vadd.f32 1.0, %v4621_v7  ;;  %v1539_v40 = vpop.f32.mrf.mxu1 }
 0x230   : > { %v3024_v1 = vpack.c.bf16 %v2372_v0, %v2372_v0  ;;  %v2375_v18 = vadd.f32 %v4273_v15, %v2304_v42  ;;  %3520 = vrsqrt.f32 %v1485_v4  ;;  %v1505_v41 = vadd.f32 1.0, %v4655_v61 }
 0x231   : > { %2694 = vst.msk [vmem:[%s4309_s7 + $0x6c] sm:$0xf] %vm2666_vm12, %v3025_v12  ;;  %3522 = vrsqrt.f32 %v1480_v17  ;;  %v1500_v15 = vadd.f32 1.0, %v4681_v19  ;;  %v1515_v5 = vadd.f32 1.0, %v4724_v58  ;;  %v1510_v36 = vadd.f32 1.0, %v1509_v28  ;;  %v3320_v8 = vpop.f32.mrf.mxu1 }
 0x232   : > { %2693 = vst.msk [vmem:[%s4309_s7 + $0x68] sm:$0xf] %vm2666_vm12, %v3024_v1  ;;  %v3027_v52 = vpack.c.bf16 %v2375_v18, %v2375_v18  ;;  %3524 = vrsqrt.f32 %v1495_v23  ;;  %vm1890_vm2 = vcmp.eq.f32.partialorder %v4690_v63, inf  ;;  %vm1892_vm3 = vcmp.eq.f32.partialorder %v4690_v63, 0.0 }
 0x233   : > { %3526 = vrsqrt.f32 %v1490_v25  ;;  %v1525_v7 = vadd.f32 1.0, %v3311_v51  ;;  %v1893_v13 = vand.u32 2147483648, %v4690_v63  ;;  %v1520_v61 = vadd.f32 1.0, %v1519_v22  ;;  %v4881_v56 = vpop.f32.mrf.mxu1 }
 0x234   : > { %2696 = vst.msk [vmem:[%s4309_s7 + $0x74] sm:$0xf] %vm2666_vm12, %v3027_v52  ;;  %3528 = vrsqrt.f32 %v1505_v41  ;;  %vm1911_vm4 = vcmp.eq.f32.partialorder %v4709_v32, inf  ;;  %vm1913_vm5 = vcmp.eq.f32.partialorder %v4709_v32, 0.0  ;;  %v1914_v58 = vand.u32 2147483648, %v4709_v32 }
 0x235   : > { %3530 = vrsqrt.f32 %v1500_v15  ;;  %v1535_v21 = vadd.f32 1.0, %v3314_v11  ;;  %vm1904_vm6 = vcmp.eq.f32.partialorder %v4734_v27, inf  ;;  %v1530_v24 = vadd.f32 1.0, %v1529_v60  ;;  %v4909_v25 = vpop.f32.mrf.mxu1 }
 0x236   : > { %3532 = vrsqrt.f32 %v1515_v5  ;;  %vm1906_vm7 = vcmp.eq.f32.partialorder %v4734_v27, 0.0  ;;  %v1907_v10 = vand.u32 2147483648, %v4734_v27  ;;  %v4891_v12 = vadd.f32 1.0, %v3317_v34 }
 0x237   : > { %3534 = vrsqrt.f32 %v1510_v36  ;;  %v4893_v17 = vadd.f32 1.0, %v1539_v40  ;;  %v4900_v18 = vadd.f32 1.0, %v3320_v8 }
 0x238   : > { %v3511_v35 = vpop.eup %3510  ;;  %3536 = vrsqrt.f32 %v1525_v7 }
 0x239   : > { %v1889_v49 = vmul.f32 %v3511_v35, %v4690_v63  ;;  %v3513_v19 = vpop.eup %3512  ;;  %3538 = vrsqrt.f32 %v1520_v61 }
 0x23a   : > { %v1910_v57 = vmul.f32 %v3513_v19, %v4709_v32  ;;  %v3515_v20 = vpop.eup %3514 }
 0x23b   : > { %v1891_v45 = vsel %vm1890_vm2, %v4690_v63, %v1889_v49  ;;  %v4832_v28 = vpop.eup %3516  ;;  %v1903_v48 = vmul.f32 %v3515_v20, %v4734_v27 }
 0x23c   : > { %v1894_v47 = vsel %vm1892_vm3, %v1893_v13, %v1891_v45  ;;  %v1912_v16 = vsel %vm1911_vm4, %v4709_v32, %v1910_v57  ;;  %v4837_v39 = vpop.eup %3518  ;;  %3540 = vrsqrt.f32 %v4832_v28  ;;  %vm1925_vm8 = vcmp.eq.f32.partialorder %v4832_v28, inf }
 0x23d   : > { %v2168_v53 = vmul.f32 %v4690_v63, %v1894_v47  ;;  %v1915_v14 = vsel %vm1913_vm5, %v1914_v58, %v1912_v16  ;;  %v4844_v30 = vpop.eup %3520  ;;  %v5578_v63 = vld [vmem:[#allocation2_spill] sm:$0xff]  ;;  %v1905_v43 = vsel %vm1904_vm6, %v4734_v27, %v1903_v48  ;;  %3542 = vrsqrt.f32 %v1535_v21  ;;  %v4934_v58 = vpop.f32.mrf.mxu1 }
 0x23e   : > { %v2171_v46 = vmul.f32 %v4709_v32, %v1915_v14  ;;  %v4851_v38 = vpop.eup %3522  ;;  %v1908_v54 = vsel %vm1906_vm7, %v1907_v10, %v1905_v43  ;;  %3544 = vrsqrt.f32 %v4837_v39  ;;  %v5579_v32 = vld [vmem:[#allocation4_spill] sm:$0xff]  ;;  %vm1927_vm9 = vcmp.eq.f32.partialorder %v4832_v28, 0.0 }
 0x23f   : > { %v2232_v62 = vmul.f32 %v2168_v53, %v5578_v63  ;;  %v4854_v6 = vpop.eup %3524  ;;  %v2170_v33 = vmul.f32 %v4734_v27, %v1908_v54  ;;  %3546 = vrsqrt.f32 %v1530_v24  ;;  %v1928_v52 = vand.u32 2147483648, %v4832_v28  ;;  %v4964_v54 = vpop.f32.mrf.mxu1 }
 0x240   : > { %v2235_v51 = vmul.f32 %v2171_v46, %v5579_v32  ;;  %3548 = vrsqrt.f32 %v4844_v30  ;;  %v4865_v50 = vpop.eup %3526  ;;  %vm1918_vm10 = vcmp.eq.f32.partialorder %v4837_v39, inf  ;;  %vm1920_vm11 = vcmp.eq.f32.partialorder %v4837_v39, 0.0 }
 0x241   : > { %v2303_v26 = vmul.f32 %v4859_v3, %v2232_v62  ;;  %v2234_v55 = vmul.f32 %v2170_v33, %v5580_v29  ;;  %3550 = vrsqrt.f32 %v4851_v38  ;;  %v4877_v27 = vpop.eup %3528  ;;  %v1921_v15 = vand.u32 2147483648, %v4837_v39 }
 0x242   : > { %v2306_v44 = vmul.f32 %v4859_v3, %v2235_v51  ;;  %3552 = vrsqrt.f32 %v4854_v6  ;;  %v4883_v22 = vpop.eup %3530  ;;  %vm1939_vm13 = vcmp.eq.f32.partialorder %v4844_v30, inf  ;;  %vm1941_vm14 = vcmp.eq.f32.partialorder %v4844_v30, 0.0 }
 0x243   : > { %v2374_v2 = vadd.f32 %v4870_v31, %v2303_v26  ;;  %v2305_v37 = vmul.f32 %v4859_v3, %v2234_v55  ;;  %3554 = vrsqrt.f32 %v4865_v50  ;;  %v4886_v0 = vpop.eup %3532  ;;  %v1942_v5 = vand.u32 2147483648, %v4844_v30  ;;  %v5581_v26 = vld [vmem:[#allocation7_spill] sm:$0xff] }
 0x244   : > { %v2377_v59 = vadd.f32 %v4870_v31, %v2306_v44  ;;  %v4895_v1 = vpop.eup %3534  ;;  %3556 = vrsqrt.f32 %v4877_v27  ;;  %vm1932_vm15 = vcmp.eq.f32.partialorder %v4851_v38, inf  ;;  %vm1934_vm0 = vcmp.eq.f32.partialorder %v4851_v38, 0.0 }
 0x245   : > { %v3026_v9 = vpack.c.bf16 %v2374_v2, %v2374_v2  ;;  %v2376_v4 = vadd.f32 %v4870_v31, %v2305_v37  ;;  %v4902_v23 = vpop.eup %3536  ;;  %3558 = vrsqrt.f32 %v4883_v22  ;;  %v1935_v7 = vand.u32 2147483648, %v4851_v38 }
 0x246   : > { %v3029_v42 = vpack.c.bf16 %v2377_v59, %v2377_v59  ;;  %v4911_v41 = vpop.eup %3538  ;;  %3560 = vrsqrt.f32 %v4886_v0  ;;  %vm1953_vm1 = vcmp.eq.f32.partialorder %v4854_v6, inf  ;;  %vm1955_vm2 = vcmp.eq.f32.partialorder %v4854_v6, 0.0 }
 0x247   : > { %2695 = vst.msk [vmem:[%s4309_s7 + $0x70] sm:$0xf] %vm2666_vm12, %v3026_v9  ;;  %v3028_v11 = vpack.c.bf16 %v2376_v4, %v2376_v4  ;;  %3562 = vrsqrt.f32 %v4895_v1  ;;  %v1956_v13 = vand.u32 2147483648, %v4854_v6  ;;  %v1949_v61 = vand.u32 2147483648, %v4865_v50  ;;  %v5582_v9 = vld [vmem:[#allocation5_spill] sm:$0xff] }
 0x248   : > { %2698 = vst.msk [vmem:[%s4309_s7 + $0x7c] sm:$0xf] %vm2666_vm12, %v3029_v42  ;;  %v1970_v34 = vand.u32 2147483648, %v4877_v27  ;;  %v1963_v19 = vand.u32 2147483648, %v4883_v22  ;;  %vm1946_vm3 = vcmp.eq.f32.partialorder %v4865_v50, inf  ;;  %v1984_v20 = vand.u32 2147483648, %v4886_v0 }
 0x249   : > { %v3541_v60 = vpop.eup %3540  ;;  %2697 = vst.msk [vmem:[%s4309_s7 + $0x78] sm:$0xf] %vm2666_vm12, %v3028_v11  ;;  %3564 = vrsqrt.f32 %v4902_v23  ;;  %vm1948_vm4 = vcmp.eq.f32.partialorder %v4865_v50, 0.0  ;;  %v1977_v53 = vand.u32 2147483648, %v4895_v1  ;;  %v1998_v16 = vand.u32 2147483648, %v4902_v23 }
 0x24a   : > { %v4923_v36 = vpop.eup %3542  ;;  %v1924_v35 = vmul.f32 %v3541_v60, %v4832_v28  ;;  %3566 = vrsqrt.f32 %v4911_v41  ;;  %vm1967_vm5 = vcmp.eq.f32.partialorder %v4877_v27, inf  ;;  %v1991_v63 = vand.u32 2147483648, %v4911_v41 }
 0x24b   : > { %v3545_v49 = vpop.eup %3544  ;;  %vm1969_vm6 = vcmp.eq.f32.partialorder %v4877_v27, 0.0  ;;  %3568 = vrsqrt.f32 %v4923_v36  ;;  %vm1960_vm7 = vcmp.eq.f32.partialorder %v4883_v22, inf }
 0x24c   : > { %v4936_v45 = vpop.eup %3546  ;;  %v1926_v57 = vsel %vm1925_vm8, %v4832_v28, %v1924_v35  ;;  %v1917_v21 = vmul.f32 %v3545_v49, %v4837_v39  ;;  %vm1962_vm8 = vcmp.eq.f32.partialorder %v4883_v22, 0.0 }
 0x24d   : > { %v3549_v47 = vpop.eup %3548  ;;  %v1929_v24 = vsel %vm1927_vm9, %v1928_v52, %v1926_v57  ;;  %3570 = vrsqrt.f32 %v4936_v45  ;;  %vm1981_vm9 = vcmp.eq.f32.partialorder %v4886_v0, inf  ;;  %v5584_v57 = vld [vmem:[#allocation6_spill] sm:$0xff] }
 0x24e   : > { %v3551_v48 = vpop.eup %3550  ;;  %v2173_v40 = vmul.f32 %v4832_v28, %v1929_v24  ;;  %v1919_v14 = vsel %vm1918_vm10, %v4837_v39, %v1917_v21  ;;  %v1938_v10 = vmul.f32 %v3549_v47, %v4844_v30  ;;  %v2012_v28 = vand.u32 2147483648, %v4923_v36 }
 0x24f   : > { %v3553_v62 = vpop.eup %3552  ;;  %v1922_v46 = vsel %vm1920_vm11, %v1921_v15, %v1919_v14  ;;  %v1931_v43 = vmul.f32 %v3551_v48, %v4851_v38  ;;  %vm1974_vm10 = vcmp.eq.f32.partialorder %v4895_v1, inf  ;;  %3572 = vrsqrt.f32 %v4891_v12 }
 0x250   : > { %v2237_v32 = vmul.f32 %v2173_v40, %v5581_v26  ;;  %v2172_v51 = vmul.f32 %v4837_v39, %v1922_v46  ;;  %v1940_v33 = vsel %vm1939_vm13, %v4844_v30, %v1938_v10  ;;  %v1952_v8 = vmul.f32 %v3553_v62, %v4854_v6  ;;  %v3555_v2 = vpop.eup %3554  ;;  %v5585_v46 = vld [vmem:[#allocation11_spill] sm:$0xff] }
 0x251   : > { %v1943_v44 = vsel %vm1941_vm14, %v1942_v5, %v1940_v33  ;;  %v1933_v29 = vsel %vm1932_vm15, %v4851_v38, %v1931_v43  ;;  %v2005_v39 = vand.u32 2147483648, %v4936_v45  ;;  %v3557_v4 = vpop.eup %3556  ;;  %v1945_v15 = vmul.f32 %v3555_v2, %v4865_v50  ;;  %v5583_v5 = vld [vmem:[#allocation8_spill] sm:$0xff] }
 0x252   : > { %v2308_v55 = vmul.f32 %v4859_v3, %v2237_v32  ;;  %v2236_v59 = vmul.f32 %v2172_v51, %v5582_v9  ;;  %v2175_v37 = vmul.f32 %v4844_v30, %v1943_v44  ;;  %v1936_v42 = vsel %vm1934_vm0, %v1935_v7, %v1933_v29  ;;  %v4994_v30 = vpop.f32.mrf.mxu1  ;;  %v3559_v49 = vpop.eup %3558 }
 0x253   : > { %v2174_v11 = vmul.f32 %v4851_v38, %v1936_v42  ;;  %v1954_v52 = vsel %vm1953_vm1, %v4854_v6, %v1952_v8  ;;  %v1947_v12 = vsel %vm1946_vm3, %v4865_v50, %v1945_v15  ;;  %v1966_v24 = vmul.f32 %v3557_v4, %v4877_v27  ;;  %v3561_v48 = vpop.eup %3560 }
 0x254   : > { %v2379_v60 = vadd.f32 %v4870_v31, %v2308_v55  ;;  %v2307_v38 = vmul.f32 %v4859_v3, %v2236_v59  ;;  %v2239_v35 = vmul.f32 %v2175_v37, %v5583_v5  ;;  %v1957_v7 = vsel %vm1955_vm2, %v1956_v13, %v1954_v52  ;;  %v3563_v10 = vpop.eup %3562  ;;  %v5024_v51 = vpop.f32.mrf.mxu1  ;;  %v5586_v55 = vld [vmem:[#allocation9_spill] sm:$0xff] }
 0x255   : > { %v2238_v21 = vmul.f32 %v2174_v11, %v5584_v57  ;;  %v2177_v47 = vmul.f32 %v4854_v6, %v1957_v7  ;;  %vm1983_vm11 = vcmp.eq.f32.partialorder %v4886_v0, 0.0  ;;  %vm1976_vm13 = vcmp.eq.f32.partialorder %v4895_v1, 0.0 }
 0x256   : > { %vm1995_vm14 = vcmp.eq.f32.partialorder %v4902_v23, inf  ;;  %v3031_v13 = vpack.c.bf16 %v2379_v60, %v2379_v60  ;;  %v2378_v40 = vadd.f32 %v4870_v31, %v2307_v38  ;;  %v2310_v14 = vmul.f32 %v4859_v3, %v2239_v35  ;;  %v3565_v2 = vpop.eup %3564  ;;  %v5587_v60 = vld [vmem:[#allocation12_spill] sm:$0xff]  ;;  %v5052_v5 = vpop.f32.mrf.mxu1 }
 0x257   : > { %v1950_v6 = vsel %vm1948_vm4, %v1949_v61, %v1947_v12  ;;  %v2309_v62 = vmul.f32 %v4859_v3, %v2238_v21  ;;  %v2241_v43 = vmul.f32 %v2177_v47, %v5585_v46  ;;  %v1968_v32 = vsel %vm1967_vm5, %v4877_v27, %v1966_v24  ;;  %v3567_v37 = vpop.eup %3566 }
 0x258   : > { %v2176_v26 = vmul.f32 %v4865_v50, %v1950_v6  ;;  %vm1997_vm15 = vcmp.eq.f32.partialorder %v4902_v23, 0.0  ;;  %vm1988_vm0 = vcmp.eq.f32.partialorder %v4911_v41, inf  ;;  %2700 = vst.msk [vmem:[%s4309_s7 + $0x84] sm:$0xf] %vm2666_vm12, %v3031_v13  ;;  %v3030_v61 = vpack.c.bf16 %v2378_v40, %v2378_v40  ;;  %v3569_v35 = vpop.eup %3568 }
 0x259   : > { %v2381_v33 = vadd.f32 %v4870_v31, %v2310_v14  ;;  %v1971_v50 = vsel %vm1969_vm6, %v1970_v34, %v1968_v32  ;;  %v1959_v8 = vmul.f32 %v3559_v49, %v4883_v22  ;;  %v2380_v44 = vadd.f32 %v4870_v31, %v2309_v62  ;;  %v5588_v62 = vld [vmem:[#allocation10_spill] sm:$0xff] }
 0x25a   : > { %v2312_v29 = vmul.f32 %v4859_v3, %v2241_v43  ;;  %v2240_v9 = vmul.f32 %v2176_v26, %v5586_v55  ;;  %v2179_v59 = vmul.f32 %v4877_v27, %v1971_v50  ;;  %vm1990_vm1 = vcmp.eq.f32.partialorder %v4911_v41, 0.0  ;;  %2699 = vst.msk [vmem:[%s4309_s7 + $0x80] sm:$0xf] %vm2666_vm12, %v3030_v61  ;;  %v5090_v43 = vpop.f32.mrf.mxu1 }
 0x25b   : > { %vm2009_vm2 = vcmp.eq.f32.partialorder %v4923_v36, inf  ;;  %v3033_v34 = vpack.c.bf16 %v2381_v33, %v2381_v33  ;;  %v1961_v42 = vsel %vm1960_vm7, %v4883_v22, %v1959_v8  ;;  %v1980_v4 = vmul.f32 %v3561_v48, %v4886_v0  ;;  %v5589_v8 = vld [vmem:[#allocation15_spill] sm:$0xff] }
 0x25c   : > { %v1973_v11 = vmul.f32 %v3563_v10, %v4895_v1  ;;  %v3032_v52 = vpack.c.bf16 %v2380_v44, %v2380_v44  ;;  %v2383_v27 = vadd.f32 %v4870_v31, %v2312_v29  ;;  %v2311_v15 = vmul.f32 %v4859_v3, %v2240_v9  ;;  %v5590_v44 = vld [vmem:[#allocation13_spill] sm:$0xff] }
 0x25d   : > { %v2243_v38 = vmul.f32 %v2179_v59, %v5587_v60  ;;  %vm2011_vm3 = vcmp.eq.f32.partialorder %v4923_v36, 0.0  ;;  %vm2002_vm4 = vcmp.eq.f32.partialorder %v4936_v45, inf  ;;  %2702 = vst.msk [vmem:[%s4309_s7 + $0x8c] sm:$0xf] %vm2666_vm12, %v3033_v34  ;;  %v1964_v7 = vsel %vm1962_vm8, %v1963_v19, %v1961_v42  ;;  %v3571_v19 = vpop.eup %3570 }
 0x25e   : > { %v1982_v49 = vsel %vm1981_vm9, %v4886_v0, %v1980_v4  ;;  %v1975_v57 = vsel %vm1974_vm10, %v4895_v1, %v1973_v11  ;;  %v1994_v21 = vmul.f32 %v3565_v2, %v4902_v23  ;;  %2701 = vst.msk [vmem:[%s4309_s7 + $0x88] sm:$0xf] %vm2666_vm12, %v3032_v52  ;;  %v3035_v47 = vpack.c.bf16 %v2383_v27, %v2383_v27  ;;  %v5092_v26 = vpop.eup %3572  ;;  %v1589_v4 = vpop.f32.mrf.mxu1 }
 0x25f   : > { %v2382_v12 = vadd.f32 %v4870_v31, %v2311_v15  ;;  %v2314_v24 = vmul.f32 %v4859_v3, %v2243_v38  ;;  %v2178_v48 = vmul.f32 %v4883_v22, %v1964_v7  ;;  %vm2004_vm5 = vcmp.eq.f32.partialorder %v4936_v45, 0.0 }
 0x260   : > { %v1985_v13 = vsel %vm1983_vm11, %v1984_v20, %v1982_v49  ;;  %v1978_v40 = vsel %vm1976_vm13, %v1977_v53, %v1975_v57  ;;  %v1996_v14 = vsel %vm1995_vm14, %v4902_v23, %v1994_v21  ;;  %v1987_v22 = vmul.f32 %v3567_v37, %v4911_v41  ;;  %2704 = vst.msk [vmem:[%s4309_s7 + $0x94] sm:$0xf] %vm2666_vm12, %v3035_v47 }
 0x261   : > { %v3034_v6 = vpack.c.bf16 %v2382_v12, %v2382_v12  ;;  %v2385_v10 = vadd.f32 %v4870_v31, %v2314_v24  ;;  %v2242_v46 = vmul.f32 %v2178_v48, %v5588_v62  ;;  %v2181_v20 = vmul.f32 %v4886_v0, %v1985_v13  ;;  %v3335_v24 = vpop.f32.mrf.mxu1  ;;  %v5593_v48 = vld [vmem:[#allocation19_spill] sm:$0xff] }
 0x262   : > { %v2180_v53 = vmul.f32 %v4895_v1, %v1978_v40  ;;  %v1999_v32 = vsel %vm1997_vm15, %v1998_v16, %v1996_v14  ;;  %v1989_v61 = vsel %vm1988_vm0, %v4911_v41, %v1987_v22  ;;  %v2008_v33 = vmul.f32 %v3569_v35, %v4923_v36  ;;  %v5594_v14 = vld [vmem:[#allocation17_spill] sm:$0xff] }
 0x263   : > { %2703 = vst.msk [vmem:[%s4309_s7 + $0x90] sm:$0xf] %vm2666_vm12, %v3034_v6  ;;  %v3037_v0 = vpack.c.bf16 %v2385_v10, %v2385_v10  ;;  %v2313_v50 = vmul.f32 %v4859_v3, %v2242_v46  ;;  %v2245_v2 = vmul.f32 %v2181_v20, %v5589_v8  ;;  %v2183_v1 = vmul.f32 %v4902_v23, %v1999_v32  ;;  %v5591_v23 = vld [vmem:[#allocation16_spill] sm:$0xff]  ;;  %v1599_v62 = vpop.f32.mrf.mxu1 }
 0x264   : > { %v2244_v29 = vmul.f32 %v2180_v53, %v5590_v44  ;;  %v1992_v16 = vsel %vm1990_vm1, %v1991_v63, %v1989_v61  ;;  %v2010_v55 = vsel %vm2009_vm2, %v4923_v36, %v2008_v33  ;;  %v2001_v9 = vmul.f32 %v3571_v19, %v4936_v45 }
 0x265   : > { %2706 = vst.msk [vmem:[%s4309_s7 + $0x9c] sm:$0xf] %vm2666_vm12, %v3037_v0  ;;  %v2384_v59 = vadd.f32 %v4870_v31, %v2313_v50  ;;  %v2316_v37 = vmul.f32 %v4859_v3, %v2245_v2  ;;  %v2247_v34 = vmul.f32 %v2183_v1, %v5591_v23  ;;  %v2182_v42 = vmul.f32 %v4911_v41, %v1992_v16  ;;  %v5592_v41 = vld [vmem:[#allocation14_spill] sm:$0xff]  ;;  %v3338_v61 = vpop.f32.mrf.mxu1 }
 0x266   : > { %v2315_v63 = vmul.f32 %v4859_v3, %v2244_v29  ;;  %v2013_v11 = vsel %vm2011_vm3, %v2012_v28, %v2010_v55  ;;  %v2003_v52 = vsel %vm2002_vm4, %v4936_v45, %v2001_v9  ;;  %3574 = vrsqrt.f32 %v5092_v26 }
 0x267   : > { %v3036_v27 = vpack.c.bf16 %v2384_v59, %v2384_v59  ;;  %v2387_v15 = vadd.f32 %v4870_v31, %v2316_v37  ;;  %v2318_v60 = vmul.f32 %v4859_v3, %v2247_v34  ;;  %v2246_v38 = vmul.f32 %v2182_v42, %v5592_v41  ;;  %v1609_v8 = vpop.f32.mrf.mxu1  ;;  %v5595_v59 = vld [vmem:[#allocation20_spill] sm:$0xff] }
 0x268   : > { %v2386_v35 = vadd.f32 %v4870_v31, %v2315_v63  ;;  %v2185_v7 = vmul.f32 %v4923_v36, %v2013_v11  ;;  %v2006_v28 = vsel %vm2004_vm5, %v2005_v39, %v2003_v52  ;;  %v1550_v49 = vadd.f32 1.0, %v4881_v56 }
 0x269   : > { %2705 = vst.msk [vmem:[%s4309_s7 + $0x98] sm:$0xf] %vm2666_vm12, %v3036_v27  ;;  %v3039_v57 = vpack.c.bf16 %v2387_v15, %v2387_v15  ;;  %v2389_v21 = vadd.f32 %v4870_v31, %v2318_v60  ;;  %v2317_v47 = vmul.f32 %v4859_v3, %v2246_v38  ;;  %v2184_v12 = vmul.f32 %v4936_v45, %v2006_v28  ;;  %v3341_v55 = vpop.f32.mrf.mxu1 }
 0x26a   : > { %v3038_v36 = vpack.c.bf16 %v2386_v35, %v2386_v35  ;;  %v2249_v19 = vmul.f32 %v2185_v7, %v5593_v48  ;;  %v1565_v13 = vadd.f32 1.0, %v4909_v25  ;;  %v1560_v39 = vadd.f32 1.0, %v4934_v58 }
 0x26b   : > { %2708 = vst.msk [vmem:[%s4309_s7 + $0xa4] sm:$0xf] %vm2666_vm12, %v3039_v57  ;;  %v3041_v56 = vpack.c.bf16 %v2389_v21, %v2389_v21  ;;  %v2388_v40 = vadd.f32 %v4870_v31, %v2317_v47  ;;  %v2248_v22 = vmul.f32 %v2184_v12, %v5594_v14  ;;  %3576 = vrsqrt.f32 %v4893_v17 }
 0x26c   : > { %2707 = vst.msk [vmem:[%s4309_s7 + $0xa0] sm:$0xf] %vm2666_vm12, %v3038_v36  ;;  %v2320_v45 = vmul.f32 %v4859_v3, %v2249_v19  ;;  %3578 = vrsqrt.f32 %v4900_v18  ;;  %v1575_v25 = vadd.f32 1.0, %v4964_v54  ;;  %v1570_v10 = vadd.f32 1.0, %v4994_v30 }
 0x26d   : > { %2710 = vst.msk [vmem:[%s4309_s7 + $0xac] sm:$0xf] %vm2666_vm12, %v3041_v56  ;;  %v3040_v58 = vpack.c.bf16 %v2388_v40, %v2388_v40  ;;  %v2319_v6 = vmul.f32 %v4859_v3, %v2248_v22  ;;  %3580 = vrsqrt.f32 %v1550_v49  ;;  %v1585_v46 = vadd.f32 1.0, %v5024_v51 }
 0x26e   : > { %v2391_v17 = vadd.f32 %v4870_v31, %v2320_v45  ;;  %3582 = vrsqrt.f32 %v1565_v13  ;;  %v1580_v54 = vadd.f32 1.0, %v5052_v5  ;;  %v1595_v53 = vadd.f32 1.0, %v5090_v43 }
 0x26f   : > { %2709 = vst.msk [vmem:[%s4309_s7 + $0xa8] sm:$0xf] %vm2666_vm12, %v3040_v58  ;;  %v2390_v18 = vadd.f32 %v4870_v31, %v2319_v6  ;;  %3584 = vrsqrt.f32 %v1560_v39  ;;  %v1590_v32 = vadd.f32 1.0, %v1589_v4  ;;  %v1605_v51 = vadd.f32 1.0, %v3335_v24  ;;  %v1619_v4 = vpop.f32.mrf.mxu1 }
 0x270   : > { %v3043_v20 = vpack.c.bf16 %v2391_v17, %v2391_v17  ;;  %3586 = vrsqrt.f32 %v1575_v25  ;;  %v1600_v0 = vadd.f32 1.0, %v1599_v62  ;;  %v1615_v5 = vadd.f32 1.0, %v3338_v61 }
 0x271   : > { %v3042_v30 = vpack.c.bf16 %v2390_v18, %v2390_v18  ;;  %3588 = vrsqrt.f32 %v1570_v10  ;;  %vm2023_vm6 = vcmp.eq.f32.partialorder %v5092_v26, inf  ;;  %v2026_v43 = vand.u32 2147483648, %v5092_v26 }
 0x272   : > { %2712 = vst.msk [vmem:[%s4309_s7 + $0xb4] sm:$0xf] %vm2666_vm12, %v3043_v20  ;;  %3590 = vrsqrt.f32 %v1585_v46  ;;  %vm2025_vm7 = vcmp.eq.f32.partialorder %v5092_v26, 0.0  ;;  %v1610_v27 = vadd.f32 1.0, %v1609_v8  ;;  %v1625_v15 = vadd.f32 1.0, %v3341_v55 }
 0x273   : > { %v3575_v33 = vpop.eup %3574  ;;  %2711 = vst.msk [vmem:[%s4309_s7 + $0xb0] sm:$0xf] %vm2666_vm12, %v3042_v30  ;;  %3592 = vrsqrt.f32 %v1580_v54  ;;  %v1620_v38 = vadd.f32 1.0, %v1619_v4 }
 0x274   : > { %v2022_v50 = vmul.f32 %v3575_v33, %v5092_v26  ;;  %3594 = vrsqrt.f32 %v1595_v53 }
 0x275   : > { %3596 = vrsqrt.f32 %v1590_v32 }
 0x276   : > { %v2024_v2 = vsel %vm2023_vm6, %v5092_v26, %v2022_v50  ;;  %3598 = vrsqrt.f32 %v1605_v51 }
 0x277   : > { %v2027_v1 = vsel %vm2025_vm7, %v2026_v43, %v2024_v2  ;;  %3600 = vrsqrt.f32 %v1600_v0 }
 0x278   : > { %v5180_v44 = vpop.eup %3576  ;;  %v2187_v29 = vmul.f32 %v5092_v26, %v2027_v1  ;;  %3602 = vrsqrt.f32 %v1615_v5  ;;  %v5596_v1 = vld [vmem:[#allocation18_spill] sm:$0xff] }
 0x279   : > { %v5183_v16 = vpop.eup %3578  ;;  %3604 = vrsqrt.f32 %v5180_v44  ;;  %vm2016_vm8 = vcmp.eq.f32.partialorder %v5180_v44, inf  ;;  %vm2018_vm9 = vcmp.eq.f32.partialorder %v5180_v44, 0.0  ;;  %v2019_v7 = vand.u32 2147483648, %v5180_v44 }
 0x27a   : > { %v5186_v9 = vpop.eup %3580  ;;  %v2251_v37 = vmul.f32 %v2187_v29, %v5595_v59  ;;  %3606 = vrsqrt.f32 %v5183_v16  ;;  %vm2037_vm10 = vcmp.eq.f32.partialorder %v5183_v16, inf  ;;  %vm2039_vm11 = vcmp.eq.f32.partialorder %v5183_v16, 0.0 }
 0x27b   : > { %v5190_v23 = vpop.eup %3582  ;;  %3608 = vrsqrt.f32 %v5186_v9  ;;  %v2040_v49 = vand.u32 2147483648, %v5183_v16  ;;  %vm2030_vm13 = vcmp.eq.f32.partialorder %v5186_v9, inf  ;;  %vm2032_vm14 = vcmp.eq.f32.partialorder %v5186_v9, 0.0 }
 0x27c   : > { %v5193_v34 = vpop.eup %3584  ;;  %v2322_v26 = vmul.f32 %v4859_v3, %v2251_v37  ;;  %3610 = vrsqrt.f32 %v5190_v23  ;;  %v2033_v21 = vand.u32 2147483648, %v5186_v9  ;;  %vm2051_vm15 = vcmp.eq.f32.partialorder %v5190_v23, inf  ;;  %v5597_v37 = vld [vmem:[#allocation23_spill] sm:$0xff] }
 0x27d   : > { %v5197_v42 = vpop.eup %3586  ;;  %3612 = vrsqrt.f32 %v5193_v34  ;;  %vm2053_vm0 = vcmp.eq.f32.partialorder %v5190_v23, 0.0  ;;  %v2054_v12 = vand.u32 2147483648, %v5190_v23  ;;  %vm2044_vm1 = vcmp.eq.f32.partialorder %v5193_v34, inf }
 0x27e   : > { %v5200_v63 = vpop.eup %3588  ;;  %v2393_v11 = vadd.f32 %v4870_v31, %v2322_v26  ;;  %3614 = vrsqrt.f32 %v5197_v42  ;;  %vm2046_vm2 = vcmp.eq.f32.partialorder %v5193_v34, 0.0  ;;  %v2047_v36 = vand.u32 2147483648, %v5193_v34 }
 0x27f   : > { %v5204_v52 = vpop.eup %3590  ;;  %3616 = vrsqrt.f32 %v5200_v63  ;;  %vm2065_vm3 = vcmp.eq.f32.partialorder %v5197_v42, inf  ;;  %v2068_v48 = vand.u32 2147483648, %v5197_v42  ;;  %vm2067_vm4 = vcmp.eq.f32.partialorder %v5197_v42, 0.0 }
 0x280   : > { %v5206_v60 = vpop.eup %3592  ;;  %v3045_v41 = vpack.c.bf16 %v2393_v11, %v2393_v11  ;;  %3618 = vrsqrt.f32 %v5204_v52  ;;  %v2061_v13 = vand.u32 2147483648, %v5200_v63  ;;  %v2082_v39 = vand.u32 2147483648, %v5204_v52 }
 0x281   : > { %v5210_v35 = vpop.eup %3594  ;;  %3620 = vrsqrt.f32 %v5206_v60  ;;  %v2075_v56 = vand.u32 2147483648, %v5206_v60  ;;  %vm2058_vm5 = vcmp.eq.f32.partialorder %v5200_v63, inf  ;;  %vm2060_vm6 = vcmp.eq.f32.partialorder %v5200_v63, 0.0 }
 0x282   : > { %v5216_v28 = vpop.eup %3596  ;;  %2714 = vst.msk [vmem:[%s4309_s7 + $0xbc] sm:$0xf] %vm2666_vm12, %v3045_v41  ;;  %3622 = vrsqrt.f32 %v5210_v35  ;;  %v2096_v22 = vand.u32 2147483648, %v5210_v35  ;;  %vm2079_vm7 = vcmp.eq.f32.partialorder %v5204_v52, inf  ;;  %v5598_v41 = vld [vmem:[#allocation21_spill] sm:$0xff] }
 0x283   : > { %v5224_v57 = vpop.eup %3598  ;;  %3624 = vrsqrt.f32 %v5216_v28  ;;  %v2089_v45 = vand.u32 2147483648, %v5216_v28 }
 0x284   : > { %v5230_v47 = vpop.eup %3600  ;;  %3626 = vrsqrt.f32 %v5224_v57  ;;  %v2110_v6 = vand.u32 2147483648, %v5224_v57 }
 0x285   : > { %v5236_v24 = vpop.eup %3602  ;;  %3628 = vrsqrt.f32 %v5230_v47  ;;  %v2103_v10 = vand.u32 2147483648, %v5230_v47 }
 0x286   : > { %v3605_v19 = vpop.eup %3604  ;;  %3630 = vrsqrt.f32 %v5236_v24  ;;  %v2124_v18 = vand.u32 2147483648, %v5236_v24 }
 0x287   : > { %v3607_v40 = vpop.eup %3606  ;;  %v2015_v14 = vmul.f32 %v3605_v19, %v5180_v44  ;;  %3632 = vrsqrt.f32 %v1610_v27 }
 0x288   : > { %v3609_v25 = vpop.eup %3608  ;;  %v2036_v58 = vmul.f32 %v3607_v40, %v5183_v16  ;;  %3634 = vrsqrt.f32 %v1625_v15 }
 0x289   : > { %v3611_v62 = vpop.eup %3610  ;;  %v2017_v17 = vsel %vm2016_vm8, %v5180_v44, %v2015_v14  ;;  %v2029_v46 = vmul.f32 %v3609_v25, %v5186_v9  ;;  %3636 = vrsqrt.f32 %v1620_v38  ;;  %vm2081_vm8 = vcmp.eq.f32.partialorder %v5204_v52, 0.0 }
 0x28a   : > { %v3613_v54 = vpop.eup %3612  ;;  %v2020_v20 = vsel %vm2018_vm9, %v2019_v7, %v2017_v17  ;;  %v2038_v53 = vsel %vm2037_vm10, %v5183_v16, %v2036_v58  ;;  %v2050_v30 = vmul.f32 %v3611_v62, %v5190_v23  ;;  %vm2072_vm9 = vcmp.eq.f32.partialorder %v5206_v60, inf  ;;  %v5600_v58 = vld [vmem:[#allocation22_spill] sm:$0xff] }
 0x28b   : > { %v3615_v32 = vpop.eup %3614  ;;  %v2186_v61 = vmul.f32 %v5180_v44, %v2020_v20  ;;  %v2041_v51 = vsel %vm2039_vm11, %v2040_v49, %v2038_v53  ;;  %v2031_v33 = vsel %vm2030_vm13, %v5186_v9, %v2029_v46  ;;  %v2043_v0 = vmul.f32 %v3613_v54, %v5193_v34  ;;  %v5601_v54 = vld [vmem:[#allocation27_spill] sm:$0xff] }
 0x28c   : > { %v2189_v50 = vmul.f32 %v5183_v16, %v2041_v51  ;;  %v2034_v5 = vsel %vm2032_vm14, %v2033_v21, %v2031_v33  ;;  %v2052_v43 = vsel %vm2051_vm15, %v5190_v23, %v2050_v30  ;;  %v2064_v8 = vmul.f32 %v3615_v32, %v5197_v42  ;;  %v3617_v2 = vpop.eup %3616 }
 0x28d   : > { %v2250_v44 = vmul.f32 %v2186_v61, %v5596_v1  ;;  %v2188_v29 = vmul.f32 %v5186_v9, %v2034_v5  ;;  %v2055_v55 = vsel %vm2053_vm0, %v2054_v12, %v2052_v43  ;;  %v2045_v16 = vsel %vm2044_vm1, %v5193_v34, %v2043_v0  ;;  %v3619_v59 = vpop.eup %3618  ;;  %v5599_v12 = vld [vmem:[#allocation24_spill] sm:$0xff] }
 0x28e   : > { %v2253_v26 = vmul.f32 %v2189_v50, %v5597_v37  ;;  %v2191_v4 = vmul.f32 %v5190_v23, %v2055_v55  ;;  %v2048_v11 = vsel %vm2046_vm2, %v2047_v36, %v2045_v16  ;;  %v2066_v9 = vsel %vm2065_vm3, %v5197_v42, %v2064_v8  ;;  %v3621_v27 = vpop.eup %3620 }
 0x28f   : > { %v2321_v15 = vmul.f32 %v4859_v3, %v2250_v44  ;;  %v2252_v38 = vmul.f32 %v2188_v29, %v5598_v41  ;;  %v2190_v7 = vmul.f32 %v5193_v34, %v2048_v11  ;;  %v2069_v49 = vsel %vm2067_vm4, %v2068_v48, %v2066_v9  ;;  %v3623_v23 = vpop.eup %3622 }
 0x290   : > { %vm2074_vm10 = vcmp.eq.f32.partialorder %v5206_v60, 0.0  ;;  %v2324_v21 = vmul.f32 %v4859_v3, %v2253_v26  ;;  %v2255_v36 = vmul.f32 %v2191_v4, %v5599_v12  ;;  %v2193_v19 = vmul.f32 %v5197_v42, %v2069_v49  ;;  %v3625_v14 = vpop.eup %3624 }
 0x291   : > { %v2057_v40 = vmul.f32 %v3617_v2, %v5200_v63  ;;  %vm2093_vm11 = vcmp.eq.f32.partialorder %v5210_v35, inf  ;;  %v2392_v25 = vadd.f32 %v4870_v31, %v2321_v15  ;;  %v2323_v34 = vmul.f32 %v4859_v3, %v2252_v38  ;;  %v3627_v17 = vpop.eup %3626 }
 0x292   : > { %v2254_v48 = vmul.f32 %v2190_v7, %v5600_v58  ;;  %v2078_v62 = vmul.f32 %v3619_v59, %v5204_v52  ;;  %vm2095_vm13 = vcmp.eq.f32.partialorder %v5210_v35, 0.0  ;;  %vm2086_vm14 = vcmp.eq.f32.partialorder %v5216_v28, inf  ;;  %v3629_v30 = vpop.eup %3628  ;;  %v5602_v59 = vld [vmem:[#allocation25_spill] sm:$0xff]  ;;  %v5603_v7 = vld [vmem:[#allocation28_spill] sm:$0xff] }
 0x293   : > { %v2395_v42 = vadd.f32 %v4870_v31, %v2324_v21  ;;  %v2326_v46 = vmul.f32 %v4859_v3, %v2255_v36  ;;  %v2257_v20 = vmul.f32 %v2193_v19, %v5601_v54  ;;  %v2059_v53 = vsel %vm2058_vm5, %v5200_v63, %v2057_v40  ;;  %v3631_v0 = vpop.eup %3630 }
 0x294   : > { %vm2088_vm15 = vcmp.eq.f32.partialorder %v5216_v28, 0.0  ;;  %v3044_v32 = vpack.c.bf16 %v2392_v25, %v2392_v25  ;;  %v2394_v61 = vadd.f32 %v4870_v31, %v2323_v34  ;;  %v2325_v51 = vmul.f32 %v4859_v3, %v2254_v48  ;;  %v5335_v2 = vpop.eup %3632 }
 0x295   : > { %v2062_v33 = vsel %vm2060_vm6, %v2061_v13, %v2059_v53  ;;  %vm2107_vm0 = vcmp.eq.f32.partialorder %v5224_v57, inf  ;;  %vm2100_vm1 = vcmp.eq.f32.partialorder %v5230_v47, inf  ;;  %v3047_v50 = vpack.c.bf16 %v2395_v42, %v2395_v42 }
 0x296   : > { %v2397_v5 = vadd.f32 %v4870_v31, %v2326_v46  ;;  %v2328_v43 = vmul.f32 %v4859_v3, %v2257_v20  ;;  %v2192_v8 = vmul.f32 %v5200_v63, %v2062_v33  ;;  %vm2109_vm2 = vcmp.eq.f32.partialorder %v5224_v57, 0.0  ;;  %2713 = vst.msk [vmem:[%s4309_s7 + $0xb8] sm:$0xf] %vm2666_vm12, %v3044_v32  ;;  %v5345_v63 = vpop.eup %3634  ;;  %v5605_v46 = vld [vmem:[#allocation31_spill] sm:$0xff] }
 0x297   : > { %v3046_v13 = vpack.c.bf16 %v2394_v61, %v2394_v61  ;;  %v2396_v1 = vadd.f32 %v4870_v31, %v2325_v51  ;;  %v2080_v44 = vsel %vm2079_vm7, %v5204_v52, %v2078_v62  ;;  %v2071_v29 = vmul.f32 %v3621_v27, %v5206_v60  ;;  %2716 = vst.msk [vmem:[%s4309_s7 + $0xc4] sm:$0xf] %vm2666_vm12, %v3047_v50  ;;  %v5355_v4 = vpop.eup %3636 }
 0x298   : > { %vm2102_vm3 = vcmp.eq.f32.partialorder %v5230_v47, 0.0  ;;  %v3049_v55 = vpack.c.bf16 %v2397_v5, %v2397_v5  ;;  %v2399_v16 = vadd.f32 %v4870_v31, %v2328_v43  ;;  %v2256_v37 = vmul.f32 %v2192_v8, %v5602_v59  ;;  %v5607_v5 = vld [vmem:[#allocation32_spill] sm:$0xff]  ;;  %v5608_v8 = vld [vmem:[#allocation30_spill] sm:$0xff] }
 0x299   : > { %v2083_v26 = vsel %vm2081_vm8, %v2082_v39, %v2080_v44  ;;  %2715 = vst.msk [vmem:[%s4309_s7 + $0xc0] sm:$0xf] %vm2666_vm12, %v3046_v13  ;;  %v3048_v11 = vpack.c.bf16 %v2396_v1, %v2396_v1  ;;  %v2073_v27 = vsel %vm2072_vm9, %v5206_v60, %v2071_v29  ;;  %v2092_v15 = vmul.f32 %v3623_v23, %v5210_v35 }
 0x29a   : > { %v2195_v9 = vmul.f32 %v5204_v52, %v2083_v26  ;;  %vm2121_vm4 = vcmp.eq.f32.partialorder %v5236_v24, inf  ;;  %2718 = vst.msk [vmem:[%s4309_s7 + $0xcc] sm:$0xf] %vm2666_vm12, %v3049_v55  ;;  %v3051_v41 = vpack.c.bf16 %v2399_v16, %v2399_v16  ;;  %v2327_v39 = vmul.f32 %v4859_v3, %v2256_v37  ;;  %v5609_v26 = vld [vmem:[#allocation35_spill] sm:$0xff] }
 0x29b   : > { %v2076_v38 = vsel %vm2074_vm10, %v2075_v56, %v2073_v27  ;;  %v2085_v52 = vmul.f32 %v3625_v14, %v5216_v28  ;;  %vm2123_vm5 = vcmp.eq.f32.partialorder %v5236_v24, 0.0  ;;  %2717 = vst.msk [vmem:[%s4309_s7 + $0xc8] sm:$0xf] %vm2666_vm12, %v3048_v11  ;;  %v2094_v21 = vsel %vm2093_vm11, %v5210_v35, %v2092_v15  ;;  %v5604_v14 = vld [vmem:[#allocation26_spill] sm:$0xff] }
 0x29c   : > { %v2259_v49 = vmul.f32 %v2195_v9, %v5603_v7  ;;  %v2194_v23 = vmul.f32 %v5206_v60, %v2076_v38  ;;  %v2106_v12 = vmul.f32 %v3627_v17, %v5224_v57  ;;  %2720 = vst.msk [vmem:[%s4309_s7 + $0xd4] sm:$0xf] %vm2666_vm12, %v3051_v41  ;;  %v2398_v56 = vadd.f32 %v4870_v31, %v2327_v39 }
 0x29d   : > { %v2097_v36 = vsel %vm2095_vm13, %v2096_v22, %v2094_v21  ;;  %v2087_v60 = vsel %vm2086_vm14, %v5216_v28, %v2085_v52  ;;  %v2099_v19 = vmul.f32 %v3629_v30, %v5230_v47  ;;  %v2120_v32 = vmul.f32 %v3631_v0, %v5236_v24 }
 0x29e   : > { %v2330_v40 = vmul.f32 %v4859_v3, %v2259_v49  ;;  %v2258_v25 = vmul.f32 %v2194_v23, %v5604_v14  ;;  %v2197_v34 = vmul.f32 %v5210_v35, %v2097_v36  ;;  %v2090_v58 = vsel %vm2088_vm15, %v2089_v45, %v2087_v60  ;;  %v5606_v45 = vld [vmem:[#allocation29_spill] sm:$0xff]  ;;  %v3646_v14 = vld [vmem:[%s5503_s4] ss:$0 sm:$0xff] }
 0x29f   : > { %v3050_v48 = vpack.c.bf16 %v2398_v56, %v2398_v56  ;;  %v2196_v22 = vmul.f32 %v5216_v28, %v2090_v58  ;;  %v2108_v62 = vsel %vm2107_vm0, %v5224_v57, %v2106_v12  ;;  %v2101_v17 = vsel %vm2100_vm1, %v5230_v47, %v2099_v19  ;;  %v5610_v56 = vld [vmem:[#allocation33_spill] sm:$0xff] }
 0x2a0   : > { %v2401_v42 = vadd.f32 %v4870_v31, %v2330_v40  ;;  %v2329_v35 = vmul.f32 %v4859_v3, %v2258_v25  ;;  %v2261_v54 = vmul.f32 %v2197_v34, %v5605_v46  ;;  %v2111_v28 = vsel %vm2109_vm2, %v2110_v6, %v2108_v62 }
 0x2a1   : > { %2719 = vst.msk [vmem:[%s4309_s7 + $0xd0] sm:$0xf] %vm2666_vm12, %v3050_v48  ;;  %v2260_v20 = vmul.f32 %v2196_v22, %v5606_v45  ;;  %v2199_v53 = vmul.f32 %v5224_v57, %v2111_v28  ;;  %v2104_v30 = vsel %vm2102_vm3, %v2103_v10, %v2101_v17  ;;  %v2122_v57 = vsel %vm2121_vm4, %v5236_v24, %v2120_v32  ;;  %v3647_v22 = vld [vmem:[%s5504_s5] ss:$0 sm:$0xff]  ;;  %v5611_v17 = vld [vmem:[#allocation36_spill] sm:$0xff] }
 0x2a2   : > { %v3053_v61 = vpack.c.bf16 %v2401_v42, %v2401_v42  ;;  %v2400_v51 = vadd.f32 %v4870_v31, %v2329_v35  ;;  %v2332_v33 = vmul.f32 %v4859_v3, %v2261_v54  ;;  %v2198_v6 = vmul.f32 %v5230_v47, %v2104_v30  ;;  %v5612_v28 = vld [vmem:[#allocation34_spill] sm:$0xff] }
 0x2a3   : > { %v2331_v50 = vmul.f32 %v4859_v3, %v2260_v20  ;;  %v2263_v43 = vmul.f32 %v2199_v53, %v5607_v5  ;;  %3638 = vrsqrt.f32 %v5335_v2  ;;  %v2125_v47 = vsel %vm2123_vm5, %v2124_v18, %v2122_v57 }
 0x2a4   : > { %2722 = vst.msk [vmem:[%s4309_s7 + $0xdc] sm:$0xf] %vm2666_vm12, %v3053_v61  ;;  %v3052_v10 = vpack.c.bf16 %v2400_v51, %v2400_v51  ;;  %v2403_v0 = vadd.f32 %v4870_v31, %v2332_v33  ;;  %v2262_v13 = vmul.f32 %v2198_v6, %v5608_v8  ;;  %v2201_v29 = vmul.f32 %v5236_v24, %v2125_v47 }
 0x2a5   : > { %v2402_v1 = vadd.f32 %v4870_v31, %v2331_v50  ;;  %v2334_v44 = vmul.f32 %v4859_v3, %v2263_v43  ;;  %3640 = vrsqrt.f32 %v5345_v63  ;;  %vm2114_vm6 = vcmp.eq.f32.partialorder %v5335_v2, inf }
 0x2a6   : > { %2721 = vst.msk [vmem:[%s4309_s7 + $0xd8] sm:$0xf] %vm2666_vm12, %v3052_v10  ;;  %v3055_v55 = vpack.c.bf16 %v2403_v0, %v2403_v0  ;;  %v2333_v16 = vmul.f32 %v4859_v3, %v2262_v13  ;;  %v2265_v11 = vmul.f32 %v2201_v29, %v5609_v26  ;;  %3642 = vrsqrt.f32 %v5355_v4 }
 0x2a7   : > { %v3054_v59 = vpack.c.bf16 %v2402_v1, %v2402_v1  ;;  %v2405_v37 = vadd.f32 %v4870_v31, %v2334_v44  ;;  %v2117_v52 = vand.u32 2147483648, %v5335_v2  ;;  %vm2116_vm7 = vcmp.eq.f32.partialorder %v5335_v2, 0.0 }
 0x2a8   : > { %2724 = vst.msk [vmem:[%s4309_s7 + $0xe4] sm:$0xf] %vm2666_vm12, %v3055_v55  ;;  %v2404_v18 = vadd.f32 %v4870_v31, %v2333_v16  ;;  %v2336_v9 = vmul.f32 %v4859_v3, %v2265_v11  ;;  %vm2135_vm8 = vcmp.eq.f32.partialorder %v5345_v63, inf  ;;  %v2138_v12 = vand.u32 2147483648, %v5345_v63 }
 0x2a9   : > { %2723 = vst.msk [vmem:[%s4309_s7 + $0xe0] sm:$0xf] %vm2666_vm12, %v3054_v59  ;;  %v3057_v24 = vpack.c.bf16 %v2405_v37, %v2405_v37  ;;  %vm2137_vm9 = vcmp.eq.f32.partialorder %v5345_v63, 0.0  ;;  %vm2128_vm10 = vcmp.eq.f32.partialorder %v5355_v4, inf  ;;  %vm2130_vm11 = vcmp.eq.f32.partialorder %v5355_v4, 0.0 }
 0x2aa   : > { %v3056_v27 = vpack.c.bf16 %v2404_v18, %v2404_v18  ;;  %v2407_v15 = vadd.f32 %v4870_v31, %v2336_v9 }
 0x2ab   : > { %2726 = vst.msk [vmem:[%s4309_s7 + $0xec] sm:$0xf] %vm2666_vm12, %v3057_v24 }
 0x2ac   : > { %2725 = vst.msk [vmem:[%s4309_s7 + $0xe8] sm:$0xf] %vm2666_vm12, %v3056_v27  ;;  %v3059_v41 = vpack.c.bf16 %v2407_v15, %v2407_v15 }
 0x2ae   : > { %2728 = vst.msk [vmem:[%s4309_s7 + $0xf4] sm:$0xf] %vm2666_vm12, %v3059_v41 }
 0x2b0   : > { %v3639_v39 = vpop.eup %3638 }
 0x2b1   : > { %v2113_v38 = vmul.f32 %v3639_v39, %v5335_v2 }
 0x2b2   : > { %v3641_v7 = vpop.eup %3640 }
 0x2b3   : > { %v2115_v3 = vsel %vm2114_vm6, %v5335_v2, %v2113_v38  ;;  %v2134_v23 = vmul.f32 %v3641_v7, %v5345_v63  ;;  %v3643_v21 = vpop.eup %3642 }
 0x2b4   : > { %v2118_v49 = vsel %vm2116_vm7, %v2117_v52, %v2115_v3  ;;  %v2127_v19 = vmul.f32 %v3643_v21, %v5355_v4 }
 0x2b5   : > { %v2200_v31 = vmul.f32 %v5335_v2, %v2118_v49  ;;  %v2136_v60 = vsel %vm2135_vm8, %v5345_v63, %v2134_v23  ;;  %v2131_v2 = vand.u32 2147483648, %v5355_v4 }
 0x2b6   : > { %v2139_v40 = vsel %vm2137_vm9, %v2138_v12, %v2136_v60  ;;  %v2129_v58 = vsel %vm2128_vm10, %v5355_v4, %v2127_v19 }
 0x2b7   : > { %v2264_v36 = vmul.f32 %v2200_v31, %v5610_v56  ;;  %v2203_v34 = vmul.f32 %v5345_v63, %v2139_v40  ;;  %v2132_v48 = vsel %vm2130_vm11, %v2131_v2, %v2129_v58 }
 0x2b8   : > { %v2202_v35 = vmul.f32 %v5355_v4, %v2132_v48 }
 0x2b9   : > { %v2335_v25 = vmul.f32 %v3646_v14, %v2264_v36  ;;  %v2267_v42 = vmul.f32 %v2203_v34, %v5611_v17 }
 0x2ba   : > { %v2266_v63 = vmul.f32 %v2202_v35, %v5612_v28 }
 0x2bb   : > { %v2406_v62 = vadd.f32 %v3647_v22, %v2335_v25  ;;  %v2338_v54 = vmul.f32 %v3646_v14, %v2267_v42 }
 0x2bc   : > { %v2337_v20 = vmul.f32 %v3646_v14, %v2266_v63 }
 0x2bd   : > { %v3058_v46 = vpack.c.bf16 %v2406_v62, %v2406_v62  ;;  %v2409_v45 = vadd.f32 %v3647_v22, %v2338_v54 }
 0x2be   : > { %v2408_v30 = vadd.f32 %v3647_v22, %v2337_v20 }
 0x2bf   : > { %2727 = vst.msk [vmem:[%s4309_s7 + $0xf0] sm:$0xf] %vm2666_vm12, %v3058_v46  ;;  %v3061_v53 = vpack.c.bf16 %v2409_v45, %v2409_v45 }
 0x2c0   : > { %v3060_v32 = vpack.c.bf16 %v2408_v30, %v2408_v30 }
 0x2c1   : > { %2730 = vst.msk [vmem:[%s4309_s7 + $0xfc] sm:$0xf] %vm2666_vm12, %v3061_v53 }
 0x2c2   : > { %2729 = vst.msk [vmem:[%s4309_s7 + $0xf8] sm:$0xf] %vm2666_vm12, %v3060_v32 }
 0x2c3 PF: > { %s16_s21 = sadd.s32 1, %s3654_s21  }
 0x2c4   : > { %p13_p4 = scmp.ge.s32.totalorder %s16_s21, 6  }
 0x2c6   :  { %15 = sbr.rel (!%p13_p4) target bundleno = 1 (0x1), region = 74 }

// kernel: half_alexnet_forward.7
= control target key start
LH: loop header
LB: loop body
LE: loop exit
PB: predicated region body
PF: predicated region fallthrough
CT: control target
= control target key end

     0   :  { %v5010_v0 = vmov 0   ;;  %vm1307_vm0 = vcmask 1043456   ;;  %v5011_v38 = vmov 0.0   ;;  %vm5012_vm1 = vmmov 0   ;;  %s7360_s1 = inlined_call_operand.vmem [shape: bf16[600,64], index: 1, kind: input, shape index: {}]   ;;  %s7361_s0 = inlined_call_operand.vmem [shape: bf16[450,600], index: 0, kind: input, shape index: {}]   ;;  %s7362_s3 = inlined_call_operand.vmem [shape: f32[64,64], index: 3, kind: input, shape index: {}]   ;;  %s7363_s2 = inlined_call_operand.vmem [shape: f32[1,64], index: 2, kind: input, shape index: {}]   ;;  %s7364_s4 = inlined_call_operand.vmem [shape: f32[1,64], index: 4, kind: input, shape index: {}]   ;;  %s7365_s5 = inlined_call_operand.vmem [shape: f32[1,64], index: 5, kind: input, shape index: {}]   ;;  %s7366_s6 = inlined_call_operand.vmem [shape: bf16[450,64], index: 6, kind: output, shape index: {}]  }
   0x1   :  { %1311 = vmatprep.subr.bf16.mxu0 %v5010_v0  ;;  %v4541_v1 = vld [vmem:[%s7360_s1 + $0x38] sm:$0xff]   ;;  %1575 = vmatprep.subr.bf16.mxu1 %v5010_v0  ;;  %v4543_v3 = vld [vmem:[%s7360_s1 + $0x30] sm:$0xff]   ;;  %v4545_v5 = vld [vmem:[%s7360_s1 + $0x28] sm:$0xff]   ;;  %vm1219_vm2 = vcmask 719872   ;;  %vm2225_vm3 = vcmask 523264   ;;  %vm3674_vm10 = vcmask 519168  }
   0x2   :  { %v4542_v2 = vld [vmem:[%s7360_s1 + $0xb8] sm:$0xff]   ;;  %1312 = vmatpush1.bf16.msra.mxu0 %v4541_v1  ;;  %v4544_v4 = vld [vmem:[%s7360_s1 + $0xb0] sm:$0xff]   ;;  %v4546_v6 = vld [vmem:[%s7360_s1 + $0xa8] sm:$0xff]  }
   0x3   :  { %1576 = vmatpush1.bf16.msra.mxu1 %v4542_v2  ;;  %1313 = vmatprep.subr.bf16.mxu0 %v5010_v0  ;;  %v4547_v7 = vld [vmem:[%s7360_s1 + $0x20] sm:$0xff]   ;;  %v4549_v9 = vld [vmem:[%s7360_s1 + $0x18] sm:$0xff]   ;;  %v4551_v11 = vld [vmem:[%s7360_s1 + $0x10] sm:$0xff]  }
   0x4   :  { %1577 = vmatprep.subr.bf16.mxu1 %v5010_v0  ;;  %v4548_v8 = vld [vmem:[%s7360_s1 + $0xa0] sm:$0xff]   ;;  %v4550_v10 = vld [vmem:[%s7360_s1 + $0x98] sm:$0xff]   ;;  %v4552_v12 = vld [vmem:[%s7360_s1 + $0x90] sm:$0xff]  }
   0x5   :  { %v4553_v13 = vld [vmem:[%s7360_s1 + $0x8] sm:$0xff]   ;;  %v4555_v15 = vld [vmem:[%s7360_s1] sm:$0xff]   ;;  %v4557_v17 = vld [vmem:[%s7360_s1 + $0x78] sm:$0xff]  }
   0x6   :  { %1314 = vmatpush1.bf16.msra.mxu0 %v4543_v3  ;;  %v4554_v14 = vld [vmem:[%s7360_s1 + $0x88] sm:$0xff]   ;;  %v4556_v16 = vld [vmem:[%s7360_s1 + $0x80] sm:$0xff]   ;;  %v4558_v18 = vld [vmem:[%s7360_s1 + $0xf8] sm:$0xff]  }
   0x7   :  { %1578 = vmatpush1.bf16.msra.mxu1 %v4544_v4  ;;  %1315 = vmatprep.subr.bf16.mxu0 %v5010_v0  ;;  %v4574_v19 = vld [vmem:[%s7361_s0 + $0x4] ss:$20 sps:$4 sm:$0xff]   ;;  %v4559_v20 = vld [vmem:[%s7360_s1 + $0x70] sm:$0xff]   ;;  %v4578_v21 = vld [vmem:[%s7361_s0 + $0xc] ss:$20 sps:$4 sm:$0xff]  }
   0x8   :  { %1579 = vmatprep.subr.bf16.mxu1 %v5010_v0  ;;  %1343 = vmatprep.mubr.bf16.mxu0 %v4574_v19  ;;  %v4560_v22 = vld [vmem:[%s7360_s1 + $0xf0] sm:$0xff]   ;;  %v4561_v23 = vld [vmem:[%s7360_s1 + $0x68] sm:$0xff]   ;;  %v4563_v25 = vld [vmem:[%s7360_s1 + $0x60] sm:$0xff]  }
   0x9   :  { %1607 = vmatprep.mubr.bf16.mxu1 %v4578_v21  ;;  %v4562_v24 = vld [vmem:[%s7360_s1 + $0xe8] sm:$0xff]   ;;  %v4564_v26 = vld [vmem:[%s7360_s1 + $0xe0] sm:$0xff]   ;;  %v4565_v27 = vld [vmem:[%s7360_s1 + $0x58] sm:$0xff]  }
   0xa   :  { %1316 = vmatpush1.bf16.msra.mxu0 %v4545_v5  ;;  %v4566_v28 = vld [vmem:[%s7360_s1 + $0xd8] sm:$0xff]   ;;  %v4567_v29 = vld [vmem:[%s7360_s1 + $0x50] sm:$0xff]   ;;  %v4569_v31 = vld [vmem:[%s7360_s1 + $0x48] sm:$0xff]  }
   0xb   :  { %1580 = vmatpush1.bf16.msra.mxu1 %v4546_v6  ;;  %1317 = vmatprep.subr.bf16.mxu0 %v5010_v0  ;;  %v4568_v30 = vld [vmem:[%s7360_s1 + $0xd0] sm:$0xff]   ;;  %v4570_v32 = vld [vmem:[%s7360_s1 + $0xc8] sm:$0xff]   ;;  %v4571_v33 = vld [vmem:[%s7360_s1 + $0x40] sm:$0xff]  }
   0xc   :  { %1581 = vmatprep.subr.bf16.mxu1 %v5010_v0  ;;  %v4575_v34 = vld [vmem:[%s7360_s1 + $0xc0] sm:$0xff]   ;;  %v4579_v35 = vld [vmem:[%s7360_s1 + $0x128] ss:$0 sps:$4 sm:$0xff]   ;;  %v4589_v46 = vld [vmem:[%s7361_s0 + $0x5c] ss:$20 sps:$4 sm:$0xff]  }
   0xd   :  { %v4572_v36 = vld [vmem:[%s7361_s0] ss:$20 sps:$4 sm:$0xff]   ;;  %v4576_v37 = vld [vmem:[%s7361_s0 + $0x8] ss:$20 sps:$4 sm:$0xff]   ;;  %v1309_v39 = vsel %vm1307_vm0, %v4579_v35, 0 }
   0xe   :  { %1318 = vmatpush1.bf16.msra.mxu0 %v4547_v7  ;;  %v4580_v40 = vld [vmem:[%s7361_s0 + $0x2c] ss:$20 sps:$4 sm:$0xff]   ;;  %v4583_v41 = vld [vmem:[%s7361_s0 + $0x34] ss:$20 sps:$4 sm:$0xff]   ;;  %v4585_v44 = vld [vmem:[%s7361_s0 + $0x30] ss:$20 sps:$4 sm:$0xff]  }
   0xf   :  { %1582 = vmatpush1.bf16.msra.mxu1 %v4548_v8  ;;  %1319 = vmatprep.subr.bf16.mxu0 %v5010_v0  ;;  %v4607_v42 = vld [vmem:[%s7360_s1 + $0x120] sm:$0xff]   ;;  %v4582_v43 = vld [vmem:[%s7361_s0 + $0x28] ss:$20 sps:$4 sm:$0xff]   ;;  %v4666_v48 = vld [vmem:[%s7360_s1 + $0x110] sm:$0xff]  }
  0x10   :  { %1583 = vmatprep.subr.bf16.mxu1 %v5010_v0  ;;  %v4586_v45 = vld [vmem:[%s7361_s0 + $0x54] ss:$20 sps:$4 sm:$0xff]   ;;  %v4637_v47 = vld [vmem:[%s7360_s1 + $0x118] sm:$0xff]   ;;  %v4588_v49 = vld [vmem:[%s7361_s0 + $0x50] ss:$20 sps:$4 sm:$0xff]  }
  0x11   :  { %v4591_v50 = vld [vmem:[%s7361_s0 + $0x58] ss:$20 sps:$4 sm:$0xff]   ;;  %v4592_v51 = vld [vmem:[%s7361_s0 + $0x7c] ss:$20 sps:$4 sm:$0xff]   ;;  %v4597_v54 = vld [vmem:[%s7361_s0 + $0x80] ss:$20 sps:$4 sm:$0xff]  }
  0x12   :  { %1320 = vmatpush1.bf16.msra.mxu0 %v4549_v9  ;;  %v4595_v52 = vld [vmem:[%s7361_s0 + $0x84] ss:$20 sps:$4 sm:$0xff]   ;;  %v4601_v56 = vld [vmem:[%s7361_s0 + $0xac] ss:$20 sps:$4 sm:$0xff]   ;;  %v4603_v59 = vld [vmem:[%s7361_s0 + $0xa8] ss:$20 sps:$4 sm:$0xff]  }
  0x13   :  { %1584 = vmatpush1.bf16.msra.mxu1 %v4550_v10  ;;  %1321 = vmatprep.subr.bf16.mxu0 %v5010_v0  ;;  %v4594_v53 = vld [vmem:[%s7361_s0 + $0x78] ss:$20 sps:$4 sm:$0xff]   ;;  %v4600_v58 = vld [vmem:[%s7361_s0 + $0xa0] ss:$20 sps:$4 sm:$0xff]   ;;  %v4606_v62 = vld [vmem:[%s7361_s0 + $0xc8] ss:$20 sps:$4 sm:$0xff]  }
  0x14   :  { %1585 = vmatprep.subr.bf16.mxu1 %v5010_v0  ;;  %v4598_v55 = vld [vmem:[%s7361_s0 + $0xa4] ss:$20 sps:$4 sm:$0xff]   ;;  %v4697_v57 = vld [vmem:[%s7360_s1 + $0x108] sm:$0xff]   ;;  %v4614_v1 = vld [vmem:[%s7361_s0 + $0xfc] ss:$20 sps:$4 sm:$0xff]  }
  0x15   :  { %v4604_v60 = vld [vmem:[%s7361_s0 + $0xcc] ss:$20 sps:$4 sm:$0xff]   ;;  %v4608_v61 = vld [vmem:[%s7361_s0 + $0xd4] ss:$20 sps:$4 sm:$0xff]   ;;  %v4610_v63 = vld [vmem:[%s7361_s0 + $0xd0] ss:$20 sps:$4 sm:$0xff]  }
  0x16   :  { %1322 = vmatpush1.bf16.msra.mxu0 %v4551_v11  ;;  %v4613_v2 = vld [vmem:[%s7361_s0 + $0xf0] ss:$20 sps:$4 sm:$0xff]   ;;  %v4616_v3 = vld [vmem:[%s7361_s0 + $0xf8] ss:$20 sps:$4 sm:$0xff]   ;;  %v4622_v7 = vld [vmem:[%s7361_s0 + $0x120] ss:$20 sps:$4 sm:$0xff]  }
  0x17   :  { %1586 = vmatpush1.bf16.msra.mxu1 %v4552_v12  ;;  %1323 = vmatprep.subr.bf16.mxu0 %v5010_v0  ;;  %v4617_v4 = vld [vmem:[%s7361_s0 + $0x11c] ss:$20 sps:$4 sm:$0xff]   ;;  %v4620_v5 = vld [vmem:[%s7361_s0 + $0x124] ss:$20 sps:$4 sm:$0xff]   ;;  %v4626_v9 = vld [vmem:[%s7361_s0 + $0x14c] ss:$20 sps:$4 sm:$0xff]  }
  0x18   :  { %1587 = vmatprep.subr.bf16.mxu1 %v5010_v0  ;;  %v4619_v6 = vld [vmem:[%s7361_s0 + $0x118] ss:$20 sps:$4 sm:$0xff]   ;;  %v4625_v10 = vld [vmem:[%s7361_s0 + $0x140] ss:$20 sps:$4 sm:$0xff]   ;;  %v4628_v11 = vld [vmem:[%s7361_s0 + $0x148] ss:$20 sps:$4 sm:$0xff]  }
  0x19   :  { %v4623_v8 = vld [vmem:[%s7361_s0 + $0x144] ss:$20 sps:$4 sm:$0xff]   ;;  %v4629_v12 = vld [vmem:[%s7361_s0 + $0x16c] ss:$20 sps:$4 sm:$0xff]   ;;  %v2223_v35 = vld [vmem:[%s7362_s3 + $0x30] sm:$0xff] }
  0x1a   :  { %1324 = vmatpush1.bf16.msra.mxu0 %v4553_v13  ;;  %v4632_v13 = vld [vmem:[%s7361_s0 + $0x174] ss:$20 sps:$4 sm:$0xff]   ;;  %v2224_v19 = vld [vmem:[%s7362_s3 + $0x38] sm:$0xff] }
  0x1b   :  { %1588 = vmatpush1.bf16.msra.mxu1 %v4554_v14  ;;  %1325 = vmatprep.subr.bf16.mxu0 %v5010_v0  ;;  %v4728_v14 = vld [vmem:[%s7360_s1 + $0x100] sm:$0xff]   ;;  %v4641_v21 = vld [vmem:[%s7361_s0 + $0x198] ss:$20 sps:$4 sm:$0xff]  }
  0x1c   :  { %1589 = vmatprep.subr.bf16.mxu1 %v5010_v0 }
  0x1e   :  { %1326 = vmatpush1.bf16.msra.mxu0 %v4555_v15  ;;  %v4631_v15 = vld [vmem:[%s7361_s0 + $0x168] ss:$20 sps:$4 sm:$0xff]  }
  0x1f   :  { %1590 = vmatpush1.bf16.msra.mxu1 %v4556_v16  ;;  %1327 = vmatprep.subr.bf16.mxu0 %v5010_v0  ;;  %v4634_v16 = vld [vmem:[%s7361_s0 + $0x170] ss:$20 sps:$4 sm:$0xff]  }
  0x20   :  { %1591 = vmatprep.subr.bf16.mxu1 %v5010_v0 }
  0x22   :  { %1328 = vmatpush2.bf16.msra.mxu0 %v4557_v17  ;;  %v4635_v17 = vld [vmem:[%s7361_s0 + $0x194] ss:$20 sps:$4 sm:$0xff]  }
  0x23   :  { %1592 = vmatpush2.bf16.msra.mxu1 %v4558_v18  ;;  %1329 = vmatprep.subr.bf16.mxu0 %v5010_v0  ;;  %v4639_v18 = vld [vmem:[%s7361_s0 + $0x19c] ss:$20 sps:$4 sm:$0xff]  }
  0x24   :  { %1593 = vmatprep.subr.bf16.mxu1 %v5010_v0 }
  0x26   :  { %1330 = vmatpush2.bf16.msra.mxu0 %v4559_v20  ;;  %v4638_v20 = vld [vmem:[%s7361_s0 + $0x190] ss:$20 sps:$4 sm:$0xff]  }
  0x27   :  { %1594 = vmatpush2.bf16.msra.mxu1 %v4560_v22  ;;  %1331 = vmatprep.subr.bf16.mxu0 %v5010_v0  ;;  %v4642_v22 = vld [vmem:[%s7361_s0 + $0x1bc] ss:$20 sps:$4 sm:$0xff]  }
  0x28   :  { %1595 = vmatprep.subr.bf16.mxu1 %v5010_v0 }
  0x2a   :  { %1332 = vmatpush2.bf16.msra.mxu0 %v4561_v23  ;;  %v4645_v23 = vld [vmem:[%s7361_s0 + $0x1c4] ss:$20 sps:$4 sm:$0xff]  }
  0x2b   :  { %1596 = vmatpush2.bf16.msra.mxu1 %v4562_v24  ;;  %1333 = vmatprep.subr.bf16.mxu0 %v5010_v0  ;;  %v4644_v24 = vld [vmem:[%s7361_s0 + $0x1b8] ss:$20 sps:$4 sm:$0xff]  }
  0x2c   :  { %1597 = vmatprep.subr.bf16.mxu1 %v5010_v0 }
  0x2e   :  { %1334 = vmatpush2.bf16.msra.mxu0 %v4563_v25  ;;  %v4647_v25 = vld [vmem:[%s7361_s0 + $0x1c0] ss:$20 sps:$4 sm:$0xff]  }
  0x2f   :  { %1598 = vmatpush2.bf16.msra.mxu1 %v4564_v26  ;;  %1335 = vmatprep.subr.bf16.mxu0 %v5010_v0  ;;  %v4648_v26 = vld [vmem:[%s7361_s0 + $0x1e4] ss:$20 sps:$4 sm:$0xff]  }
  0x30   :  { %1599 = vmatprep.subr.bf16.mxu1 %v5010_v0 }
  0x32   :  { %1336 = vmatpush2.bf16.msra.mxu0 %v4565_v27  ;;  %v4651_v27 = vld [vmem:[%s7361_s0 + $0x1ec] ss:$20 sps:$4 sm:$0xff]  }
  0x33   :  { %1600 = vmatpush2.bf16.msra.mxu1 %v4566_v28  ;;  %1337 = vmatprep.subr.bf16.mxu0 %v5010_v0  ;;  %v4650_v28 = vld [vmem:[%s7361_s0 + $0x1e0] ss:$20 sps:$4 sm:$0xff]  }
  0x34   :  { %1601 = vmatprep.subr.bf16.mxu1 %v5010_v0 }
  0x36   :  { %1338 = vmatpush2.bf16.msra.mxu0 %v4567_v29  ;;  %v4653_v29 = vld [vmem:[%s7361_s0 + $0x1e8] ss:$20 sps:$4 sm:$0xff]  }
  0x37   :  { %1602 = vmatpush2.bf16.msra.mxu1 %v4568_v30  ;;  %1339 = vmatprep.subr.bf16.mxu0 %v5010_v0  ;;  %v4654_v30 = vld [vmem:[%s7361_s0 + $0x20c] ss:$20 sps:$4 sm:$0xff]  }
  0x38   :  { %1603 = vmatprep.subr.bf16.mxu1 %v5010_v0 }
  0x3a   :  { %1340 = vmatpush2.bf16.msra.mxu0 %v4569_v31  ;;  %v4657_v31 = vld [vmem:[%s7361_s0 + $0x214] ss:$20 sps:$4 sm:$0xff]  }
  0x3b   :  { %1604 = vmatpush2.bf16.msra.mxu1 %v4570_v32  ;;  %1341 = vmatprep.subr.bf16.mxu0 %v5010_v0  ;;  %v4656_v32 = vld [vmem:[%s7361_s0 + $0x208] ss:$20 sps:$4 sm:$0xff]  }
  0x3c   :  { %1605 = vmatprep.subr.bf16.mxu1 %v5010_v0  ;;  %v4611_v0 = vld [vmem:[%s7361_s0 + $0xf4] ss:$20 sps:$4 sm:$0xff]  }
  0x3e   :  { %1342 = vmatpush2.bf16.msra.mxu0 %v4571_v33  ;;  %v4659_v33 = vld [vmem:[%s7361_s0 + $0x210] ss:$20 sps:$4 sm:$0xff]  }
  0x3f   :  { %1606 = vmatpush2.bf16.msra.mxu1 %v4575_v34  ;;  %4223 = vmatprep.subr.bf16.mxu0 %v5011_v38  ;;  %v4660_v34 = vld [vmem:[%s7361_s0 + $0x234] ss:$20 sps:$4 sm:$0xff]  }
  0x40   :  { %4351 = vmatprep.subr.mxu1 %v5011_v38 }
  0x41   :  { %1344 = vmatmul.mubr.bf16.vlgmr.msra.gmra.mxu0 %v4572_v36  ;;  %v4663_v36 = vld [vmem:[%s7361_s0 + $0x23c] ss:$20 sps:$4 sm:$0xff]  }
  0x42   :  { %4224 = vmatpush3.bf16.msra.mxu0 %v1309_v39  ;;  %1608 = vmatmul.mubr.bf16.vlgmr.msra.gmra.mxu1 %v4576_v37  ;;  %v4662_v37 = vld [vmem:[%s7361_s0 + $0x230] ss:$20 sps:$4 sm:$0xff]   ;;  %v4665_v39 = vld [vmem:[%s7361_s0 + $0x238] ss:$20 sps:$4 sm:$0xff]  }
  0x43   :  { %1351 = vmatprep.mubr.bf16.mxu0 %v4580_v40  ;;  %1615 = vmatprep.mubr.bf16.mxu1 %v4583_v41  ;;  %v4667_v40 = vld [vmem:[%s7361_s0 + $0x25c] ss:$20 sps:$4 sm:$0xff]   ;;  %v4670_v41 = vld [vmem:[%s7361_s0 + $0x264] ss:$20 sps:$4 sm:$0xff]  }
  0x44   :  { %4225 = vmatprep.subr.bf16.mxu0 %v5011_v38  ;;  %4352 = vmatpush3.msra.mxu1 %v2224_v19  ;;  %v2220_v19 = vld [vmem:[%s7362_s3 + $0x18] sm:$0xff] }
  0x45   :  { %4353 = vmatprep.subr.mxu1 %v5011_v38 }
  0x46   :  { %4226 = vmatpush3.bf16.msra.mxu0 %v4607_v42  ;;  %4354 = vmatpush3.msra.mxu1 %v2223_v35  ;;  %v4669_v42 = vld [vmem:[%s7361_s0 + $0x258] ss:$20 sps:$4 sm:$0xff]   ;;  %v4738_v35 = vld [vmem:[%s7361_s0 + $0x41c] ss:$20 sps:$4 sm:$0xff]  }
  0x47   :  { %4227 = vmatprep.subr.bf16.mxu0 %v5011_v38  ;;  %4355 = vmatprep.subr.mxu1 %v5011_v38 }
  0x49   :  { %1352 = vmatmul.mubr.bf16.gmra.mxu0 %v4582_v43  ;;  %v4672_v43 = vld [vmem:[%s7361_s0 + $0x260] ss:$20 sps:$4 sm:$0xff]  }
  0x4a   :  { %1616 = vmatmul.mubr.bf16.gmra.mxu1 %v4585_v44  ;;  %1359 = vmatprep.mubr.bf16.mxu0 %v4586_v45  ;;  %v4673_v44 = vld [vmem:[%s7361_s0 + $0x284] ss:$20 sps:$4 sm:$0xff]   ;;  %v4676_v45 = vld [vmem:[%s7361_s0 + $0x28c] ss:$20 sps:$4 sm:$0xff]  }
  0x4b   :  { %1623 = vmatprep.mubr.bf16.mxu1 %v4589_v46  ;;  %4228 = vmatpush3.bf16.msra.mxu0 %v4637_v47  ;;  %v4675_v46 = vld [vmem:[%s7361_s0 + $0x280] ss:$20 sps:$4 sm:$0xff]   ;;  %v4678_v47 = vld [vmem:[%s7361_s0 + $0x288] ss:$20 sps:$4 sm:$0xff]  }
  0x4c   :  { %4229 = vmatprep.subr.bf16.mxu0 %v5011_v38 }
  0x4f   :  { %4230 = vmatpush3.bf16.msra.mxu0 %v4666_v48  ;;  %v4679_v48 = vld [vmem:[%s7361_s0 + $0x2ac] ss:$20 sps:$4 sm:$0xff]  }
  0x50   :  { %4231 = vmatprep.subr.bf16.mxu0 %v5011_v38 }
  0x51   :  { %1360 = vmatmul.mubr.bf16.gmra.mxu0 %v4588_v49  ;;  %v4682_v49 = vld [vmem:[%s7361_s0 + $0x2b4] ss:$20 sps:$4 sm:$0xff]  }
  0x52   :  { %1624 = vmatmul.mubr.bf16.gmra.mxu1 %v4591_v50  ;;  %1367 = vmatprep.mubr.bf16.mxu0 %v4592_v51  ;;  %v2222_v50 = vld [vmem:[%s7362_s3 + $0x28] sm:$0xff] }
  0x53   :  { %1631 = vmatprep.mubr.bf16.mxu1 %v4595_v52  ;;  %4232 = vmatpush3.bf16.msra.mxu0 %v4697_v57  ;;  %v4681_v51 = vld [vmem:[%s7361_s0 + $0x2a8] ss:$20 sps:$4 sm:$0xff]   ;;  %v4684_v52 = vld [vmem:[%s7361_s0 + $0x2b0] ss:$20 sps:$4 sm:$0xff]  }
  0x54   :  { %4233 = vmatprep.subr.bf16.mxu0 %v5011_v38  ;;  %4356 = vmatpush3.msra.mxu1 %v2222_v50  ;;  %v4691_v57 = vld [vmem:[%s7361_s0 + $0x2fc] ss:$20 sps:$4 sm:$0xff]  }
  0x55   :  { %4357 = vmatprep.subr.mxu1 %v5011_v38  ;;  %v4741_v50 = vld [vmem:[%s7361_s0 + $0x43c] ss:$20 sps:$4 sm:$0xff]  }
  0x57   :  { %4234 = vmatpush3.bf16.msra.mxu0 %v4728_v14  ;;  %v4722_v14 = vld [vmem:[%s7361_s0 + $0x3c4] ss:$20 sps:$4 sm:$0xff]  }
  0x59   :  { %1368 = vmatmul.mubr.bf16.gmra.mxu0 %v4594_v53  ;;  %v4685_v53 = vld [vmem:[%s7361_s0 + $0x2d4] ss:$20 sps:$4 sm:$0xff]  }
  0x5a   :  { %1632 = vmatmul.mubr.bf16.gmra.mxu1 %v4597_v54  ;;  %1375 = vmatprep.mubr.bf16.mxu0 %v4598_v55  ;;  %v4688_v54 = vld [vmem:[%s7361_s0 + $0x2dc] ss:$20 sps:$4 sm:$0xff]  }
  0x5b   :  { %1639 = vmatprep.mubr.bf16.mxu1 %v4601_v56  ;;  %v4687_v55 = vld [vmem:[%s7361_s0 + $0x2d0] ss:$20 sps:$4 sm:$0xff]   ;;  %v4690_v56 = vld [vmem:[%s7361_s0 + $0x2d8] ss:$20 sps:$4 sm:$0xff]  }
  0x61   :  { %1376 = vmatmul.mubr.bf16.gmra.mxu0 %v4600_v58  ;;  %v4694_v58 = vld [vmem:[%s7361_s0 + $0x304] ss:$20 sps:$4 sm:$0xff]  }
  0x62   :  { %1640 = vmatmul.mubr.bf16.gmra.mxu1 %v4603_v59  ;;  %1383 = vmatprep.mubr.bf16.mxu0 %v4604_v60  ;;  %v4693_v59 = vld [vmem:[%s7361_s0 + $0x2f8] ss:$20 sps:$4 sm:$0xff]   ;;  %v4696_v60 = vld [vmem:[%s7361_s0 + $0x300] ss:$20 sps:$4 sm:$0xff]  }
  0x63   :  { %1647 = vmatprep.mubr.bf16.mxu1 %v4608_v61  ;;  %v4698_v61 = vld [vmem:[%s7361_s0 + $0x324] ss:$20 sps:$4 sm:$0xff]  }
  0x69   :  { %1384 = vmatmul.mubr.bf16.gmra.mxu0 %v4606_v62  ;;  %v4701_v62 = vld [vmem:[%s7361_s0 + $0x32c] ss:$20 sps:$4 sm:$0xff]  }
  0x6a   :  { %1648 = vmatmul.mubr.bf16.gmra.mxu1 %v4610_v63  ;;  %1391 = vmatprep.mubr.bf16.mxu0 %v4611_v0  ;;  %v4700_v63 = vld [vmem:[%s7361_s0 + $0x320] ss:$20 sps:$4 sm:$0xff]   ;;  %v4703_v0 = vld [vmem:[%s7361_s0 + $0x328] ss:$20 sps:$4 sm:$0xff]  }
  0x6b   :  { %1655 = vmatprep.mubr.bf16.mxu1 %v4614_v1  ;;  %v4704_v1 = vld [vmem:[%s7361_s0 + $0x34c] ss:$20 sps:$4 sm:$0xff]  }
  0x71   :  { %1392 = vmatmul.mubr.bf16.gmra.mxu0 %v4613_v2  ;;  %v4707_v2 = vld [vmem:[%s7361_s0 + $0x354] ss:$20 sps:$4 sm:$0xff]  }
  0x72   :  { %1656 = vmatmul.mubr.bf16.gmra.mxu1 %v4616_v3  ;;  %1399 = vmatprep.mubr.bf16.mxu0 %v4617_v4  ;;  %v2221_v3 = vld [vmem:[%s7362_s3 + $0x20] sm:$0xff]  ;;  %v4706_v4 = vld [vmem:[%s7361_s0 + $0x348] ss:$20 sps:$4 sm:$0xff]  }
  0x73   :  { %1663 = vmatprep.mubr.bf16.mxu1 %v4620_v5  ;;  %4358 = vmatpush3.msra.mxu1 %v2221_v3  ;;  %v4709_v5 = vld [vmem:[%s7361_s0 + $0x350] ss:$20 sps:$4 sm:$0xff]   ;;  %v4746_v3 = vld [vmem:[%s7361_s0 + $0x440] ss:$20 sps:$4 sm:$0xff]  }
  0x74   :  { %4359 = vmatprep.subr.mxu1 %v5011_v38 }
  0x75   :  { %4360 = vmatpush3.msra.mxu1 %v2220_v19 }
  0x76   :  { %4361 = vmatprep.subr.mxu1 %v5011_v38 }
  0x79   :  { %1400 = vmatmul.mubr.bf16.gmra.mxu0 %v4619_v6  ;;  %v4710_v6 = vld [vmem:[%s7361_s0 + $0x374] ss:$20 sps:$4 sm:$0xff]  }
  0x7a   :  { %1664 = vmatmul.mubr.bf16.gmra.mxu1 %v4622_v7  ;;  %1407 = vmatprep.mubr.bf16.mxu0 %v4623_v8  ;;  %v4713_v7 = vld [vmem:[%s7361_s0 + $0x37c] ss:$20 sps:$4 sm:$0xff]  }
  0x7b   :  { %1671 = vmatprep.mubr.bf16.mxu1 %v4626_v9  ;;  %v4712_v8 = vld [vmem:[%s7361_s0 + $0x370] ss:$20 sps:$4 sm:$0xff]   ;;  %v4715_v9 = vld [vmem:[%s7361_s0 + $0x378] ss:$20 sps:$4 sm:$0xff]  }
  0x81   :  { %1408 = vmatmul.mubr.bf16.gmra.mxu0 %v4625_v10  ;;  %v4716_v10 = vld [vmem:[%s7361_s0 + $0x39c] ss:$20 sps:$4 sm:$0xff]  }
  0x82   :  { %1672 = vmatmul.mubr.bf16.gmra.mxu1 %v4628_v11  ;;  %1415 = vmatprep.mubr.bf16.mxu0 %v4629_v12  ;;  %v4719_v11 = vld [vmem:[%s7361_s0 + $0x3a4] ss:$20 sps:$4 sm:$0xff]  }
  0x83   :  { %1679 = vmatprep.mubr.bf16.mxu1 %v4632_v13  ;;  %v4718_v12 = vld [vmem:[%s7361_s0 + $0x398] ss:$20 sps:$4 sm:$0xff]   ;;  %v4721_v13 = vld [vmem:[%s7361_s0 + $0x3a0] ss:$20 sps:$4 sm:$0xff]  }
  0x89   :  { %1416 = vmatmul.mubr.bf16.gmra.mxu0 %v4631_v15  ;;  %v4725_v15 = vld [vmem:[%s7361_s0 + $0x3cc] ss:$20 sps:$4 sm:$0xff]  }
  0x8a   :  { %1680 = vmatmul.mubr.bf16.gmra.mxu1 %v4634_v16  ;;  %1423 = vmatprep.mubr.bf16.mxu0 %v4635_v17  ;;  %v4724_v16 = vld [vmem:[%s7361_s0 + $0x3c0] ss:$20 sps:$4 sm:$0xff]   ;;  %v4727_v17 = vld [vmem:[%s7361_s0 + $0x3c8] ss:$20 sps:$4 sm:$0xff]  }
  0x8b   :  { %1687 = vmatprep.mubr.bf16.mxu1 %v4639_v18  ;;  %v4729_v18 = vld [vmem:[%s7361_s0 + $0x3ec] ss:$20 sps:$4 sm:$0xff]  }
  0x91   :  { %1424 = vmatmul.mubr.bf16.gmra.mxu0 %v4638_v20  ;;  %v5526_v20 = vld [vmem:[%s7363_s2] ss:$0 sm:$0xff] }
  0x92   :  { %1688 = vmatmul.mubr.bf16.gmra.mxu1 %v4641_v21  ;;  %1431 = vmatprep.mubr.bf16.mxu0 %v4642_v22  ;;  %v4732_v21 = vld [vmem:[%s7361_s0 + $0x3f4] ss:$20 sps:$4 sm:$0xff]  }
  0x93   :  { %1695 = vmatprep.mubr.bf16.mxu1 %v4645_v23 }
  0x99   :  { %1432 = vmatmul.mubr.bf16.gmra.mxu0 %v4644_v24 }
  0x9a   :  { %1696 = vmatmul.mubr.bf16.gmra.mxu1 %v4647_v25  ;;  %1439 = vmatprep.mubr.bf16.mxu0 %v4648_v26 }
  0x9b   :  { %1703 = vmatprep.mubr.bf16.mxu1 %v4651_v27 }
  0xa1   :  { %1440 = vmatmul.mubr.bf16.gmra.mxu0 %v4650_v28 }
  0xa2   :  { %1704 = vmatmul.mubr.bf16.gmra.mxu1 %v4653_v29  ;;  %1447 = vmatprep.mubr.bf16.mxu0 %v4654_v30  ;;  %v4731_v29 = vld [vmem:[%s7361_s0 + $0x3e8] ss:$20 sps:$4 sm:$0xff]  }
  0xa3   :  { %1711 = vmatprep.mubr.bf16.mxu1 %v4657_v31 }
  0xa9   :  { %1448 = vmatmul.mubr.bf16.gmra.mxu0 %v4656_v32  ;;  %v4734_v32 = vld [vmem:[%s7361_s0 + $0x3f0] ss:$20 sps:$4 sm:$0xff]  }
  0xaa   :  { %1712 = vmatmul.mubr.bf16.gmra.mxu1 %v4659_v33  ;;  %1455 = vmatprep.mubr.bf16.mxu0 %v4660_v34  ;;  %v4735_v33 = vld [vmem:[%s7361_s0 + $0x414] ss:$20 sps:$4 sm:$0xff]  }
  0xab   :  { %1719 = vmatprep.mubr.bf16.mxu1 %v4663_v36 }
  0xb1   :  { %1456 = vmatmul.mubr.bf16.gmra.mxu0 %v4662_v37 }
  0xb2   :  { %1720 = vmatmul.mubr.bf16.gmra.mxu1 %v4665_v39  ;;  %1463 = vmatprep.mubr.bf16.mxu0 %v4667_v40 }
  0xb3   :  { %1727 = vmatprep.mubr.bf16.mxu1 %v4670_v41 }
  0xb9   :  { %1464 = vmatmul.mubr.bf16.gmra.mxu0 %v4669_v42 }
  0xba   :  { %1728 = vmatmul.mubr.bf16.gmra.mxu1 %v4672_v43  ;;  %1471 = vmatprep.mubr.bf16.mxu0 %v4673_v44 }
  0xbb   :  { %1735 = vmatprep.mubr.bf16.mxu1 %v4676_v45 }
  0xc1   :  { %1472 = vmatmul.mubr.bf16.gmra.mxu0 %v4675_v46  ;;  %v4737_v46 = vld [vmem:[%s7361_s0 + $0x410] ss:$20 sps:$4 sm:$0xff]  }
  0xc2   :  { %1736 = vmatmul.mubr.bf16.gmra.mxu1 %v4678_v47  ;;  %1479 = vmatprep.mubr.bf16.mxu0 %v4679_v48 }
  0xc3   :  { %1743 = vmatprep.mubr.bf16.mxu1 %v4682_v49  ;;  %v4740_v49 = vld [vmem:[%s7361_s0 + $0x418] ss:$20 sps:$4 sm:$0xff]  }
  0xc9   :  { %1480 = vmatmul.mubr.bf16.gmra.mxu0 %v4681_v51 }
  0xca   :  { %1744 = vmatmul.mubr.bf16.gmra.mxu1 %v4684_v52  ;;  %1487 = vmatprep.mubr.bf16.mxu0 %v4685_v53  ;;  %v4744_v52 = vld [vmem:[%s7361_s0 + $0x444] ss:$20 sps:$4 sm:$0xff]  }
  0xcb   :  { %1751 = vmatprep.mubr.bf16.mxu1 %v4688_v54 }
  0xd1   :  { %1488 = vmatmul.mubr.bf16.gmra.mxu0 %v4687_v55 }
  0xd2   :  { %1752 = vmatmul.mubr.bf16.gmra.mxu1 %v4690_v56  ;;  %1495 = vmatprep.mubr.bf16.mxu0 %v4691_v57 }
  0xd3   :  { %1759 = vmatprep.mubr.bf16.mxu1 %v4694_v58 }
  0xd9   :  { %1496 = vmatmul.mubr.bf16.gmra.mxu0 %v4693_v59  ;;  %v192_v59 = vld [vmem:[%s7361_s0 + $0x460] sm:$0x11] }
  0xda   :  { %1760 = vmatmul.mubr.bf16.gmra.mxu1 %v4696_v60  ;;  %1503 = vmatprep.mubr.bf16.mxu0 %v4698_v61 }
  0xdb   :  { %1767 = vmatprep.mubr.bf16.mxu1 %v4701_v62  ;;  %v193_v62 = vld [vmem:[%s7361_s0 + $0x468] sm:$0x11] }
  0xe1   :  { %1504 = vmatmul.mubr.bf16.gmra.mxu0 %v4700_v63 }
  0xe2   :  { %1768 = vmatmul.mubr.bf16.gmra.mxu1 %v4703_v0  ;;  %1511 = vmatprep.mubr.bf16.mxu0 %v4704_v1  ;;  %v4743_v0 = vld [vmem:[%s7361_s0 + $0x438] ss:$20 sps:$4 sm:$0xff]  }
  0xe3   :  { %1775 = vmatprep.mubr.bf16.mxu1 %v4707_v2 }
  0xe9   :  { %1512 = vmatmul.mubr.bf16.gmra.mxu0 %v4706_v4  ;;  %v3879_v4 = vcombine.high %v192_v59, %v192_v59 }
  0xea   :  { %1776 = vmatmul.mubr.bf16.gmra.mxu1 %v4709_v5  ;;  %1519 = vmatprep.mubr.bf16.mxu0 %v4710_v6  ;;  %v3881_v6 = vcombine.high %v193_v62, %v193_v62 }
  0xeb   :  { %1783 = vmatprep.mubr.bf16.mxu1 %v4713_v7 }
  0xf1   :  { %1520 = vmatmul.mubr.bf16.gmra.mxu0 %v4712_v8 }
  0xf2   :  { %1784 = vmatmul.mubr.bf16.gmra.mxu1 %v4715_v9  ;;  %1527 = vmatprep.mubr.bf16.mxu0 %v4716_v10 }
  0xf3   :  { %1791 = vmatprep.mubr.bf16.mxu1 %v4719_v11 }
  0xf9   :  { %1528 = vmatmul.mubr.bf16.gmra.mxu0 %v4718_v12  ;;  %v2219_v12 = vld [vmem:[%s7362_s3 + $0x10] sm:$0xff] }
  0xfa   :  { %1792 = vmatmul.mubr.bf16.gmra.mxu1 %v4721_v13  ;;  %1535 = vmatprep.mubr.bf16.mxu0 %v4722_v14 }
  0xfb   :  { %1799 = vmatprep.mubr.bf16.mxu1 %v4725_v15  ;;  %4362 = vmatpush3.msra.mxu1 %v2219_v12 }
  0xfc   :  { %4363 = vmatprep.subr.mxu1 %v5011_v38 }
 0x101   :  { %v1345_v22 = vpop.f32.mrf.mxu0  ;;  %1536 = vmatmul.mubr.bf16.gmra.mxu0 %v4724_v16 }
 0x102   :  { %v1346_v23 = vadd.f32 %v5526_v20, %v1345_v22  ;;  %v1609_v24 = vpop.f32.mrf.mxu1  ;;  %1800 = vmatmul.mubr.bf16.gmra.mxu1 %v4727_v17  ;;  %1543 = vmatprep.mubr.bf16.mxu0 %v4729_v18  ;;  %v3878_v17 = vcombine.low %v192_v59, %v192_v59 }
 0x103   :  { %v1347_v25 = vpop.f32.mrf.mxu0  ;;  %1807 = vmatprep.mubr.bf16.mxu1 %v4732_v21  ;;  %v3880_v21 = vcombine.low %v193_v62, %v193_v62 }
 0x104   :  { %v5533_v26 = vadd.f32 %v1609_v24, %v1346_v23  ;;  %v1611_v27 = vpop.f32.mrf.mxu1 }
 0x105   :  { %v1348_v28 = vpop.f32.mrf.mxu0 }
 0x106   :  { %v1349_v30 = vadd.f32 %v5526_v20, %v1348_v28  ;;  %v1612_v31 = vpop.f32.mrf.mxu1 }
 0x107   :  { %v1350_v34 = vpop.f32.mrf.mxu0 }
 0x108   :  { %v5548_v36 = vadd.f32 %v1612_v31, %v1349_v30  ;;  %v1614_v37 = vpop.f32.mrf.mxu1 }
 0x109   :  { %v1353_v39 = vpop.f32.mrf.mxu0  ;;  %1544 = vmatmul.mubr.bf16.gmra.mxu0 %v4731_v29 }
 0x10a   :  { %v1354_v40 = vadd.f32 %v5526_v20, %v1353_v39  ;;  %v1617_v41 = vpop.f32.mrf.mxu1  ;;  %1808 = vmatmul.mubr.bf16.gmra.mxu1 %v4734_v32  ;;  %1551 = vmatprep.mubr.bf16.mxu0 %v4735_v33  ;;  %v4751_v33 = vld [vmem:[%s7361_s0 + $0x10] ss:$20 sps:$4 sm:$0xff]  }
 0x10b   :  { %v1355_v42 = vpop.f32.mrf.mxu0  ;;  %1815 = vmatprep.mubr.bf16.mxu1 %v4738_v35 }
 0x10c   :  { %v5551_v43 = vadd.f32 %v1617_v41, %v1354_v40  ;;  %v1619_v44 = vpop.f32.mrf.mxu1 }
 0x10d   :  { %v1356_v45 = vpop.f32.mrf.mxu0 }
 0x10e   :  { %v1357_v47 = vadd.f32 %v5526_v20, %v1356_v45  ;;  %v1620_v48 = vpop.f32.mrf.mxu1 }
 0x10f   :  { %v1358_v51 = vpop.f32.mrf.mxu0 }
 0x110   :  { %v5566_v53 = vadd.f32 %v1620_v48, %v1357_v47  ;;  %v1622_v54 = vpop.f32.mrf.mxu1 }
 0x111   :  { %v1361_v55 = vpop.f32.mrf.mxu0  ;;  %1552 = vmatmul.mubr.bf16.gmra.mxu0 %v4737_v46 }
 0x112   :  { %v1362_v56 = vadd.f32 %v5526_v20, %v1361_v55  ;;  %v1625_v57 = vpop.f32.mrf.mxu1  ;;  %1816 = vmatmul.mubr.bf16.gmra.mxu1 %v4740_v49  ;;  %1559 = vmatprep.mubr.bf16.mxu0 %v4741_v50  ;;  %v4752_v49 = vld [vmem:[%s7361_s0 + $0x38] ss:$20 sps:$4 sm:$0xff]  }
 0x113   :  { %v1363_v58 = vpop.f32.mrf.mxu0  ;;  %1823 = vmatprep.mubr.bf16.mxu1 %v4744_v52 }
 0x114   :  { %v5572_v60 = vadd.f32 %v1625_v57, %v1362_v56  ;;  %v1627_v61 = vpop.f32.mrf.mxu1 }
 0x115   :  { %v1364_v63 = vpop.f32.mrf.mxu0 }
 0x116   :  { %v1365_v1 = vadd.f32 %v5526_v20, %v1364_v63  ;;  %v1628_v2 = vpop.f32.mrf.mxu1 }
 0x117   :  { %v1366_v5 = vpop.f32.mrf.mxu0 }
 0x118   :  { %v5584_v7 = vadd.f32 %v1628_v2, %v1365_v1  ;;  %v1630_v8 = vpop.f32.mrf.mxu1 }
 0x119   :  { %v1369_v9 = vpop.f32.mrf.mxu0  ;;  %1560 = vmatmul.mubr.bf16.gmra.mxu0 %v4743_v0  ;;  %v4753_v0 = vld [vmem:[%s7361_s0 + $0x60] ss:$20 sps:$4 sm:$0xff]  }
 0x11a   :  { %v1370_v10 = vadd.f32 %v5526_v20, %v1369_v9  ;;  %v1633_v11 = vpop.f32.mrf.mxu1  ;;  %1824 = vmatmul.mubr.bf16.gmra.mxu1 %v4746_v3  ;;  %1567 = vmatprep.mubr.bf16.mxu0 %v3879_v4 }
 0x11b   :  { %v1371_v13 = vpop.f32.mrf.mxu0  ;;  %1831 = vmatprep.mubr.bf16.mxu1 %v3881_v6  ;;  %v2218_v6 = vld [vmem:[%s7362_s3 + $0x8] sm:$0xff] }
 0x11c   :  { %v5590_v14 = vadd.f32 %v1633_v11, %v1370_v10  ;;  %v1635_v15 = vpop.f32.mrf.mxu1  ;;  %4364 = vmatpush3.msra.mxu1 %v2218_v6  ;;  %v4757_v6 = vld [vmem:[%s7361_s0 + $0x100] ss:$20 sps:$4 sm:$0xff]  }
 0x11d   :  { %v1372_v16 = vpop.f32.mrf.mxu0  ;;  %4365 = vmatprep.subr.mxu1 %v5011_v38 }
 0x11e   :  { %v1373_v18 = vadd.f32 %v5526_v20, %v1372_v16  ;;  %v1636_v19 = vpop.f32.mrf.mxu1  ;;  %v4754_v16 = vld [vmem:[%s7361_s0 + $0x88] ss:$20 sps:$4 sm:$0xff]  }
 0x11f   :  { %v1374_v22 = vpop.f32.mrf.mxu0 }
 0x120   :  { %v5594_v23 = vadd.f32 %v1636_v19, %v1373_v18  ;;  %v1638_v24 = vpop.f32.mrf.mxu1 }
 0x121   :  { %v1377_v25 = vpop.f32.mrf.mxu0  ;;  %1568 = vmatmul.mubr.bf16.gmra.mxu0 %v3878_v17 }
 0x122   :  { %v1378_v27 = vadd.f32 %v5526_v20, %v1377_v25  ;;  %v1641_v28 = vpop.f32.mrf.mxu1  ;;  %1832 = vmatmul.mubr.bf16.gmra.mxu1 %v3880_v21  ;;  %4235 = vmatprep.mubr.msk.bf16.mxu0 %vm5012_vm1, %v5011_v38 }
 0x123   :  { %v1379_v29 = vpop.f32.mrf.mxu0  ;;  %4367 = vmatprep.mubr.msk.f32.mxu1 %vm5012_vm1, %v5011_v38 }
 0x124   :  { %v5601_v30 = vadd.f32 %v1641_v28, %v1378_v27  ;;  %v1643_v31 = vpop.f32.mrf.mxu1 }
 0x125   :  { %v1380_v32 = vpop.f32.mrf.mxu0 }
 0x126   :  { %v1381_v34 = vadd.f32 %v5526_v20, %v1380_v32  ;;  %v1644_v35 = vpop.f32.mrf.mxu1 }
 0x127   :  { %v1382_v37 = vpop.f32.mrf.mxu0 }
 0x128   :  { %v5607_v39 = vadd.f32 %v1644_v35, %v1381_v34  ;;  %v1646_v40 = vpop.f32.mrf.mxu1 }
 0x129   :  { %v1385_v41 = vpop.f32.mrf.mxu0  ;;  %4236 = vmatmul.mubr.msk.bf16.vlgmr.msra.gmra.mxu0 %vm1219_vm2, %v4751_v33  ;;  %v4755_v33 = vld [vmem:[%s7361_s0 + $0xb0] ss:$20 sps:$4 sm:$0xff]  }
 0x12a   :  { %v1386_v42 = vadd.f32 %v5526_v20, %v1385_v41  ;;  %v1649_v44 = vpop.f32.mrf.mxu1  ;;  %4239 = vmatprep.mubr.msk.bf16.mxu0 %vm5012_vm1, %v5011_v38 }
 0x12b   :  { %v1387_v45 = vpop.f32.mrf.mxu0 }
 0x12c   :  { %v5613_v46 = vadd.f32 %v1649_v44, %v1386_v42  ;;  %v1651_v47 = vpop.f32.mrf.mxu1 }
 0x12d   :  { %v1388_v48 = vpop.f32.mrf.mxu0 }
 0x12e   :  { %v1389_v50 = vadd.f32 %v5526_v20, %v1388_v48  ;;  %v1652_v51 = vpop.f32.mrf.mxu1 }
 0x12f   :  { %v1390_v52 = vpop.f32.mrf.mxu0 }
 0x130   :  { %v5619_v54 = vadd.f32 %v1652_v51, %v1389_v50  ;;  %v1654_v55 = vpop.f32.mrf.mxu1  ;;  %v4756_v51 = vld [vmem:[%s7361_s0 + $0xd8] ss:$20 sps:$4 sm:$0xff]  }
 0x131   :  { %v1393_v56 = vpop.f32.mrf.mxu0  ;;  %4240 = vmatmul.mubr.msk.bf16.gmra.mxu0 %vm1219_vm2, %v4752_v49 }
 0x132   :  { %v1394_v57 = vadd.f32 %v5526_v20, %v1393_v56  ;;  %v1657_v58 = vpop.f32.mrf.mxu1  ;;  %4243 = vmatprep.mubr.msk.bf16.mxu0 %vm5012_vm1, %v5011_v38 }
 0x133   :  { %v1395_v59 = vpop.f32.mrf.mxu0 }
 0x134   :  { %v5625_v61 = vadd.f32 %v1657_v58, %v1394_v57  ;;  %v1659_v62 = vpop.f32.mrf.mxu1 }
 0x135   :  { %v1396_v63 = vpop.f32.mrf.mxu0 }
 0x136   :  { %v1397_v1 = vadd.f32 %v5526_v20, %v1396_v63  ;;  %v1660_v2 = vpop.f32.mrf.mxu1 }
 0x137   :  { %v1398_v3 = vpop.f32.mrf.mxu0 }
 0x138   :  { %v5631_v4 = vadd.f32 %v1660_v2, %v1397_v1  ;;  %v1662_v5 = vpop.f32.mrf.mxu1  ;;  %v2217_v3 = vld [vmem:[%s7362_s3] sm:$0xff] }
 0x139   :  { %v1401_v8 = vpop.f32.mrf.mxu0  ;;  %4244 = vmatmul.mubr.msk.bf16.gmra.mxu0 %vm1219_vm2, %v4753_v0  ;;  %4366 = vmatpush3.msra.mxu1 %v2217_v3  ;;  %v4760_v3 = vld [vmem:[%s7361_s0 + $0x178] ss:$20 sps:$4 sm:$0xff]  }
 0x13a   :  { %v1402_v9 = vadd.f32 %v5526_v20, %v1401_v8  ;;  %v1665_v10 = vpop.f32.mrf.mxu1  ;;  %4247 = vmatprep.mubr.msk.bf16.mxu0 %vm5012_vm1, %v5011_v38 }
 0x13b   :  { %v1403_v11 = vpop.f32.mrf.mxu0 }
 0x13c   :  { %v5641_v12 = vadd.f32 %v1665_v10, %v1402_v9  ;;  %v1667_v13 = vpop.f32.mrf.mxu1 }
 0x13d   :  { %v1404_v15 = vpop.f32.mrf.mxu0 }
 0x13e   :  { %v1405_v17 = vadd.f32 %v5526_v20, %v1404_v15  ;;  %v1668_v18 = vpop.f32.mrf.mxu1 }
 0x13f   :  { %v1406_v19 = vpop.f32.mrf.mxu0 }
 0x140   :  { %v5647_v21 = vadd.f32 %v1668_v18, %v1405_v17  ;;  %v1670_v22 = vpop.f32.mrf.mxu1 }
 0x141   :  { %v1409_v24 = vpop.f32.mrf.mxu0  ;;  %4248 = vmatmul.mubr.msk.bf16.gmra.mxu0 %vm1219_vm2, %v4754_v16 }
 0x142   :  { %v1410_v25 = vadd.f32 %v5526_v20, %v1409_v24  ;;  %v1673_v27 = vpop.f32.mrf.mxu1  ;;  %4251 = vmatprep.mubr.msk.bf16.mxu0 %vm5012_vm1, %v5011_v38 }
 0x143   :  { %v1411_v28 = vpop.f32.mrf.mxu0 }
 0x144   :  { %v5653_v29 = vadd.f32 %v1673_v27, %v1410_v25  ;;  %v1675_v31 = vpop.f32.mrf.mxu1  ;;  %v4758_v25 = vld [vmem:[%s7361_s0 + $0x128] ss:$20 sps:$4 sm:$0xff]  }
 0x145   :  { %v1412_v32 = vpop.f32.mrf.mxu0 }
 0x146   :  { %v1413_v34 = vadd.f32 %v5526_v20, %v1412_v32  ;;  %v1676_v35 = vpop.f32.mrf.mxu1 }
 0x147   :  { %v1414_v37 = vpop.f32.mrf.mxu0 }
 0x148   :  { %v5659_v40 = vadd.f32 %v1676_v35, %v1413_v34  ;;  %v1678_v41 = vpop.f32.mrf.mxu1 }
 0x149   :  { %v1417_v42 = vpop.f32.mrf.mxu0  ;;  %4252 = vmatmul.mubr.msk.bf16.gmra.mxu0 %vm1219_vm2, %v4755_v33 }
 0x14a   :  { %v1418_v44 = vadd.f32 %v5526_v20, %v1417_v42  ;;  %v1681_v45 = vpop.f32.mrf.mxu1  ;;  %4255 = vmatprep.mubr.msk.bf16.mxu0 %vm5012_vm1, %v5011_v38 }
 0x14b   :  { %v1419_v47 = vpop.f32.mrf.mxu0 }
 0x14c   :  { %v5665_v48 = vadd.f32 %v1681_v45, %v1418_v44  ;;  %v1683_v49 = vpop.f32.mrf.mxu1  ;;  %v4759_v47 = vld [vmem:[%s7361_s0 + $0x150] ss:$20 sps:$4 sm:$0xff]  }
 0x14d   :  { %v1420_v50 = vpop.f32.mrf.mxu0 }
 0x14e   :  { %v1421_v52 = vadd.f32 %v5526_v20, %v1420_v50  ;;  %v1684_v55 = vpop.f32.mrf.mxu1 }
 0x14f   :  { %v1422_v56 = vpop.f32.mrf.mxu0 }
 0x150   :  { %v5671_v57 = vadd.f32 %v1684_v55, %v1421_v52  ;;  %v1686_v58 = vpop.f32.mrf.mxu1 }
 0x151   :  { %v1425_v59 = vpop.f32.mrf.mxu0  ;;  %4256 = vmatmul.mubr.msk.bf16.gmra.mxu0 %vm1219_vm2, %v4756_v51 }
 0x152   :  { %v1426_v62 = vadd.f32 %v5526_v20, %v1425_v59  ;;  %v1689_v63 = vpop.f32.mrf.mxu1  ;;  %4259 = vmatprep.mubr.msk.bf16.mxu0 %vm5012_vm1, %v5011_v38 }
 0x153   :  { %v1427_v0 = vpop.f32.mrf.mxu0 }
 0x154   :  { %v5677_v1 = vadd.f32 %v1689_v63, %v1426_v62  ;;  %v1691_v2 = vpop.f32.mrf.mxu1 }
 0x155   :  { %v1428_v5 = vpop.f32.mrf.mxu0 }
 0x156   :  { %v1429_v8 = vadd.f32 %v5526_v20, %v1428_v5  ;;  %v1692_v9 = vpop.f32.mrf.mxu1 }
 0x157   :  { %v1430_v10 = vpop.f32.mrf.mxu0 }
 0x158   :  { %v5686_v11 = vadd.f32 %v1692_v9, %v1429_v8  ;;  %v1694_v13 = vpop.f32.mrf.mxu1 }
 0x159   :  { %v1433_v15 = vpop.f32.mrf.mxu0  ;;  %4260 = vmatmul.mubr.msk.bf16.gmra.mxu0 %vm1219_vm2, %v4757_v6 }
 0x15a   :  { %v1434_v16 = vadd.f32 %v5526_v20, %v1433_v15  ;;  %v1697_v17 = vpop.f32.mrf.mxu1  ;;  %4263 = vmatprep.mubr.msk.bf16.mxu0 %vm5012_vm1, %v5011_v38 }
 0x15b   :  { %v1435_v18 = vpop.f32.mrf.mxu0 }
 0x15c   :  { %v5692_v19 = vadd.f32 %v1697_v17, %v1434_v16  ;;  %v1699_v22 = vpop.f32.mrf.mxu1 }
 0x15d   :  { %v1436_v24 = vpop.f32.mrf.mxu0 }
 0x15e   :  { %v1437_v27 = vadd.f32 %v5526_v20, %v1436_v24  ;;  %v1700_v28 = vpop.f32.mrf.mxu1 }
 0x15f   :  { %v1438_v31 = vpop.f32.mrf.mxu0 }
 0x160   :  { %v5698_v32 = vadd.f32 %v1700_v28, %v1437_v27  ;;  %v1702_v33 = vpop.f32.mrf.mxu1 }
 0x161   :  { %v1441_v34 = vpop.f32.mrf.mxu0  ;;  %4264 = vmatmul.mubr.msk.bf16.gmra.mxu0 %vm1219_vm2, %v4758_v25  ;;  %v4761_v25 = vld [vmem:[%s7361_s0 + $0x1a0] ss:$20 sps:$4 sm:$0xff]  }
 0x162   :  { %v1442_v35 = vadd.f32 %v5526_v20, %v1441_v34  ;;  %v1705_v37 = vpop.f32.mrf.mxu1  ;;  %4267 = vmatprep.mubr.msk.bf16.mxu0 %vm5012_vm1, %v5011_v38 }
 0x163   :  { %v1443_v41 = vpop.f32.mrf.mxu0 }
 0x164   :  { %v5704_v42 = vadd.f32 %v1705_v37, %v1442_v35  ;;  %v1707_v44 = vpop.f32.mrf.mxu1 }
 0x165   :  { %v1444_v45 = vpop.f32.mrf.mxu0 }
 0x166   :  { %v1445_v49 = vadd.f32 %v5526_v20, %v1444_v45  ;;  %v1708_v50 = vpop.f32.mrf.mxu1 }
 0x167   :  { %v1446_v51 = vpop.f32.mrf.mxu0 }
 0x168   :  { %v5710_v52 = vadd.f32 %v1708_v50, %v1445_v49  ;;  %v1710_v55 = vpop.f32.mrf.mxu1  ;;  %v4762_v50 = vld [vmem:[%s7361_s0 + $0x1c8] ss:$20 sps:$4 sm:$0xff]  }
 0x169   :  { %v1449_v56 = vpop.f32.mrf.mxu0  ;;  %4268 = vmatmul.mubr.msk.bf16.gmra.mxu0 %vm1219_vm2, %v4759_v47 }
 0x16a   :  { %v1450_v58 = vadd.f32 %v5526_v20, %v1449_v56  ;;  %v1713_v59 = vpop.f32.mrf.mxu1  ;;  %4271 = vmatprep.mubr.msk.bf16.mxu0 %vm5012_vm1, %v5011_v38 }
 0x16b   :  { %v1451_v62 = vpop.f32.mrf.mxu0 }
 0x16c   :  { %v5716_v63 = vadd.f32 %v1713_v59, %v1450_v58  ;;  %v1715_v0 = vpop.f32.mrf.mxu1 }
 0x16d   :  { %v1452_v2 = vpop.f32.mrf.mxu0 }
 0x16e   :  { %v1453_v5 = vadd.f32 %v5526_v20, %v1452_v2  ;;  %v1716_v6 = vpop.f32.mrf.mxu1 }
 0x16f   :  { %v1454_v8 = vpop.f32.mrf.mxu0 }
 0x170   :  { %v5722_v9 = vadd.f32 %v1716_v6, %v1453_v5  ;;  %v1718_v10 = vpop.f32.mrf.mxu1 }
 0x171   :  { %v1457_v13 = vpop.f32.mrf.mxu0  ;;  %4272 = vmatmul.mubr.msk.bf16.gmra.mxu0 %vm1219_vm2, %v4760_v3  ;;  %v4763_v10 = vld [vmem:[%s7361_s0 + $0x1f0] ss:$20 sps:$4 sm:$0xff]  }
 0x172   :  { %v1458_v15 = vadd.f32 %v5526_v20, %v1457_v13  ;;  %v1721_v16 = vpop.f32.mrf.mxu1  ;;  %4275 = vmatprep.mubr.msk.bf16.mxu0 %vm5012_vm1, %v5011_v38 }
 0x173   :  { %v1459_v17 = vpop.f32.mrf.mxu0 }
 0x174   :  { %v5728_v18 = vadd.f32 %v1721_v16, %v1458_v15  ;;  %v1723_v22 = vpop.f32.mrf.mxu1 }
 0x175   :  { %v1460_v24 = vpop.f32.mrf.mxu0 }
 0x176   :  { %v1461_v27 = vadd.f32 %v5526_v20, %v1460_v24  ;;  %v1724_v28 = vpop.f32.mrf.mxu1 }
 0x177   :  { %v1462_v31 = vpop.f32.mrf.mxu0 }
 0x178   :  { %v5734_v33 = vadd.f32 %v1724_v28, %v1461_v27  ;;  %v1726_v34 = vpop.f32.mrf.mxu1 }
 0x179   :  { %v1465_v35 = vpop.f32.mrf.mxu0  ;;  %4276 = vmatmul.mubr.msk.bf16.gmra.mxu0 %vm1219_vm2, %v4761_v25 }
 0x17a   :  { %v1466_v37 = vadd.f32 %v5526_v20, %v1465_v35  ;;  %v1729_v41 = vpop.f32.mrf.mxu1  ;;  %4279 = vmatprep.mubr.msk.bf16.mxu0 %vm5012_vm1, %v5011_v38 }
 0x17b   :  { %v1467_v44 = vpop.f32.mrf.mxu0 }
 0x17c   :  { %v5740_v45 = vadd.f32 %v1729_v41, %v1466_v37  ;;  %v1731_v47 = vpop.f32.mrf.mxu1  ;;  %v4764_v37 = vld [vmem:[%s7361_s0 + $0x218] ss:$20 sps:$4 sm:$0xff]  }
 0x17d   :  { %v1468_v49 = vpop.f32.mrf.mxu0 }
 0x17e   :  { %v1469_v51 = vadd.f32 %v5526_v20, %v1468_v49  ;;  %v1732_v55 = vpop.f32.mrf.mxu1 }
 0x17f   :  { %v1470_v56 = vpop.f32.mrf.mxu0 }
 0x180   :  { %v5746_v58 = vadd.f32 %v1732_v55, %v1469_v51  ;;  %v1734_v59 = vpop.f32.mrf.mxu1 }
 0x181   :  { %v1473_v62 = vpop.f32.mrf.mxu0  ;;  %4280 = vmatmul.mubr.msk.bf16.gmra.mxu0 %vm1219_vm2, %v4762_v50 }
 0x182   :  { %v1474_v0 = vadd.f32 %v5526_v20, %v1473_v62  ;;  %v1737_v2 = vpop.f32.mrf.mxu1  ;;  %4283 = vmatprep.mubr.msk.bf16.mxu0 %vm5012_vm1, %v5011_v38 }
 0x183   :  { %v1475_v3 = vpop.f32.mrf.mxu0 }
 0x184   :  { %v5752_v5 = vadd.f32 %v1737_v2, %v1474_v0  ;;  %v1739_v6 = vpop.f32.mrf.mxu1  ;;  %v4765_v3 = vld [vmem:[%s7361_s0 + $0x240] ss:$20 sps:$4 sm:$0xff]  }
 0x185   :  { %v1476_v8 = vpop.f32.mrf.mxu0 }
 0x186   :  { %v1477_v13 = vadd.f32 %v5526_v20, %v1476_v8  ;;  %v1740_v15 = vpop.f32.mrf.mxu1 }
 0x187   :  { %v1478_v16 = vpop.f32.mrf.mxu0 }
 0x188   :  { %v5758_v17 = vadd.f32 %v1740_v15, %v1477_v13  ;;  %v1742_v22 = vpop.f32.mrf.mxu1 }
 0x189   :  { %v1481_v24 = vpop.f32.mrf.mxu0  ;;  %4284 = vmatmul.mubr.msk.bf16.gmra.mxu0 %vm1219_vm2, %v4763_v10 }
 0x18a   :  { %v1482_v25 = vadd.f32 %v5526_v20, %v1481_v24  ;;  %v1745_v27 = vpop.f32.mrf.mxu1  ;;  %4287 = vmatprep.mubr.msk.bf16.mxu0 %vm5012_vm1, %v5011_v38 }
 0x18b   :  { %v1483_v28 = vpop.f32.mrf.mxu0 }
 0x18c   :  { %v5764_v31 = vadd.f32 %v1745_v27, %v1482_v25  ;;  %v1747_v34 = vpop.f32.mrf.mxu1 }
 0x18d   :  { %v1484_v35 = vpop.f32.mrf.mxu0 }
 0x18e   :  { %v1485_v41 = vadd.f32 %v5526_v20, %v1484_v35  ;;  %v1748_v44 = vpop.f32.mrf.mxu1  ;;  %v4766_v35 = vld [vmem:[%s7361_s0 + $0x268] ss:$20 sps:$4 sm:$0xff]  }
 0x18f   :  { %v1486_v47 = vpop.f32.mrf.mxu0 }
 0x190   :  { %v5770_v49 = vadd.f32 %v1748_v44, %v1485_v41  ;;  %v1750_v50 = vpop.f32.mrf.mxu1 }
 0x191   :  { %v1489_v51 = vpop.f32.mrf.mxu0  ;;  %4288 = vmatmul.mubr.msk.bf16.gmra.mxu0 %vm1219_vm2, %v4764_v37 }
 0x192   :  { %v1490_v55 = vadd.f32 %v5526_v20, %v1489_v51  ;;  %v1753_v56 = vpop.f32.mrf.mxu1  ;;  %4291 = vmatprep.mubr.msk.bf16.mxu0 %vm5012_vm1, %v5011_v38 }
 0x193   :  { %v1491_v59 = vpop.f32.mrf.mxu0 }
 0x194   :  { %v5776_v62 = vadd.f32 %v1753_v56, %v1490_v55  ;;  %v1755_v0 = vpop.f32.mrf.mxu1 }
 0x195   :  { %v1492_v2 = vpop.f32.mrf.mxu0 }
 0x196   :  { %v1493_v6 = vadd.f32 %v5526_v20, %v1492_v2  ;;  %v1756_v8 = vpop.f32.mrf.mxu1 }
 0x197   :  { %v1494_v10 = vpop.f32.mrf.mxu0 }
 0x198   :  { %v5782_v13 = vadd.f32 %v1756_v8, %v1493_v6  ;;  %v1758_v15 = vpop.f32.mrf.mxu1  ;;  %v4767_v6 = vld [vmem:[%s7361_s0 + $0x290] ss:$20 sps:$4 sm:$0xff]  }
 0x199   :  { %v1497_v16 = vpop.f32.mrf.mxu0  ;;  %4292 = vmatmul.mubr.msk.bf16.gmra.mxu0 %vm1219_vm2, %v4765_v3 }
 0x19a   :  { %v1498_v22 = vadd.f32 %v5526_v20, %v1497_v16  ;;  %v1761_v24 = vpop.f32.mrf.mxu1  ;;  %4295 = vmatprep.mubr.msk.bf16.mxu0 %vm5012_vm1, %v5011_v38 }
 0x19b   :  { %v1499_v25 = vpop.f32.mrf.mxu0 }
 0x19c   :  { %v5788_v27 = vadd.f32 %v1761_v24, %v1498_v22  ;;  %v1763_v28 = vpop.f32.mrf.mxu1 }
 0x19d   :  { %v1500_v34 = vpop.f32.mrf.mxu0 }
 0x19e   :  { %v1501_v37 = vadd.f32 %v5526_v20, %v1500_v34  ;;  %v1764_v41 = vpop.f32.mrf.mxu1 }
 0x19f   :  { %v1502_v44 = vpop.f32.mrf.mxu0 }
 0x1a0   :  { %v5794_v47 = vadd.f32 %v1764_v41, %v1501_v37  ;;  %v1766_v50 = vpop.f32.mrf.mxu1  ;;  %v4768_v44 = vld [vmem:[%s7361_s0 + $0x2b8] ss:$20 sps:$4 sm:$0xff]  }
 0x1a1   :  { %v1505_v51 = vpop.f32.mrf.mxu0  ;;  %4296 = vmatmul.mubr.msk.bf16.gmra.mxu0 %vm1219_vm2, %v4766_v35 }
 0x1a2   :  { %v1506_v55 = vadd.f32 %v5526_v20, %v1505_v51  ;;  %v1769_v56 = vpop.f32.mrf.mxu1  ;;  %4299 = vmatprep.mubr.msk.bf16.mxu0 %vm5012_vm1, %v5011_v38 }
 0x1a3   :  { %v1507_v59 = vpop.f32.mrf.mxu0 }
 0x1a4   :  { %v5800_v0 = vadd.f32 %v1769_v56, %v1506_v55  ;;  %v1771_v2 = vpop.f32.mrf.mxu1 }
 0x1a5   :  { %v1508_v3 = vpop.f32.mrf.mxu0 }
 0x1a6   :  { %v1509_v8 = vadd.f32 %v5526_v20, %v1508_v3  ;;  %v1772_v10 = vpop.f32.mrf.mxu1 }
 0x1a7   :  { %v1510_v15 = vpop.f32.mrf.mxu0 }
 0x1a8   :  { %v5806_v16 = vadd.f32 %v1772_v10, %v1509_v8  ;;  %v1774_v22 = vpop.f32.mrf.mxu1 }
 0x1a9   :  { %v1513_v24 = vpop.f32.mrf.mxu0  ;;  %4300 = vmatmul.mubr.msk.bf16.gmra.mxu0 %vm1219_vm2, %v4767_v6 }
 0x1aa   :  { %v1514_v25 = vadd.f32 %v5526_v20, %v1513_v24  ;;  %v1777_v28 = vpop.f32.mrf.mxu1  ;;  %4303 = vmatprep.mubr.msk.bf16.mxu0 %vm5012_vm1, %v5011_v38  ;;  %v4769_v24 = vld [vmem:[%s7361_s0 + $0x2e0] ss:$20 sps:$4 sm:$0xff]  }
 0x1ab   :  { %v1515_v34 = vpop.f32.mrf.mxu0 }
 0x1ac   :  { %v5812_v35 = vadd.f32 %v1777_v28, %v1514_v25  ;;  %v1779_v37 = vpop.f32.mrf.mxu1 }
 0x1ad   :  { %v1516_v41 = vpop.f32.mrf.mxu0 }
 0x1ae   :  { %v1517_v50 = vadd.f32 %v5526_v20, %v1516_v41  ;;  %v1780_v51 = vpop.f32.mrf.mxu1 }
 0x1af   :  { %v1518_v55 = vpop.f32.mrf.mxu0 }
 0x1b0   :  { %v5818_v56 = vadd.f32 %v1780_v51, %v1517_v50  ;;  %v1782_v59 = vpop.f32.mrf.mxu1 }
 0x1b1   :  { %v1521_v2 = vpop.f32.mrf.mxu0  ;;  %4304 = vmatmul.mubr.msk.bf16.gmra.mxu0 %vm1219_vm2, %v4768_v44 }
 0x1b2   :  { %v1522_v3 = vadd.f32 %v5526_v20, %v1521_v2  ;;  %v1785_v6 = vpop.f32.mrf.mxu1  ;;  %4307 = vmatprep.mubr.msk.bf16.mxu0 %vm5012_vm1, %v5011_v38 }
 0x1b3   :  { %v1523_v8 = vpop.f32.mrf.mxu0 }
 0x1b4   :  { %v5824_v10 = vadd.f32 %v1785_v6, %v1522_v3  ;;  %v1787_v15 = vpop.f32.mrf.mxu1  ;;  %v4770_v6 = vld [vmem:[%s7361_s0 + $0x308] ss:$20 sps:$4 sm:$0xff]  }
 0x1b5   :  { %v1524_v22 = vpop.f32.mrf.mxu0 }
 0x1b6   :  { %v1525_v25 = vadd.f32 %v5526_v20, %v1524_v22  ;;  %v1788_v28 = vpop.f32.mrf.mxu1 }
 0x1b7   :  { %v1526_v34 = vpop.f32.mrf.mxu0 }
 0x1b8   :  { %v5830_v37 = vadd.f32 %v1788_v28, %v1525_v25  ;;  %v1790_v41 = vpop.f32.mrf.mxu1 }
 0x1b9   :  { %v1529_v44 = vpop.f32.mrf.mxu0  ;;  %4308 = vmatmul.mubr.msk.bf16.gmra.mxu0 %vm1219_vm2, %v4769_v24 }
 0x1ba   :  { %v1530_v50 = vadd.f32 %v5526_v20, %v1529_v44  ;;  %v1793_v51 = vpop.f32.mrf.mxu1  ;;  %4311 = vmatprep.mubr.msk.bf16.mxu0 %vm5012_vm1, %v5011_v38 }
 0x1bb   :  { %v1531_v55 = vpop.f32.mrf.mxu0 }
 0x1bc   :  { %v5836_v59 = vadd.f32 %v1793_v51, %v1530_v50  ;;  %v1795_v2 = vpop.f32.mrf.mxu1 }
 0x1bd   :  { %v1532_v3 = vpop.f32.mrf.mxu0  ;;  %v4771_v2 = vld [vmem:[%s7361_s0 + $0x330] ss:$20 sps:$4 sm:$0xff]  }
 0x1be   :  { %v1533_v8 = vadd.f32 %v5526_v20, %v1532_v3  ;;  %v1796_v15 = vpop.f32.mrf.mxu1 }
 0x1bf   :  { %v1534_v22 = vpop.f32.mrf.mxu0 }
 0x1c0   :  { %v5842_v24 = vadd.f32 %v1796_v15, %v1533_v8  ;;  %v1798_v25 = vpop.f32.mrf.mxu1 }
 0x1c1   :  { %v1537_v28 = vpop.f32.mrf.mxu0  ;;  %4312 = vmatmul.mubr.msk.bf16.gmra.mxu0 %vm1219_vm2, %v4770_v6 }
 0x1c2   :  { %v1538_v34 = vadd.f32 %v5526_v20, %v1537_v28  ;;  %v1801_v41 = vpop.f32.mrf.mxu1  ;;  %4315 = vmatprep.mubr.msk.bf16.mxu0 %vm5012_vm1, %v5011_v38 }
 0x1c3   :  { %v1539_v44 = vpop.f32.mrf.mxu0 }
 0x1c4   :  { %v5848_v50 = vadd.f32 %v1801_v41, %v1538_v34  ;;  %v1803_v51 = vpop.f32.mrf.mxu1 }
 0x1c5   :  { %v1540_v55 = vpop.f32.mrf.mxu0 }
 0x1c6   :  { %7382 = vst [vmem:[#allocation2_spill] sm:$0xff] %v5848_v50  ;;  %v1541_v3 = vadd.f32 %v5526_v20, %v1540_v55  ;;  %v1804_v8 = vpop.f32.mrf.mxu1  ;;  %v4772_v55 = vld [vmem:[%s7361_s0 + $0x358] ss:$20 sps:$4 sm:$0xff]  }
 0x1c7   :  { %v1542_v15 = vpop.f32.mrf.mxu0 }
 0x1c8   :  { %v5854_v6 = vadd.f32 %v1804_v8, %v1541_v3  ;;  %v1806_v22 = vpop.f32.mrf.mxu1 }
 0x1c9   :  { %v1545_v25 = vpop.f32.mrf.mxu0  ;;  %4316 = vmatmul.mubr.msk.bf16.gmra.mxu0 %vm1219_vm2, %v4771_v2 }
 0x1ca   :  { %7383 = vst [vmem:[#allocation3_spill] sm:$0xff] %v5854_v6  ;;  %v1546_v28 = vadd.f32 %v5526_v20, %v1545_v25  ;;  %v1809_v34 = vpop.f32.mrf.mxu1  ;;  %4319 = vmatprep.mubr.msk.bf16.mxu0 %vm5012_vm1, %v5011_v38 }
 0x1cb   :  { %v1547_v41 = vpop.f32.mrf.mxu0 }
 0x1cc   :  { %v5860_v44 = vadd.f32 %v1809_v34, %v1546_v28  ;;  %v1811_v51 = vpop.f32.mrf.mxu1 }
 0x1cd   :  { %v1548_v50 = vpop.f32.mrf.mxu0 }
 0x1ce   :  { %7384 = vst [vmem:[#allocation4_spill] sm:$0xff] %v5860_v44  ;;  %v1549_v3 = vadd.f32 %v5526_v20, %v1548_v50  ;;  %v1812_v8 = vpop.f32.mrf.mxu1  ;;  %v4773_v50 = vld [vmem:[%s7361_s0 + $0x380] ss:$20 sps:$4 sm:$0xff]  }
 0x1cf   :  { %v1550_v15 = vpop.f32.mrf.mxu0 }
 0x1d0   :  { %v5866_v2 = vadd.f32 %v1812_v8, %v1549_v3  ;;  %v1814_v22 = vpop.f32.mrf.mxu1 }
 0x1d1   :  { %v1553_v25 = vpop.f32.mrf.mxu0  ;;  %4320 = vmatmul.mubr.msk.bf16.gmra.mxu0 %vm1219_vm2, %v4772_v55 }
 0x1d2   :  { %7385 = vst [vmem:[#allocation5_spill] sm:$0xff] %v5866_v2  ;;  %v1554_v41 = vadd.f32 %v5526_v20, %v1553_v25  ;;  %v1817_v28 = vpop.f32.mrf.mxu1  ;;  %4323 = vmatprep.mubr.msk.bf16.mxu0 %vm5012_vm1, %v5011_v38 }
 0x1d3   :  { %v1555_v34 = vpop.f32.mrf.mxu0 }
 0x1d4   :  { %v5872_v51 = vadd.f32 %v1817_v28, %v1554_v41  ;;  %v1819_v44 = vpop.f32.mrf.mxu1 }
 0x1d5   :  { %v1556_v6 = vpop.f32.mrf.mxu0 }
 0x1d6   :  { %7386 = vst [vmem:[#allocation6_spill] sm:$0xff] %v5872_v51  ;;  %v1557_v3 = vadd.f32 %v5526_v20, %v1556_v6  ;;  %v1820_v8 = vpop.f32.mrf.mxu1  ;;  %v4774_v6 = vld [vmem:[%s7361_s0 + $0x3a8] ss:$20 sps:$4 sm:$0xff]  }
 0x1d7   :  { %v1558_v15 = vpop.f32.mrf.mxu0 }
 0x1d8   :  { %v5878_v55 = vadd.f32 %v1820_v8, %v1557_v3  ;;  %v1822_v22 = vpop.f32.mrf.mxu1 }
 0x1d9   :  { %v1561_v25 = vpop.f32.mrf.mxu0  ;;  %4324 = vmatmul.mubr.msk.bf16.gmra.mxu0 %vm1219_vm2, %v4773_v50 }
 0x1da   :  { %7387 = vst [vmem:[#allocation7_spill] sm:$0xff] %v5878_v55  ;;  %v1562_v34 = vadd.f32 %v5526_v20, %v1561_v25  ;;  %v1825_v41 = vpop.f32.mrf.mxu1  ;;  %4327 = vmatprep.mubr.msk.bf16.mxu0 %vm5012_vm1, %v5011_v38 }
 0x1db   :  { %v1563_v44 = vpop.f32.mrf.mxu0 }
 0x1dc   :  { %v5884_v28 = vadd.f32 %v1825_v41, %v1562_v34  ;;  %v1827_v51 = vpop.f32.mrf.mxu1 }
 0x1dd   :  { %v1564_v2 = vpop.f32.mrf.mxu0 }
 0x1de   :  { %7388 = vst [vmem:[#allocation8_spill] sm:$0xff] %v5884_v28  ;;  %v1565_v3 = vadd.f32 %v5526_v20, %v1564_v2  ;;  %v1828_v8 = vpop.f32.mrf.mxu1  ;;  %v4775_v2 = vld [vmem:[%s7361_s0 + $0x3d0] ss:$20 sps:$4 sm:$0xff]  }
 0x1df   :  { %v1566_v15 = vpop.f32.mrf.mxu0 }
 0x1e0   :  { %v5890_v50 = vadd.f32 %v1828_v8, %v1565_v3  ;;  %v1830_v22 = vpop.f32.mrf.mxu1 }
 0x1e1   :  { %v1569_v25 = vpop.f32.mrf.mxu0  ;;  %4328 = vmatmul.mubr.msk.bf16.gmra.mxu0 %vm1219_vm2, %v4774_v6 }
 0x1e2   :  { %v1570_v44 = vadd.f32 %v5526_v20, %v1569_v25  ;;  %v1833_v34 = vpop.f32.mrf.mxu1  ;;  %4331 = vmatprep.mubr.msk.bf16.mxu0 %vm5012_vm1, %v5011_v38 }
 0x1e3   :  { %v1571_v51 = vpop.f32.mrf.mxu0 }
 0x1e4   :  { %v5896_v41 = vadd.f32 %v1833_v34, %v1570_v44  ;;  %v1835_v28 = vpop.f32.mrf.mxu1 }
 0x1e5   :  { %v1572_v55 = vpop.f32.mrf.mxu0 }
 0x1e6   :  { %v1836_v3 = vpop.f32.mrf.mxu1  ;;  %v4776_v55 = vld [vmem:[%s7361_s0 + $0x3f8] ss:$20 sps:$4 sm:$0xff]  }
 0x1e7   :  { %v1573_v8 = vpop.f32.mrf.mxu0 }
 0x1e8   :  { %v1837_v15 = vpop.f32.mrf.mxu1 }
 0x1e9   :  { %v1873_v22 = vpop.f32.mrf.mxu0  ;;  %4332 = vmatmul.mubr.msk.bf16.gmra.mxu0 %vm1219_vm2, %v4775_v2 }
 0x1ea   :  { %v1874_v20 = vadd.f32 %v1873_v22, %v5533_v26  ;;  %4335 = vmatprep.mubr.msk.bf16.mxu0 %vm5012_vm1, %v5011_v38 }
 0x1eb   :  { %v4237_v6 = vpop.f32.mrf.mxu0 }
 0x1ec   :  { %v5905_v25 = vmax.f32 %v1874_v20, 0.0  ;;  %v4777_v20 = vld [vmem:[%s7361_s0 + $0x420] ss:$20 sps:$4 sm:$0xff]  }
 0x1ed   :  { %v1876_v28 = vpop.f32.mrf.mxu0 }
 0x1ee   :  { %v2160_v44 = vmul.f32 %v5905_v25, %v5905_v25  ;;  %v1877_v34 = vadd.f32 %v1876_v28, %v5548_v36 }
 0x1ef   :  { %v4238_v51 = vpop.f32.mrf.mxu0 }
 0x1f0   :  { %v5913_v2 = vmax.f32 %v1877_v34, 0.0  ;;  %4368 = vmatmul.mubr.msk.f32.vlgmr.msra.gmra.mxu1 %vm2225_vm3, %v2160_v44 }
 0x1f1   :  { %v1881_v26 = vpop.f32.mrf.mxu0  ;;  %4336 = vmatmul.mubr.msk.bf16.gmra.mxu0 %vm1219_vm2, %v4776_v55  ;;  %4370 = vmatprep.mubr.msk.f32.mxu1 %vm5012_vm1, %v5011_v38 }
 0x1f2   :  { %v2161_v3 = vmul.f32 %v5913_v2, %v5913_v2  ;;  %v1882_v8 = vadd.f32 %v1881_v26, %v5551_v43  ;;  %4339 = vmatprep.mubr.msk.bf16.mxu0 %vm5012_vm1, %v5011_v38 }
 0x1f3   :  { %v4241_v36 = vpop.f32.mrf.mxu0 }
 0x1f4   :  { %v5924_v15 = vmax.f32 %v1882_v8, 0.0  ;;  %4371 = vmatmul.mubr.msk.f32.gmra.mxu1 %vm2225_vm3, %v2161_v3  ;;  %v4778_v8 = vld [vmem:[%s7361_s0 + $0x448] ss:$20 sps:$4 sm:$0xff]  }
 0x1f5   :  { %v1884_v22 = vpop.f32.mrf.mxu0  ;;  %4373 = vmatprep.mubr.msk.f32.mxu1 %vm5012_vm1, %v5011_v38 }
 0x1f6   :  { %v2162_v6 = vmul.f32 %v5924_v15, %v5924_v15  ;;  %v1885_v43 = vadd.f32 %v1884_v22, %v5566_v53 }
 0x1f7   :  { %v4242_v28 = vpop.f32.mrf.mxu0 }
 0x1f8   :  { %v5935_v55 = vmax.f32 %v1885_v43, 0.0  ;;  %4374 = vmatmul.mubr.msk.f32.gmra.mxu1 %vm2225_vm3, %v2162_v6 }
 0x1f9   :  { %v1889_v44 = vpop.f32.mrf.mxu0  ;;  %4340 = vmatmul.mubr.msk.bf16.gmra.mxu0 %vm1219_vm2, %v4777_v20  ;;  %4376 = vmatprep.mubr.msk.f32.mxu1 %vm5012_vm1, %v5011_v38 }
 0x1fa   :  { %v2163_v34 = vmul.f32 %v5935_v55, %v5935_v55  ;;  %v1890_v51 = vadd.f32 %v1889_v44, %v5572_v60  ;;  %4343 = vmatprep.mubr.msk.bf16.mxu0 %vm5012_vm1, %v5011_v38 }
 0x1fb   :  { %v4245_v53 = vpop.f32.mrf.mxu0 }
 0x1fc   :  { %v5946_v26 = vmax.f32 %v1890_v51, 0.0  ;;  %4377 = vmatmul.mubr.msk.f32.gmra.mxu1 %vm2225_vm3, %v2163_v34  ;;  %v4779_v51 = vld [vmem:[%s7361_s0 + $0x470] ss:$0 sps:$4 sm:$0x11]  }
 0x1fd   :  { %v1892_v3 = vpop.f32.mrf.mxu0  ;;  %4379 = vmatprep.mubr.msk.f32.mxu1 %vm5012_vm1, %v5011_v38 }
 0x1fe   :  { %v2164_v36 = vmul.f32 %v5946_v26, %v5946_v26  ;;  %v1893_v60 = vadd.f32 %v1892_v3, %v5584_v7 }
 0x1ff   :  { %v4246_v22 = vpop.f32.mrf.mxu0 }
 0x200   :  { %v5957_v20 = vmax.f32 %v1893_v60, 0.0  ;;  %4380 = vmatmul.mubr.msk.f32.gmra.mxu1 %vm2225_vm3, %v2164_v36 }
 0x201   :  { %v1897_v6 = vpop.f32.mrf.mxu0  ;;  %4344 = vmatmul.mubr.msk.bf16.gmra.mxu0 %vm1219_vm2, %v4778_v8  ;;  %4382 = vmatprep.mubr.msk.f32.mxu1 %vm5012_vm1, %v5011_v38 }
 0x202   :  { %v2165_v43 = vmul.f32 %v5957_v20, %v5957_v20  ;;  %v1898_v28 = vadd.f32 %v1897_v6, %v5590_v14  ;;  %4347 = vmatprep.mubr.msk.bf16.mxu0 %vm5012_vm1, %v5011_v38 }
 0x203   :  { %v4249_v7 = vpop.f32.mrf.mxu0 }
 0x204   :  { %v5968_v44 = vmax.f32 %v1898_v28, 0.0  ;;  %4383 = vmatmul.mubr.msk.f32.gmra.mxu1 %vm2225_vm3, %v2165_v43 }
 0x205   :  { %v1900_v34 = vpop.f32.mrf.mxu0  ;;  %4385 = vmatprep.mubr.msk.f32.mxu1 %vm5012_vm1, %v5011_v38 }
 0x206   :  { %v2166_v53 = vmul.f32 %v5968_v44, %v5968_v44  ;;  %v1901_v14 = vadd.f32 %v1900_v34, %v5594_v23 }
 0x207   :  { %v4250_v3 = vpop.f32.mrf.mxu0 }
 0x208   :  { %v5979_v8 = vmax.f32 %v1901_v14, 0.0  ;;  %4386 = vmatmul.mubr.msk.f32.gmra.mxu1 %vm2225_vm3, %v2166_v53 }
 0x209   :  { %v1905_v36 = vpop.f32.mrf.mxu0  ;;  %4348 = vmatmul.mubr.msk.bf16.gmra.mxu0 %vm1219_vm2, %v4779_v51  ;;  %4388 = vmatprep.mubr.msk.f32.mxu1 %vm5012_vm1, %v5011_v38 }
 0x20a   :  { %v2167_v60 = vmul.f32 %v5979_v8, %v5979_v8  ;;  %v1906_v22 = vadd.f32 %v1905_v36, %v5601_v30 }
 0x20b   :  { %v4253_v6 = vpop.f32.mrf.mxu0 }
 0x20c   :  { %v5988_v43 = vmax.f32 %v1906_v22, 0.0  ;;  %4389 = vmatmul.mubr.msk.f32.gmra.mxu1 %vm2225_vm3, %v2167_v60 }
 0x20d   :  { %v1908_v23 = vpop.f32.mrf.mxu0  ;;  %4391 = vmatprep.mubr.msk.f32.mxu1 %vm5012_vm1, %v5011_v38 }
 0x20e   :  { %v2168_v28 = vmul.f32 %v5988_v43, %v5988_v43  ;;  %v1909_v7 = vadd.f32 %v1908_v23, %v5607_v39 }
 0x20f   :  { %v4254_v34 = vpop.f32.mrf.mxu0 }
 0x210   :  { %v5996_v51 = vmax.f32 %v1909_v7, 0.0  ;;  %4392 = vmatmul.mubr.msk.f32.gmra.mxu1 %vm2225_vm3, %v2168_v28 }
 0x211   :  { %v1913_v30 = vpop.f32.mrf.mxu0  ;;  %4394 = vmatprep.mubr.msk.f32.mxu1 %vm5012_vm1, %v5011_v38 }
 0x212   :  { %v2169_v53 = vmul.f32 %v5996_v51, %v5996_v51  ;;  %v1914_v14 = vadd.f32 %v1913_v30, %v5613_v46 }
 0x213   :  { %v4257_v3 = vpop.f32.mrf.mxu0 }
 0x214   :  { %v6004_v36 = vmax.f32 %v1914_v14, 0.0  ;;  %4395 = vmatmul.mubr.msk.f32.gmra.mxu1 %vm2225_vm3, %v2169_v53 }
 0x215   :  { %v1916_v39 = vpop.f32.mrf.mxu0  ;;  %4397 = vmatprep.mubr.msk.f32.mxu1 %vm5012_vm1, %v5011_v38 }
 0x216   :  { %v2170_v60 = vmul.f32 %v6004_v36, %v6004_v36  ;;  %v1917_v22 = vadd.f32 %v1916_v39, %v5619_v54 }
 0x217   :  { %v4258_v6 = vpop.f32.mrf.mxu0 }
 0x218   :  { %v6012_v23 = vmax.f32 %v1917_v22, 0.0  ;;  %4398 = vmatmul.mubr.msk.f32.gmra.mxu1 %vm2225_vm3, %v2170_v60 }
 0x219   :  { %v1921_v46 = vpop.f32.mrf.mxu0  ;;  %4400 = vmatprep.mubr.msk.f32.mxu1 %vm5012_vm1, %v5011_v38 }
 0x21a   :  { %v2171_v28 = vmul.f32 %v6012_v23, %v6012_v23  ;;  %v1922_v7 = vadd.f32 %v1921_v46, %v5625_v61 }
 0x21b   :  { %v4261_v34 = vpop.f32.mrf.mxu0 }
 0x21c   :  { %v6020_v30 = vmax.f32 %v1922_v7, 0.0  ;;  %4401 = vmatmul.mubr.msk.f32.gmra.mxu1 %vm2225_vm3, %v2171_v28 }
 0x21d   :  { %v1924_v54 = vpop.f32.mrf.mxu0  ;;  %4403 = vmatprep.mubr.msk.f32.mxu1 %vm5012_vm1, %v5011_v38 }
 0x21e   :  { %v2172_v53 = vmul.f32 %v6020_v30, %v6020_v30  ;;  %v1925_v14 = vadd.f32 %v1924_v54, %v5631_v4 }
 0x21f   :  { %v4262_v3 = vpop.f32.mrf.mxu0 }
 0x220   :  { %v6028_v39 = vmax.f32 %v1925_v14, 0.0  ;;  %4404 = vmatmul.mubr.msk.f32.gmra.mxu1 %vm2225_vm3, %v2172_v53 }
 0x221   :  { %v1929_v61 = vpop.f32.mrf.mxu0  ;;  %4406 = vmatprep.mubr.msk.f32.mxu1 %vm5012_vm1, %v5011_v38 }
 0x222   :  { %v2173_v60 = vmul.f32 %v6028_v39, %v6028_v39  ;;  %v1930_v22 = vadd.f32 %v1929_v61, %v5641_v12 }
 0x223   :  { %v4265_v6 = vpop.f32.mrf.mxu0 }
 0x224   :  { %v6036_v46 = vmax.f32 %v1930_v22, 0.0  ;;  %4407 = vmatmul.mubr.msk.f32.gmra.mxu1 %vm2225_vm3, %v2173_v60 }
 0x225   :  { %v1932_v4 = vpop.f32.mrf.mxu0  ;;  %4409 = vmatprep.mubr.msk.f32.mxu1 %vm5012_vm1, %v5011_v38 }
 0x226   :  { %v2174_v28 = vmul.f32 %v6036_v46, %v6036_v46  ;;  %v1933_v7 = vadd.f32 %v1932_v4, %v5647_v21 }
 0x227   :  { %v4266_v34 = vpop.f32.mrf.mxu0 }
 0x228   :  { %v6044_v54 = vmax.f32 %v1933_v7, 0.0  ;;  %4410 = vmatmul.mubr.msk.f32.gmra.mxu1 %vm2225_vm3, %v2174_v28 }
 0x229   :  { %v1937_v12 = vpop.f32.mrf.mxu0  ;;  %4412 = vmatprep.mubr.msk.f32.mxu1 %vm5012_vm1, %v5011_v38 }
 0x22a   :  { %v2175_v53 = vmul.f32 %v6044_v54, %v6044_v54  ;;  %v1938_v14 = vadd.f32 %v1937_v12, %v5653_v29 }
 0x22b   :  { %v4269_v3 = vpop.f32.mrf.mxu0 }
 0x22c   :  { %v6052_v61 = vmax.f32 %v1938_v14, 0.0  ;;  %4413 = vmatmul.mubr.msk.f32.gmra.mxu1 %vm2225_vm3, %v2175_v53 }
 0x22d   :  { %v1940_v21 = vpop.f32.mrf.mxu0  ;;  %4415 = vmatprep.mubr.msk.f32.mxu1 %vm5012_vm1, %v5011_v38 }
 0x22e   :  { %v2176_v60 = vmul.f32 %v6052_v61, %v6052_v61  ;;  %v1941_v22 = vadd.f32 %v1940_v21, %v5659_v40 }
 0x22f   :  { %v4270_v6 = vpop.f32.mrf.mxu0 }
 0x230   :  { %v6060_v4 = vmax.f32 %v1941_v22, 0.0  ;;  %4416 = vmatmul.mubr.msk.f32.gmra.mxu1 %vm2225_vm3, %v2176_v60 }
 0x231   :  { %v1945_v29 = vpop.f32.mrf.mxu0  ;;  %4418 = vmatprep.mubr.msk.f32.mxu1 %vm5012_vm1, %v5011_v38 }
 0x232   :  { %v2177_v28 = vmul.f32 %v6060_v4, %v6060_v4  ;;  %v1946_v7 = vadd.f32 %v1945_v29, %v5665_v48 }
 0x233   :  { %v4273_v34 = vpop.f32.mrf.mxu0 }
 0x234   :  { %v6068_v12 = vmax.f32 %v1946_v7, 0.0  ;;  %4419 = vmatmul.mubr.msk.f32.gmra.mxu1 %vm2225_vm3, %v2177_v28 }
 0x235   :  { %v1948_v40 = vpop.f32.mrf.mxu0  ;;  %4421 = vmatprep.mubr.msk.f32.mxu1 %vm5012_vm1, %v5011_v38 }
 0x236   :  { %v2178_v53 = vmul.f32 %v6068_v12, %v6068_v12  ;;  %v1949_v14 = vadd.f32 %v1948_v40, %v5671_v57 }
 0x237   :  { %v4274_v3 = vpop.f32.mrf.mxu0 }
 0x238   :  { %v6076_v21 = vmax.f32 %v1949_v14, 0.0  ;;  %4422 = vmatmul.mubr.msk.f32.gmra.mxu1 %vm2225_vm3, %v2178_v53 }
 0x239   :  { %v1953_v48 = vpop.f32.mrf.mxu0  ;;  %4424 = vmatprep.mubr.msk.f32.mxu1 %vm5012_vm1, %v5011_v38 }
 0x23a   :  { %v2179_v60 = vmul.f32 %v6076_v21, %v6076_v21  ;;  %v1954_v22 = vadd.f32 %v1953_v48, %v5677_v1 }
 0x23b   :  { %v4277_v6 = vpop.f32.mrf.mxu0 }
 0x23c   :  { %v6084_v29 = vmax.f32 %v1954_v22, 0.0  ;;  %4425 = vmatmul.mubr.msk.f32.gmra.mxu1 %vm2225_vm3, %v2179_v60 }
 0x23d   :  { %v1956_v57 = vpop.f32.mrf.mxu0  ;;  %4427 = vmatprep.mubr.msk.f32.mxu1 %vm5012_vm1, %v5011_v38 }
 0x23e   :  { %v2180_v28 = vmul.f32 %v6084_v29, %v6084_v29  ;;  %v1957_v7 = vadd.f32 %v1956_v57, %v5686_v11 }
 0x23f   :  { %v4278_v34 = vpop.f32.mrf.mxu0 }
 0x240   :  { %v6092_v40 = vmax.f32 %v1957_v7, 0.0  ;;  %4428 = vmatmul.mubr.msk.f32.gmra.mxu1 %vm2225_vm3, %v2180_v28 }
 0x241   :  { %v1961_v1 = vpop.f32.mrf.mxu0  ;;  %4430 = vmatprep.mubr.msk.f32.mxu1 %vm5012_vm1, %v5011_v38 }
 0x242   :  { %v2181_v53 = vmul.f32 %v6092_v40, %v6092_v40  ;;  %v1962_v14 = vadd.f32 %v1961_v1, %v5692_v19 }
 0x243   :  { %v4281_v3 = vpop.f32.mrf.mxu0 }
 0x244   :  { %v6100_v48 = vmax.f32 %v1962_v14, 0.0  ;;  %4431 = vmatmul.mubr.msk.f32.gmra.mxu1 %vm2225_vm3, %v2181_v53 }
 0x245   :  { %v1964_v11 = vpop.f32.mrf.mxu0  ;;  %4433 = vmatprep.mubr.msk.f32.mxu1 %vm5012_vm1, %v5011_v38 }
 0x246   :  { %v2182_v60 = vmul.f32 %v6100_v48, %v6100_v48  ;;  %v1965_v22 = vadd.f32 %v1964_v11, %v5698_v32 }
 0x247   :  { %v4282_v6 = vpop.f32.mrf.mxu0 }
 0x248   :  { %v6108_v57 = vmax.f32 %v1965_v22, 0.0  ;;  %4434 = vmatmul.mubr.msk.f32.gmra.mxu1 %vm2225_vm3, %v2182_v60 }
 0x249   :  { %v1969_v19 = vpop.f32.mrf.mxu0  ;;  %4436 = vmatprep.mubr.msk.f32.mxu1 %vm5012_vm1, %v5011_v38 }
 0x24a   :  { %v2183_v28 = vmul.f32 %v6108_v57, %v6108_v57  ;;  %v1970_v7 = vadd.f32 %v1969_v19, %v5704_v42 }
 0x24b   :  { %v4285_v34 = vpop.f32.mrf.mxu0 }
 0x24c   :  { %v6116_v1 = vmax.f32 %v1970_v7, 0.0  ;;  %4437 = vmatmul.mubr.msk.f32.gmra.mxu1 %vm2225_vm3, %v2183_v28 }
 0x24d   :  { %v1972_v32 = vpop.f32.mrf.mxu0  ;;  %4439 = vmatprep.mubr.msk.f32.mxu1 %vm5012_vm1, %v5011_v38 }
 0x24e   :  { %v2184_v53 = vmul.f32 %v6116_v1, %v6116_v1  ;;  %v1973_v14 = vadd.f32 %v1972_v32, %v5710_v52 }
 0x24f   :  { %v4286_v3 = vpop.f32.mrf.mxu0 }
 0x250   :  { %v6124_v11 = vmax.f32 %v1973_v14, 0.0  ;;  %4440 = vmatmul.mubr.msk.f32.gmra.mxu1 %vm2225_vm3, %v2184_v53 }
 0x251   :  { %v1977_v42 = vpop.f32.mrf.mxu0  ;;  %4442 = vmatprep.mubr.msk.f32.mxu1 %vm5012_vm1, %v5011_v38 }
 0x252   :  { %v2185_v60 = vmul.f32 %v6124_v11, %v6124_v11  ;;  %v1978_v22 = vadd.f32 %v1977_v42, %v5716_v63 }
 0x253   :  { %v4289_v6 = vpop.f32.mrf.mxu0 }
 0x254   :  { %v6132_v19 = vmax.f32 %v1978_v22, 0.0  ;;  %4443 = vmatmul.mubr.msk.f32.gmra.mxu1 %vm2225_vm3, %v2185_v60 }
 0x255   :  { %v1980_v52 = vpop.f32.mrf.mxu0  ;;  %4445 = vmatprep.mubr.msk.f32.mxu1 %vm5012_vm1, %v5011_v38 }
 0x256   :  { %v2186_v28 = vmul.f32 %v6132_v19, %v6132_v19  ;;  %v1981_v7 = vadd.f32 %v1980_v52, %v5722_v9 }
 0x257   :  { %v4290_v34 = vpop.f32.mrf.mxu0 }
 0x258   :  { %v6140_v32 = vmax.f32 %v1981_v7, 0.0  ;;  %4446 = vmatmul.mubr.msk.f32.gmra.mxu1 %vm2225_vm3, %v2186_v28 }
 0x259   :  { %v1985_v63 = vpop.f32.mrf.mxu0  ;;  %4448 = vmatprep.mubr.msk.f32.mxu1 %vm5012_vm1, %v5011_v38 }
 0x25a   :  { %v2187_v53 = vmul.f32 %v6140_v32, %v6140_v32  ;;  %v1986_v14 = vadd.f32 %v1985_v63, %v5728_v18 }
 0x25b   :  { %v4293_v3 = vpop.f32.mrf.mxu0 }
 0x25c   :  { %v6148_v42 = vmax.f32 %v1986_v14, 0.0  ;;  %4449 = vmatmul.mubr.msk.f32.gmra.mxu1 %vm2225_vm3, %v2187_v53 }
 0x25d   :  { %v1988_v9 = vpop.f32.mrf.mxu0  ;;  %4451 = vmatprep.mubr.msk.f32.mxu1 %vm5012_vm1, %v5011_v38 }
 0x25e   :  { %v2188_v60 = vmul.f32 %v6148_v42, %v6148_v42  ;;  %v1989_v22 = vadd.f32 %v1988_v9, %v5734_v33 }
 0x25f   :  { %v4294_v6 = vpop.f32.mrf.mxu0 }
 0x260   :  { %v6156_v52 = vmax.f32 %v1989_v22, 0.0  ;;  %4452 = vmatmul.mubr.msk.f32.gmra.mxu1 %vm2225_vm3, %v2188_v60 }
 0x261   :  { %v1993_v18 = vpop.f32.mrf.mxu0  ;;  %4454 = vmatprep.mubr.msk.f32.mxu1 %vm5012_vm1, %v5011_v38 }
 0x262   :  { %v2189_v28 = vmul.f32 %v6156_v52, %v6156_v52  ;;  %v1994_v7 = vadd.f32 %v1993_v18, %v5740_v45 }
 0x263   :  { %v4297_v34 = vpop.f32.mrf.mxu0 }
 0x264   :  { %v6164_v63 = vmax.f32 %v1994_v7, 0.0  ;;  %4455 = vmatmul.mubr.msk.f32.gmra.mxu1 %vm2225_vm3, %v2189_v28 }
 0x265   :  { %v1996_v33 = vpop.f32.mrf.mxu0  ;;  %4457 = vmatprep.mubr.msk.f32.mxu1 %vm5012_vm1, %v5011_v38 }
 0x266   :  { %v2190_v53 = vmul.f32 %v6164_v63, %v6164_v63  ;;  %v1997_v14 = vadd.f32 %v1996_v33, %v5746_v58 }
 0x267   :  { %v4298_v3 = vpop.f32.mrf.mxu0 }
 0x268   :  { %v6172_v9 = vmax.f32 %v1997_v14, 0.0  ;;  %4458 = vmatmul.mubr.msk.f32.gmra.mxu1 %vm2225_vm3, %v2190_v53 }
 0x269   :  { %v2001_v45 = vpop.f32.mrf.mxu0  ;;  %4460 = vmatprep.mubr.msk.f32.mxu1 %vm5012_vm1, %v5011_v38 }
 0x26a   :  { %v2191_v60 = vmul.f32 %v6172_v9, %v6172_v9  ;;  %v2002_v22 = vadd.f32 %v2001_v45, %v5752_v5 }
 0x26b   :  { %v4301_v6 = vpop.f32.mrf.mxu0 }
 0x26c   :  { %v6180_v18 = vmax.f32 %v2002_v22, 0.0  ;;  %4461 = vmatmul.mubr.msk.f32.gmra.mxu1 %vm2225_vm3, %v2191_v60 }
 0x26d   :  { %v2004_v58 = vpop.f32.mrf.mxu0  ;;  %4463 = vmatprep.mubr.msk.f32.mxu1 %vm5012_vm1, %v5011_v38 }
 0x26e   :  { %v2192_v28 = vmul.f32 %v6180_v18, %v6180_v18  ;;  %v2005_v7 = vadd.f32 %v2004_v58, %v5758_v17 }
 0x26f   :  { %v4302_v34 = vpop.f32.mrf.mxu0 }
 0x270   :  { %v6188_v33 = vmax.f32 %v2005_v7, 0.0  ;;  %4464 = vmatmul.mubr.msk.f32.gmra.mxu1 %vm2225_vm3, %v2192_v28 }
 0x271   :  { %v2009_v5 = vpop.f32.mrf.mxu0  ;;  %4466 = vmatprep.mubr.msk.f32.mxu1 %vm5012_vm1, %v5011_v38 }
 0x272   :  { %v2193_v53 = vmul.f32 %v6188_v33, %v6188_v33  ;;  %v2010_v14 = vadd.f32 %v2009_v5, %v5764_v31 }
 0x273   :  { %v4305_v3 = vpop.f32.mrf.mxu0 }
 0x274   :  { %v6196_v45 = vmax.f32 %v2010_v14, 0.0  ;;  %4467 = vmatmul.mubr.msk.f32.gmra.mxu1 %vm2225_vm3, %v2193_v53 }
 0x275   :  { %v2012_v17 = vpop.f32.mrf.mxu0  ;;  %4469 = vmatprep.mubr.msk.f32.mxu1 %vm5012_vm1, %v5011_v38 }
 0x276   :  { %v2194_v60 = vmul.f32 %v6196_v45, %v6196_v45  ;;  %v2013_v22 = vadd.f32 %v2012_v17, %v5770_v49 }
 0x277   :  { %v4306_v6 = vpop.f32.mrf.mxu0 }
 0x278   :  { %v6204_v58 = vmax.f32 %v2013_v22, 0.0  ;;  %4470 = vmatmul.mubr.msk.f32.gmra.mxu1 %vm2225_vm3, %v2194_v60 }
 0x279   :  { %v2017_v31 = vpop.f32.mrf.mxu0  ;;  %4472 = vmatprep.mubr.msk.f32.mxu1 %vm5012_vm1, %v5011_v38 }
 0x27a   :  { %v2195_v28 = vmul.f32 %v6204_v58, %v6204_v58  ;;  %v2018_v7 = vadd.f32 %v2017_v31, %v5776_v62 }
 0x27b   :  { %v4309_v34 = vpop.f32.mrf.mxu0 }
 0x27c   :  { %v6212_v5 = vmax.f32 %v2018_v7, 0.0  ;;  %4473 = vmatmul.mubr.msk.f32.gmra.mxu1 %vm2225_vm3, %v2195_v28 }
 0x27d   :  { %v2020_v49 = vpop.f32.mrf.mxu0  ;;  %4475 = vmatprep.mubr.msk.f32.mxu1 %vm5012_vm1, %v5011_v38 }
 0x27e   :  { %v2196_v53 = vmul.f32 %v6212_v5, %v6212_v5  ;;  %v2021_v14 = vadd.f32 %v2020_v49, %v5782_v13 }
 0x27f   :  { %v4310_v3 = vpop.f32.mrf.mxu0 }
 0x280   :  { %v6220_v17 = vmax.f32 %v2021_v14, 0.0  ;;  %4476 = vmatmul.mubr.msk.f32.gmra.mxu1 %vm2225_vm3, %v2196_v53 }
 0x281   :  { %v2025_v62 = vpop.f32.mrf.mxu0  ;;  %4478 = vmatprep.mubr.msk.f32.mxu1 %vm5012_vm1, %v5011_v38 }
 0x282   :  { %v2197_v60 = vmul.f32 %v6220_v17, %v6220_v17  ;;  %v2026_v22 = vadd.f32 %v2025_v62, %v5788_v27 }
 0x283   :  { %v4313_v6 = vpop.f32.mrf.mxu0 }
 0x284   :  { %v6228_v31 = vmax.f32 %v2026_v22, 0.0  ;;  %4479 = vmatmul.mubr.msk.f32.gmra.mxu1 %vm2225_vm3, %v2197_v60 }
 0x285   :  { %v2028_v13 = vpop.f32.mrf.mxu0  ;;  %4481 = vmatprep.mubr.msk.f32.mxu1 %vm5012_vm1, %v5011_v38 }
 0x286   :  { %v2198_v28 = vmul.f32 %v6228_v31, %v6228_v31  ;;  %v2029_v7 = vadd.f32 %v2028_v13, %v5794_v47 }
 0x287   :  { %v4314_v34 = vpop.f32.mrf.mxu0 }
 0x288   :  { %v6236_v49 = vmax.f32 %v2029_v7, 0.0  ;;  %4482 = vmatmul.mubr.msk.f32.gmra.mxu1 %vm2225_vm3, %v2198_v28 }
 0x289   :  { %v2033_v27 = vpop.f32.mrf.mxu0  ;;  %4484 = vmatprep.mubr.msk.f32.mxu1 %vm5012_vm1, %v5011_v38 }
 0x28a   :  { %v2199_v53 = vmul.f32 %v6236_v49, %v6236_v49  ;;  %v2034_v14 = vadd.f32 %v2033_v27, %v5800_v0 }
 0x28b   :  { %v4317_v3 = vpop.f32.mrf.mxu0 }
 0x28c   :  { %v6244_v62 = vmax.f32 %v2034_v14, 0.0  ;;  %4485 = vmatmul.mubr.msk.f32.gmra.mxu1 %vm2225_vm3, %v2199_v53 }
 0x28d   :  { %v2036_v47 = vpop.f32.mrf.mxu0  ;;  %4487 = vmatprep.mubr.msk.f32.mxu1 %vm5012_vm1, %v5011_v38 }
 0x28e   :  { %v2200_v60 = vmul.f32 %v6244_v62, %v6244_v62  ;;  %v2037_v22 = vadd.f32 %v2036_v47, %v5806_v16 }
 0x28f   :  { %v4318_v6 = vpop.f32.mrf.mxu0 }
 0x290   :  { %v6252_v13 = vmax.f32 %v2037_v22, 0.0  ;;  %4488 = vmatmul.mubr.msk.f32.gmra.mxu1 %vm2225_vm3, %v2200_v60 }
 0x291   :  { %v2041_v0 = vpop.f32.mrf.mxu0  ;;  %4490 = vmatprep.mubr.msk.f32.mxu1 %vm5012_vm1, %v5011_v38 }
 0x292   :  { %v2201_v28 = vmul.f32 %v6252_v13, %v6252_v13  ;;  %v2042_v7 = vadd.f32 %v2041_v0, %v5812_v35 }
 0x293   :  { %v4321_v34 = vpop.f32.mrf.mxu0 }
 0x294   :  { %v6260_v27 = vmax.f32 %v2042_v7, 0.0  ;;  %4491 = vmatmul.mubr.msk.f32.gmra.mxu1 %vm2225_vm3, %v2201_v28 }
 0x295   :  { %v2044_v16 = vpop.f32.mrf.mxu0  ;;  %4493 = vmatprep.mubr.msk.f32.mxu1 %vm5012_vm1, %v5011_v38 }
 0x296   :  { %7389 = vst [vmem:[#allocation9_spill] sm:$0xff] %v6260_v27  ;;  %v2202_v53 = vmul.f32 %v6260_v27, %v6260_v27  ;;  %v2045_v14 = vadd.f32 %v2044_v16, %v5818_v56 }
 0x297   :  { %v4322_v3 = vpop.f32.mrf.mxu0 }
 0x298   :  { %v6268_v47 = vmax.f32 %v2045_v14, 0.0  ;;  %4494 = vmatmul.mubr.msk.f32.gmra.mxu1 %vm2225_vm3, %v2202_v53 }
 0x299   :  { %v2049_v35 = vpop.f32.mrf.mxu0  ;;  %4496 = vmatprep.mubr.msk.f32.mxu1 %vm5012_vm1, %v5011_v38 }
 0x29a   :  { %7390 = vst [vmem:[#allocation10_spill] sm:$0xff] %v6268_v47  ;;  %v2203_v60 = vmul.f32 %v6268_v47, %v6268_v47  ;;  %v2050_v22 = vadd.f32 %v2049_v35, %v5824_v10 }
 0x29b   :  { %v4325_v6 = vpop.f32.mrf.mxu0 }
 0x29c   :  { %v6276_v0 = vmax.f32 %v2050_v22, 0.0  ;;  %4497 = vmatmul.mubr.msk.f32.gmra.mxu1 %vm2225_vm3, %v2203_v60 }
 0x29d   :  { %v2052_v56 = vpop.f32.mrf.mxu0  ;;  %4499 = vmatprep.mubr.msk.f32.mxu1 %vm5012_vm1, %v5011_v38 }
 0x29e   :  { %7391 = vst [vmem:[#allocation11_spill] sm:$0xff] %v6276_v0  ;;  %v2204_v28 = vmul.f32 %v6276_v0, %v6276_v0  ;;  %v2053_v7 = vadd.f32 %v2052_v56, %v5830_v37 }
 0x29f   :  { %v4326_v34 = vpop.f32.mrf.mxu0 }
 0x2a0   :  { %v6284_v16 = vmax.f32 %v2053_v7, 0.0  ;;  %4500 = vmatmul.mubr.msk.f32.gmra.mxu1 %vm2225_vm3, %v2204_v28  ;;  %v7395_v7 = vld [vmem:[#allocation2_spill] sm:$0xff] }
 0x2a1   :  { %v2057_v10 = vpop.f32.mrf.mxu0  ;;  %4502 = vmatprep.mubr.msk.f32.mxu1 %vm5012_vm1, %v5011_v38 }
 0x2a2   :  { %7392 = vst [vmem:[#allocation12_spill] sm:$0xff] %v6284_v16  ;;  %v2205_v53 = vmul.f32 %v6284_v16, %v6284_v16  ;;  %v2058_v14 = vadd.f32 %v2057_v10, %v5836_v59 }
 0x2a3   :  { %v4329_v3 = vpop.f32.mrf.mxu0 }
 0x2a4   :  { %v6292_v35 = vmax.f32 %v2058_v14, 0.0  ;;  %4503 = vmatmul.mubr.msk.f32.gmra.mxu1 %vm2225_vm3, %v2205_v53  ;;  %v7397_v3 = vld [vmem:[#allocation3_spill] sm:$0xff] }
 0x2a5   :  { %v2060_v37 = vpop.f32.mrf.mxu0  ;;  %4505 = vmatprep.mubr.msk.f32.mxu1 %vm5012_vm1, %v5011_v38 }
 0x2a6   :  { %7393 = vst [vmem:[#allocation13_spill] sm:$0xff] %v6292_v35  ;;  %v2206_v60 = vmul.f32 %v6292_v35, %v6292_v35  ;;  %v2061_v22 = vadd.f32 %v2060_v37, %v5842_v24 }
 0x2a7   :  { %v4330_v6 = vpop.f32.mrf.mxu0 }
 0x2a8   :  { %v6300_v56 = vmax.f32 %v2061_v22, 0.0  ;;  %4506 = vmatmul.mubr.msk.f32.gmra.mxu1 %vm2225_vm3, %v2206_v60 }
 0x2a9   :  { %v2065_v59 = vpop.f32.mrf.mxu0  ;;  %4508 = vmatprep.mubr.msk.f32.mxu1 %vm5012_vm1, %v5011_v38 }
 0x2aa   :  { %7394 = vst [vmem:[#allocation14_spill] sm:$0xff] %v6300_v56  ;;  %v2207_v28 = vmul.f32 %v6300_v56, %v6300_v56  ;;  %v2066_v34 = vadd.f32 %v2065_v59, %v7395_v7 }
 0x2ab   :  { %v4333_v10 = vpop.f32.mrf.mxu0 }
 0x2ac   :  { %v6308_v53 = vmax.f32 %v2066_v34, 0.0  ;;  %4509 = vmatmul.mubr.msk.f32.gmra.mxu1 %vm2225_vm3, %v2207_v28  ;;  %v7399_v34 = vld [vmem:[#allocation4_spill] sm:$0xff] }
 0x2ad   :  { %v2068_v24 = vpop.f32.mrf.mxu0  ;;  %4511 = vmatprep.mubr.msk.f32.mxu1 %vm5012_vm1, %v5011_v38 }
 0x2ae   :  { %7396 = vst [vmem:[#allocation2_spill] sm:$0xff] %v6308_v53  ;;  %v2208_v14 = vmul.f32 %v6308_v53, %v6308_v53  ;;  %v2069_v37 = vadd.f32 %v2068_v24, %v7397_v3 }
 0x2af   :  { %v4334_v60 = vpop.f32.mrf.mxu0 }
 0x2b0   :  { %v6316_v22 = vmax.f32 %v2069_v37, 0.0  ;;  %v2463_v6 = vpop.f32.mrf.mxu1  ;;  %4512 = vmatmul.mubr.msk.f32.gmra.mxu1 %vm2225_vm3, %v2208_v14 }
 0x2b1   :  { %v2464_v59 = vadd.f32 1.0, %v2463_v6  ;;  %v2073_v7 = vpop.f32.mrf.mxu0  ;;  %4514 = vmatprep.mubr.msk.f32.mxu1 %vm5012_vm1, %v5011_v38  ;;  %v7401_v6 = vld [vmem:[#allocation5_spill] sm:$0xff] }
 0x2b2   :  { %7398 = vst [vmem:[#allocation3_spill] sm:$0xff] %v6316_v22  ;;  %v2209_v28 = vmul.f32 %v6316_v22, %v6316_v22  ;;  %v2074_v10 = vadd.f32 %v2073_v7, %v7399_v34  ;;  %v4369_v56 = vpop.f32.mrf.mxu1 }
 0x2b3   :  { %4780 = vrsqrt.f32 %v2464_v59  ;;  %v4337_v53 = vpop.f32.mrf.mxu0 }
 0x2b4   :  { %v6324_v24 = vmax.f32 %v2074_v10, 0.0  ;;  %v2468_v3 = vpop.f32.mrf.mxu1  ;;  %4515 = vmatmul.mubr.msk.f32.gmra.mxu1 %vm2225_vm3, %v2209_v28  ;;  %v7403_v10 = vld [vmem:[#allocation6_spill] sm:$0xff] }
 0x2b5   :  { %v2469_v37 = vadd.f32 1.0, %v2468_v3  ;;  %v2076_v14 = vpop.f32.mrf.mxu0  ;;  %4517 = vmatprep.mubr.msk.f32.mxu1 %vm5012_vm1, %v5011_v38 }
 0x2b6   :  { %7400 = vst [vmem:[#allocation4_spill] sm:$0xff] %v6324_v24  ;;  %v2210_v60 = vmul.f32 %v6324_v24, %v6324_v24  ;;  %v2077_v22 = vadd.f32 %v2076_v14, %v7401_v6  ;;  %v4372_v35 = vpop.f32.mrf.mxu1 }
 0x2b7   :  { %4782 = vrsqrt.f32 %v2469_v37  ;;  %v4338_v56 = vpop.f32.mrf.mxu0 }
 0x2b8   :  { %v6332_v59 = vmax.f32 %v2077_v22, 0.0  ;;  %v2473_v53 = vpop.f32.mrf.mxu1  ;;  %4518 = vmatmul.mubr.msk.f32.gmra.mxu1 %vm2225_vm3, %v2210_v60  ;;  %v7405_v56 = vld [vmem:[#allocation7_spill] sm:$0xff] }
 0x2b9   :  { %v2474_v7 = vadd.f32 1.0, %v2473_v53  ;;  %v2081_v28 = vpop.f32.mrf.mxu0  ;;  %4520 = vmatprep.mubr.msk.f32.mxu1 %vm5012_vm1, %v5011_v38 }
 0x2ba   :  { %7402 = vst [vmem:[#allocation5_spill] sm:$0xff] %v6332_v59  ;;  %v2211_v34 = vmul.f32 %v6332_v59, %v6332_v59  ;;  %v2082_v3 = vadd.f32 %v2081_v28, %v7403_v10  ;;  %v4375_v24 = vpop.f32.mrf.mxu1 }
 0x2bb   :  { %4784 = vrsqrt.f32 %v2474_v7  ;;  %v4341_v35 = vpop.f32.mrf.mxu0 }
 0x2bc   :  { %v6340_v37 = vmax.f32 %v2082_v3, 0.0  ;;  %v2478_v22 = vpop.f32.mrf.mxu1  ;;  %4521 = vmatmul.mubr.msk.f32.gmra.mxu1 %vm2225_vm3, %v2211_v34 }
 0x2bd   :  { %v2479_v14 = vadd.f32 1.0, %v2478_v22  ;;  %v2084_v60 = vpop.f32.mrf.mxu0  ;;  %4523 = vmatprep.mubr.msk.f32.mxu1 %vm5012_vm1, %v5011_v38 }
 0x2be   :  { %7404 = vst [vmem:[#allocation6_spill] sm:$0xff] %v6340_v37  ;;  %v2212_v6 = vmul.f32 %v6340_v37, %v6340_v37  ;;  %v2085_v53 = vadd.f32 %v2084_v60, %v7405_v56  ;;  %v4378_v59 = vpop.f32.mrf.mxu1 }
 0x2bf   :  { %4786 = vrsqrt.f32 %v2479_v14  ;;  %v4342_v24 = vpop.f32.mrf.mxu0  ;;  %v7407_v59 = vld [vmem:[#allocation8_spill] sm:$0xff] }
 0x2c0   :  { %v6348_v7 = vpop.eup %4780  ;;  %v6350_v28 = vmax.f32 %v2085_v53, 0.0  ;;  %v2483_v10 = vpop.f32.mrf.mxu1  ;;  %4524 = vmatmul.mubr.msk.f32.gmra.mxu1 %vm2225_vm3, %v2212_v6 }
 0x2c1   :  { %4788 = vrsqrt.f32 %v6348_v7  ;;  %v2089_v34 = vpop.f32.mrf.mxu0  ;;  %4526 = vmatprep.mubr.msk.f32.mxu1 %vm5012_vm1, %v5011_v38  ;;  %v2484_v35 = vadd.f32 1.0, %v2483_v10  ;;  %vm2806_vm4 = vcmp.eq.f32.partialorder %v6348_v7, inf  ;;  %vm2808_vm5 = vcmp.eq.f32.partialorder %v6348_v7, 0.0 }
 0x2c2   :  { %7406 = vst [vmem:[#allocation7_spill] sm:$0xff] %v6350_v28  ;;  %v2213_v3 = vmul.f32 %v6350_v28, %v6350_v28  ;;  %v2090_v22 = vadd.f32 %v2089_v34, %v7407_v59  ;;  %v4381_v14 = vpop.f32.mrf.mxu1 }
 0x2c3   :  { %v4345_v60 = vpop.f32.mrf.mxu0  ;;  %4790 = vrsqrt.f32 %v2484_v35 }
 0x2c4   :  { %v6359_v56 = vpop.eup %4782  ;;  %v6361_v53 = vmax.f32 %v2090_v22, 0.0  ;;  %v2488_v6 = vpop.f32.mrf.mxu1  ;;  %4527 = vmatmul.mubr.msk.f32.gmra.mxu1 %vm2225_vm3, %v2213_v3 }
 0x2c5   :  { %4792 = vrsqrt.f32 %v6359_v56  ;;  %v2092_v24 = vpop.f32.mrf.mxu0  ;;  %4529 = vmatprep.mubr.msk.f32.mxu1 %vm5012_vm1, %v5011_v38  ;;  %v2489_v34 = vadd.f32 1.0, %v2488_v6  ;;  %vm2813_vm6 = vcmp.eq.f32.partialorder %v6359_v56, inf  ;;  %vm2815_vm7 = vcmp.eq.f32.partialorder %v6359_v56, 0.0 }
 0x2c6   :  { %7408 = vst [vmem:[#allocation8_spill] sm:$0xff] %v6361_v53  ;;  %v2214_v10 = vmul.f32 %v6361_v53, %v6361_v53  ;;  %v2093_v59 = vadd.f32 %v2092_v24, %v5890_v50  ;;  %v4384_v14 = vpop.f32.mrf.mxu1 }
 0x2c7   :  { %v4346_v60 = vpop.f32.mrf.mxu0  ;;  %4794 = vrsqrt.f32 %v2489_v34 }
 0x2c8   :  { %v6370_v35 = vpop.eup %4784  ;;  %v6372_v22 = vmax.f32 %v2093_v59, 0.0  ;;  %v2493_v3 = vpop.f32.mrf.mxu1  ;;  %4530 = vmatmul.mubr.msk.f32.gmra.mxu1 %vm2225_vm3, %v2214_v10 }
 0x2c9   :  { %4796 = vrsqrt.f32 %v6370_v35  ;;  %v2097_v28 = vpop.f32.mrf.mxu0  ;;  %4532 = vmatprep.mubr.msk.f32.mxu1 %vm5012_vm1, %v5011_v38  ;;  %v2494_v50 = vadd.f32 1.0, %v2493_v3  ;;  %vm2820_vm8 = vcmp.eq.f32.partialorder %v6370_v35, inf  ;;  %vm2822_vm9 = vcmp.eq.f32.partialorder %v6370_v35, 0.0 }
 0x2ca   :  { %7409 = vst [vmem:[#allocation15_spill] sm:$0xff] %v6372_v22  ;;  %v2215_v6 = vmul.f32 %v6372_v22, %v6372_v22  ;;  %v2098_v24 = vadd.f32 %v2097_v28, %v5896_v41  ;;  %v4387_v14 = vpop.f32.mrf.mxu1 }
 0x2cb   :  { %v4349_v60 = vpop.f32.mrf.mxu0  ;;  %4798 = vrsqrt.f32 %v2494_v50 }
 0x2cc   :  { %v6381_v34 = vpop.eup %4786  ;;  %v6383_v59 = vmax.f32 %v2098_v24, 0.0  ;;  %v2498_v10 = vpop.f32.mrf.mxu1  ;;  %4533 = vmatmul.mubr.msk.f32.gmra.mxu1 %vm2225_vm3, %v2215_v6  ;;  %v2809_v24 = vand.u32 2147483648, %v6348_v7 }
 0x2cd   :  { %4800 = vrsqrt.f32 %v6381_v34  ;;  %v2100_v53 = vpop.f32.mrf.mxu0  ;;  %4535 = vmatprep.mubr.msk.f32.mxu1 %vm5012_vm1, %v5011_v38  ;;  %v2499_v28 = vadd.f32 1.0, %v2498_v10  ;;  %vm2827_vm11 = vcmp.eq.f32.partialorder %v6381_v34, inf  ;;  %vm2829_vm12 = vcmp.eq.f32.partialorder %v6381_v34, 0.0 }
 0x2ce   :  { %7410 = vst [vmem:[#allocation16_spill] sm:$0xff] %v6383_v59  ;;  %v4789_v22 = vpop.eup %4788  ;;  %v2216_v41 = vmul.f32 %v6383_v59, %v6383_v59  ;;  %v4390_v3 = vpop.f32.mrf.mxu1 }
 0x2cf   :  { %v2805_v14 = vmul.f32 %v4789_v22, %v6348_v7  ;;  %v4350_v50 = vpop.f32.mrf.mxu0  ;;  %4802 = vrsqrt.f32 %v2499_v28  ;;  %v2816_v28 = vand.u32 2147483648, %v6359_v56 }
 0x2d0   :  { %v2503_v6 = vpop.f32.mrf.mxu1  ;;  %4536 = vmatmul.mubr.msk.f32.gmra.mxu1 %vm2225_vm3, %v2216_v41  ;;  %v6395_v53 = vpop.eup %4790  ;;  %v6405_v41 = vld [vmem:[%s7364_s4] ss:$0 sm:$0xff] }
 0x2d1   :  { %v2807_v38 = vsel %vm2806_vm4, %v6348_v7, %v2805_v14  ;;  %v2504_v60 = vadd.f32 1.0, %v2503_v6  ;;  %4804 = vrsqrt.f32 %v6395_v53  ;;  %vm2834_vm13 = vcmp.eq.f32.partialorder %v6395_v53, inf }
 0x2d2   :  { %v4793_v10 = vpop.eup %4792  ;;  %v2810_v3 = vsel %vm2808_vm5, %v2809_v24, %v2807_v38  ;;  %v4393_v22 = vpop.f32.mrf.mxu1  ;;  %vm2836_vm14 = vcmp.eq.f32.partialorder %v6395_v53, 0.0 }
 0x2d3   :  { %v3203_v50 = vmul.f32 %v6348_v7, %v2810_v3  ;;  %v2812_v59 = vmul.f32 %v4793_v10, %v6359_v56  ;;  %4806 = vrsqrt.f32 %v2504_v60  ;;  %v6417_v10 = vld [vmem:[%s7365_s5] ss:$0 sm:$0xff] }
 0x2d4   :  { %v2508_v14 = vpop.f32.mrf.mxu1  ;;  %v6409_v6 = vpop.eup %4794 }
 0x2d5   :  { %v3260_v24 = vmul.f32 %v3203_v50, %v5905_v25  ;;  %v2814_v38 = vsel %vm2813_vm6, %v6359_v56, %v2812_v59  ;;  %v2509_v7 = vadd.f32 1.0, %v2508_v14  ;;  %4808 = vrsqrt.f32 %v6409_v6 }
 0x2d6   :  { %v4797_v60 = vpop.eup %4796  ;;  %v2817_v3 = vsel %vm2815_vm7, %v2816_v28, %v2814_v38  ;;  %v4396_v22 = vpop.f32.mrf.mxu1  ;;  %v2823_v59 = vand.u32 2147483648, %v6370_v35  ;;  %vm2841_vm15 = vcmp.eq.f32.partialorder %v6409_v6, inf  ;;  %vm2843_vm0 = vcmp.eq.f32.partialorder %v6409_v6, 0.0 }
 0x2d7   :  { %v3324_v37 = vmul.f32 %v6405_v41, %v3260_v24  ;;  %v3204_v16 = vmul.f32 %v6359_v56, %v2817_v3  ;;  %v2819_v25 = vmul.f32 %v4797_v60, %v6370_v35  ;;  %4810 = vrsqrt.f32 %v2509_v7 }
 0x2d8   :  { %v2513_v50 = vpop.f32.mrf.mxu1  ;;  %v6426_v14 = vpop.eup %4798 }
 0x2d9   :  { %v3388_v28 = vadd.f32 %v6417_v10, %v3324_v37  ;;  %v3261_v38 = vmul.f32 %v3204_v16, %v5913_v2  ;;  %v2821_v24 = vsel %vm2820_vm8, %v6370_v35, %v2819_v25  ;;  %v2514_v22 = vadd.f32 1.0, %v2513_v50 }
 0x2da   :  { %v4801_v56 = vpop.eup %4800  ;;  %v2824_v60 = vsel %vm2822_vm9, %v2823_v59, %v2821_v24  ;;  %4812 = vrsqrt.f32 %v6426_v14  ;;  %v4399_v3 = vpop.f32.mrf.mxu1  ;;  %v2830_v2 = vand.u32 2147483648, %v6381_v34  ;;  %vm2848_vm1 = vcmp.eq.f32.partialorder %v6426_v14, inf }
 0x2db   :  { %v4066_v0 = vpack.c.bf16 %v3388_v28, %v3388_v28  ;;  %v3325_v47 = vmul.f32 %v6405_v41, %v3261_v38  ;;  %v3205_v7 = vmul.f32 %v6370_v35, %v2824_v60  ;;  %v2826_v27 = vmul.f32 %v4801_v56, %v6381_v34 }
 0x2dc   :  { %4814 = vrsqrt.f32 %v2514_v22  ;;  %v2518_v16 = vpop.f32.mrf.mxu1  ;;  %v6438_v37 = vpop.eup %4802  ;;  %vm2850_vm2 = vcmp.eq.f32.partialorder %v6426_v14, 0.0 }
 0x2dd   :  { %3675 = vst.msk [vmem:[%s7366_s6] sm:$0xf] %vm3674_vm10, %v4066_v0  ;;  %v3389_v25 = vadd.f32 %v6417_v10, %v3325_v47  ;;  %v3262_v35 = vmul.f32 %v3205_v7, %v5924_v15  ;;  %v2828_v59 = vsel %vm2827_vm11, %v6381_v34, %v2826_v27  ;;  %v2519_v50 = vadd.f32 1.0, %v2518_v16 }
 0x2de   :  { %v2831_v28 = vsel %vm2829_vm12, %v2830_v2, %v2828_v59  ;;  %4816 = vrsqrt.f32 %v6438_v37  ;;  %v4402_v38 = vpop.f32.mrf.mxu1  ;;  %v4805_v24 = vpop.eup %4804  ;;  %v2837_v7 = vand.u32 2147483648, %v6395_v53  ;;  %vm2855_vm3 = vcmp.eq.f32.partialorder %v6438_v37, inf }
 0x2df   :  { %v4067_v22 = vpack.c.bf16 %v3389_v25, %v3389_v25  ;;  %v3326_v56 = vmul.f32 %v6405_v41, %v3262_v35  ;;  %v3206_v60 = vmul.f32 %v6381_v34, %v2831_v28  ;;  %v2833_v0 = vmul.f32 %v4805_v24, %v6395_v53 }
 0x2e0   :  { %v6450_v3 = vpop.eup %4806  ;;  %4818 = vrsqrt.f32 %v2519_v50  ;;  %v2523_v15 = vpop.f32.mrf.mxu1  ;;  %vm2857_vm4 = vcmp.eq.f32.partialorder %v6438_v37, 0.0 }
 0x2e1   :  { %3676 = vst.msk [vmem:[%s7366_s6 + $0x4] sm:$0xf] %vm3674_vm10, %v4067_v22  ;;  %v3390_v27 = vadd.f32 %v6417_v10, %v3326_v56  ;;  %v3263_v47 = vmul.f32 %v3206_v60, %v5935_v55  ;;  %4820 = vrsqrt.f32 %v6450_v3  ;;  %v2835_v34 = vsel %vm2834_vm13, %v6395_v53, %v2833_v0 }
 0x2e2   :  { %v2524_v2 = vadd.f32 1.0, %v2523_v15  ;;  %v4405_v16 = vpop.f32.mrf.mxu1  ;;  %v4809_v25 = vpop.eup %4808  ;;  %v2838_v50 = vsel %vm2836_vm14, %v2837_v7, %v2835_v34  ;;  %v2844_v56 = vand.u32 2147483648, %v6409_v6  ;;  %vm2862_vm5 = vcmp.eq.f32.partialorder %v6450_v3, inf }
 0x2e3   :  { %v4068_v35 = vpack.c.bf16 %v3390_v27, %v3390_v27  ;;  %v3327_v59 = vmul.f32 %v6405_v41, %v3263_v47  ;;  %v3207_v28 = vmul.f32 %v6395_v53, %v2838_v50  ;;  %v2840_v38 = vmul.f32 %v4809_v25, %v6409_v6 }
 0x2e4   :  { %4822 = vrsqrt.f32 %v2524_v2  ;;  %v2528_v55 = vpop.f32.mrf.mxu1  ;;  %v6467_v24 = vpop.eup %4810  ;;  %vm2864_vm6 = vcmp.eq.f32.partialorder %v6450_v3, 0.0 }
 0x2e5   :  { %3677 = vst.msk [vmem:[%s7366_s6 + $0x8] sm:$0xf] %vm3674_vm10, %v4068_v35  ;;  %v3391_v22 = vadd.f32 %v6417_v10, %v3327_v59  ;;  %v2529_v60 = vadd.f32 1.0, %v2528_v55  ;;  %v3264_v53 = vmul.f32 %v3207_v28, %v5946_v26  ;;  %v2842_v0 = vsel %vm2841_vm15, %v6409_v6, %v2840_v38 }
 0x2e6   :  { %4824 = vrsqrt.f32 %v6467_v24  ;;  %v4408_v15 = vpop.f32.mrf.mxu1  ;;  %v2845_v7 = vsel %vm2843_vm0, %v2844_v56, %v2842_v0  ;;  %v2851_v26 = vand.u32 2147483648, %v6426_v14  ;;  %vm2869_vm7 = vcmp.eq.f32.partialorder %v6467_v24, inf }
 0x2e7   :  { %v4813_v27 = vpop.eup %4812  ;;  %v4069_v47 = vpack.c.bf16 %v3391_v22, %v3391_v22  ;;  %v3328_v34 = vmul.f32 %v6405_v41, %v3264_v53  ;;  %v3208_v2 = vmul.f32 %v6409_v6, %v2845_v7  ;;  %4826 = vrsqrt.f32 %v2529_v60 }
 0x2e8   :  { %v2847_v16 = vmul.f32 %v4813_v27, %v6426_v14  ;;  %v2533_v25 = vpop.f32.mrf.mxu1  ;;  %vm2871_vm8 = vcmp.eq.f32.partialorder %v6467_v24, 0.0 }
 0x2e9   :  { %v6483_v35 = vpop.eup %4814  ;;  %3678 = vst.msk [vmem:[%s7366_s6 + $0xc] sm:$0xf] %vm3674_vm10, %v4069_v47  ;;  %v2534_v59 = vadd.f32 1.0, %v2533_v25  ;;  %v3392_v6 = vadd.f32 %v6417_v10, %v3328_v34  ;;  %v3265_v50 = vmul.f32 %v3208_v2, %v5957_v20  ;;  %v2858_v20 = vand.u32 2147483648, %v6438_v37 }
 0x2ea   :  { %v2849_v28 = vsel %vm2848_vm1, %v6426_v14, %v2847_v16  ;;  %4828 = vrsqrt.f32 %v6483_v35  ;;  %v4411_v38 = vpop.f32.mrf.mxu1  ;;  %vm2876_vm9 = vcmp.eq.f32.partialorder %v6483_v35, inf  ;;  %vm2878_vm11 = vcmp.eq.f32.partialorder %v6483_v35, 0.0 }
 0x2eb   :  { %v4817_v55 = vpop.eup %4816  ;;  %v2852_v22 = vsel %vm2850_vm2, %v2851_v26, %v2849_v28  ;;  %v4070_v56 = vpack.c.bf16 %v3392_v6, %v3392_v6  ;;  %v3329_v60 = vmul.f32 %v6405_v41, %v3265_v50  ;;  %4830 = vrsqrt.f32 %v2534_v59 }
 0x2ec   :  { %v3209_v53 = vmul.f32 %v6426_v14, %v2852_v22  ;;  %v2854_v0 = vmul.f32 %v4817_v55, %v6438_v37  ;;  %v2538_v15 = vpop.f32.mrf.mxu1  ;;  %v2865_v28 = vand.u32 2147483648, %v6450_v3 }
 0x2ed   :  { %v6500_v27 = vpop.eup %4818  ;;  %v2539_v47 = vadd.f32 1.0, %v2538_v15  ;;  %3679 = vst.msk [vmem:[%s7366_s6 + $0x10] sm:$0xf] %vm3674_vm10, %v4070_v56  ;;  %v3393_v34 = vadd.f32 %v6417_v10, %v3329_v60 }
 0x2ee   :  { %v4821_v7 = vpop.eup %4820  ;;  %v3266_v14 = vmul.f32 %v3209_v53, %v5968_v44  ;;  %v2856_v2 = vsel %vm2855_vm3, %v6438_v37, %v2854_v0  ;;  %4832 = vrsqrt.f32 %v6500_v27  ;;  %v4414_v16 = vpop.f32.mrf.mxu1  ;;  %vm2883_vm12 = vcmp.eq.f32.partialorder %v6500_v27, inf }
 0x2ef   :  { %v2859_v25 = vsel %vm2857_vm4, %v2858_v20, %v2856_v2  ;;  %v2861_v26 = vmul.f32 %v4821_v7, %v6450_v3  ;;  %v4071_v59 = vpack.c.bf16 %v3393_v34, %v3393_v34  ;;  %4834 = vrsqrt.f32 %v2539_v47 }
 0x2f0   :  { %v3330_v6 = vmul.f32 %v6405_v41, %v3266_v14  ;;  %v3210_v50 = vmul.f32 %v6438_v37, %v2859_v25  ;;  %v2543_v38 = vpop.f32.mrf.mxu1  ;;  %vm2885_vm13 = vcmp.eq.f32.partialorder %v6500_v27, 0.0 }
 0x2f1   :  { %v6517_v55 = vpop.eup %4822  ;;  %v2863_v44 = vsel %vm2862_vm5, %v6450_v3, %v2861_v26  ;;  %v2544_v22 = vadd.f32 1.0, %v2543_v38  ;;  %3680 = vst.msk [vmem:[%s7366_s6 + $0x14] sm:$0xf] %vm3674_vm10, %v4071_v59 }
 0x2f2   :  { %v3394_v56 = vadd.f32 %v6417_v10, %v3330_v6  ;;  %v3267_v37 = vmul.f32 %v3210_v50, %v5979_v8  ;;  %v2866_v60 = vsel %vm2864_vm6, %v2865_v28, %v2863_v44  ;;  %4836 = vrsqrt.f32 %v6517_v55  ;;  %v4417_v53 = vpop.f32.mrf.mxu1 }
 0x2f3   :  { %v4825_v0 = vpop.eup %4824  ;;  %v3211_v15 = vmul.f32 %v6450_v3, %v2866_v60  ;;  %4838 = vrsqrt.f32 %v2544_v22  ;;  %v2872_v8 = vand.u32 2147483648, %v6467_v24  ;;  %vm2890_vm14 = vcmp.eq.f32.partialorder %v6517_v55, inf }
 0x2f4   :  { %v4072_v20 = vpack.c.bf16 %v3394_v56, %v3394_v56  ;;  %v3331_v47 = vmul.f32 %v6405_v41, %v3267_v37  ;;  %v2868_v7 = vmul.f32 %v4825_v0, %v6467_v24  ;;  %v2548_v34 = vpop.f32.mrf.mxu1  ;;  %v6531_v14 = vpop.eup %4826  ;;  %v2879_v56 = vand.u32 2147483648, %v6483_v35 }
 0x2f5   :  { %v3268_v2 = vmul.f32 %v3211_v15, %v5988_v43  ;;  %v2549_v16 = vadd.f32 1.0, %v2548_v34  ;;  %4840 = vrsqrt.f32 %v6531_v14  ;;  %vm2892_vm15 = vcmp.eq.f32.partialorder %v6517_v55, 0.0 }
 0x2f6   :  { %3681 = vst.msk [vmem:[%s7366_s6 + $0x18] sm:$0xf] %vm3674_vm10, %v4072_v20  ;;  %v3395_v3 = vadd.f32 %v6417_v10, %v3331_v47  ;;  %v2870_v25 = vsel %vm2869_vm7, %v6467_v24, %v2868_v7  ;;  %v4420_v26 = vpop.f32.mrf.mxu1  ;;  %vm2897_vm0 = vcmp.eq.f32.partialorder %v6531_v14, inf  ;;  %vm2899_vm1 = vcmp.eq.f32.partialorder %v6531_v14, 0.0 }
 0x2f7   :  { %v4829_v43 = vpop.eup %4828  ;;  %v3332_v59 = vmul.f32 %v6405_v41, %v3268_v2  ;;  %v2873_v6 = vsel %vm2871_vm8, %v2872_v8, %v2870_v25  ;;  %4842 = vrsqrt.f32 %v2549_v16 }
 0x2f8   :  { %v4073_v50 = vpack.c.bf16 %v3395_v3, %v3395_v3  ;;  %v3212_v28 = vmul.f32 %v6467_v24, %v2873_v6  ;;  %v2875_v38 = vmul.f32 %v4829_v43, %v6483_v35  ;;  %v2553_v44 = vpop.f32.mrf.mxu1  ;;  %v6550_v60 = vpop.eup %4830 }
 0x2f9   :  { %v3396_v22 = vadd.f32 %v6417_v10, %v3332_v59  ;;  %v2554_v37 = vadd.f32 1.0, %v2553_v44  ;;  %4844 = vrsqrt.f32 %v6550_v60  ;;  %vm2904_vm2 = vcmp.eq.f32.partialorder %v6550_v60, inf }
 0x2fa   :  { %3682 = vst.msk [vmem:[%s7366_s6 + $0x1c] sm:$0xf] %vm3674_vm10, %v4073_v50  ;;  %v3269_v24 = vmul.f32 %v3212_v28, %v5996_v51  ;;  %v2877_v53 = vsel %vm2876_vm9, %v6483_v35, %v2875_v38  ;;  %v4423_v0 = vpop.f32.mrf.mxu1  ;;  %v2886_v51 = vand.u32 2147483648, %v6500_v27  ;;  %vm2906_vm3 = vcmp.eq.f32.partialorder %v6550_v60, 0.0 }
 0x2fb   :  { %v4833_v15 = vpop.eup %4832  ;;  %v4074_v20 = vpack.c.bf16 %v3396_v22, %v3396_v22  ;;  %v2880_v47 = vsel %vm2878_vm11, %v2879_v56, %v2877_v53  ;;  %4846 = vrsqrt.f32 %v2554_v37  ;;  %v2893_v56 = vand.u32 2147483648, %v6517_v55 }
 0x2fc   :  { %v3333_v7 = vmul.f32 %v6405_v41, %v3269_v24  ;;  %v3213_v34 = vmul.f32 %v6483_v35, %v2880_v47  ;;  %v2882_v2 = vmul.f32 %v4833_v15, %v6500_v27  ;;  %v2558_v8 = vpop.f32.mrf.mxu1  ;;  %v6569_v3 = vpop.eup %4834 }
 0x2fd   :  { %3683 = vst.msk [vmem:[%s7366_s6 + $0x20] sm:$0xf] %vm3674_vm10, %v4074_v20  ;;  %v2559_v16 = vadd.f32 1.0, %v2558_v8  ;;  %4848 = vrsqrt.f32 %v6569_v3  ;;  %vm2911_vm4 = vcmp.eq.f32.partialorder %v6569_v3, inf  ;;  %vm2913_vm5 = vcmp.eq.f32.partialorder %v6569_v3, 0.0 }
 0x2fe   :  { %v3397_v25 = vadd.f32 %v6417_v10, %v3333_v7  ;;  %v3270_v35 = vmul.f32 %v3213_v34, %v6004_v36  ;;  %v2884_v26 = vsel %vm2883_vm12, %v6500_v27, %v2882_v2  ;;  %v4426_v43 = vpop.f32.mrf.mxu1 }
 0x2ff   :  { %v4837_v59 = vpop.eup %4836  ;;  %v2887_v6 = vsel %vm2885_vm13, %v2886_v51, %v2884_v26  ;;  %4850 = vrsqrt.f32 %v2559_v16 }
 0x300   :  { %v4075_v50 = vpack.c.bf16 %v3397_v25, %v3397_v25  ;;  %v3334_v28 = vmul.f32 %v6405_v41, %v3270_v35  ;;  %v3214_v38 = vmul.f32 %v6500_v27, %v2887_v6  ;;  %v2889_v44 = vmul.f32 %v4837_v59, %v6517_v55  ;;  %v2563_v22 = vpop.f32.mrf.mxu1  ;;  %v6580_v36 = vpop.eup %4838 }
 0x301   :  { %v2564_v37 = vadd.f32 1.0, %v2563_v22  ;;  %4852 = vrsqrt.f32 %v6580_v36  ;;  %vm2918_vm6 = vcmp.eq.f32.partialorder %v6580_v36, inf  ;;  %vm2920_vm7 = vcmp.eq.f32.partialorder %v6580_v36, 0.0 }
 0x302   :  { %3684 = vst.msk [vmem:[%s7366_s6 + $0x24] sm:$0xf] %vm3674_vm10, %v4075_v50  ;;  %v3398_v24 = vadd.f32 %v6417_v10, %v3334_v28  ;;  %v3271_v27 = vmul.f32 %v3214_v38, %v6012_v23  ;;  %v2891_v53 = vsel %vm2890_vm14, %v6517_v55, %v2889_v44  ;;  %v4429_v0 = vpop.f32.mrf.mxu1  ;;  %v4841_v15 = vpop.eup %4840  ;;  %v2900_v23 = vand.u32 2147483648, %v6531_v14 }
 0x303   :  { %v2894_v20 = vsel %vm2892_vm15, %v2893_v56, %v2891_v53  ;;  %v2896_v2 = vmul.f32 %v4841_v15, %v6531_v14  ;;  %4854 = vrsqrt.f32 %v2564_v37 }
 0x304   :  { %v4076_v47 = vpack.c.bf16 %v3398_v24, %v3398_v24  ;;  %v3335_v7 = vmul.f32 %v6405_v41, %v3271_v27  ;;  %v3215_v34 = vmul.f32 %v6517_v55, %v2894_v20  ;;  %v2568_v8 = vpop.f32.mrf.mxu1  ;;  %v6596_v51 = vpop.eup %4842 }
 0x305   :  { %v2569_v16 = vadd.f32 1.0, %v2568_v8  ;;  %v2898_v35 = vsel %vm2897_vm0, %v6531_v14, %v2896_v2  ;;  %4856 = vrsqrt.f32 %v6596_v51  ;;  %vm2925_vm8 = vcmp.eq.f32.partialorder %v6596_v51, inf }
 0x306   :  { %3685 = vst.msk [vmem:[%s7366_s6 + $0x28] sm:$0xf] %vm3674_vm10, %v4076_v47  ;;  %v3399_v25 = vadd.f32 %v6417_v10, %v3335_v7  ;;  %v3272_v55 = vmul.f32 %v3215_v34, %v6020_v30  ;;  %v4432_v26 = vpop.f32.mrf.mxu1  ;;  %v2901_v43 = vsel %vm2899_vm1, %v2900_v23, %v2898_v35  ;;  %v4845_v59 = vpop.eup %4844  ;;  %v2914_v23 = vand.u32 2147483648, %v6569_v3 }
 0x307   :  { %v3216_v28 = vmul.f32 %v6531_v14, %v2901_v43  ;;  %4858 = vrsqrt.f32 %v2569_v16  ;;  %v2903_v44 = vmul.f32 %v4845_v59, %v6550_v60  ;;  %v2907_v14 = vand.u32 2147483648, %v6550_v60 }
 0x308   :  { %v4077_v6 = vpack.c.bf16 %v3399_v25, %v3399_v25  ;;  %v3336_v50 = vmul.f32 %v6405_v41, %v3272_v55  ;;  %v2573_v38 = vpop.f32.mrf.mxu1  ;;  %v6611_v56 = vpop.eup %4846  ;;  %vm2927_vm9 = vcmp.eq.f32.partialorder %v6596_v51, 0.0 }
 0x309   :  { %v2574_v22 = vadd.f32 1.0, %v2573_v38  ;;  %v3273_v37 = vmul.f32 %v3216_v28, %v6028_v39  ;;  %v2905_v27 = vsel %vm2904_vm2, %v6550_v60, %v2903_v44  ;;  %4860 = vrsqrt.f32 %v6611_v56 }
 0x30a   :  { %3686 = vst.msk [vmem:[%s7366_s6 + $0x2c] sm:$0xf] %vm3674_vm10, %v4077_v6  ;;  %v3400_v30 = vadd.f32 %v6417_v10, %v3336_v50  ;;  %v4435_v24 = vpop.f32.mrf.mxu1  ;;  %v4849_v53 = vpop.eup %4848  ;;  %v2908_v20 = vsel %vm2906_vm3, %v2907_v14, %v2905_v27  ;;  %v2921_v28 = vand.u32 2147483648, %v6580_v36  ;;  %vm2932_vm11 = vcmp.eq.f32.partialorder %v6611_v56, inf }
 0x30b   :  { %v3337_v15 = vmul.f32 %v6405_v41, %v3273_v37  ;;  %v3217_v7 = vmul.f32 %v6550_v60, %v2908_v20  ;;  %v2910_v39 = vmul.f32 %v4849_v53, %v6569_v3  ;;  %4862 = vrsqrt.f32 %v2574_v22 }
 0x30c   :  { %v4078_v0 = vpack.c.bf16 %v3400_v30, %v3400_v30  ;;  %v2578_v47 = vpop.f32.mrf.mxu1  ;;  %v6627_v2 = vpop.eup %4850  ;;  %vm2934_vm12 = vcmp.eq.f32.partialorder %v6611_v56, 0.0 }
 0x30d   :  { %v2579_v34 = vadd.f32 1.0, %v2578_v47  ;;  %v3401_v8 = vadd.f32 %v6417_v10, %v3337_v15  ;;  %v3274_v60 = vmul.f32 %v3217_v7, %v6036_v46  ;;  %v2912_v55 = vsel %vm2911_vm4, %v6569_v3, %v2910_v39 }
 0x30e   :  { %3687 = vst.msk [vmem:[%s7366_s6 + $0x30] sm:$0xf] %vm3674_vm10, %v4078_v0  ;;  %v4438_v16 = vpop.f32.mrf.mxu1  ;;  %v4853_v25 = vpop.eup %4852  ;;  %4864 = vrsqrt.f32 %v6627_v2  ;;  %v2915_v26 = vsel %vm2913_vm5, %v2914_v23, %v2912_v55  ;;  %v2928_v47 = vand.u32 2147483648, %v6596_v51  ;;  %vm2939_vm13 = vcmp.eq.f32.partialorder %v6627_v2, inf }
 0x30f   :  { %v4079_v35 = vpack.c.bf16 %v3401_v8, %v3401_v8  ;;  %v2917_v43 = vmul.f32 %v4853_v25, %v6580_v36  ;;  %v3338_v6 = vmul.f32 %v6405_v41, %v3274_v60  ;;  %v3218_v50 = vmul.f32 %v6569_v3, %v2915_v26 }
 0x310   :  { %v2583_v59 = vpop.f32.mrf.mxu1  ;;  %4866 = vrsqrt.f32 %v2579_v34  ;;  %v6645_v46 = vpop.eup %4854  ;;  %vm2941_vm14 = vcmp.eq.f32.partialorder %v6627_v2, 0.0 }
 0x311   :  { %3688 = vst.msk [vmem:[%s7366_s6 + $0x34] sm:$0xf] %vm3674_vm10, %v4079_v35  ;;  %v2919_v38 = vsel %vm2918_vm6, %v6580_v36, %v2917_v43  ;;  %v2584_v44 = vadd.f32 1.0, %v2583_v59  ;;  %v3402_v37 = vadd.f32 %v6417_v10, %v3338_v6  ;;  %v3275_v3 = vmul.f32 %v3218_v50, %v6044_v54 }
 0x312   :  { %v4441_v22 = vpop.f32.mrf.mxu1  ;;  %v4857_v30 = vpop.eup %4856  ;;  %v2922_v14 = vsel %vm2920_vm7, %v2921_v28, %v2919_v38  ;;  %4868 = vrsqrt.f32 %v6645_v46  ;;  %v2935_v6 = vand.u32 2147483648, %v6611_v56  ;;  %vm2946_vm15 = vcmp.eq.f32.partialorder %v6645_v46, inf }
 0x313   :  { %v3219_v24 = vmul.f32 %v6580_v36, %v2922_v14  ;;  %v2924_v27 = vmul.f32 %v4857_v30, %v6596_v51  ;;  %v4080_v15 = vpack.c.bf16 %v3402_v37, %v3402_v37  ;;  %v3339_v20 = vmul.f32 %v6405_v41, %v3275_v3 }
 0x314   :  { %v2588_v53 = vpop.f32.mrf.mxu1  ;;  %v6659_v0 = vpop.eup %4858  ;;  %4870 = vrsqrt.f32 %v2584_v44  ;;  %vm2948_vm0 = vcmp.eq.f32.partialorder %v6645_v46, 0.0 }
 0x315   :  { %v3276_v54 = vmul.f32 %v3219_v24, %v6052_v61  ;;  %v2926_v7 = vsel %vm2925_vm8, %v6596_v51, %v2924_v27  ;;  %4872 = vrsqrt.f32 %v6659_v0  ;;  %3689 = vst.msk [vmem:[%s7366_s6 + $0x38] sm:$0xf] %vm3674_vm10, %v4080_v15  ;;  %v3403_v39 = vadd.f32 %v6417_v10, %v3339_v20 }
 0x316   :  { %v4444_v36 = vpop.f32.mrf.mxu1  ;;  %v2929_v34 = vsel %vm2927_vm9, %v2928_v47, %v2926_v7  ;;  %v4861_v8 = vpop.eup %4860  ;;  %v2589_v16 = vadd.f32 1.0, %v2588_v53  ;;  %v2942_v27 = vand.u32 2147483648, %v6627_v2  ;;  %vm2953_vm1 = vcmp.eq.f32.partialorder %v6659_v0, inf }
 0x317   :  { %v3340_v23 = vmul.f32 %v6405_v41, %v3276_v54  ;;  %v3220_v61 = vmul.f32 %v6596_v51, %v2929_v34  ;;  %v4081_v60 = vpack.c.bf16 %v3403_v39, %v3403_v39  ;;  %v2931_v55 = vmul.f32 %v4861_v8, %v6611_v56 }
 0x318   :  { %v2593_v25 = vpop.f32.mrf.mxu1  ;;  %v6676_v26 = vpop.eup %4862  ;;  %4874 = vrsqrt.f32 %v2589_v16  ;;  %vm2955_vm2 = vcmp.eq.f32.partialorder %v6659_v0, 0.0 }
 0x319   :  { %v2594_v35 = vadd.f32 1.0, %v2593_v25  ;;  %v3404_v43 = vadd.f32 %v6417_v10, %v3340_v23  ;;  %v3277_v59 = vmul.f32 %v3220_v61, %v6060_v4  ;;  %3690 = vst.msk [vmem:[%s7366_s6 + $0x3c] sm:$0xf] %vm3674_vm10, %v4081_v60  ;;  %v2933_v51 = vsel %vm2932_vm11, %v6611_v56, %v2931_v55 }
 0x31a   :  { %v4447_v50 = vpop.f32.mrf.mxu1  ;;  %4876 = vrsqrt.f32 %v6676_v26  ;;  %v2936_v4 = vsel %vm2934_vm12, %v2935_v6, %v2933_v51  ;;  %v2956_v51 = vand.u32 2147483648, %v6659_v0  ;;  %vm2960_vm3 = vcmp.eq.f32.partialorder %v6676_v26, inf }
 0x31b   :  { %v4865_v28 = vpop.eup %4864  ;;  %v4082_v38 = vpack.c.bf16 %v3404_v43, %v3404_v43  ;;  %v3341_v44 = vmul.f32 %v6405_v41, %v3277_v59  ;;  %v3221_v30 = vmul.f32 %v6611_v56, %v2936_v4  ;;  %4878 = vrsqrt.f32 %v2594_v35 }
 0x31c   :  { %v2598_v22 = vpop.f32.mrf.mxu1  ;;  %v2938_v37 = vmul.f32 %v4865_v28, %v6627_v2  ;;  %vm2962_vm4 = vcmp.eq.f32.partialorder %v6676_v26, 0.0 }
 0x31d   :  { %v2599_v3 = vadd.f32 1.0, %v2598_v22  ;;  %v6691_v14 = vpop.eup %4866  ;;  %3691 = vst.msk [vmem:[%s7366_s6 + $0x40] sm:$0xf] %vm3674_vm10, %v4082_v38  ;;  %v3405_v24 = vadd.f32 %v6417_v10, %v3341_v44  ;;  %v3278_v56 = vmul.f32 %v3221_v30, %v6068_v12  ;;  %v2949_v12 = vand.u32 2147483648, %v6645_v46 }
 0x31e   :  { %v4450_v53 = vpop.f32.mrf.mxu1  ;;  %v2940_v15 = vsel %vm2939_vm13, %v6627_v2, %v2938_v37  ;;  %4880 = vrsqrt.f32 %v6691_v14  ;;  %vm2967_vm5 = vcmp.eq.f32.partialorder %v6691_v14, inf  ;;  %vm2969_vm6 = vcmp.eq.f32.partialorder %v6691_v14, 0.0 }
 0x31f   :  { %v4869_v20 = vpop.eup %4868  ;;  %v4083_v47 = vpack.c.bf16 %v3405_v24, %v3405_v24  ;;  %v2943_v54 = vsel %vm2941_vm14, %v2942_v27, %v2940_v15  ;;  %v3342_v36 = vmul.f32 %v6405_v41, %v3278_v56  ;;  %4882 = vrsqrt.f32 %v2599_v3 }
 0x320   :  { %v2603_v7 = vpop.f32.mrf.mxu1  ;;  %v3222_v39 = vmul.f32 %v6627_v2, %v2943_v54  ;;  %v2945_v34 = vmul.f32 %v4869_v20, %v6645_v46 }
 0x321   :  { %v6707_v8 = vpop.eup %4870  ;;  %3692 = vst.msk [vmem:[%s7366_s6 + $0x44] sm:$0xf] %vm3674_vm10, %v4083_v47  ;;  %v2604_v23 = vadd.f32 1.0, %v2603_v7  ;;  %v3406_v2 = vadd.f32 %v6417_v10, %v3342_v36 }
 0x322   :  { %v4453_v61 = vpop.f32.mrf.mxu1  ;;  %v4873_v16 = vpop.eup %4872  ;;  %v3279_v25 = vmul.f32 %v3222_v39, %v6076_v21  ;;  %v2947_v60 = vsel %vm2946_vm15, %v6645_v46, %v2945_v34  ;;  %4884 = vrsqrt.f32 %v6707_v8  ;;  %vm2974_vm7 = vcmp.eq.f32.partialorder %v6707_v8, inf }
 0x323   :  { %v2950_v55 = vsel %vm2948_vm0, %v2949_v12, %v2947_v60  ;;  %v2952_v35 = vmul.f32 %v4873_v16, %v6659_v0  ;;  %v4084_v59 = vpack.c.bf16 %v3406_v2, %v3406_v2  ;;  %4886 = vrsqrt.f32 %v2604_v23 }
 0x324   :  { %v2608_v43 = vpop.f32.mrf.mxu1  ;;  %v3343_v6 = vmul.f32 %v6405_v41, %v3279_v25  ;;  %v3223_v50 = vmul.f32 %v6645_v46, %v2950_v55  ;;  %v2970_v2 = vand.u32 2147483648, %v6691_v14  ;;  %vm2976_vm8 = vcmp.eq.f32.partialorder %v6707_v8, 0.0 }
 0x325   :  { %v2954_v28 = vsel %vm2953_vm1, %v6659_v0, %v2952_v35  ;;  %v2609_v21 = vadd.f32 1.0, %v2608_v43  ;;  %v6727_v44 = vpop.eup %4874  ;;  %3693 = vst.msk [vmem:[%s7366_s6 + $0x48] sm:$0xf] %vm3674_vm10, %v4084_v59 }
 0x326   :  { %v4456_v38 = vpop.f32.mrf.mxu1  ;;  %v3407_v4 = vadd.f32 %v6417_v10, %v3343_v6  ;;  %v3280_v46 = vmul.f32 %v3223_v50, %v6084_v29  ;;  %v2957_v22 = vsel %vm2955_vm2, %v2956_v51, %v2954_v28  ;;  %4888 = vrsqrt.f32 %v6727_v44 }
 0x327   :  { %v4877_v30 = vpop.eup %4876  ;;  %v3224_v37 = vmul.f32 %v6659_v0, %v2957_v22  ;;  %v2963_v29 = vand.u32 2147483648, %v6676_v26  ;;  %4890 = vrsqrt.f32 %v2609_v21  ;;  %vm2981_vm9 = vcmp.eq.f32.partialorder %v6727_v44, inf }
 0x328   :  { %v2613_v3 = vpop.f32.mrf.mxu1  ;;  %v4085_v24 = vpack.c.bf16 %v3407_v4, %v3407_v4  ;;  %v3344_v27 = vmul.f32 %v6405_v41, %v3280_v46  ;;  %v2959_v53 = vmul.f32 %v4877_v30, %v6676_v26  ;;  %v6740_v56 = vpop.eup %4878  ;;  %vm2983_vm11 = vcmp.eq.f32.partialorder %v6727_v44, 0.0 }
 0x329   :  { %v3281_v15 = vmul.f32 %v3224_v37, %v6092_v40  ;;  %v2614_v20 = vadd.f32 1.0, %v2613_v3  ;;  %4892 = vrsqrt.f32 %v6740_v56  ;;  %vm2988_vm12 = vcmp.eq.f32.partialorder %v6740_v56, inf }
 0x32a   :  { %v4459_v47 = vpop.f32.mrf.mxu1  ;;  %3694 = vst.msk [vmem:[%s7366_s6 + $0x4c] sm:$0xf] %vm3674_vm10, %v4085_v24  ;;  %v3408_v0 = vadd.f32 %v6417_v10, %v3344_v27  ;;  %v2961_v54 = vsel %vm2960_vm3, %v6676_v26, %v2959_v53  ;;  %vm2990_vm13 = vcmp.eq.f32.partialorder %v6740_v56, 0.0 }
 0x32b   :  { %v4881_v7 = vpop.eup %4880  ;;  %v3345_v40 = vmul.f32 %v6405_v41, %v3281_v15  ;;  %v2964_v36 = vsel %vm2962_vm4, %v2963_v29, %v2961_v54  ;;  %4894 = vrsqrt.f32 %v2614_v20 }
 0x32c   :  { %v2618_v39 = vpop.f32.mrf.mxu1  ;;  %v4086_v34 = vpack.c.bf16 %v3408_v0, %v3408_v0  ;;  %v3225_v12 = vmul.f32 %v6676_v26, %v2964_v36  ;;  %v2966_v23 = vmul.f32 %v4881_v7, %v6691_v14  ;;  %v6755_v61 = vpop.eup %4882 }
 0x32d   :  { %v3409_v16 = vadd.f32 %v6417_v10, %v3345_v40  ;;  %v2619_v25 = vadd.f32 1.0, %v2618_v39  ;;  %4896 = vrsqrt.f32 %v6755_v61  ;;  %vm2995_vm14 = vcmp.eq.f32.partialorder %v6755_v61, inf }
 0x32e   :  { %v4462_v60 = vpop.f32.mrf.mxu1  ;;  %3695 = vst.msk [vmem:[%s7366_s6 + $0x50] sm:$0xf] %vm3674_vm10, %v4086_v34  ;;  %v3282_v26 = vmul.f32 %v3225_v12, %v6100_v48  ;;  %v2968_v55 = vsel %vm2967_vm5, %v6691_v14, %v2966_v23  ;;  %v2977_v48 = vand.u32 2147483648, %v6707_v8  ;;  %vm2997_vm15 = vcmp.eq.f32.partialorder %v6755_v61, 0.0 }
 0x32f   :  { %v4885_v35 = vpop.eup %4884  ;;  %v4087_v43 = vpack.c.bf16 %v3409_v16, %v3409_v16  ;;  %v2971_v59 = vsel %vm2969_vm6, %v2970_v2, %v2968_v55  ;;  %4898 = vrsqrt.f32 %v2619_v25  ;;  %v2991_v16 = vand.u32 2147483648, %v6740_v56 }
 0x330   :  { %v2623_v6 = vpop.f32.mrf.mxu1  ;;  %v3346_v50 = vmul.f32 %v6405_v41, %v3282_v26  ;;  %v3226_v51 = vmul.f32 %v6691_v14, %v2971_v59  ;;  %v2973_v28 = vmul.f32 %v4885_v35, %v6707_v8  ;;  %v6777_v4 = vpop.eup %4886 }
 0x331   :  { %3696 = vst.msk [vmem:[%s7366_s6 + $0x54] sm:$0xf] %vm3674_vm10, %v4087_v43  ;;  %v2624_v21 = vadd.f32 1.0, %v2623_v6  ;;  %4900 = vrsqrt.f32 %v6777_v4  ;;  %vm3002_vm0 = vcmp.eq.f32.partialorder %v6777_v4, inf  ;;  %vm3004_vm1 = vcmp.eq.f32.partialorder %v6777_v4, 0.0 }
 0x332   :  { %v4465_v38 = vpop.f32.mrf.mxu1  ;;  %v3410_v46 = vadd.f32 %v6417_v10, %v3346_v50  ;;  %v3283_v14 = vmul.f32 %v3226_v51, %v6108_v57  ;;  %v2975_v22 = vsel %vm2974_vm7, %v6707_v8, %v2973_v28 }
 0x333   :  { %v2978_v30 = vsel %vm2976_vm8, %v2977_v48, %v2975_v22  ;;  %v4889_v3 = vpop.eup %4888  ;;  %4902 = vrsqrt.f32 %v2624_v21  ;;  %v2998_v48 = vand.u32 2147483648, %v6755_v61 }
 0x334   :  { %v2628_v37 = vpop.f32.mrf.mxu1  ;;  %v4088_v24 = vpack.c.bf16 %v3410_v46, %v3410_v46  ;;  %v3347_v27 = vmul.f32 %v6405_v41, %v3283_v14  ;;  %v3227_v53 = vmul.f32 %v6707_v8, %v2978_v30  ;;  %v2980_v15 = vmul.f32 %v4889_v3, %v6727_v44  ;;  %v6787_v57 = vpop.eup %4890 }
 0x335   :  { %v2629_v29 = vadd.f32 1.0, %v2628_v37  ;;  %v2984_v8 = vand.u32 2147483648, %v6727_v44  ;;  %4904 = vrsqrt.f32 %v6787_v57  ;;  %vm3009_vm2 = vcmp.eq.f32.partialorder %v6787_v57, inf }
 0x336   :  { %v4468_v20 = vpop.f32.mrf.mxu1  ;;  %3697 = vst.msk [vmem:[%s7366_s6 + $0x58] sm:$0xf] %vm3674_vm10, %v4088_v24  ;;  %v3411_v47 = vadd.f32 %v6417_v10, %v3347_v27  ;;  %v3284_v0 = vmul.f32 %v3227_v53, %v6116_v1  ;;  %v4893_v54 = vpop.eup %4892  ;;  %v2982_v7 = vsel %vm2981_vm9, %v6727_v44, %v2980_v15  ;;  %vm3011_vm3 = vcmp.eq.f32.partialorder %v6787_v57, 0.0 }
 0x337   :  { %v2985_v34 = vsel %vm2983_vm11, %v2984_v8, %v2982_v7  ;;  %v2987_v1 = vmul.f32 %v4893_v54, %v6740_v56  ;;  %4906 = vrsqrt.f32 %v2629_v29 }
 0x338   :  { %v2633_v40 = vpop.f32.mrf.mxu1  ;;  %v4089_v36 = vpack.c.bf16 %v3411_v47, %v3411_v47  ;;  %v3348_v39 = vmul.f32 %v6405_v41, %v3284_v0  ;;  %v6803_v12 = vpop.eup %4894  ;;  %v3228_v23 = vmul.f32 %v6727_v44, %v2985_v34  ;;  %v3005_v47 = vand.u32 2147483648, %v6777_v4 }
 0x339   :  { %v2634_v2 = vadd.f32 1.0, %v2633_v40  ;;  %v2989_v26 = vsel %vm2988_vm12, %v6740_v56, %v2987_v1  ;;  %4908 = vrsqrt.f32 %v6803_v12  ;;  %v6865_v1 = vld [vmem:[%s7365_s5] ss:$0 sm:$0xff]  ;;  %vm3016_vm4 = vcmp.eq.f32.partialorder %v6803_v12, inf }
 0x33a   :  { %v4471_v25 = vpop.f32.mrf.mxu1  ;;  %3698 = vst.msk [vmem:[%s7366_s6 + $0x5c] sm:$0xf] %vm3674_vm10, %v4089_v36  ;;  %v3412_v60 = vadd.f32 %v6417_v10, %v3348_v39  ;;  %v4897_v55 = vpop.eup %4896  ;;  %v3285_v44 = vmul.f32 %v3228_v23, %v6124_v11  ;;  %v2992_v35 = vsel %vm2990_vm13, %v2991_v16, %v2989_v26  ;;  %vm3018_vm5 = vcmp.eq.f32.partialorder %v6803_v12, 0.0 }
 0x33b   :  { %v3229_v6 = vmul.f32 %v6740_v56, %v2992_v35  ;;  %v2994_v50 = vmul.f32 %v4897_v55, %v6755_v61  ;;  %4910 = vrsqrt.f32 %v2634_v2 }
 0x33c   :  { %v2638_v43 = vpop.f32.mrf.mxu1  ;;  %v4090_v59 = vpack.c.bf16 %v3412_v60, %v3412_v60  ;;  %v6818_v51 = vpop.eup %4898  ;;  %v3349_v28 = vmul.f32 %v6405_v41, %v3285_v44 }
 0x33d   :  { %v2639_v21 = vadd.f32 1.0, %v2638_v43  ;;  %v3286_v11 = vmul.f32 %v3229_v6, %v6132_v19  ;;  %v2996_v56 = vsel %vm2995_vm14, %v6755_v61, %v2994_v50  ;;  %4912 = vrsqrt.f32 %v6818_v51 }
 0x33e   :  { %v4474_v38 = vpop.f32.mrf.mxu1  ;;  %3699 = vst.msk [vmem:[%s7366_s6 + $0x60] sm:$0xf] %vm3674_vm10, %v4090_v59  ;;  %v3413_v46 = vadd.f32 %v6417_v10, %v3349_v28  ;;  %v2999_v14 = vsel %vm2997_vm15, %v2998_v48, %v2996_v56  ;;  %v4901_v30 = vpop.eup %4900  ;;  %vm3023_vm6 = vcmp.eq.f32.partialorder %v6818_v51, inf  ;;  %vm3025_vm7 = vcmp.eq.f32.partialorder %v6818_v51, 0.0 }
 0x33f   :  { %v3350_v37 = vmul.f32 %v6405_v41, %v3286_v11  ;;  %v3230_v3 = vmul.f32 %v6755_v61, %v2999_v14  ;;  %4914 = vrsqrt.f32 %v2639_v21  ;;  %v3001_v19 = vmul.f32 %v4901_v30, %v6777_v4 }
 0x340   :  { %v2643_v22 = vpop.f32.mrf.mxu1  ;;  %v4091_v27 = vpack.c.bf16 %v3413_v46, %v3413_v46  ;;  %v6836_v15 = vpop.eup %4902  ;;  %v3026_v30 = vand.u32 2147483648, %v6818_v51 }
 0x341   :  { %v2644_v24 = vadd.f32 1.0, %v2643_v22  ;;  %v3414_v29 = vadd.f32 %v6417_v10, %v3350_v37  ;;  %v3287_v20 = vmul.f32 %v3230_v3, %v6140_v32  ;;  %v3003_v41 = vsel %vm3002_vm0, %v6777_v4, %v3001_v19  ;;  %v6851_v32 = vld [vmem:[%s7364_s4] ss:$0 sm:$0xff] }
 0x342   :  { %v4477_v53 = vpop.f32.mrf.mxu1  ;;  %3700 = vst.msk [vmem:[%s7366_s6 + $0x64] sm:$0xf] %vm3674_vm10, %v4091_v27  ;;  %v4905_v0 = vpop.eup %4904  ;;  %v3006_v54 = vsel %vm3004_vm1, %v3005_v47, %v3003_v41  ;;  %vm3030_vm8 = vcmp.eq.f32.partialorder %v6836_v15, inf  ;;  %vm3032_vm9 = vcmp.eq.f32.partialorder %v6836_v15, 0.0 }
 0x343   :  { %4916 = vrsqrt.f32 %v2644_v24  ;;  %v4092_v8 = vpack.c.bf16 %v3414_v29, %v3414_v29  ;;  %v3351_v10 = vmul.f32 %v6851_v32, %v3287_v20  ;;  %v3231_v7 = vmul.f32 %v6777_v4, %v3006_v54 }
 0x344   :  { %4918 = vrsqrt.f32 %v6836_v15  ;;  %v2648_v61 = vpop.f32.mrf.mxu1  ;;  %v3008_v40 = vmul.f32 %v4905_v0, %v6787_v57  ;;  %v6856_v34 = vpop.eup %4906  ;;  %v3012_v4 = vand.u32 2147483648, %v6787_v57  ;;  %v3033_v0 = vand.u32 2147483648, %v6836_v15 }
 0x345   :  { %v2649_v36 = vadd.f32 1.0, %v2648_v61  ;;  %3701 = vst.msk [vmem:[%s7366_s6 + $0x68] sm:$0xf] %vm3674_vm10, %v4092_v8  ;;  %v3415_v23 = vadd.f32 %v6865_v1, %v3351_v10  ;;  %v3288_v2 = vmul.f32 %v3231_v7, %v6148_v42  ;;  %4920 = vrsqrt.f32 %v6856_v34 }
 0x346   :  { %v4480_v39 = vpop.f32.mrf.mxu1  ;;  %v4909_v16 = vpop.eup %4908  ;;  %v3010_v25 = vsel %vm3009_vm2, %v6787_v57, %v3008_v40  ;;  %v3019_v42 = vand.u32 2147483648, %v6803_v12  ;;  %vm3037_vm11 = vcmp.eq.f32.partialorder %v6856_v34, inf  ;;  %vm3039_vm12 = vcmp.eq.f32.partialorder %v6856_v34, 0.0 }
 0x347   :  { %v4093_v26 = vpack.c.bf16 %v3415_v23, %v3415_v23  ;;  %v3013_v55 = vsel %vm3011_vm3, %v3012_v4, %v3010_v25  ;;  %v3015_v44 = vmul.f32 %v4909_v16, %v6803_v12  ;;  %v3352_v43 = vmul.f32 %v6851_v32, %v3288_v2 }
 0x348   :  { %v2653_v60 = vpop.f32.mrf.mxu1  ;;  %v6876_v35 = vpop.eup %4910  ;;  %v3232_v59 = vmul.f32 %v6787_v57, %v3013_v55  ;;  %4922 = vrsqrt.f32 %v2649_v36  ;;  %v3040_v55 = vand.u32 2147483648, %v6856_v34 }
 0x349   :  { %3702 = vst.msk [vmem:[%s7366_s6 + $0x6c] sm:$0xf] %vm3674_vm10, %v4093_v26  ;;  %v3017_v50 = vsel %vm3016_vm4, %v6803_v12, %v3015_v44  ;;  %4924 = vrsqrt.f32 %v6876_v35  ;;  %v3416_v48 = vadd.f32 %v6865_v1, %v3352_v43  ;;  %vm3044_vm13 = vcmp.eq.f32.partialorder %v6876_v35, inf }
 0x34a   :  { %v4483_v6 = vpop.f32.mrf.mxu1  ;;  %v4913_v28 = vpop.eup %4912  ;;  %v3289_v57 = vmul.f32 %v3232_v59, %v6156_v52  ;;  %v3020_v21 = vsel %vm3018_vm5, %v3019_v42, %v3017_v50  ;;  %vm3046_vm14 = vcmp.eq.f32.partialorder %v6876_v35, 0.0 }
 0x34b   :  { %v3233_v11 = vmul.f32 %v6803_v12, %v3020_v21  ;;  %v3022_v56 = vmul.f32 %v4913_v28, %v6818_v51  ;;  %v4094_v14 = vpack.c.bf16 %v3416_v48, %v3416_v48  ;;  %v2654_v12 = vadd.f32 1.0, %v2653_v60 }
 0x34c   :  { %v2658_v38 = vpop.f32.mrf.mxu1  ;;  %v6893_v46 = vpop.eup %4914  ;;  %v3353_v22 = vmul.f32 %v6851_v32, %v3289_v57  ;;  %v3047_v57 = vand.u32 2147483648, %v6876_v35 }
 0x34d   :  { %v3290_v52 = vmul.f32 %v3233_v11, %v6164_v63  ;;  %v3024_v3 = vsel %vm3023_vm6, %v6818_v51, %v3022_v56  ;;  %4926 = vrsqrt.f32 %v6893_v46  ;;  %3703 = vst.msk [vmem:[%s7366_s6 + $0x70] sm:$0xf] %vm3674_vm10, %v4094_v14  ;;  %v2659_v53 = vadd.f32 1.0, %v2658_v38 }
 0x34e   :  { %v4486_v37 = vpop.f32.mrf.mxu1  ;;  %v3417_v27 = vadd.f32 %v6865_v1, %v3353_v22  ;;  %v3027_v19 = vsel %vm3025_vm7, %v3026_v30, %v3024_v3  ;;  %vm3051_vm15 = vcmp.eq.f32.partialorder %v6893_v46, inf  ;;  %vm3053_vm0 = vcmp.eq.f32.partialorder %v6893_v46, 0.0 }
 0x34f   :  { %v3354_v63 = vmul.f32 %v6851_v32, %v3290_v52  ;;  %v3234_v47 = vmul.f32 %v6818_v51, %v3027_v19  ;;  %v3054_v19 = vand.u32 2147483648, %v6893_v46 }
 0x350   :  { %v6901_v24 = vpop.eup %4916  ;;  %v2663_v29 = vpop.f32.mrf.mxu1  ;;  %v4095_v41 = vpack.c.bf16 %v3417_v27, %v3417_v27 }
 0x351   :  { %v4919_v20 = vpop.eup %4918  ;;  %4928 = vrsqrt.f32 %v6901_v24  ;;  %v3418_v10 = vadd.f32 %v6865_v1, %v3354_v63  ;;  %v3291_v54 = vmul.f32 %v3234_v47, %v6172_v9  ;;  %v2664_v7 = vadd.f32 1.0, %v2663_v29 }
 0x352   :  { %v3029_v61 = vmul.f32 %v4919_v20, %v6836_v15  ;;  %v4489_v8 = vpop.f32.mrf.mxu1  ;;  %4930 = vrsqrt.f32 %v2654_v12  ;;  %3704 = vst.msk [vmem:[%s7366_s6 + $0x74] sm:$0xf] %vm3674_vm10, %v4095_v41  ;;  %v4921_v36 = vpop.eup %4920  ;;  %vm3058_vm1 = vcmp.eq.f32.partialorder %v6901_v24, inf  ;;  %vm3060_vm2 = vcmp.eq.f32.partialorder %v6901_v24, 0.0 }
 0x353   :  { %4932 = vrsqrt.f32 %v2659_v53  ;;  %v4096_v39 = vpack.c.bf16 %v3418_v10, %v3418_v10  ;;  %v3355_v23 = vmul.f32 %v6851_v32, %v3291_v54  ;;  %v3036_v16 = vmul.f32 %v4921_v36, %v6856_v34 }
 0x354   :  { %v3031_v51 = vsel %vm3030_vm8, %v6836_v15, %v3029_v61  ;;  %v2668_v40 = vpop.f32.mrf.mxu1  ;;  %4934 = vrsqrt.f32 %v2664_v7 }
 0x355   :  { %v3034_v4 = vsel %vm3032_vm9, %v3033_v0, %v3031_v51  ;;  %v2669_v2 = vadd.f32 1.0, %v2668_v40  ;;  %v6925_v60 = vpop.eup %4922  ;;  %3705 = vst.msk [vmem:[%s7366_s6 + $0x78] sm:$0xf] %vm3674_vm10, %v4096_v39  ;;  %v3419_v26 = vadd.f32 %v6865_v1, %v3355_v23  ;;  %v3038_v43 = vsel %vm3037_vm11, %v6856_v34, %v3036_v16 }
 0x356   :  { %v3235_v9 = vmul.f32 %v6836_v15, %v3034_v4  ;;  %v4492_v25 = vpop.f32.mrf.mxu1  ;;  %v4925_v44 = vpop.eup %4924  ;;  %4936 = vrsqrt.f32 %v6925_v60  ;;  %v3041_v6 = vsel %vm3039_vm12, %v3040_v55, %v3038_v43  ;;  %vm3065_vm3 = vcmp.eq.f32.partialorder %v6925_v60, inf }
 0x357   :  { %v4097_v42 = vpack.c.bf16 %v3419_v26, %v3419_v26  ;;  %v3043_v50 = vmul.f32 %v4925_v44, %v6876_v35  ;;  %v3236_v48 = vmul.f32 %v6856_v34, %v3041_v6  ;;  %4938 = vrsqrt.f32 %v2669_v2 }
 0x358   :  { %v3292_v15 = vmul.f32 %v3235_v9, %v6180_v18  ;;  %v2673_v59 = vpop.f32.mrf.mxu1  ;;  %vm3067_vm4 = vcmp.eq.f32.partialorder %v6925_v60, 0.0 }
 0x359   :  { %3706 = vst.msk [vmem:[%s7366_s6 + $0x7c] sm:$0xf] %vm3674_vm10, %v4097_v42  ;;  %v3045_v21 = vsel %vm3044_vm13, %v6876_v35, %v3043_v50  ;;  %v2674_v38 = vadd.f32 1.0, %v2673_v59  ;;  %v3293_v34 = vmul.f32 %v3236_v48, %v6188_v33 }
 0x35a   :  { %v3356_v28 = vmul.f32 %v6851_v32, %v3292_v15  ;;  %v4495_v18 = vpop.f32.mrf.mxu1  ;;  %v4927_v11 = vpop.eup %4926  ;;  %v3048_v14 = vsel %vm3046_vm14, %v3047_v57, %v3045_v21 }
 0x35b   :  { %v3237_v30 = vmul.f32 %v6876_v35, %v3048_v14  ;;  %v3050_v37 = vmul.f32 %v4927_v11, %v6893_v46  ;;  %4940 = vrsqrt.f32 %v2674_v38  ;;  %v3357_v27 = vmul.f32 %v6851_v32, %v3293_v34 }
 0x35c   :  { %v3420_v56 = vadd.f32 %v6865_v1, %v3356_v28  ;;  %v2678_v22 = vpop.f32.mrf.mxu1 }
 0x35d   :  { %v2679_v52 = vadd.f32 1.0, %v2678_v22  ;;  %v3294_v33 = vmul.f32 %v3237_v30, %v6196_v45  ;;  %v3052_v29 = vsel %vm3051_vm15, %v6893_v46, %v3050_v37  ;;  %v3421_v63 = vadd.f32 %v6865_v1, %v3357_v27 }
 0x35e   :  { %v4929_v3 = vpop.eup %4928  ;;  %v4098_v12 = vpack.c.bf16 %v3420_v56, %v3420_v56  ;;  %v4498_v53 = vpop.f32.mrf.mxu1  ;;  %v3055_v47 = vsel %vm3053_vm0, %v3054_v19, %v3052_v29  ;;  %v3061_v45 = vand.u32 2147483648, %v6901_v24 }
 0x35f   :  { %v3057_v35 = vmul.f32 %v4929_v3, %v6901_v24  ;;  %4942 = vrsqrt.f32 %v2679_v52  ;;  %v6963_v20 = vpop.eup %4930  ;;  %v3358_v0 = vmul.f32 %v6851_v32, %v3294_v33  ;;  %v3238_v8 = vmul.f32 %v6893_v46, %v3055_v47 }
 0x360   :  { %3707 = vst.msk [vmem:[%s7366_s6 + $0x80] sm:$0xf] %vm3674_vm10, %v4098_v12  ;;  %v2683_v41 = vpop.f32.mrf.mxu1  ;;  %v6974_v61 = vpop.eup %4932  ;;  %4944 = vrsqrt.f32 %v6963_v20  ;;  %v4099_v7 = vpack.c.bf16 %v3421_v63, %v3421_v63  ;;  %vm3072_vm5 = vcmp.eq.f32.partialorder %v6963_v20, inf  ;;  %vm3074_vm6 = vcmp.eq.f32.partialorder %v6963_v20, 0.0 }
 0x361   :  { %v3059_v10 = vsel %vm3058_vm1, %v6901_v24, %v3057_v35  ;;  %v6982_v54 = vpop.eup %4934  ;;  %v3422_v36 = vadd.f32 %v6865_v1, %v3358_v0  ;;  %v3295_v39 = vmul.f32 %v3238_v8, %v6204_v58  ;;  %4946 = vrsqrt.f32 %v6974_v61 }
 0x362   :  { %v3062_v51 = vsel %vm3060_vm2, %v3061_v45, %v3059_v10  ;;  %v4501_v40 = vpop.f32.mrf.mxu1  ;;  %3708 = vst.msk [vmem:[%s7366_s6 + $0x84] sm:$0xf] %vm3674_vm10, %v4099_v7  ;;  %4948 = vrsqrt.f32 %v6982_v54  ;;  %v2684_v44 = vadd.f32 1.0, %v2683_v41  ;;  %vm3079_vm7 = vcmp.eq.f32.partialorder %v6974_v61, inf }
 0x363   :  { %v3239_v23 = vmul.f32 %v6901_v24, %v3062_v51  ;;  %v4937_v4 = vpop.eup %4936  ;;  %v4100_v9 = vpack.c.bf16 %v3422_v36, %v3422_v36  ;;  %v3359_v16 = vmul.f32 %v6851_v32, %v3295_v39  ;;  %vm3081_vm8 = vcmp.eq.f32.partialorder %v6974_v61, 0.0 }
 0x364   :  { %v2688_v46 = vpop.f32.mrf.mxu1  ;;  %v3064_v58 = vmul.f32 %v4937_v4, %v6925_v60  ;;  %v6997_v25 = vpop.eup %4938  ;;  %v3082_v52 = vand.u32 2147483648, %v6974_v61  ;;  %vm3086_vm9 = vcmp.eq.f32.partialorder %v6982_v54, inf  ;;  %vm3088_vm11 = vcmp.eq.f32.partialorder %v6982_v54, 0.0 }
 0x365   :  { %v3296_v2 = vmul.f32 %v3239_v23, %v6212_v5  ;;  %3709 = vst.msk [vmem:[%s7366_s6 + $0x88] sm:$0xf] %vm3674_vm10, %v4100_v9  ;;  %v3423_v26 = vadd.f32 %v6865_v1, %v3359_v16  ;;  %v3068_v5 = vand.u32 2147483648, %v6925_v60  ;;  %4950 = vrsqrt.f32 %v6997_v25 }
 0x366   :  { %v4504_v24 = vpop.f32.mrf.mxu1  ;;  %v3066_v15 = vsel %vm3065_vm3, %v6925_v60, %v3064_v58  ;;  %v2689_v43 = vadd.f32 1.0, %v2688_v46  ;;  %4952 = vrsqrt.f32 %v2684_v44  ;;  %v3089_v41 = vand.u32 2147483648, %v6982_v54 }
 0x367   :  { %v3360_v55 = vmul.f32 %v6851_v32, %v3296_v2  ;;  %v4101_v42 = vpack.c.bf16 %v3423_v26, %v3423_v26  ;;  %v3069_v50 = vsel %vm3067_vm4, %v3068_v5, %v3066_v15  ;;  %vm3093_vm12 = vcmp.eq.f32.partialorder %v6997_v25, inf }
 0x368   :  { %v2693_v59 = vpop.f32.mrf.mxu1  ;;  %v7010_v28 = vpop.eup %4940  ;;  %v3240_v48 = vmul.f32 %v6925_v60, %v3069_v50  ;;  %vm3095_vm13 = vcmp.eq.f32.partialorder %v6997_v25, 0.0 }
 0x369   :  { %v3424_v6 = vadd.f32 %v6865_v1, %v3360_v55  ;;  %3710 = vst.msk [vmem:[%s7366_s6 + $0x8c] sm:$0xf] %vm3674_vm10, %v4101_v42  ;;  %4954 = vrsqrt.f32 %v7010_v28  ;;  %v2694_v11 = vadd.f32 1.0, %v2693_v59  ;;  %vm3100_vm14 = vcmp.eq.f32.partialorder %v7010_v28, inf }
 0x36a   :  { %v4507_v57 = vpop.f32.mrf.mxu1  ;;  %v3297_v38 = vmul.f32 %v3240_v48, %v6220_v17  ;;  %4956 = vrsqrt.f32 %v2689_v43  ;;  %v3075_v17 = vand.u32 2147483648, %v6963_v20  ;;  %vm3102_vm15 = vcmp.eq.f32.partialorder %v7010_v28, 0.0 }
 0x36b   :  { %v4102_v18 = vpack.c.bf16 %v3424_v6, %v3424_v6  ;;  %v3103_v24 = vand.u32 2147483648, %v7010_v28 }
 0x36c   :  { %v7018_v21 = vpop.eup %4942  ;;  %v2698_v56 = vpop.f32.mrf.mxu1  ;;  %v3361_v34 = vmul.f32 %v6851_v32, %v3297_v38 }
 0x36d   :  { %3711 = vst.msk [vmem:[%s7366_s6 + $0x90] sm:$0xf] %vm3674_vm10, %v4102_v18  ;;  %4958 = vrsqrt.f32 %v7018_v21  ;;  %v4945_v60 = vpop.eup %4944  ;;  %v2699_v14 = vadd.f32 1.0, %v2698_v56  ;;  %vm3107_vm0 = vcmp.eq.f32.partialorder %v7018_v21, inf  ;;  %v3110_v42 = vand.u32 2147483648, %v7018_v21 }
 0x36e   :  { %v4510_v22 = vpop.f32.mrf.mxu1  ;;  %v3071_v30 = vmul.f32 %v4945_v60, %v6963_v20  ;;  %v3425_v37 = vadd.f32 %v6865_v1, %v3361_v34  ;;  %4960 = vrsqrt.f32 %v2694_v11  ;;  %v4947_v12 = vpop.eup %4946  ;;  %vm3109_vm1 = vcmp.eq.f32.partialorder %v7018_v21, 0.0 }
 0x36f   :  { %4962 = vrsqrt.f32 %v2699_v14  ;;  %v4949_v53 = vpop.eup %4948  ;;  %v3078_v35 = vmul.f32 %v4947_v12, %v6974_v61 }
 0x370   :  { %v2703_v3 = vpop.f32.mrf.mxu1  ;;  %v3073_v27 = vsel %vm3072_vm5, %v6963_v20, %v3071_v30  ;;  %v4103_v33 = vpack.c.bf16 %v3425_v37, %v3425_v37  ;;  %v3085_v45 = vmul.f32 %v4949_v53, %v6982_v54 }
 0x371   :  { %v2704_v19 = vadd.f32 1.0, %v2703_v3  ;;  %v3076_v29 = vsel %vm3074_vm6, %v3075_v17, %v3073_v27  ;;  %v3080_v0 = vsel %vm3079_vm7, %v6974_v61, %v3078_v35  ;;  %v7411_v3 = vld [vmem:[#allocation9_spill] sm:$0xff] }
 0x372   :  { %v4513_v63 = vpop.f32.mrf.mxu1  ;;  %v3241_v47 = vmul.f32 %v6963_v20, %v3076_v29  ;;  %3712 = vst.msk [vmem:[%s7366_s6 + $0x94] sm:$0xf] %vm3674_vm10, %v4103_v33  ;;  %v3096_v20 = vand.u32 2147483648, %v6997_v25  ;;  %v4951_v10 = vpop.eup %4950  ;;  %v3083_v51 = vsel %vm3081_vm8, %v3082_v52, %v3080_v0  ;;  %v3087_v40 = vsel %vm3086_vm9, %v6982_v54, %v3085_v45 }
 0x373   :  { %4964 = vrsqrt.f32 %v2704_v19  ;;  %v3242_v39 = vmul.f32 %v6974_v61, %v3083_v51  ;;  %v3090_v23 = vsel %vm3088_vm11, %v3089_v41, %v3087_v40  ;;  %v3092_v46 = vmul.f32 %v4951_v10, %v6997_v25  ;;  %v7063_v9 = vpop.eup %4952 }
 0x374   :  { %v2708_v8 = vpop.f32.mrf.mxu1  ;;  %v3298_v7 = vmul.f32 %v3241_v47, %v6228_v31  ;;  %v3243_v16 = vmul.f32 %v6982_v54, %v3090_v23  ;;  %vm3114_vm2 = vcmp.eq.f32.partialorder %v7063_v9, inf  ;;  %vm3116_vm3 = vcmp.eq.f32.partialorder %v7063_v9, 0.0 }
 0x375   :  { %v2709_v36 = vadd.f32 1.0, %v2708_v8  ;;  %v3299_v61 = vmul.f32 %v3242_v39, %v6236_v49  ;;  %v3094_v58 = vsel %vm3093_vm12, %v6997_v25, %v3092_v46  ;;  %v3117_v23 = vand.u32 2147483648, %v7063_v9 }
 0x376   :  { %v4516_v4 = vpop.f32.mrf.mxu1  ;;  %v3362_v31 = vmul.f32 %v6851_v32, %v3298_v7  ;;  %v4955_v2 = vpop.eup %4954  ;;  %v3300_v54 = vmul.f32 %v3243_v16, %v6244_v62  ;;  %v3097_v44 = vsel %vm3095_vm13, %v3096_v20, %v3094_v58 }
 0x377   :  { %4966 = vrsqrt.f32 %v2709_v36  ;;  %v7074_v55 = vpop.eup %4956  ;;  %v3099_v49 = vmul.f32 %v4955_v2, %v7010_v28  ;;  %v3363_v43 = vmul.f32 %v6851_v32, %v3299_v61  ;;  %v3244_v59 = vmul.f32 %v6997_v25, %v3097_v44 }
 0x378   :  { %4968 = vrsqrt.f32 %v7063_v9  ;;  %v2713_v26 = vpop.f32.mrf.mxu1  ;;  %v3426_v5 = vadd.f32 %v6865_v1, %v3362_v31  ;;  %v3364_v48 = vmul.f32 %v6851_v32, %v3300_v54  ;;  %vm3121_vm4 = vcmp.eq.f32.partialorder %v7074_v55, inf }
 0x379   :  { %v3101_v62 = vsel %vm3100_vm14, %v7010_v28, %v3099_v49  ;;  %v3427_v18 = vadd.f32 %v6865_v1, %v3363_v43  ;;  %v3301_v38 = vmul.f32 %v3244_v59, %v6252_v13  ;;  %4970 = vrsqrt.f32 %v7074_v55  ;;  %v7413_v49 = vld [vmem:[#allocation11_spill] sm:$0xff] }
 0x37a   :  { %v4959_v15 = vpop.eup %4958  ;;  %v4519_v6 = vpop.f32.mrf.mxu1  ;;  %v4104_v50 = vpack.c.bf16 %v3426_v5, %v3426_v5  ;;  %v3104_v25 = vsel %vm3102_vm15, %v3103_v24, %v3101_v62  ;;  %v3428_v60 = vadd.f32 %v6865_v1, %v3364_v48  ;;  %v2714_v0 = vadd.f32 1.0, %v2713_v26 }
 0x37b   :  { %v3106_v57 = vmul.f32 %v4959_v15, %v7018_v21  ;;  %v7095_v56 = vpop.eup %4960  ;;  %v3245_v34 = vmul.f32 %v7010_v28, %v3104_v25  ;;  %v4105_v22 = vpack.c.bf16 %v3427_v18, %v3427_v18  ;;  %v3365_v30 = vmul.f32 %v6851_v32, %v3301_v38 }
 0x37c   :  { %v2718_v11 = vpop.f32.mrf.mxu1  ;;  %3713 = vst.msk [vmem:[%s7366_s6 + $0x98] sm:$0xf] %vm3674_vm10, %v4104_v50  ;;  %v7107_v14 = vpop.eup %4962  ;;  %v4106_v52 = vpack.c.bf16 %v3428_v60, %v3428_v60  ;;  %4972 = vrsqrt.f32 %v7095_v56  ;;  %vm3123_vm5 = vcmp.eq.f32.partialorder %v7074_v55, 0.0  ;;  %v3124_v58 = vand.u32 2147483648, %v7074_v55 }
 0x37d   :  { %v3108_v13 = vsel %vm3107_vm0, %v7018_v21, %v3106_v57  ;;  %v3302_v12 = vmul.f32 %v3245_v34, %v7411_v3  ;;  %3714 = vst.msk [vmem:[%s7366_s6 + $0x9c] sm:$0xf] %vm3674_vm10, %v4105_v22  ;;  %v3429_v28 = vadd.f32 %v6865_v1, %v3365_v30  ;;  %4974 = vrsqrt.f32 %v7107_v14 }
 0x37e   :  { %v3111_v17 = vsel %vm3109_vm1, %v3110_v42, %v3108_v13  ;;  %v4522_v37 = vpop.f32.mrf.mxu1  ;;  %3715 = vst.msk [vmem:[%s7366_s6 + $0xa0] sm:$0xf] %vm3674_vm10, %v4106_v52  ;;  %v2719_v20 = vadd.f32 1.0, %v2718_v11  ;;  %vm3128_vm6 = vcmp.eq.f32.partialorder %v7095_v56, inf  ;;  %vm3130_vm7 = vcmp.eq.f32.partialorder %v7095_v56, 0.0  ;;  %v7414_v13 = vld [vmem:[#allocation12_spill] sm:$0xff] }
 0x37f   :  { %v3246_v27 = vmul.f32 %v7018_v21, %v3111_v17  ;;  %v3366_v33 = vmul.f32 %v6851_v32, %v3302_v12  ;;  %v7412_v21 = vld [vmem:[#allocation10_spill] sm:$0xff]  ;;  %v4107_v35 = vpack.c.bf16 %v3429_v28, %v3429_v28  ;;  %v3131_v44 = vand.u32 2147483648, %v7095_v56 }
 0x380   :  { %v7112_v19 = vpop.eup %4964  ;;  %v2723_v53 = vpop.f32.mrf.mxu1  ;;  %vm3135_vm8 = vcmp.eq.f32.partialorder %v7107_v14, inf  ;;  %vm3137_vm9 = vcmp.eq.f32.partialorder %v7107_v14, 0.0  ;;  %v3138_v43 = vand.u32 2147483648, %v7107_v14 }
 0x381   :  { %v3303_v29 = vmul.f32 %v3246_v27, %v7412_v21  ;;  %v3430_v47 = vadd.f32 %v6865_v1, %v3366_v33  ;;  %4976 = vrsqrt.f32 %v7112_v19  ;;  %3716 = vst.msk [vmem:[%s7366_s6 + $0xa4] sm:$0xf] %vm3674_vm10, %v4107_v35  ;;  %v2724_v46 = vadd.f32 1.0, %v2723_v53 }
 0x382   :  { %v4525_v63 = vpop.f32.mrf.mxu1  ;;  %vm3142_vm11 = vcmp.eq.f32.partialorder %v7112_v19, inf  ;;  %vm3144_vm12 = vcmp.eq.f32.partialorder %v7112_v19, 0.0  ;;  %v3145_v11 = vand.u32 2147483648, %v7112_v19 }
 0x383   :  { %v3367_v45 = vmul.f32 %v6851_v32, %v3303_v29  ;;  %v4108_v7 = vpack.c.bf16 %v3430_v47, %v3430_v47 }
 0x384   :  { %v7130_v41 = vpop.eup %4966  ;;  %v2728_v8 = vpop.f32.mrf.mxu1 }
 0x385   :  { %v4969_v10 = vpop.eup %4968  ;;  %v3431_v51 = vadd.f32 %v6865_v1, %v3367_v45  ;;  %4978 = vrsqrt.f32 %v7130_v41  ;;  %3717 = vst.msk [vmem:[%s7366_s6 + $0xa8] sm:$0xf] %vm3674_vm10, %v4108_v7  ;;  %v2729_v31 = vadd.f32 1.0, %v2728_v8  ;;  %vm3149_vm13 = vcmp.eq.f32.partialorder %v7130_v41, inf }
 0x386   :  { %v3113_v40 = vmul.f32 %v4969_v10, %v7063_v9  ;;  %4980 = vrsqrt.f32 %v2714_v0  ;;  %v4528_v36 = vpop.f32.mrf.mxu1  ;;  %v4971_v2 = vpop.eup %4970  ;;  %v3152_v30 = vand.u32 2147483648, %v7130_v41  ;;  %v7415_v0 = vld [vmem:[#allocation13_spill] sm:$0xff]  ;;  %v7416_v10 = vld [vmem:[#allocation14_spill] sm:$0xff]  ;;  %vm3151_vm14 = vcmp.eq.f32.partialorder %v7130_v41, 0.0 }
 0x387   :  { %v4109_v39 = vpack.c.bf16 %v3431_v51, %v3431_v51  ;;  %4982 = vrsqrt.f32 %v2719_v20  ;;  %v3120_v5 = vmul.f32 %v4971_v2, %v7074_v55 }
 0x388   :  { %v3115_v4 = vsel %vm3114_vm2, %v7063_v9, %v3113_v40  ;;  %v2733_v16 = vpop.f32.mrf.mxu1  ;;  %4984 = vrsqrt.f32 %v2724_v46 }
 0x389   :  { %3718 = vst.msk [vmem:[%s7366_s6 + $0xac] sm:$0xf] %vm3674_vm10, %v4109_v39  ;;  %v3118_v61 = vsel %vm3116_vm3, %v3117_v23, %v3115_v4  ;;  %v2734_v24 = vadd.f32 1.0, %v2733_v16  ;;  %4986 = vrsqrt.f32 %v2729_v31  ;;  %v4973_v42 = vpop.eup %4972  ;;  %v7417_v31 = vld [vmem:[#allocation2_spill] sm:$0xff] }
 0x38a   :  { %v3247_v26 = vmul.f32 %v7063_v9, %v3118_v61  ;;  %v4531_v54 = vpop.f32.mrf.mxu1  ;;  %v3122_v9 = vsel %vm3121_vm4, %v7074_v55, %v3120_v5  ;;  %v4975_v48 = vpop.eup %4974  ;;  %v3127_v18 = vmul.f32 %v4973_v42, %v7095_v56 }
 0x38b   :  { %v3125_v6 = vsel %vm3123_vm5, %v3124_v58, %v3122_v9  ;;  %4988 = vrsqrt.f32 %v2734_v24  ;;  %v3134_v25 = vmul.f32 %v4975_v48, %v7107_v14 }
 0x38c   :  { %v3304_v15 = vmul.f32 %v3247_v26, %v7413_v49  ;;  %v2738_v59 = vpop.f32.mrf.mxu1  ;;  %v3248_v57 = vmul.f32 %v7074_v55, %v3125_v6  ;;  %v3129_v55 = vsel %vm3128_vm6, %v7095_v56, %v3127_v18  ;;  %v7418_v26 = vld [vmem:[#allocation3_spill] sm:$0xff] }
 0x38d   :  { %v2739_v50 = vadd.f32 1.0, %v2738_v59  ;;  %v3132_v37 = vsel %vm3130_vm7, %v3131_v44, %v3129_v55  ;;  %v3136_v52 = vsel %vm3135_vm8, %v7107_v14, %v3134_v25 }
 0x38e   :  { %v3368_v62 = vmul.f32 %v6851_v32, %v3304_v15  ;;  %v4534_v38 = vpop.f32.mrf.mxu1  ;;  %v4977_v60 = vpop.eup %4976  ;;  %v3305_v22 = vmul.f32 %v3248_v57, %v7414_v13  ;;  %v3249_v33 = vmul.f32 %v7095_v56, %v3132_v37  ;;  %v3139_v21 = vsel %vm3137_vm9, %v3138_v43, %v3136_v52 }
 0x38f   :  { %4990 = vrsqrt.f32 %v2739_v50  ;;  %v3141_v3 = vmul.f32 %v4977_v60, %v7112_v19  ;;  %v3250_v63 = vmul.f32 %v7107_v14, %v3139_v21 }
 0x390   :  { %v3432_v34 = vadd.f32 %v6865_v1, %v3368_v62  ;;  %v2743_v17 = vpop.f32.mrf.mxu1  ;;  %v3369_v53 = vmul.f32 %v6851_v32, %v3305_v22  ;;  %v3306_v20 = vmul.f32 %v3249_v33, %v7415_v0  ;;  %v7419_v22 = vld [vmem:[#allocation4_spill] sm:$0xff] }
 0x391   :  { %v2744_v12 = vadd.f32 1.0, %v2743_v17  ;;  %v3143_v47 = vsel %vm3142_vm11, %v7112_v19, %v3141_v3  ;;  %v3307_v7 = vmul.f32 %v3250_v63, %v7416_v10 }
 0x392   :  { %v4979_v27 = vpop.eup %4978  ;;  %v4110_v28 = vpack.c.bf16 %v3432_v34, %v3432_v34  ;;  %v4537_v29 = vpop.f32.mrf.mxu1  ;;  %v3433_v56 = vadd.f32 %v6865_v1, %v3369_v53  ;;  %v3146_v8 = vsel %vm3144_vm12, %v3145_v11, %v3143_v47  ;;  %v3370_v39 = vmul.f32 %v6851_v32, %v3306_v20 }
 0x393   :  { %v4981_v35 = vpop.eup %4980  ;;  %v3148_v45 = vmul.f32 %v4979_v27, %v7130_v41  ;;  %4992 = vrsqrt.f32 %v2744_v12  ;;  %v3251_v51 = vmul.f32 %v7112_v19, %v3146_v8  ;;  %v3371_v4 = vmul.f32 %v6851_v32, %v3307_v7 }
 0x394   :  { %3719 = vst.msk [vmem:[%s7366_s6 + $0xb0] sm:$0xf] %vm3674_vm10, %v4110_v28  ;;  %4994 = vrsqrt.f32 %v4981_v35  ;;  %v7205_v14 = vpop.eup %4982  ;;  %v4111_v36 = vpack.c.bf16 %v3433_v56, %v3433_v56  ;;  %v3434_v19 = vadd.f32 %v6865_v1, %v3370_v39  ;;  %vm3156_vm15 = vcmp.eq.f32.partialorder %v4981_v35, inf  ;;  %v7421_v39 = vld [vmem:[#allocation6_spill] sm:$0xff] }
 0x395   :  { %v3150_v40 = vsel %vm3149_vm13, %v7130_v41, %v3148_v45  ;;  %v7214_v46 = vpop.eup %4984  ;;  %v3308_v16 = vmul.f32 %v3251_v51, %v7417_v31  ;;  %4996 = vrsqrt.f32 %v7205_v14  ;;  %v3435_v58 = vadd.f32 %v6865_v1, %v3371_v4  ;;  %v7420_v45 = vld [vmem:[#allocation5_spill] sm:$0xff] }
 0x396   :  { %v3153_v23 = vsel %vm3151_vm14, %v3152_v30, %v3150_v40  ;;  %3720 = vst.msk [vmem:[%s7366_s6 + $0xb4] sm:$0xf] %vm3674_vm10, %v4111_v36  ;;  %v7225_v61 = vpop.eup %4986  ;;  %4998 = vrsqrt.f32 %v7214_v46  ;;  %v3159_v62 = vand.u32 2147483648, %v4981_v35  ;;  %vm3158_vm0 = vcmp.eq.f32.partialorder %v4981_v35, 0.0 }
 0x397   :  { %v3252_v2 = vmul.f32 %v7130_v41, %v3153_v23  ;;  %v3372_v24 = vmul.f32 %v6851_v32, %v3308_v16  ;;  %v4112_v41 = vpack.c.bf16 %v3434_v19, %v3434_v19  ;;  %v4113_v44 = vpack.c.bf16 %v3435_v58, %v3435_v58 }
 0x398   :  { %v7230_v54 = vpop.eup %4988  ;;  %5000 = vrsqrt.f32 %v7225_v61  ;;  %vm3163_vm1 = vcmp.eq.f32.partialorder %v7205_v14, inf  ;;  %vm3165_vm2 = vcmp.eq.f32.partialorder %v7205_v14, 0.0  ;;  %v3166_v60 = vand.u32 2147483648, %v7205_v14 }
 0x399   :  { %v3309_v5 = vmul.f32 %v3252_v2, %v7418_v26  ;;  %v3436_v49 = vadd.f32 %v6865_v1, %v3372_v24  ;;  %3721 = vst.msk [vmem:[%s7366_s6 + $0xb8] sm:$0xf] %vm3674_vm10, %v4112_v41  ;;  %3722 = vst.msk [vmem:[%s7366_s6 + $0xbc] sm:$0xf] %vm3674_vm10, %v4113_v44  ;;  %5002 = vrsqrt.f32 %v7230_v54  ;;  %vm3170_vm3 = vcmp.eq.f32.partialorder %v7214_v46, inf }
 0x39a   :  { %vm3172_vm4 = vcmp.eq.f32.partialorder %v7214_v46, 0.0  ;;  %v3173_v13 = vand.u32 2147483648, %v7214_v46  ;;  %vm3177_vm5 = vcmp.eq.f32.partialorder %v7225_v61, inf  ;;  %vm3179_vm6 = vcmp.eq.f32.partialorder %v7225_v61, 0.0 }
 0x39b   :  { %v3373_v15 = vmul.f32 %v6851_v32, %v3309_v5  ;;  %v4114_v43 = vpack.c.bf16 %v3436_v49, %v3436_v49  ;;  %v3180_v37 = vand.u32 2147483648, %v7225_v61  ;;  %vm3184_vm7 = vcmp.eq.f32.partialorder %v7230_v54, inf }
 0x39c   :  { %v7235_v9 = vpop.eup %4990  ;;  %vm3186_vm8 = vcmp.eq.f32.partialorder %v7230_v54, 0.0  ;;  %v3187_v12 = vand.u32 2147483648, %v7230_v54  ;;  %vm3731_vm14 = vcmask 516096  }
 0x39d   :  { %v3437_v59 = vadd.f32 %v6865_v1, %v3373_v15  ;;  %5004 = vrsqrt.f32 %v7235_v9  ;;  %3723 = vst.msk [vmem:[%s7366_s6 + $0xc0] sm:$0xf] %vm3674_vm10, %v4114_v43  ;;  %vm3191_vm9 = vcmp.eq.f32.partialorder %v7235_v9, inf  ;;  %vm3193_vm11 = vcmp.eq.f32.partialorder %v7235_v9, 0.0  ;;  %v7423_v43 = vld [vmem:[#allocation8_spill] sm:$0xff] }
 0x39e   :  { %v3194_v7 = vand.u32 2147483648, %v7235_v9 }
 0x39f   :  { %v4115_v42 = vpack.c.bf16 %v3437_v59, %v3437_v59 }
 0x3a0   :  { %v7253_v6 = vpop.eup %4992 }
 0x3a1   :  { %v4995_v50 = vpop.eup %4994  ;;  %3724 = vst.msk [vmem:[%s7366_s6 + $0xc4] sm:$0xf] %vm3674_vm10, %v4115_v42  ;;  %5006 = vrsqrt.f32 %v7253_v6  ;;  %vm3198_vm12 = vcmp.eq.f32.partialorder %v7253_v6, inf  ;;  %vm3200_vm13 = vcmp.eq.f32.partialorder %v7253_v6, 0.0  ;;  %v3201_v41 = vand.u32 2147483648, %v7253_v6 }
 0x3a2   :  { %v3155_v48 = vmul.f32 %v4995_v50, %v4981_v35  ;;  %v4997_v18 = vpop.eup %4996 }
 0x3a3   :  { %v3162_v11 = vmul.f32 %v4997_v18, %v7205_v14  ;;  %v4999_v34 = vpop.eup %4998  ;;  %v7424_v18 = vld [vmem:[#allocation15_spill] sm:$0xff] }
 0x3a4   :  { %v3157_v57 = vsel %vm3156_vm15, %v4981_v35, %v3155_v48  ;;  %v3169_v17 = vmul.f32 %v4999_v34, %v7214_v46 }
 0x3a5   :  { %v3160_v38 = vsel %vm3158_vm0, %v3159_v62, %v3157_v57  ;;  %v3164_v30 = vsel %vm3163_vm1, %v7205_v14, %v3162_v11  ;;  %v5001_v52 = vpop.eup %5000  ;;  %v7425_v11 = vld [vmem:[#allocation16_spill] sm:$0xff] }
 0x3a6   :  { %v3253_v25 = vmul.f32 %v4981_v35, %v3160_v38  ;;  %v3167_v3 = vsel %vm3165_vm2, %v3166_v60, %v3164_v30  ;;  %v5003_v27 = vpop.eup %5002  ;;  %v3171_v33 = vsel %vm3170_vm3, %v7214_v46, %v3169_v17  ;;  %v3176_v21 = vmul.f32 %v5001_v52, %v7225_v61 }
 0x3a7   :  { %v3254_v53 = vmul.f32 %v7205_v14, %v3167_v3  ;;  %v3174_v35 = vsel %vm3172_vm4, %v3173_v13, %v3171_v33  ;;  %v3183_v63 = vmul.f32 %v5003_v27, %v7230_v54 }
 0x3a8   :  { %v3310_v55 = vmul.f32 %v3253_v25, %v7419_v22  ;;  %v3255_v0 = vmul.f32 %v7214_v46, %v3174_v35  ;;  %v3178_v20 = vsel %vm3177_vm5, %v7225_v61, %v3176_v21 }
 0x3a9   :  { %v3311_v56 = vmul.f32 %v3254_v53, %v7420_v45  ;;  %v3181_v8 = vsel %vm3179_vm6, %v3180_v37, %v3178_v20  ;;  %v3185_v14 = vsel %vm3184_vm7, %v7230_v54, %v3183_v63 }
 0x3aa   :  { %v3374_v28 = vmul.f32 %v6851_v32, %v3310_v55  ;;  %v5005_v29 = vpop.eup %5004  ;;  %v3312_v23 = vmul.f32 %v3255_v0, %v7421_v39  ;;  %v3256_v46 = vmul.f32 %v7225_v61, %v3181_v8  ;;  %v3188_v4 = vsel %vm3186_vm8, %v3187_v12, %v3185_v14  ;;  %v7422_v61 = vld [vmem:[#allocation7_spill] sm:$0xff] }
 0x3ab   :  { %v3190_v10 = vmul.f32 %v5005_v29, %v7235_v9  ;;  %v3375_v36 = vmul.f32 %v6851_v32, %v3311_v56  ;;  %v3257_v24 = vmul.f32 %v7230_v54, %v3188_v4 }
 0x3ac   :  { %v3438_v47 = vadd.f32 %v6865_v1, %v3374_v28  ;;  %v3376_v19 = vmul.f32 %v6851_v32, %v3312_v23  ;;  %v3313_v58 = vmul.f32 %v3256_v46, %v7422_v61 }
 0x3ad   :  { %v3192_v31 = vsel %vm3191_vm9, %v7235_v9, %v3190_v10  ;;  %v3439_v2 = vadd.f32 %v6865_v1, %v3375_v36  ;;  %v3314_v59 = vmul.f32 %v3257_v24, %v7423_v43 }
 0x3ae   :  { %v5007_v51 = vpop.eup %5006  ;;  %v4116_v40 = vpack.c.bf16 %v3438_v47, %v3438_v47  ;;  %v3195_v26 = vsel %vm3193_vm11, %v3194_v7, %v3192_v31  ;;  %v3440_v49 = vadd.f32 %v6865_v1, %v3376_v19  ;;  %v3377_v15 = vmul.f32 %v6851_v32, %v3313_v58 }
 0x3af   :  { %v3197_v16 = vmul.f32 %v5007_v51, %v7253_v6  ;;  %v4117_v44 = vpack.c.bf16 %v3439_v2, %v3439_v2  ;;  %v3258_v42 = vmul.f32 %v7235_v9, %v3195_v26  ;;  %v3378_v62 = vmul.f32 %v6851_v32, %v3314_v59 }
 0x3b0   :  { %3725 = vst.msk [vmem:[%s7366_s6 + $0xc8] sm:$0xf] %vm3674_vm10, %v4116_v40  ;;  %v4118_v54 = vpack.c.bf16 %v3440_v49, %v3440_v49  ;;  %v3441_v48 = vadd.f32 %v6865_v1, %v3377_v15 }
 0x3b1   :  { %v3199_v5 = vsel %vm3198_vm12, %v7253_v6, %v3197_v16  ;;  %3726 = vst.msk [vmem:[%s7366_s6 + $0xcc] sm:$0xf] %vm3674_vm10, %v4117_v44  ;;  %v3315_v38 = vmul.f32 %v3258_v42, %v7424_v18  ;;  %v3442_v25 = vadd.f32 %v6865_v1, %v3378_v62 }
 0x3b2   :  { %v3202_v50 = vsel %vm3200_vm13, %v3201_v41, %v3199_v5  ;;  %3727 = vst.msk [vmem:[%s7366_s6 + $0xd0] sm:$0xf] %vm3674_vm10, %v4118_v54  ;;  %v4119_v9 = vpack.c.bf16 %v3441_v48, %v3441_v48 }
 0x3b3   :  { %v3259_v57 = vmul.f32 %v7253_v6, %v3202_v50  ;;  %v3379_v34 = vmul.f32 %v6851_v32, %v3315_v38  ;;  %v4120_v6 = vpack.c.bf16 %v3442_v25, %v3442_v25 }
 0x3b4   :  { %3728 = vst.msk [vmem:[%s7366_s6 + $0xd4] sm:$0xf] %vm3674_vm10, %v4119_v9 }
 0x3b5   :  { %v3316_v60 = vmul.f32 %v3259_v57, %v7425_v11  ;;  %v3443_v22 = vadd.f32 %v6865_v1, %v3379_v34  ;;  %3729 = vst.msk [vmem:[%s7366_s6 + $0xd8] sm:$0xf] %vm3674_vm10, %v4120_v6 }
 0x3b7   :  { %v3380_v13 = vmul.f32 %v6851_v32, %v3316_v60  ;;  %v4121_v30 = vpack.c.bf16 %v3443_v22, %v3443_v22 }
 0x3b9   :  { %v3444_v55 = vadd.f32 %v6865_v1, %v3380_v13  ;;  %3730 = vst.msk [vmem:[%s7366_s6 + $0xdc] sm:$0xf] %vm3674_vm10, %v4121_v30 }
 0x3bb   :  { %v4122_v17 = vpack.c.bf16 %v3444_v55, %v3444_v55 }
 0x3bd   :  { %3732 = vst.msk [vmem:[%s7366_s6 + $0xe0] sm:$0x1] %vm3731_vm14, %v4122_v17 }

// kernel: half_alexnet_forward.8
= control target key start
LH: loop header
LB: loop body
LE: loop exit
PB: predicated region body
PF: predicated region fallthrough
CT: control target
= control target key end

     0   :  { %v1296_v34 = vmov 0.0   ;;  %vm1297_vm0 = vmmov 0   ;;  %vm522_vm1 = vcmask 523264   ;;  %vm914_vm2 = vcmask 781312   ;;  %s1738_s1 = inlined_call_operand.vmem [shape: bf16[576,96], index: 1, kind: input, shape index: {}]   ;;  %s1739_s0 = inlined_call_operand.vmem [shape: bf16[98,576], index: 0, kind: input, shape index: {}]   ;;  %s1740_s2 = inlined_call_operand.vmem [shape: f32[1,96], index: 2, kind: input, shape index: {}]   ;;  %s1741_s3 = inlined_call_operand.vmem [shape: f32[1,96], index: 3, kind: input, shape index: {}]   ;;  %s1742_s4 = inlined_call_operand.vmem [shape: f32[1,96], index: 4, kind: input, shape index: {}]   ;;  %s1743_s5 = inlined_call_operand.vmem [shape: bf16[98,96], index: 5, kind: output, shape index: {}]  }
   0x1   :  { %v1213_v0 = vld [vmem:[%s1738_s1 + $0x78] sm:$0xff]   ;;  %v1217_v4 = vld [vmem:[%s1738_s1 + $0x70] sm:$0xff]   ;;  %v1221_v8 = vld [vmem:[%s1738_s1 + $0x68] sm:$0xff]   ;;  %vm927_vm3 = vcmask 778240  }
   0x2   :  { %v1214_v1 = vld [vmem:[%s1738_s1 + $0xf8] sm:$0xff]   ;;  %1040 = vmatprep.subr.bf16.mxu0 %v1213_v0  ;;  %v1218_v5 = vld [vmem:[%s1738_s1 + $0xf0] sm:$0xff]   ;;  %v1222_v9 = vld [vmem:[%s1738_s1 + $0xe8] sm:$0xff]  }
   0x3   :  { %v1215_v2 = vld [vmem:[%s1738_s1 + $0x38] sm:$0xff]   ;;  %1098 = vmatprep.subr.bf16.mxu1 %v1214_v1  ;;  %v1219_v6 = vld [vmem:[%s1738_s1 + $0x30] sm:$0xff]   ;;  %v1223_v10 = vld [vmem:[%s1738_s1 + $0x28] sm:$0xff]  }
   0x4   :  { %v1216_v3 = vld [vmem:[%s1738_s1 + $0xb8] sm:$0xff]   ;;  %1041 = vmatpush3.bf16.msra.mxu0 %v1215_v2  ;;  %v1220_v7 = vld [vmem:[%s1738_s1 + $0xb0] sm:$0xff]   ;;  %v1224_v11 = vld [vmem:[%s1738_s1 + $0xa8] sm:$0xff]  }
   0x5   :  { %1099 = vmatpush3.bf16.msra.mxu1 %v1216_v3  ;;  %1042 = vmatprep.subr.bf16.mxu0 %v1217_v4  ;;  %v1225_v12 = vld [vmem:[%s1738_s1 + $0x60] sm:$0xff]   ;;  %v1229_v16 = vld [vmem:[%s1738_s1 + $0x58] sm:$0xff]   ;;  %v1233_v20 = vld [vmem:[%s1738_s1 + $0x50] sm:$0xff]  }
   0x6   :  { %1100 = vmatprep.subr.bf16.mxu1 %v1218_v5  ;;  %v1226_v13 = vld [vmem:[%s1738_s1 + $0xe0] sm:$0xff]   ;;  %v1230_v17 = vld [vmem:[%s1738_s1 + $0xd8] sm:$0xff]   ;;  %v1234_v21 = vld [vmem:[%s1738_s1 + $0xd0] sm:$0xff]  }
   0x7   :  { %v1227_v14 = vld [vmem:[%s1738_s1 + $0x20] sm:$0xff]   ;;  %v1231_v18 = vld [vmem:[%s1738_s1 + $0x18] sm:$0xff]   ;;  %v1235_v22 = vld [vmem:[%s1738_s1 + $0x10] sm:$0xff]  }
   0x8   :  { %1043 = vmatpush3.bf16.msra.mxu0 %v1219_v6  ;;  %v1228_v15 = vld [vmem:[%s1738_s1 + $0xa0] sm:$0xff]   ;;  %v1232_v19 = vld [vmem:[%s1738_s1 + $0x98] sm:$0xff]   ;;  %v1236_v23 = vld [vmem:[%s1738_s1 + $0x90] sm:$0xff]  }
   0x9   :  { %1101 = vmatpush3.bf16.msra.mxu1 %v1220_v7  ;;  %1044 = vmatprep.subr.bf16.mxu0 %v1221_v8  ;;  %v1237_v24 = vld [vmem:[%s1738_s1 + $0x48] sm:$0xff]   ;;  %v1241_v28 = vld [vmem:[%s1738_s1 + $0x40] sm:$0xff]   ;;  %v1251_v37 = vld [vmem:[%s1738_s1 + $0x118] sm:$0xff]  }
   0xa   :  { %1102 = vmatprep.subr.bf16.mxu1 %v1222_v9  ;;  %v1238_v25 = vld [vmem:[%s1738_s1 + $0xc8] sm:$0xff]   ;;  %v1242_v29 = vld [vmem:[%s1738_s1 + $0xc0] sm:$0xff]   ;;  %v1262_v43 = vld [vmem:[%s1738_s1 + $0x110] sm:$0xff]  }
   0xb   :  { %v1239_v26 = vld [vmem:[%s1738_s1 + $0x8] sm:$0xff]   ;;  %v1243_v30 = vld [vmem:[%s1738_s1] sm:$0xff]   ;;  %v1260_v44 = vld [vmem:[%s1739_s0 + $0x5c] ss:$20 sps:$4 sm:$0xff]  }
   0xc   :  { %1045 = vmatpush3.bf16.msra.mxu0 %v1223_v10  ;;  %v1240_v27 = vld [vmem:[%s1738_s1 + $0x88] sm:$0xff]   ;;  %v1244_v31 = vld [vmem:[%s1738_s1 + $0x80] sm:$0xff]   ;;  %v1265_v48 = vld [vmem:[%s1739_s0 + $0x7c] ss:$20 sps:$4 sm:$0xff]  }
   0xd   :  { %1103 = vmatpush3.bf16.msra.mxu1 %v1224_v11  ;;  %1046 = vmatprep.subr.bf16.mxu0 %v1225_v12  ;;  %v1245_v32 = vld [vmem:[%s1739_s0] ss:$20 sps:$4 sm:$0xff]   ;;  %v1247_v33 = vld [vmem:[%s1739_s0 + $0x4] ss:$20 sps:$4 sm:$0xff]   ;;  %v1248_v35 = vld [vmem:[%s1739_s0 + $0x8] ss:$20 sps:$4 sm:$0xff]  }
   0xe   :  { %1104 = vmatprep.subr.bf16.mxu1 %v1226_v13  ;;  %v1250_v36 = vld [vmem:[%s1739_s0 + $0xc] ss:$20 sps:$4 sm:$0xff]   ;;  %576 = vmatprep.mubr.bf16.mxu0 %v1247_v33  ;;  %v1254_v39 = vld [vmem:[%s1739_s0 + $0x34] ss:$20 sps:$4 sm:$0xff]   ;;  %v1257_v41 = vld [vmem:[%s1739_s0 + $0x30] ss:$20 sps:$4 sm:$0xff]  }
   0xf   :  { %664 = vmatprep.mubr.bf16.mxu1 %v1250_v36  ;;  %v1252_v38 = vld [vmem:[%s1739_s0 + $0x2c] ss:$20 sps:$4 sm:$0xff]   ;;  %v1256_v40 = vld [vmem:[%s1739_s0 + $0x28] ss:$20 sps:$4 sm:$0xff]   ;;  %v1263_v46 = vld [vmem:[%s1739_s0 + $0x50] ss:$20 sps:$4 sm:$0xff]  }
  0x10   :  { %1047 = vmatpush3.bf16.msra.mxu0 %v1227_v14  ;;  %v1258_v42 = vld [vmem:[%s1739_s0 + $0x54] ss:$20 sps:$4 sm:$0xff]   ;;  %v1264_v47 = vld [vmem:[%s1739_s0 + $0x58] ss:$20 sps:$4 sm:$0xff]   ;;  %v1284_v50 = vld [vmem:[%s1738_s1 + $0x100] sm:$0xff]  }
  0x11   :  { %1105 = vmatpush3.bf16.msra.mxu1 %v1228_v15  ;;  %1048 = vmatprep.subr.bf16.mxu0 %v1229_v16  ;;  %v1271_v45 = vld [vmem:[%s1738_s1 + $0x108] sm:$0xff]   ;;  %v1267_v49 = vld [vmem:[%s1739_s0 + $0x84] ss:$20 sps:$4 sm:$0xff]   ;;  %v1270_v52 = vld [vmem:[%s1739_s0 + $0x80] ss:$20 sps:$4 sm:$0xff]  }
  0x12   :  { %1106 = vmatprep.subr.bf16.mxu1 %v1230_v17  ;;  %v1269_v51 = vld [vmem:[%s1739_s0 + $0x78] ss:$20 sps:$4 sm:$0xff]   ;;  %v1276_v55 = vld [vmem:[%s1739_s0 + $0xa0] ss:$20 sps:$4 sm:$0xff]   ;;  %v1277_v56 = vld [vmem:[%s1739_s0 + $0xa8] ss:$20 sps:$4 sm:$0xff]  }
  0x13   :  { %v1272_v53 = vld [vmem:[%s1739_s0 + $0xa4] ss:$20 sps:$4 sm:$0xff]   ;;  %v1274_v54 = vld [vmem:[%s1739_s0 + $0xac] ss:$20 sps:$4 sm:$0xff]   ;;  %v1280_v58 = vld [vmem:[%s1739_s0 + $0xd4] ss:$20 sps:$4 sm:$0xff]  }
  0x14   :  { %1049 = vmatpush3.bf16.msra.mxu0 %v1231_v18  ;;  %v1278_v57 = vld [vmem:[%s1739_s0 + $0xcc] ss:$20 sps:$4 sm:$0xff]   ;;  %v57_v59 = vld [vmem:[%s1739_s0 + $0xf0] sm:$0x11]  ;;  %v58_v60 = vld [vmem:[%s1739_s0 + $0xf8] sm:$0x11] }
  0x15   :  { %1107 = vmatpush3.bf16.msra.mxu1 %v1232_v19  ;;  %1050 = vmatprep.subr.bf16.mxu0 %v1233_v20  ;;  %v1282_v61 = vld [vmem:[%s1739_s0 + $0xc8] ss:$20 sps:$4 sm:$0xff]   ;;  %v1283_v62 = vld [vmem:[%s1739_s0 + $0xd0] ss:$20 sps:$4 sm:$0xff]   ;;  %v965_v63 = vcombine.high %v57_v59, %v57_v59  ;;  %v967_v0 = vcombine.high %v58_v60, %v58_v60  ;;  %v964_v1 = vcombine.low %v57_v59, %v57_v59  ;;  %v1291_v5 = vld [vmem:[%s1739_s0 + $0x38] ss:$20 sps:$4 sm:$0xff]  }
  0x16   :  { %1108 = vmatprep.subr.bf16.mxu1 %v1234_v21  ;;  %v966_v2 = vcombine.low %v58_v60, %v58_v60  ;;  %v1289_v3 = vld [vmem:[%s1739_s0 + $0x10] ss:$20 sps:$4 sm:$0xff]   ;;  %v1292_v6 = vld [vmem:[%s1739_s0 + $0xd8] ss:$20 sps:$4 sm:$0xff]   ;;  %v1293_v7 = vld [vmem:[%s1739_s0 + $0x60] ss:$20 sps:$4 sm:$0xff]  }
  0x17   :  { %v1290_v4 = vld [vmem:[%s1739_s0 + $0xb0] ss:$20 sps:$4 sm:$0xff]   ;;  %v1294_v8 = vld [vmem:[%s1739_s0 + $0x100] ss:$0 sps:$4 sm:$0x11]  }
  0x18   :  { %1051 = vmatpush3.bf16.msra.mxu0 %v1235_v22  ;;  %v1295_v9 = vld [vmem:[%s1739_s0 + $0x88] ss:$20 sps:$4 sm:$0xff]  }
  0x19   :  { %1109 = vmatpush3.bf16.msra.mxu1 %v1236_v23  ;;  %1052 = vmatprep.subr.bf16.mxu0 %v1237_v24 }
  0x1a   :  { %1110 = vmatprep.subr.bf16.mxu1 %v1238_v25 }
  0x1c   :  { %1053 = vmatpush3.bf16.msra.mxu0 %v1239_v26 }
  0x1d   :  { %1111 = vmatpush3.bf16.msra.mxu1 %v1240_v27  ;;  %1054 = vmatprep.subr.bf16.mxu0 %v1241_v28 }
  0x1e   :  { %1112 = vmatprep.subr.bf16.mxu1 %v1242_v29 }
  0x20   :  { %1055 = vmatpush3.bf16.msra.mxu0 %v1243_v30 }
  0x21   :  { %1113 = vmatpush3.bf16.msra.mxu1 %v1244_v31  ;;  %1167 = vmatprep.subr.bf16.mxu0 %v1296_v34 }
  0x22   :  { %1203 = vmatprep.subr.bf16.mxu1 %v1296_v34 }
  0x23   :  { %577 = vmatmul.mubr.bf16.vlgmr.msra.gmra.mxu0 %v1245_v32 }
  0x24   :  { %665 = vmatmul.mubr.bf16.vlgmr.msra.gmra.mxu1 %v1248_v35  ;;  %1168 = vmatpush3.bf16.msra.mxu0 %v1251_v37 }
  0x25   :  { %584 = vmatprep.mubr.bf16.mxu0 %v1252_v38  ;;  %1207 = vmatpush3.bf16.msra.mxu1 %v1251_v37 }
  0x26   :  { %672 = vmatprep.mubr.bf16.mxu1 %v1254_v39  ;;  %1169 = vmatprep.subr.bf16.mxu0 %v1296_v34 }
  0x27   :  { %1204 = vmatprep.subr.bf16.mxu1 %v1296_v34 }
  0x28   :  { %1170 = vmatpush3.bf16.msra.mxu0 %v1262_v43 }
  0x29   :  { %1208 = vmatpush3.bf16.msra.mxu1 %v1262_v43  ;;  %1171 = vmatprep.subr.bf16.mxu0 %v1296_v34 }
  0x2a   :  { %1205 = vmatprep.subr.bf16.mxu1 %v1296_v34 }
  0x2b   :  { %585 = vmatmul.mubr.bf16.gmra.mxu0 %v1256_v40 }
  0x2c   :  { %673 = vmatmul.mubr.bf16.gmra.mxu1 %v1257_v41  ;;  %592 = vmatprep.mubr.bf16.mxu0 %v1258_v42 }
  0x2d   :  { %680 = vmatprep.mubr.bf16.mxu1 %v1260_v44  ;;  %1172 = vmatpush3.bf16.msra.mxu0 %v1271_v45 }
  0x2e   :  { %1209 = vmatpush3.bf16.msra.mxu1 %v1271_v45  ;;  %1173 = vmatprep.subr.bf16.mxu0 %v1296_v34 }
  0x2f   :  { %1206 = vmatprep.subr.bf16.mxu1 %v1296_v34 }
  0x31   :  { %1174 = vmatpush3.bf16.msra.mxu0 %v1284_v50 }
  0x32   :  { %1210 = vmatpush3.bf16.msra.mxu1 %v1284_v50 }
  0x33   :  { %593 = vmatmul.mubr.bf16.gmra.mxu0 %v1263_v46 }
  0x34   :  { %681 = vmatmul.mubr.bf16.gmra.mxu1 %v1264_v47  ;;  %600 = vmatprep.mubr.bf16.mxu0 %v1265_v48 }
  0x35   :  { %688 = vmatprep.mubr.bf16.mxu1 %v1267_v49 }
  0x3b   :  { %601 = vmatmul.mubr.bf16.gmra.mxu0 %v1269_v51 }
  0x3c   :  { %689 = vmatmul.mubr.bf16.gmra.mxu1 %v1270_v52  ;;  %608 = vmatprep.mubr.bf16.mxu0 %v1272_v53 }
  0x3d   :  { %696 = vmatprep.mubr.bf16.mxu1 %v1274_v54 }
  0x43   :  { %609 = vmatmul.mubr.bf16.gmra.mxu0 %v1276_v55 }
  0x44   :  { %697 = vmatmul.mubr.bf16.gmra.mxu1 %v1277_v56  ;;  %616 = vmatprep.mubr.bf16.mxu0 %v1278_v57 }
  0x45   :  { %704 = vmatprep.mubr.bf16.mxu1 %v1280_v58  ;;  %v1609_v58 = vld [vmem:[%s1740_s2] ss:$0 sm:$0xff] }
  0x4b   :  { %617 = vmatmul.mubr.bf16.gmra.mxu0 %v1282_v61 }
  0x4c   :  { %705 = vmatmul.mubr.bf16.gmra.mxu1 %v1283_v62  ;;  %624 = vmatprep.mubr.bf16.mxu0 %v965_v63 }
  0x4d   :  { %712 = vmatprep.mubr.bf16.mxu1 %v967_v0 }
  0x53   :  { %625 = vmatmul.mubr.bf16.gmra.mxu0 %v964_v1 }
  0x54   :  { %713 = vmatmul.mubr.bf16.gmra.mxu1 %v966_v2  ;;  %1175 = vmatprep.mubr.msk.bf16.mxu0 %vm1297_vm0, %v1296_v34 }
  0x55   :  { %1191 = vmatprep.mubr.msk.bf16.mxu1 %vm1297_vm0, %v1296_v34 }
  0x5b   :  { %1176 = vmatmul.mubr.msk.bf16.vlgmr.msra.gmra.mxu0 %vm522_vm1, %v1289_v3 }
  0x5c   :  { %1192 = vmatmul.mubr.msk.bf16.vlgmr.msra.gmra.mxu1 %vm522_vm1, %v1290_v4  ;;  %1179 = vmatprep.mubr.msk.bf16.mxu0 %vm1297_vm0, %v1296_v34 }
  0x5d   :  { %1195 = vmatprep.mubr.msk.bf16.mxu1 %vm1297_vm0, %v1296_v34 }
  0x63   :  { %1180 = vmatmul.mubr.msk.bf16.gmra.mxu0 %vm522_vm1, %v1291_v5 }
  0x64   :  { %1196 = vmatmul.mubr.msk.bf16.gmra.mxu1 %vm522_vm1, %v1292_v6  ;;  %1183 = vmatprep.mubr.msk.bf16.mxu0 %vm1297_vm0, %v1296_v34 }
  0x65   :  { %1199 = vmatprep.mubr.msk.bf16.mxu1 %vm1297_vm0, %v1296_v34 }
  0x6b   :  { %1184 = vmatmul.mubr.msk.bf16.gmra.mxu0 %vm522_vm1, %v1293_v7 }
  0x6c   :  { %1200 = vmatmul.mubr.msk.bf16.gmra.mxu1 %vm522_vm1, %v1294_v8  ;;  %1187 = vmatprep.mubr.msk.bf16.mxu0 %vm1297_vm0, %v1296_v34 }
  0x73   :  { %1188 = vmatmul.mubr.msk.bf16.gmra.mxu0 %vm522_vm1, %v1295_v9 }
  0xe3   :  { %v1056_v10 = vpop.f32.mrf.mxu0 }
  0xe4   :  { %v1114_v11 = vpop.f32.mrf.mxu1 }
  0xe5   :  { %v1057_v12 = vpop.f32.mrf.mxu0 }
  0xe6   :  { %v1115_v13 = vpop.f32.mrf.mxu1  ;;  %v1058_v56 = vadd.f32 %v1057_v12, %v1056_v10 }
  0xe7   :  { %v1059_v14 = vpop.f32.mrf.mxu0  ;;  %v1116_v0 = vadd.f32 %v1115_v13, %v1114_v11 }
  0xe8   :  { %v1564_v15 = vpop.f32.mrf.mxu1  ;;  %v579_v63 = vadd.f32 %v1058_v56, %v1609_v58 }
  0xe9   :  { %v1060_v16 = vpop.f32.mrf.mxu0 }
  0xea   :  { %v1118_v17 = vpop.f32.mrf.mxu1  ;;  %v1061_v2 = vadd.f32 %v1060_v16, %v1059_v14  ;;  %v667_v12 = vadd.f32 %v1116_v0, %v579_v63 }
  0xeb   :  { %v1062_v18 = vpop.f32.mrf.mxu0 }
  0xec   :  { %v1120_v19 = vpop.f32.mrf.mxu1 }
  0xed   :  { %v1063_v20 = vpop.f32.mrf.mxu0 }
  0xee   :  { %v1121_v21 = vpop.f32.mrf.mxu1  ;;  %v1064_v3 = vadd.f32 %v1063_v20, %v1062_v18 }
  0xef   :  { %v1566_v22 = vpop.f32.mrf.mxu0  ;;  %v1122_v11 = vadd.f32 %v1121_v21, %v1120_v19 }
  0xf0   :  { %v1568_v23 = vpop.f32.mrf.mxu1  ;;  %v587_v56 = vadd.f32 %v1064_v3, %v1609_v58 }
  0xf1   :  { %v1570_v24 = vpop.f32.mrf.mxu0 }
  0xf2   :  { %v1572_v25 = vpop.f32.mrf.mxu1 }
  0xf3   :  { %v1574_v26 = vpop.f32.mrf.mxu0  ;;  %v1125_v3 = vadd.f32 %v1572_v25, %v1568_v23 }
  0xf4   :  { %v1576_v27 = vpop.f32.mrf.mxu1 }
  0xf5   :  { %v1578_v28 = vpop.f32.mrf.mxu0 }
  0xf6   :  { %v1580_v29 = vpop.f32.mrf.mxu1 }
  0xf7   :  { %v1582_v30 = vpop.f32.mrf.mxu0 }
  0xf8   :  { %v1584_v31 = vpop.f32.mrf.mxu1 }
  0xf9   :  { %v1586_v32 = vpop.f32.mrf.mxu0 }
  0xfa   :  { %v1588_v33 = vpop.f32.mrf.mxu1 }
  0xfb   :  { %v1590_v34 = vpop.f32.mrf.mxu0 }
  0xfc   :  { %v1592_v35 = vpop.f32.mrf.mxu1 }
  0xfd   :  { %v1594_v36 = vpop.f32.mrf.mxu0 }
  0xfe   :  { %v1596_v37 = vpop.f32.mrf.mxu1 }
  0xff   :  { %v1598_v38 = vpop.f32.mrf.mxu0 }
 0x100   :  { %v1600_v39 = vpop.f32.mrf.mxu1 }
 0x101   :  { %v1602_v40 = vpop.f32.mrf.mxu0 }
 0x102   :  { %v1604_v41 = vpop.f32.mrf.mxu1 }
 0x103   :  { %v1080_v42 = vpop.f32.mrf.mxu0 }
 0x104   :  { %v1138_v43 = vpop.f32.mrf.mxu1 }
 0x105   :  { %v1081_v44 = vpop.f32.mrf.mxu0 }
 0x106   :  { %v1139_v45 = vpop.f32.mrf.mxu1  ;;  %v1082_v60 = vadd.f32 %v1081_v44, %v1080_v42  ;;  %v582_v42 = vadd.f32 %v1061_v2, %v1609_v58  ;;  %v1119_v44 = vadd.f32 %v1118_v17, %v1564_v15 }
 0x107   :  { %v1083_v46 = vpop.f32.mrf.mxu0  ;;  %v1140_v6 = vadd.f32 %v1139_v45, %v1138_v43 }
 0x108   :  { %v1141_v47 = vpop.f32.mrf.mxu1  ;;  %v611_v5 = vadd.f32 %v1082_v60, %v1609_v58 }
 0x109   :  { %v1084_v48 = vpop.f32.mrf.mxu0 }
 0x10a   :  { %v1142_v49 = vpop.f32.mrf.mxu1  ;;  %v1085_v7 = vadd.f32 %v1084_v48, %v1083_v46  ;;  %v699_v60 = vadd.f32 %v1140_v6, %v611_v5  ;;  %v1067_v46 = vadd.f32 %v1570_v24, %v1566_v22  ;;  %v1626_v48 = vld [vmem:[%s1741_s3] ss:$0 sm:$0xff] }
 0x10b   :  { %v1086_v50 = vpop.f32.mrf.mxu0  ;;  %v1143_v16 = vadd.f32 %v1142_v49, %v1141_v47  ;;  %v670_v47 = vadd.f32 %v1119_v44, %v582_v42  ;;  %v675_v49 = vadd.f32 %v1122_v11, %v587_v56  ;;  %v1632_v22 = vld [vmem:[%s1742_s4] ss:$0 sm:$0xff] }
 0x10c   :  { %v1144_v51 = vpop.f32.mrf.mxu1  ;;  %v614_v14 = vadd.f32 %v1085_v7, %v1609_v58 }
 0x10d   :  { %v1087_v52 = vpop.f32.mrf.mxu0 }
 0x10e   :  { %v1145_v53 = vpop.f32.mrf.mxu1  ;;  %v1088_v18 = vadd.f32 %v1087_v52, %v1086_v50  ;;  %v702_v2 = vadd.f32 %v1143_v16, %v614_v14 }
 0x10f   :  { %v1089_v54 = vpop.f32.mrf.mxu0  ;;  %v1146_v52 = vadd.f32 %v1145_v53, %v1144_v51  ;;  %v590_v51 = vadd.f32 %v1067_v46, %v1609_v58  ;;  %v1128_v53 = vadd.f32 %v1580_v29, %v1576_v27 }
 0x110   :  { %v1147_v55 = vpop.f32.mrf.mxu1  ;;  %v619_v50 = vadd.f32 %v1088_v18, %v1609_v58 }
 0x111   :  { %v1090_v57 = vpop.f32.mrf.mxu0 }
 0x112   :  { %v1148_v59 = vpop.f32.mrf.mxu1  ;;  %v1091_v19 = vadd.f32 %v1090_v57, %v1089_v54  ;;  %v1070_v54 = vadd.f32 %v1578_v28, %v1574_v26  ;;  %v707_v11 = vadd.f32 %v1146_v52, %v619_v50  ;;  %v1076_v52 = vadd.f32 %v1594_v36, %v1590_v34 }
 0x113   :  { %v1092_v61 = vpop.f32.mrf.mxu0 }
 0x114   :  { %v1611_v62 = vpop.f32.mrf.mxu1 }
 0x115   :  { %v1093_v1 = vpop.f32.mrf.mxu0 }
 0x116   :  { %v1614_v4 = vpop.f32.mrf.mxu1  ;;  %v1094_v28 = vadd.f32 %v1093_v1, %v1092_v61  ;;  %v1073_v61 = vadd.f32 %v1586_v32, %v1582_v30 }
 0x117   :  { %v1095_v8 = vpop.f32.mrf.mxu0 }
 0x118   :  { %v1153_v9 = vpop.f32.mrf.mxu1 }
 0x119   :  { %v1096_v10 = vpop.f32.mrf.mxu0 }
 0x11a   :  { %v1154_v13 = vpop.f32.mrf.mxu1  ;;  %v622_v10 = vadd.f32 %v1091_v19, %v1609_v58 }
 0x11b   :  { %v754_v20 = vpop.f32.mrf.mxu0  ;;  %v595_v13 = vadd.f32 %v1070_v54, %v1609_v58 }
 0x11c   :  { %v755_v43 = vadd.f32 %v754_v20, %v667_v12  ;;  %v786_v45 = vpop.f32.mrf.mxu1  ;;  %v1149_v12 = vadd.f32 %v1148_v59, %v1147_v55 }
 0x11d   :  { %v787_v15 = vadd.f32 %v786_v45, %v699_v60  ;;  %v1177_v17 = vpop.f32.mrf.mxu0  ;;  %v678_v60 = vadd.f32 %v1125_v3, %v590_v51  ;;  %v683_v50 = vadd.f32 %v1128_v53, %v595_v13  ;;  %v1131_v3 = vadd.f32 %v1588_v33, %v1584_v31 }
 0x11e   :  { %v808_v21 = vmax.f32 %v755_v43, 0.0  ;;  %v1193_v63 = vpop.f32.mrf.mxu1  ;;  %v710_v46 = vadd.f32 %v1149_v12, %v622_v10  ;;  %v1152_v17 = vadd.f32 %v1614_v4, %v1611_v62  ;;  %v1134_v31 = vadd.f32 %v1596_v37, %v1592_v35 }
 0x11f   :  { %v816_v24 = vmax.f32 %v787_v15, 0.0  ;;  %v757_v0 = vpop.f32.mrf.mxu0  ;;  %v627_v15 = vadd.f32 %v1094_v28, %v1609_v58 }
 0x120   :  { %v828_v57 = vmul.f32 %v1626_v48, %v808_v21  ;;  %v758_v5 = vadd.f32 %v757_v0, %v670_v47  ;;  %v789_v6 = vpop.f32.mrf.mxu1 }
 0x121   :  { %v836_v7 = vmul.f32 %v1626_v48, %v816_v24  ;;  %v790_v8 = vadd.f32 %v789_v6, %v702_v2  ;;  %v1178_v9 = vpop.f32.mrf.mxu0  ;;  %v598_v2 = vadd.f32 %v1073_v61, %v1609_v58  ;;  %v715_v51 = vadd.f32 %v1152_v17, %v627_v15 }
 0x122   :  { %v848_v23 = vadd.f32 %v1632_v22, %v828_v57  ;;  %v809_v25 = vmax.f32 %v758_v5, 0.0  ;;  %v1194_v26 = vpop.f32.mrf.mxu1  ;;  %v603_v9 = vadd.f32 %v1076_v52, %v1609_v58 }
 0x123   :  { %v856_v42 = vadd.f32 %v1632_v22, %v836_v7  ;;  %v817_v44 = vmax.f32 %v790_v8, 0.0  ;;  %v762_v56 = vpop.f32.mrf.mxu0  ;;  %v1079_v26 = vadd.f32 %v1602_v40, %v1598_v38  ;;  %v686_v28 = vadd.f32 %v1131_v3, %v598_v2 }
 0x124   :  { %v1027_v27 = vpack.c.bf16 %v848_v23, %v848_v23  ;;  %v829_v29 = vmul.f32 %v1626_v48, %v809_v25  ;;  %v763_v14 = vadd.f32 %v762_v56, %v675_v49  ;;  %v794_v16 = vpop.f32.mrf.mxu1 }
 0x125   :  { %v1035_v18 = vpack.c.bf16 %v856_v42, %v856_v42  ;;  %v837_v55 = vmul.f32 %v1626_v48, %v817_v44  ;;  %v795_v59 = vadd.f32 %v794_v16, %v707_v11  ;;  %v1181_v20 = vpop.f32.mrf.mxu0 }
 0x126   :  { %915 = vst.msk [vmem:[%s1743_s5] sm:$0xf] %vm914_vm2, %v1027_v27  ;;  %v849_v1 = vadd.f32 %v1632_v22, %v829_v29  ;;  %v810_v43 = vmax.f32 %v763_v14, 0.0  ;;  %v1197_v45 = vpop.f32.mrf.mxu1 }
 0x127   :  { %923 = vst.msk [vmem:[%s1743_s5 + $0x20] sm:$0xf] %vm914_vm2, %v1035_v18  ;;  %v857_v30 = vadd.f32 %v1632_v22, %v837_v55  ;;  %v818_v32 = vmax.f32 %v795_v59, 0.0  ;;  %v765_v19 = vpop.f32.mrf.mxu0  ;;  %v691_v18 = vadd.f32 %v1134_v31, %v603_v9  ;;  %v606_v55 = vadd.f32 %v1079_v26, %v1609_v58 }
 0x128   :  { %v1028_v21 = vpack.c.bf16 %v849_v1, %v849_v1  ;;  %v830_v63 = vmul.f32 %v1626_v48, %v810_v43  ;;  %v766_v47 = vadd.f32 %v765_v19, %v678_v60  ;;  %v797_v49 = vpop.f32.mrf.mxu1  ;;  %v1137_v59 = vadd.f32 %v1604_v41, %v1600_v39 }
 0x129   :  { %v1036_v24 = vpack.c.bf16 %v857_v30, %v857_v30  ;;  %v838_v62 = vmul.f32 %v1626_v48, %v818_v32  ;;  %v798_v4 = vadd.f32 %v797_v49, %v710_v46  ;;  %v1182_v0 = vpop.f32.mrf.mxu0 }
 0x12a   :  { %916 = vst.msk [vmem:[%s1743_s5 + $0x4] sm:$0xf] %vm914_vm2, %v1028_v21  ;;  %v850_v54 = vadd.f32 %v1632_v22, %v830_v63  ;;  %v811_v57 = vmax.f32 %v766_v47, 0.0  ;;  %v1198_v5 = vpop.f32.mrf.mxu1  ;;  %v694_v30 = vadd.f32 %v1137_v59, %v606_v55 }
 0x12b   :  { %924 = vst.msk [vmem:[%s1743_s5 + $0x24] sm:$0xf] %vm914_vm2, %v1036_v24  ;;  %v858_v34 = vadd.f32 %v1632_v22, %v838_v62  ;;  %v819_v36 = vmax.f32 %v798_v4, 0.0  ;;  %v770_v6 = vpop.f32.mrf.mxu0 }
 0x12c   :  { %v1029_v33 = vpack.c.bf16 %v850_v54, %v850_v54  ;;  %v831_v53 = vmul.f32 %v1626_v48, %v811_v57  ;;  %v771_v7 = vadd.f32 %v770_v6, %v683_v50  ;;  %v802_v8 = vpop.f32.mrf.mxu1 }
 0x12d   :  { %v1037_v10 = vpack.c.bf16 %v858_v34, %v858_v34  ;;  %v839_v12 = vmul.f32 %v1626_v48, %v819_v36  ;;  %v803_v23 = vadd.f32 %v802_v8, %v715_v51  ;;  %v1185_v25 = vpop.f32.mrf.mxu0 }
 0x12e   :  { %917 = vst.msk [vmem:[%s1743_s5 + $0x8] sm:$0xf] %vm914_vm2, %v1029_v33  ;;  %v851_v35 = vadd.f32 %v1632_v22, %v831_v53  ;;  %v812_v37 = vmax.f32 %v771_v7, 0.0  ;;  %v1201_v42 = vpop.f32.mrf.mxu1 }
 0x12f   :  { %925 = vst.msk [vmem:[%s1743_s5 + $0x28] sm:$0xf] %vm914_vm2, %v1037_v10  ;;  %v859_v44 = vadd.f32 %v1632_v22, %v839_v12  ;;  %v820_v56 = vmax.f32 %v803_v23, 0.0  ;;  %v773_v11 = vpop.f32.mrf.mxu0 }
 0x130   :  { %v1030_v38 = vpack.c.bf16 %v851_v35, %v851_v35  ;;  %v832_v40 = vmul.f32 %v1626_v48, %v812_v37  ;;  %v774_v13 = vadd.f32 %v773_v11, %v686_v28  ;;  %v805_v27 = vpop.f32.mrf.mxu1 }
 0x131   :  { %v1038_v29 = vpack.c.bf16 %v859_v44, %v859_v44  ;;  %v840_v14 = vmul.f32 %v1626_v48, %v820_v56  ;;  %v1186_v16 = vpop.f32.mrf.mxu0 }
 0x132   :  { %918 = vst.msk [vmem:[%s1743_s5 + $0xc] sm:$0xf] %vm914_vm2, %v1030_v38  ;;  %v852_v20 = vadd.f32 %v1632_v22, %v832_v40  ;;  %v813_v60 = vmax.f32 %v774_v13, 0.0  ;;  %v1202_v61 = vpop.f32.mrf.mxu1 }
 0x133   :  { %926 = vst.msk [vmem:[%s1743_s5 + $0x2c] sm:$0xf] %vm914_vm2, %v1038_v29  ;;  %v860_v1 = vadd.f32 %v1632_v22, %v840_v14  ;;  %v778_v58 = vpop.f32.mrf.mxu0 }
 0x134   :  { %v1031_v43 = vpack.c.bf16 %v852_v20, %v852_v20  ;;  %v833_v39 = vmul.f32 %v1626_v48, %v813_v60  ;;  %v779_v41 = vadd.f32 %v778_v58, %v691_v18 }
 0x135   :  { %v1039_v45 = vpack.c.bf16 %v860_v1, %v860_v1  ;;  %v1189_v46 = vpop.f32.mrf.mxu0 }
 0x136   :  { %919 = vst.msk [vmem:[%s1743_s5 + $0x10] sm:$0xf] %vm914_vm2, %v1031_v43  ;;  %v853_v15 = vadd.f32 %v1632_v22, %v833_v39  ;;  %v814_v17 = vmax.f32 %v779_v41, 0.0 }
 0x137   :  { %928 = vst.msk [vmem:[%s1743_s5 + $0x30] sm:$0x1] %vm927_vm3, %v1039_v45  ;;  %v781_v32 = vpop.f32.mrf.mxu0 }
 0x138   :  { %v1032_v19 = vpack.c.bf16 %v853_v15, %v853_v15  ;;  %v834_v21 = vmul.f32 %v1626_v48, %v814_v17  ;;  %v782_v63 = vadd.f32 %v781_v32, %v694_v30 }
 0x139   :  { %v1190_v47 = vpop.f32.mrf.mxu0 }
 0x13a   :  { %920 = vst.msk [vmem:[%s1743_s5 + $0x14] sm:$0xf] %vm914_vm2, %v1032_v19  ;;  %v854_v49 = vadd.f32 %v1632_v22, %v834_v21  ;;  %v815_v50 = vmax.f32 %v782_v63, 0.0 }
 0x13c   :  { %v1033_v52 = vpack.c.bf16 %v854_v49, %v854_v49  ;;  %v835_v24 = vmul.f32 %v1626_v48, %v815_v50 }
 0x13e   :  { %921 = vst.msk [vmem:[%s1743_s5 + $0x18] sm:$0xf] %vm914_vm2, %v1033_v52  ;;  %v855_v62 = vadd.f32 %v1632_v22, %v835_v24 }
 0x140   :  { %v1034_v4 = vpack.c.bf16 %v855_v62, %v855_v62 }
 0x142   :  { %922 = vst.msk [vmem:[%s1743_s5 + $0x1c] sm:$0xf] %vm914_vm2, %v1034_v4 }

// kernel: half_alexnet_forward.9
= control target key start
LH: loop header
LB: loop body
LE: loop exit
PB: predicated region body
PF: predicated region fallthrough
CT: control target
= control target key end

     0   :  { %v1734_v36 = vmov 0.0   ;;  %vm1735_vm0 = vmmov 0   ;;  %vm746_vm1 = vcmask 785408   ;;  %vm1226_vm2 = vcmask 781312   ;;  %s2327_s1 = inlined_call_operand.vmem [shape: bf16[864,96], index: 1, kind: input, shape index: {}]   ;;  %s2328_s0 = inlined_call_operand.vmem [shape: bf16[98,864], index: 0, kind: input, shape index: {}]   ;;  %s2329_s2 = inlined_call_operand.vmem [shape: f32[1,96], index: 2, kind: input, shape index: {}]   ;;  %s2330_s3 = inlined_call_operand.vmem [shape: f32[1,96], index: 3, kind: input, shape index: {}]   ;;  %s2331_s4 = inlined_call_operand.vmem [shape: f32[1,96], index: 4, kind: input, shape index: {}]   ;;  %s2332_s5 = inlined_call_operand.vmem [shape: bf16[98,96], index: 5, kind: output, shape index: {}]  }
   0x1   :  { %v1613_v0 = vld [vmem:[%s2327_s1 + $0x78] sm:$0xff]   ;;  %v1617_v4 = vld [vmem:[%s2327_s1 + $0x70] sm:$0xff]   ;;  %v1621_v8 = vld [vmem:[%s2327_s1 + $0x68] sm:$0xff]   ;;  %vm1239_vm3 = vcmask 778240  }
   0x2   :  { %v1614_v1 = vld [vmem:[%s2327_s1 + $0x38] sm:$0xff]   ;;  %1384 = vmatprep.subr.bf16.mxu0 %v1613_v0  ;;  %v1618_v5 = vld [vmem:[%s2327_s1 + $0x30] sm:$0xff]   ;;  %v1622_v9 = vld [vmem:[%s2327_s1 + $0x28] sm:$0xff]  }
   0x3   :  { %v1615_v2 = vld [vmem:[%s2327_s1 + $0xf8] sm:$0xff]   ;;  %1385 = vmatpush3.bf16.msra.mxu0 %v1614_v1  ;;  %v1619_v6 = vld [vmem:[%s2327_s1 + $0xf0] sm:$0xff]   ;;  %v1623_v10 = vld [vmem:[%s2327_s1 + $0xe8] sm:$0xff]  }
   0x4   :  { %v1616_v3 = vld [vmem:[%s2327_s1 + $0xb8] sm:$0xff]   ;;  %1442 = vmatprep.subr.bf16.mxu1 %v1615_v2  ;;  %1386 = vmatprep.subr.bf16.mxu0 %v1617_v4  ;;  %v1620_v7 = vld [vmem:[%s2327_s1 + $0xb0] sm:$0xff]   ;;  %v1624_v11 = vld [vmem:[%s2327_s1 + $0xa8] sm:$0xff]  }
   0x5   :  { %1443 = vmatpush3.bf16.msra.mxu1 %v1616_v3  ;;  %v1625_v12 = vld [vmem:[%s2327_s1 + $0x60] sm:$0xff]   ;;  %v1629_v16 = vld [vmem:[%s2327_s1 + $0x58] sm:$0xff]   ;;  %v1633_v20 = vld [vmem:[%s2327_s1 + $0x50] sm:$0xff]  }
   0x6   :  { %1444 = vmatprep.subr.bf16.mxu1 %v1619_v6  ;;  %v1626_v13 = vld [vmem:[%s2327_s1 + $0x20] sm:$0xff]   ;;  %v1630_v17 = vld [vmem:[%s2327_s1 + $0x18] sm:$0xff]   ;;  %v1634_v21 = vld [vmem:[%s2327_s1 + $0x10] sm:$0xff]  }
   0x7   :  { %1387 = vmatpush3.bf16.msra.mxu0 %v1618_v5  ;;  %v1627_v14 = vld [vmem:[%s2327_s1 + $0xe0] sm:$0xff]   ;;  %v1631_v18 = vld [vmem:[%s2327_s1 + $0xd8] sm:$0xff]   ;;  %v1635_v22 = vld [vmem:[%s2327_s1 + $0xd0] sm:$0xff]  }
   0x8   :  { %1388 = vmatprep.subr.bf16.mxu0 %v1621_v8  ;;  %v1628_v15 = vld [vmem:[%s2327_s1 + $0xa0] sm:$0xff]   ;;  %v1632_v19 = vld [vmem:[%s2327_s1 + $0x98] sm:$0xff]   ;;  %v1636_v23 = vld [vmem:[%s2327_s1 + $0x90] sm:$0xff]  }
   0x9   :  { %1445 = vmatpush3.bf16.msra.mxu1 %v1620_v7  ;;  %v1637_v24 = vld [vmem:[%s2327_s1 + $0x48] sm:$0xff]   ;;  %v1641_v28 = vld [vmem:[%s2327_s1 + $0x40] sm:$0xff]   ;;  %v1651_v37 = vld [vmem:[%s2327_s1 + $0x178] sm:$0xff]  }
   0xa   :  { %1446 = vmatprep.subr.bf16.mxu1 %v1623_v10  ;;  %v1638_v25 = vld [vmem:[%s2327_s1 + $0x8] sm:$0xff]   ;;  %v1642_v29 = vld [vmem:[%s2327_s1] sm:$0xff]   ;;  %v1652_v38 = vld [vmem:[%s2327_s1 + $0x138] sm:$0xff]  }
   0xb   :  { %1389 = vmatpush3.bf16.msra.mxu0 %v1622_v9  ;;  %v1639_v26 = vld [vmem:[%s2327_s1 + $0xc8] sm:$0xff]   ;;  %v1643_v30 = vld [vmem:[%s2327_s1 + $0xc0] sm:$0xff]   ;;  %v1653_v39 = vld [vmem:[%s2328_s0 + $0x3c] ss:$28 sps:$4 sm:$0xff]  }
   0xc   :  { %1390 = vmatprep.subr.bf16.mxu0 %v1625_v12  ;;  %v1640_v27 = vld [vmem:[%s2327_s1 + $0x88] sm:$0xff]   ;;  %v1644_v31 = vld [vmem:[%s2327_s1 + $0x80] sm:$0xff]   ;;  %v1655_v40 = vld [vmem:[%s2327_s1 + $0x170] sm:$0xff]  }
   0xd   :  { %1447 = vmatpush3.bf16.msra.mxu1 %v1624_v11  ;;  %v1645_v32 = vld [vmem:[%s2328_s0] ss:$28 sps:$4 sm:$0xff]   ;;  %v1648_v34 = vld [vmem:[%s2328_s0 + $0x8] ss:$28 sps:$4 sm:$0xff]   ;;  %v1657_v42 = vld [vmem:[%s2328_s0 + $0x38] ss:$28 sps:$4 sm:$0xff]  }
   0xe   :  { %1448 = vmatprep.subr.bf16.mxu1 %v1627_v14  ;;  %v1647_v33 = vld [vmem:[%s2328_s0 + $0x4] ss:$28 sps:$4 sm:$0xff]   ;;  %v1650_v35 = vld [vmem:[%s2328_s0 + $0xc] ss:$28 sps:$4 sm:$0xff]   ;;  %v1660_v44 = vld [vmem:[%s2327_s1 + $0x130] sm:$0xff]  }
   0xf   :  { %1391 = vmatpush3.bf16.msra.mxu0 %v1626_v13  ;;  %800 = vmatprep.mubr.bf16.mxu0 %v1647_v33  ;;  %v1656_v41 = vld [vmem:[%s2327_s1 + $0x1a8] sm:$0xff]   ;;  %v1658_v43 = vld [vmem:[%s2328_s0 + $0x44] ss:$28 sps:$4 sm:$0xff]   ;;  %v1663_v47 = vld [vmem:[%s2328_s0 + $0x74] ss:$28 sps:$4 sm:$0xff]  }
  0x10   :  { %1392 = vmatprep.subr.bf16.mxu0 %v1629_v16  ;;  %888 = vmatprep.mubr.bf16.mxu1 %v1650_v35  ;;  %v1661_v45 = vld [vmem:[%s2328_s0 + $0x40] ss:$28 sps:$4 sm:$0xff]   ;;  %v1662_v46 = vld [vmem:[%s2327_s1 + $0x168] sm:$0xff]   ;;  %v1669_v51 = vld [vmem:[%s2328_s0 + $0x78] ss:$28 sps:$4 sm:$0xff]  }
  0x11   :  { %1449 = vmatpush3.bf16.msra.mxu1 %v1628_v15  ;;  %v1665_v48 = vld [vmem:[%s2327_s1 + $0x128] sm:$0xff]   ;;  %v1667_v50 = vld [vmem:[%s2328_s0 + $0x7c] ss:$28 sps:$4 sm:$0xff]   ;;  %v1670_v52 = vld [vmem:[%s2327_s1 + $0x1a0] sm:$0xff]  }
  0x12   :  { %1450 = vmatprep.subr.bf16.mxu1 %v1631_v18  ;;  %v1666_v49 = vld [vmem:[%s2328_s0 + $0x70] ss:$28 sps:$4 sm:$0xff]   ;;  %v1671_v53 = vld [vmem:[%s2327_s1 + $0x160] sm:$0xff]   ;;  %v1679_v57 = vld [vmem:[%s2327_s1 + $0x198] sm:$0xff]  }
  0x13   :  { %1393 = vmatpush3.bf16.msra.mxu0 %v1630_v17  ;;  %v1672_v54 = vld [vmem:[%s2327_s1 + $0x120] sm:$0xff]   ;;  %v1673_v55 = vld [vmem:[%s2328_s0 + $0xac] ss:$28 sps:$4 sm:$0xff]   ;;  %v1676_v56 = vld [vmem:[%s2328_s0 + $0xb4] ss:$28 sps:$4 sm:$0xff]  }
  0x14   :  { %1394 = vmatprep.subr.bf16.mxu0 %v1633_v20  ;;  %v1680_v58 = vld [vmem:[%s2327_s1 + $0x158] sm:$0xff]   ;;  %v1675_v60 = vld [vmem:[%s2328_s0 + $0xa8] ss:$28 sps:$4 sm:$0xff]   ;;  %v1678_v61 = vld [vmem:[%s2328_s0 + $0xb0] ss:$28 sps:$4 sm:$0xff]  }
  0x15   :  { %1451 = vmatpush3.bf16.msra.mxu1 %v1632_v19  ;;  %v1681_v59 = vld [vmem:[%s2327_s1 + $0x118] sm:$0xff]   ;;  %v1682_v62 = vld [vmem:[%s2328_s0 + $0xe4] ss:$28 sps:$4 sm:$0xff]   ;;  %v1685_v63 = vld [vmem:[%s2328_s0 + $0xec] ss:$28 sps:$4 sm:$0xff]  }
  0x16   :  { %1452 = vmatprep.subr.bf16.mxu1 %v1635_v22  ;;  %v1688_v0 = vld [vmem:[%s2327_s1 + $0x150] sm:$0xff]   ;;  %v1684_v3 = vld [vmem:[%s2328_s0 + $0xe0] ss:$28 sps:$4 sm:$0xff]   ;;  %v1687_v4 = vld [vmem:[%s2328_s0 + $0xe8] ss:$28 sps:$4 sm:$0xff]  }
  0x17   :  { %1395 = vmatpush3.bf16.msra.mxu0 %v1634_v21  ;;  %v1689_v1 = vld [vmem:[%s2327_s1 + $0x190] sm:$0xff]   ;;  %v1691_v5 = vld [vmem:[%s2328_s0 + $0x11c] ss:$28 sps:$4 sm:$0xff]   ;;  %v1694_v6 = vld [vmem:[%s2328_s0 + $0x124] ss:$28 sps:$4 sm:$0xff]  }
  0x18   :  { %1396 = vmatprep.subr.bf16.mxu0 %v1637_v24  ;;  %v1690_v2 = vld [vmem:[%s2327_s1 + $0x110] sm:$0xff]   ;;  %v1697_v7 = vld [vmem:[%s2327_s1 + $0x148] sm:$0xff]   ;;  %v1704_v11 = vld [vmem:[%s2327_s1 + $0x140] sm:$0xff]  }
  0x19   :  { %1453 = vmatpush3.bf16.msra.mxu1 %v1636_v23  ;;  %v1698_v8 = vld [vmem:[%s2327_s1 + $0x108] sm:$0xff]   ;;  %v69_v10 = vld [vmem:[%s2328_s0 + $0x150] sm:$0x11]  ;;  %v1705_v12 = vld [vmem:[%s2327_s1 + $0x100] sm:$0xff]  }
  0x1a   :  { %1454 = vmatprep.subr.bf16.mxu1 %v1639_v26  ;;  %v1699_v9 = vld [vmem:[%s2327_s1 + $0x188] sm:$0xff]   ;;  %v1706_v13 = vld [vmem:[%s2327_s1 + $0x180] sm:$0xff]   ;;  %v70_v14 = vld [vmem:[%s2328_s0 + $0x158] sm:$0x11]  ;;  %v1289_v17 = vcombine.high %v69_v10, %v69_v10  ;;  %v1288_v19 = vcombine.low %v69_v10, %v69_v10 }
  0x1b   :  { %1397 = vmatpush3.bf16.msra.mxu0 %v1638_v25  ;;  %v1693_v15 = vld [vmem:[%s2328_s0 + $0x118] ss:$28 sps:$4 sm:$0xff]   ;;  %v1696_v16 = vld [vmem:[%s2328_s0 + $0x120] ss:$28 sps:$4 sm:$0xff]   ;;  %v1291_v18 = vcombine.high %v70_v14, %v70_v14  ;;  %v1290_v20 = vcombine.low %v70_v14, %v70_v14  ;;  %v1707_v22 = vld [vmem:[%s2328_s0 + $0x10] ss:$28 sps:$4 sm:$0xff]  }
  0x1c   :  { %1398 = vmatprep.subr.bf16.mxu0 %v1641_v28  ;;  %v1709_v21 = vld [vmem:[%s2328_s0 + $0x14] ss:$28 sps:$4 sm:$0xff]   ;;  %v1711_v24 = vld [vmem:[%s2328_s0 + $0x4c] ss:$28 sps:$4 sm:$0xff]   ;;  %v1717_v28 = vld [vmem:[%s2328_s0 + $0x80] ss:$28 sps:$4 sm:$0xff]  }
  0x1d   :  { %1455 = vmatpush3.bf16.msra.mxu1 %v1640_v27  ;;  %v1710_v23 = vld [vmem:[%s2328_s0 + $0x18] ss:$28 sps:$4 sm:$0xff]   ;;  %v1713_v25 = vld [vmem:[%s2328_s0 + $0x48] ss:$28 sps:$4 sm:$0xff]   ;;  %v1714_v26 = vld [vmem:[%s2328_s0 + $0x50] ss:$28 sps:$4 sm:$0xff]  }
  0x1e   :  { %1456 = vmatprep.subr.bf16.mxu1 %v1643_v30  ;;  %v1715_v27 = vld [vmem:[%s2328_s0 + $0x84] ss:$28 sps:$4 sm:$0xff]   ;;  %v1719_v30 = vld [vmem:[%s2328_s0 + $0xbc] ss:$28 sps:$4 sm:$0xff]   ;;  %v1723_v33 = vld [vmem:[%s2328_s0 + $0xf4] ss:$28 sps:$4 sm:$0xff]  }
  0x1f   :  { %1399 = vmatpush3.bf16.msra.mxu0 %v1642_v29  ;;  %v1718_v29 = vld [vmem:[%s2328_s0 + $0x88] ss:$28 sps:$4 sm:$0xff]   ;;  %v1726_v35 = vld [vmem:[%s2328_s0 + $0xf8] ss:$28 sps:$4 sm:$0xff]  }
  0x20   :  { %1500 = vmatprep.subr.bf16.mxu0 %v1651_v37  ;;  %v1727_v37 = vld [vmem:[%s2328_s0 + $0x12c] ss:$28 sps:$4 sm:$0xff]  }
  0x21   :  { %1457 = vmatpush3.bf16.msra.mxu1 %v1644_v31  ;;  %v1721_v31 = vld [vmem:[%s2328_s0 + $0xb8] ss:$28 sps:$4 sm:$0xff]  }
  0x22   :  { %1571 = vmatprep.subr.bf16.mxu1 %v1734_v36  ;;  %801 = vmatmul.mubr.bf16.vlgmr.msra.gmra.mxu0 %v1645_v32  ;;  %v1722_v32 = vld [vmem:[%s2328_s0 + $0xc0] ss:$28 sps:$4 sm:$0xff]  }
  0x23   :  { %1501 = vmatpush3.bf16.msra.mxu0 %v1652_v38  ;;  %808 = vmatprep.mubr.bf16.mxu0 %v1653_v39  ;;  %v71_v38 = vld [vmem:[%s2328_s0 + $0x160] sm:$0x11] }
  0x24   :  { %889 = vmatmul.mubr.bf16.vlgmr.msra.gmra.mxu1 %v1648_v34  ;;  %1502 = vmatprep.subr.bf16.mxu0 %v1655_v40  ;;  %v1725_v34 = vld [vmem:[%s2328_s0 + $0xf0] ss:$28 sps:$4 sm:$0xff]   ;;  %v1729_v39 = vld [vmem:[%s2328_s0 + $0x128] ss:$28 sps:$4 sm:$0xff]  }
  0x25   :  { %1572 = vmatpush3.bf16.msra.mxu1 %v1656_v41  ;;  %896 = vmatprep.mubr.bf16.mxu1 %v1658_v43  ;;  %v1730_v40 = vld [vmem:[%s2328_s0 + $0x130] ss:$28 sps:$4 sm:$0xff]   ;;  %v1293_v41 = vcombine.high %v71_v38, %v71_v38  ;;  %v1733_v43 = vld [vmem:[%s2328_s0 + $0x168] ss:$0 sps:$4 sm:$0x11]  }
  0x26   :  { %1573 = vmatprep.subr.bf16.mxu1 %v1734_v36 }
  0x27   :  { %1503 = vmatpush3.bf16.msra.mxu0 %v1660_v44 }
  0x28   :  { %1504 = vmatprep.subr.bf16.mxu0 %v1662_v46 }
  0x29   :  { %1574 = vmatpush3.bf16.msra.mxu1 %v1670_v52 }
  0x2a   :  { %809 = vmatmul.mubr.bf16.gmra.mxu0 %v1657_v42  ;;  %1575 = vmatprep.subr.bf16.mxu1 %v1734_v36  ;;  %v1292_v42 = vcombine.low %v71_v38, %v71_v38 }
  0x2b   :  { %816 = vmatprep.mubr.bf16.mxu0 %v1663_v47  ;;  %1505 = vmatpush3.bf16.msra.mxu0 %v1665_v48 }
  0x2c   :  { %897 = vmatmul.mubr.bf16.gmra.mxu1 %v1661_v45  ;;  %1506 = vmatprep.subr.bf16.mxu0 %v1671_v53 }
  0x2d   :  { %904 = vmatprep.mubr.bf16.mxu1 %v1667_v50  ;;  %1576 = vmatpush3.bf16.msra.mxu1 %v1679_v57 }
  0x2e   :  { %1577 = vmatprep.subr.bf16.mxu1 %v1734_v36 }
  0x2f   :  { %1507 = vmatpush3.bf16.msra.mxu0 %v1672_v54 }
  0x30   :  { %1508 = vmatprep.subr.bf16.mxu0 %v1680_v58 }
  0x31   :  { %1578 = vmatpush3.bf16.msra.mxu1 %v1689_v1 }
  0x32   :  { %817 = vmatmul.mubr.bf16.gmra.mxu0 %v1666_v49  ;;  %1579 = vmatprep.subr.bf16.mxu1 %v1734_v36 }
  0x33   :  { %824 = vmatprep.mubr.bf16.mxu0 %v1673_v55  ;;  %1509 = vmatpush3.bf16.msra.mxu0 %v1681_v59 }
  0x34   :  { %905 = vmatmul.mubr.bf16.gmra.mxu1 %v1669_v51  ;;  %1510 = vmatprep.subr.bf16.mxu0 %v1688_v0 }
  0x35   :  { %912 = vmatprep.mubr.bf16.mxu1 %v1676_v56  ;;  %1580 = vmatpush3.bf16.msra.mxu1 %v1699_v9 }
  0x36   :  { %1581 = vmatprep.subr.bf16.mxu1 %v1734_v36 }
  0x37   :  { %1511 = vmatpush3.bf16.msra.mxu0 %v1690_v2 }
  0x38   :  { %1512 = vmatprep.subr.bf16.mxu0 %v1697_v7 }
  0x39   :  { %1582 = vmatpush3.bf16.msra.mxu1 %v1706_v13 }
  0x3a   :  { %825 = vmatmul.mubr.bf16.gmra.mxu0 %v1675_v60 }
  0x3b   :  { %832 = vmatprep.mubr.bf16.mxu0 %v1682_v62  ;;  %1513 = vmatpush3.bf16.msra.mxu0 %v1698_v8 }
  0x3c   :  { %913 = vmatmul.mubr.bf16.gmra.mxu1 %v1678_v61  ;;  %1514 = vmatprep.subr.bf16.mxu0 %v1704_v11 }
  0x3d   :  { %920 = vmatprep.mubr.bf16.mxu1 %v1685_v63 }
  0x3f   :  { %1515 = vmatpush3.bf16.msra.mxu0 %v1705_v12 }
  0x42   :  { %833 = vmatmul.mubr.bf16.gmra.mxu0 %v1684_v3 }
  0x43   :  { %840 = vmatprep.mubr.bf16.mxu0 %v1691_v5 }
  0x44   :  { %921 = vmatmul.mubr.bf16.gmra.mxu1 %v1687_v4 }
  0x45   :  { %928 = vmatprep.mubr.bf16.mxu1 %v1694_v6 }
  0x4a   :  { %841 = vmatmul.mubr.bf16.gmra.mxu0 %v1693_v15 }
  0x4b   :  { %848 = vmatprep.mubr.bf16.mxu0 %v1289_v17 }
  0x4c   :  { %929 = vmatmul.mubr.bf16.gmra.mxu1 %v1696_v16 }
  0x4d   :  { %936 = vmatprep.mubr.bf16.mxu1 %v1291_v18 }
  0x52   :  { %849 = vmatmul.mubr.bf16.gmra.mxu0 %v1288_v19 }
  0x53   :  { %976 = vmatprep.mubr.bf16.mxu0 %v1709_v21 }
  0x54   :  { %937 = vmatmul.mubr.bf16.gmra.mxu1 %v1290_v20 }
  0x55   :  { %1583 = vmatprep.mubr.msk.bf16.mxu1 %vm1735_vm0, %v1734_v36 }
  0x5a   :  { %977 = vmatmul.mubr.bf16.vlgmr.msra.gmra.mxu0 %v1707_v22 }
  0x5b   :  { %984 = vmatprep.mubr.bf16.mxu0 %v1711_v24 }
  0x5c   :  { %1584 = vmatmul.mubr.msk.bf16.vlgmr.msra.gmra.mxu1 %vm746_vm1, %v1710_v23 }
  0x5d   :  { %1587 = vmatprep.mubr.msk.bf16.mxu1 %vm1735_vm0, %v1734_v36 }
  0x62   :  { %985 = vmatmul.mubr.bf16.gmra.mxu0 %v1713_v25 }
  0x63   :  { %992 = vmatprep.mubr.bf16.mxu0 %v1715_v27 }
  0x64   :  { %1588 = vmatmul.mubr.msk.bf16.gmra.mxu1 %vm746_vm1, %v1714_v26 }
  0x65   :  { %1591 = vmatprep.mubr.msk.bf16.mxu1 %vm1735_vm0, %v1734_v36 }
  0x6a   :  { %993 = vmatmul.mubr.bf16.gmra.mxu0 %v1717_v28 }
  0x6b   :  { %1000 = vmatprep.mubr.bf16.mxu0 %v1719_v30 }
  0x6c   :  { %1592 = vmatmul.mubr.msk.bf16.gmra.mxu1 %vm746_vm1, %v1718_v29 }
  0x6d   :  { %1595 = vmatprep.mubr.msk.bf16.mxu1 %vm1735_vm0, %v1734_v36 }
  0x72   :  { %1001 = vmatmul.mubr.bf16.gmra.mxu0 %v1721_v31 }
  0x73   :  { %1008 = vmatprep.mubr.bf16.mxu0 %v1723_v33 }
  0x74   :  { %1596 = vmatmul.mubr.msk.bf16.gmra.mxu1 %vm746_vm1, %v1722_v32  ;;  %v2182_v32 = vld [vmem:[%s2329_s2] ss:$0 sm:$0xff] }
  0x75   :  { %1599 = vmatprep.mubr.msk.bf16.mxu1 %vm1735_vm0, %v1734_v36 }
  0x7a   :  { %1009 = vmatmul.mubr.bf16.gmra.mxu0 %v1725_v34 }
  0x7b   :  { %1016 = vmatprep.mubr.bf16.mxu0 %v1727_v37 }
  0x7c   :  { %1600 = vmatmul.mubr.msk.bf16.gmra.mxu1 %vm746_vm1, %v1726_v35 }
  0x7d   :  { %1603 = vmatprep.mubr.msk.bf16.mxu1 %vm1735_vm0, %v1734_v36 }
  0x82   :  { %1017 = vmatmul.mubr.bf16.gmra.mxu0 %v1729_v39 }
  0x83   :  { %1024 = vmatprep.mubr.bf16.mxu0 %v1293_v41 }
  0x84   :  { %1604 = vmatmul.mubr.msk.bf16.gmra.mxu1 %vm746_vm1, %v1730_v40 }
  0x85   :  { %1607 = vmatprep.mubr.msk.bf16.mxu1 %vm1735_vm0, %v1734_v36 }
  0x8a   :  { %1025 = vmatmul.mubr.bf16.gmra.mxu0 %v1292_v42 }
  0x8c   :  { %1608 = vmatmul.mubr.msk.bf16.gmra.mxu1 %vm746_vm1, %v1733_v43 }
  0xe2   :  { %v1400_v44 = vpop.f32.mrf.mxu0 }
  0xe4   :  { %v1458_v45 = vpop.f32.mrf.mxu1  ;;  %v1401_v46 = vpop.f32.mrf.mxu0 }
  0xe5   :  { %v1402_v30 = vadd.f32 %v1401_v46, %v1400_v44 }
  0xe6   :  { %v1459_v47 = vpop.f32.mrf.mxu1  ;;  %v1403_v48 = vpop.f32.mrf.mxu0 }
  0xe7   :  { %v803_v38 = vadd.f32 %v1402_v30, %v2182_v32  ;;  %v1460_v39 = vadd.f32 %v1459_v47, %v1458_v45 }
  0xe8   :  { %v2093_v49 = vpop.f32.mrf.mxu1  ;;  %v1404_v50 = vpop.f32.mrf.mxu0 }
  0xe9   :  { %v1405_v35 = vadd.f32 %v1404_v50, %v1403_v48  ;;  %v891_v46 = vadd.f32 %v1460_v39, %v803_v38 }
  0xea   :  { %v2095_v51 = vpop.f32.mrf.mxu1  ;;  %v1406_v52 = vpop.f32.mrf.mxu0 }
  0xeb   :  { %v806_v43 = vadd.f32 %v1405_v35, %v2182_v32 }
  0xec   :  { %v2097_v36 = vpop.f32.mrf.mxu1  ;;  %v1407_v53 = vpop.f32.mrf.mxu0 }
  0xee   :  { %v2099_v54 = vpop.f32.mrf.mxu1  ;;  %v2101_v55 = vpop.f32.mrf.mxu0 }
  0xef   :  { %v1466_v35 = vadd.f32 %v2099_v54, %v2097_v36  ;;  %v2203_v36 = vld [vmem:[%s2331_s4] ss:$0 sm:$0xff] }
  0xf0   :  { %v2103_v56 = vpop.f32.mrf.mxu1  ;;  %v1410_v57 = vpop.f32.mrf.mxu0 }
  0xf1   :  { %v1411_v30 = vadd.f32 %v1410_v57, %v2101_v55 }
  0xf2   :  { %v2105_v58 = vpop.f32.mrf.mxu1  ;;  %v2107_v59 = vpop.f32.mrf.mxu0 }
  0xf3   :  { %v814_v55 = vadd.f32 %v1411_v30, %v2182_v32 }
  0xf4   :  { %v2109_v60 = vpop.f32.mrf.mxu1  ;;  %v2111_v61 = vpop.f32.mrf.mxu0 }
  0xf5   :  { %v1414_v57 = vadd.f32 %v2111_v61, %v2107_v59 }
  0xf6   :  { %v2113_v62 = vpop.f32.mrf.mxu1  ;;  %v2115_v63 = vpop.f32.mrf.mxu0 }
  0xf8   :  { %v2117_v0 = vpop.f32.mrf.mxu1  ;;  %v2119_v1 = vpop.f32.mrf.mxu0 }
  0xfa   :  { %v2121_v2 = vpop.f32.mrf.mxu1  ;;  %v2123_v3 = vpop.f32.mrf.mxu0 }
  0xfc   :  { %v2125_v4 = vpop.f32.mrf.mxu1  ;;  %v2127_v5 = vpop.f32.mrf.mxu0 }
  0xfe   :  { %v2129_v6 = vpop.f32.mrf.mxu1  ;;  %v2131_v7 = vpop.f32.mrf.mxu0 }
 0x100   :  { %v2133_v8 = vpop.f32.mrf.mxu1  ;;  %v2135_v9 = vpop.f32.mrf.mxu0 }
 0x102   :  { %v2137_v10 = vpop.f32.mrf.mxu1  ;;  %v2139_v11 = vpop.f32.mrf.mxu0 }
 0x104   :  { %v2141_v12 = vpop.f32.mrf.mxu1  ;;  %v2143_v13 = vpop.f32.mrf.mxu0 }
 0x106   :  { %v2145_v14 = vpop.f32.mrf.mxu1  ;;  %v2147_v15 = vpop.f32.mrf.mxu0 }
 0x108   :  { %v2149_v16 = vpop.f32.mrf.mxu1  ;;  %v2151_v17 = vpop.f32.mrf.mxu0 }
 0x10a   :  { %v2153_v18 = vpop.f32.mrf.mxu1  ;;  %v2155_v19 = vpop.f32.mrf.mxu0 }
 0x10c   :  { %v2157_v20 = vpop.f32.mrf.mxu1  ;;  %v2159_v21 = vpop.f32.mrf.mxu0 }
 0x10e   :  { %v2161_v22 = vpop.f32.mrf.mxu1  ;;  %v2163_v23 = vpop.f32.mrf.mxu0 }
 0x110   :  { %v2165_v24 = vpop.f32.mrf.mxu1  ;;  %v2167_v25 = vpop.f32.mrf.mxu0 }
 0x111   :  { %2333 = vst [vmem:[#allocation2_spill] sm:$0xff] %v2165_v24  ;;  %v1463_v24 = vadd.f32 %v2095_v51, %v2093_v49 }
 0x112   :  { %v2169_v26 = vpop.f32.mrf.mxu1  ;;  %v2171_v27 = vpop.f32.mrf.mxu0 }
 0x113   :  { %2334 = vst [vmem:[#allocation3_spill] sm:$0xff] %v2169_v26  ;;  %v894_v50 = vadd.f32 %v1463_v24, %v806_v43 }
 0x114   :  { %v2173_v28 = vpop.f32.mrf.mxu1  ;;  %v2175_v29 = vpop.f32.mrf.mxu0 }
 0x115   :  { %2335 = vst [vmem:[#allocation4_spill] sm:$0xff] %v2173_v28 }
 0x116   :  { %v2177_v31 = vpop.f32.mrf.mxu1  ;;  %v1439_v33 = vpop.f32.mrf.mxu0 }
 0x117   :  { %2336 = vst [vmem:[#allocation5_spill] sm:$0xff] %v2177_v31  ;;  %v1408_v31 = vadd.f32 %v1407_v53, %v1406_v52  ;;  %v2195_v53 = vld [vmem:[%s2330_s3] ss:$0 sm:$0xff] }
 0x118   :  { %v1497_v34 = vpop.f32.mrf.mxu1  ;;  %v1440_v37 = vpop.f32.mrf.mxu0 }
 0x119   :  { %v811_v47 = vadd.f32 %v1408_v31, %v2182_v32 }
 0x11a   :  { %v1498_v40 = vpop.f32.mrf.mxu1  ;;  %v1516_v41 = vpop.f32.mrf.mxu0 }
 0x11c   :  { %v1066_v42 = vpop.f32.mrf.mxu1  ;;  %v1517_v44 = vpop.f32.mrf.mxu0 }
 0x11d   :  { %v1518_v28 = vadd.f32 %v1517_v44, %v1516_v41 }
 0x11e   :  { %v1585_v26 = vpop.f32.mrf.mxu1  ;;  %v1519_v33 = vpop.f32.mrf.mxu0 }
 0x11f   :  { %v979_v34 = vadd.f32 %v1518_v28, %v891_v46  ;;  %v899_v28 = vadd.f32 %v1466_v35, %v811_v47 }
 0x120   :  { %v1069_v48 = vpop.f32.mrf.mxu1  ;;  %v1520_v45 = vpop.f32.mrf.mxu0 }
 0x121   :  { %v1067_v37 = vadd.f32 %v1066_v42, %v979_v34  ;;  %v1521_v38 = vadd.f32 %v1520_v45, %v1519_v33  ;;  %v1469_v42 = vadd.f32 %v2105_v58, %v2103_v56  ;;  %v819_v34 = vadd.f32 %v1414_v57, %v2182_v32 }
 0x122   :  { %v1586_v52 = vpop.f32.mrf.mxu1  ;;  %v1522_v49 = vpop.f32.mrf.mxu0 }
 0x123   :  { %v1120_v51 = vmax.f32 %v1067_v37, 0.0  ;;  %v982_v26 = vadd.f32 %v1521_v38, %v894_v50  ;;  %v902_v33 = vadd.f32 %v1469_v42, %v814_v55  ;;  %v1472_v50 = vadd.f32 %v2113_v62, %v2109_v60 }
 0x124   :  { %v1074_v24 = vpop.f32.mrf.mxu1  ;;  %v1523_v54 = vpop.f32.mrf.mxu0 }
 0x125   :  { %v1140_v31 = vmul.f32 %v2195_v53, %v1120_v51  ;;  %v1070_v39 = vadd.f32 %v1069_v48, %v982_v26  ;;  %v1524_v40 = vadd.f32 %v1523_v54, %v1522_v49  ;;  %v1417_v48 = vadd.f32 %v2119_v1, %v2115_v63 }
 0x126   :  { %v1589_v41 = vpop.f32.mrf.mxu1  ;;  %v1525_v43 = vpop.f32.mrf.mxu0  ;;  %v907_v49 = vadd.f32 %v1472_v50, %v819_v34  ;;  %v1420_v1 = vadd.f32 %v2127_v5, %v2123_v3 }
 0x127   :  { %v1160_v44 = vadd.f32 %v2203_v36, %v1140_v31  ;;  %v1121_v59 = vmax.f32 %v1070_v39, 0.0  ;;  %v987_v61 = vadd.f32 %v1524_v40, %v899_v28  ;;  %v822_v63 = vadd.f32 %v1417_v48, %v2182_v32 }
 0x128   :  { %v1077_v46 = vpop.f32.mrf.mxu1  ;;  %v1526_v30 = vpop.f32.mrf.mxu0  ;;  %v1475_v28 = vadd.f32 %v2121_v2, %v2117_v0  ;;  %v827_v42 = vadd.f32 %v1420_v1, %v2182_v32  ;;  %v1423_v0 = vadd.f32 %v2135_v9, %v2131_v7  ;;  %v1426_v9 = vadd.f32 %v2143_v13, %v2139_v11 }
 0x129   :  { %v1371_v45 = vpack.c.bf16 %v1160_v44, %v1160_v44  ;;  %v1141_v56 = vmul.f32 %v2195_v53, %v1121_v59  ;;  %v1075_v58 = vadd.f32 %v1074_v24, %v987_v61  ;;  %v1527_v47 = vadd.f32 %v1526_v30, %v1525_v43 }
 0x12a   :  { %v1590_v35 = vpop.f32.mrf.mxu1  ;;  %v1528_v37 = vpop.f32.mrf.mxu0  ;;  %v910_v41 = vadd.f32 %v1475_v28, %v822_v63  ;;  %v1478_v43 = vadd.f32 %v2129_v6, %v2125_v4  ;;  %v830_v7 = vadd.f32 %v1423_v0, %v2182_v32  ;;  %v835_v63 = vadd.f32 %v1426_v9, %v2182_v32 }
 0x12b   :  { %1227 = vst.msk [vmem:[%s2332_s5] sm:$0xf] %vm1226_vm2, %v1371_v45  ;;  %v1161_v38 = vadd.f32 %v2203_v36, %v1141_v56  ;;  %v1122_v52 = vmax.f32 %v1075_v58, 0.0  ;;  %v990_v60 = vadd.f32 %v1527_v47, %v902_v33  ;;  %v1484_v1 = vadd.f32 %v2145_v14, %v2141_v12 }
 0x12c   :  { %v1082_v62 = vpop.f32.mrf.mxu1  ;;  %v1529_v51 = vpop.f32.mrf.mxu0  ;;  %v915_v30 = vadd.f32 %v1478_v43, %v827_v42  ;;  %v1487_v0 = vadd.f32 %v2153_v18, %v2149_v16  ;;  %v1435_v16 = vadd.f32 %v2167_v25, %v2163_v23  ;;  %v1438_v25 = vadd.f32 %v2175_v29, %v2171_v27 }
 0x12d   :  { %v1372_v26 = vpack.c.bf16 %v1161_v38, %v1161_v38  ;;  %v1142_v24 = vmul.f32 %v2195_v53, %v1122_v52  ;;  %v1078_v55 = vadd.f32 %v1077_v46, %v990_v60  ;;  %v1530_v57 = vadd.f32 %v1529_v51, %v1528_v37 }
 0x12e   :  { %v1593_v54 = vpop.f32.mrf.mxu1  ;;  %v1531_v31 = vpop.f32.mrf.mxu0  ;;  %v1481_v38 = vadd.f32 %v2137_v10, %v2133_v8  ;;  %v1429_v8 = vadd.f32 %v2151_v17, %v2147_v15  ;;  %v1432_v17 = vadd.f32 %v2159_v21, %v2155_v19  ;;  %v846_v23 = vadd.f32 %v1435_v16, %v2182_v32 }
 0x12f   :  { %1228 = vst.msk [vmem:[%s2332_s5 + $0x4] sm:$0xf] %vm1226_vm2, %v1372_v26  ;;  %v1162_v39 = vadd.f32 %v2203_v36, %v1142_v24  ;;  %v1123_v40 = vmax.f32 %v1078_v55, 0.0  ;;  %v995_v3 = vadd.f32 %v1530_v57, %v907_v49 }
 0x130   :  { %v1085_v5 = vpop.f32.mrf.mxu1  ;;  %v1532_v2 = vpop.f32.mrf.mxu0  ;;  %v918_v49 = vadd.f32 %v1481_v38, %v830_v7  ;;  %v838_v15 = vadd.f32 %v1429_v8, %v2182_v32  ;;  %v2339_v8 = vld [vmem:[#allocation4_spill] sm:$0xff] }
 0x131   :  { %v1373_v44 = vpack.c.bf16 %v1162_v39, %v1162_v39  ;;  %v1143_v59 = vmul.f32 %v2195_v53, %v1123_v40  ;;  %v1083_v61 = vadd.f32 %v1082_v62, %v995_v3  ;;  %v1533_v46 = vadd.f32 %v1532_v2, %v1531_v31 }
 0x132   :  { %v1594_v33 = vpop.f32.mrf.mxu1  ;;  %v1534_v34 = vpop.f32.mrf.mxu0  ;;  %v923_v39 = vadd.f32 %v1484_v1, %v835_v63  ;;  %v851_v1 = vadd.f32 %v1438_v25, %v2182_v32 }
 0x133   :  { %1229 = vst.msk [vmem:[%s2332_s5 + $0x8] sm:$0xf] %vm1226_vm2, %v1373_v44  ;;  %v1163_v50 = vadd.f32 %v2203_v36, %v1143_v59  ;;  %v1124_v48 = vmax.f32 %v1083_v61, 0.0  ;;  %v998_v4 = vadd.f32 %v1533_v46, %v910_v41  ;;  %v926_v61 = vadd.f32 %v1487_v0, %v838_v15 }
 0x134   :  { %v1090_v6 = vpop.f32.mrf.mxu1  ;;  %v1535_v45 = vpop.f32.mrf.mxu0  ;;  %v843_v46 = vadd.f32 %v1432_v17, %v2182_v32  ;;  %v1490_v33 = vadd.f32 %v2161_v22, %v2157_v20 }
 0x135   :  { %v1374_v56 = vpack.c.bf16 %v1163_v50, %v1163_v50  ;;  %v1144_v58 = vmul.f32 %v2195_v53, %v1124_v48  ;;  %v1086_v47 = vadd.f32 %v1085_v5, %v998_v4  ;;  %v1536_v35 = vadd.f32 %v1535_v45, %v1534_v34 }
 0x136   :  { %v1597_v37 = vpop.f32.mrf.mxu1  ;;  %v1537_v52 = vpop.f32.mrf.mxu0  ;;  %v931_v45 = vadd.f32 %v1490_v33, %v843_v46 }
 0x137   :  { %1230 = vst.msk [vmem:[%s2332_s5 + $0xc] sm:$0xf] %vm1226_vm2, %v1374_v56  ;;  %v1164_v60 = vadd.f32 %v2203_v36, %v1144_v58  ;;  %v1125_v62 = vmax.f32 %v1086_v47, 0.0  ;;  %v1003_v11 = vadd.f32 %v1536_v35, %v915_v30 }
 0x138   :  { %v1093_v13 = vpop.f32.mrf.mxu1  ;;  %v1538_v10 = vpop.f32.mrf.mxu0 }
 0x139   :  { %v1375_v51 = vpack.c.bf16 %v1164_v60, %v1164_v60  ;;  %v1145_v26 = vmul.f32 %v2195_v53, %v1125_v62  ;;  %v1091_v24 = vadd.f32 %v1090_v6, %v1003_v11  ;;  %v1539_v55 = vadd.f32 %v1538_v10, %v1537_v52  ;;  %v2337_v52 = vld [vmem:[#allocation2_spill] sm:$0xff]  ;;  %v2338_v60 = vld [vmem:[#allocation3_spill] sm:$0xff]  ;;  %v2340_v10 = vld [vmem:[#allocation5_spill] sm:$0xff] }
 0x13a   :  { %v1598_v57 = vpop.f32.mrf.mxu1  ;;  %v1540_v54 = vpop.f32.mrf.mxu0  ;;  %v1493_v62 = vadd.f32 %v2338_v60, %v2337_v52 }
 0x13b   :  { %1231 = vst.msk [vmem:[%s2332_s5 + $0x10] sm:$0xf] %vm1226_vm2, %v1375_v51  ;;  %v1165_v28 = vadd.f32 %v2203_v36, %v1145_v26  ;;  %v1126_v31 = vmax.f32 %v1091_v24, 0.0  ;;  %v1006_v12 = vadd.f32 %v1539_v55, %v918_v49  ;;  %v1496_v51 = vadd.f32 %v2340_v10, %v2339_v8 }
 0x13c   :  { %v1098_v14 = vpop.f32.mrf.mxu1  ;;  %v1541_v40 = vpop.f32.mrf.mxu0  ;;  %v934_v63 = vadd.f32 %v1493_v62, %v846_v23 }
 0x13d   :  { %v1376_v3 = vpack.c.bf16 %v1165_v28, %v1165_v28  ;;  %v1146_v5 = vmul.f32 %v2195_v53, %v1126_v31  ;;  %v1094_v41 = vadd.f32 %v1093_v13, %v1006_v12  ;;  %v1542_v42 = vadd.f32 %v1541_v40, %v1540_v54 }
 0x13e   :  { %v1601_v43 = vpop.f32.mrf.mxu1  ;;  %v1543_v2 = vpop.f32.mrf.mxu0  ;;  %v939_v15 = vadd.f32 %v1496_v51, %v851_v1 }
 0x13f   :  { %1232 = vst.msk [vmem:[%s2332_s5 + $0x14] sm:$0xf] %vm1226_vm2, %v1376_v3  ;;  %v1166_v44 = vadd.f32 %v2203_v36, %v1146_v5  ;;  %v1127_v59 = vmax.f32 %v1094_v41, 0.0  ;;  %v1011_v19 = vadd.f32 %v1542_v42, %v923_v39 }
 0x140   :  { %v1101_v21 = vpop.f32.mrf.mxu1  ;;  %v1544_v18 = vpop.f32.mrf.mxu0 }
 0x141   :  { %v1377_v34 = vpack.c.bf16 %v1166_v44, %v1166_v44  ;;  %v1147_v50 = vmul.f32 %v2195_v53, %v1127_v59  ;;  %v1099_v48 = vadd.f32 %v1098_v14, %v1011_v19  ;;  %v1545_v4 = vadd.f32 %v1544_v18, %v1543_v2 }
 0x142   :  { %v1602_v6 = vpop.f32.mrf.mxu1  ;;  %v1546_v30 = vpop.f32.mrf.mxu0 }
 0x143   :  { %1233 = vst.msk [vmem:[%s2332_s5 + $0x18] sm:$0xf] %vm1226_vm2, %v1377_v34  ;;  %v1167_v7 = vadd.f32 %v2203_v36, %v1147_v50  ;;  %v1128_v9 = vmax.f32 %v1099_v48, 0.0  ;;  %v1014_v20 = vadd.f32 %v1545_v4, %v926_v61 }
 0x144   :  { %v1106_v22 = vpop.f32.mrf.mxu1  ;;  %v1547_v56 = vpop.f32.mrf.mxu0 }
 0x145   :  { %v1378_v58 = vpack.c.bf16 %v1167_v7, %v1167_v7  ;;  %v1148_v47 = vmul.f32 %v2195_v53, %v1128_v9  ;;  %v1102_v35 = vadd.f32 %v1101_v21, %v1014_v20  ;;  %v1548_v37 = vadd.f32 %v1547_v56, %v1546_v30 }
 0x146   :  { %v1605_v38 = vpop.f32.mrf.mxu1  ;;  %v1549_v11 = vpop.f32.mrf.mxu0 }
 0x147   :  { %1234 = vst.msk [vmem:[%s2332_s5 + $0x1c] sm:$0xf] %vm1226_vm2, %v1378_v58  ;;  %v1168_v13 = vadd.f32 %v2203_v36, %v1148_v47  ;;  %v1129_v49 = vmax.f32 %v1102_v35, 0.0  ;;  %v1019_v27 = vadd.f32 %v1548_v37, %v931_v45 }
 0x148   :  { %v1109_v29 = vpop.f32.mrf.mxu1  ;;  %v1550_v26 = vpop.f32.mrf.mxu0 }
 0x149   :  { %v1379_v24 = vpack.c.bf16 %v1168_v13, %v1168_v13  ;;  %v1149_v55 = vmul.f32 %v2195_v53, %v1129_v49  ;;  %v1107_v57 = vadd.f32 %v1106_v22, %v1019_v27  ;;  %v1551_v54 = vadd.f32 %v1550_v26, %v1549_v11 }
 0x14a   :  { %v1606_v28 = vpop.f32.mrf.mxu1  ;;  %v1552_v31 = vpop.f32.mrf.mxu0 }
 0x14b   :  { %1235 = vst.msk [vmem:[%s2332_s5 + $0x20] sm:$0xf] %vm1226_vm2, %v1379_v24  ;;  %v1169_v12 = vadd.f32 %v2203_v36, %v1149_v55  ;;  %v1130_v14 = vmax.f32 %v1107_v57, 0.0  ;;  %v1022_v32 = vadd.f32 %v1551_v54, %v934_v63 }
 0x14c   :  { %v1114_v39 = vpop.f32.mrf.mxu1  ;;  %v1553_v17 = vpop.f32.mrf.mxu0 }
 0x14d   :  { %v1380_v40 = vpack.c.bf16 %v1169_v12, %v1169_v12  ;;  %v1150_v3 = vmul.f32 %v2195_v53, %v1130_v14  ;;  %v1110_v5 = vadd.f32 %v1109_v29, %v1022_v32  ;;  %v1554_v41 = vadd.f32 %v1553_v17, %v1552_v31 }
 0x14e   :  { %v1609_v42 = vpop.f32.mrf.mxu1  ;;  %v1555_v43 = vpop.f32.mrf.mxu0 }
 0x14f   :  { %1236 = vst.msk [vmem:[%s2332_s5 + $0x24] sm:$0xf] %vm1226_vm2, %v1380_v40  ;;  %v1170_v0 = vadd.f32 %v2203_v36, %v1150_v3  ;;  %v1131_v2 = vmax.f32 %v1110_v5, 0.0  ;;  %v1027_v44 = vadd.f32 %v1554_v41, %v939_v15 }
 0x150   :  { %v1117_v59 = vpop.f32.mrf.mxu1  ;;  %v1556_v19 = vpop.f32.mrf.mxu0 }
 0x151   :  { %v1381_v21 = vpack.c.bf16 %v1170_v0, %v1170_v0  ;;  %v1151_v61 = vmul.f32 %v2195_v53, %v1131_v2  ;;  %v1115_v46 = vadd.f32 %v1114_v39, %v1027_v44 }
 0x152   :  { %v1610_v33 = vpop.f32.mrf.mxu1 }
 0x153   :  { %1237 = vst.msk [vmem:[%s2332_s5 + $0x28] sm:$0xf] %vm1226_vm2, %v1381_v21  ;;  %v1171_v16 = vadd.f32 %v2203_v36, %v1151_v61  ;;  %v1132_v18 = vmax.f32 %v1115_v46, 0.0 }
 0x155   :  { %v1382_v34 = vpack.c.bf16 %v1171_v16, %v1171_v16  ;;  %v1152_v50 = vmul.f32 %v2195_v53, %v1132_v18 }
 0x157   :  { %1238 = vst.msk [vmem:[%s2332_s5 + $0x2c] sm:$0xf] %vm1226_vm2, %v1382_v34  ;;  %v1172_v48 = vadd.f32 %v2203_v36, %v1152_v50 }
 0x159   :  { %v1383_v4 = vpack.c.bf16 %v1172_v48, %v1172_v48 }
 0x15b   :  { %1240 = vst.msk [vmem:[%s2332_s5 + $0x30] sm:$0x1] %vm1239_vm3, %v1383_v4 }

// kernel: half_alexnet_forward.10
= control target key start
LH: loop header
LB: loop body
LE: loop exit
PB: predicated region body
PF: predicated region fallthrough
CT: control target
= control target key end

     0   :  { %v1734_v36 = vmov 0.0   ;;  %vm1735_vm0 = vmmov 0   ;;  %vm746_vm1 = vcmask 785408   ;;  %vm1226_vm2 = vcmask 519168   ;;  %s2327_s1 = inlined_call_operand.vmem [shape: bf16[864,64], index: 1, kind: input, shape index: {}]   ;;  %s2328_s0 = inlined_call_operand.vmem [shape: bf16[98,864], index: 0, kind: input, shape index: {}]   ;;  %s2329_s2 = inlined_call_operand.vmem [shape: f32[1,64], index: 2, kind: input, shape index: {}]   ;;  %s2330_s3 = inlined_call_operand.vmem [shape: f32[1,64], index: 3, kind: input, shape index: {}]   ;;  %s2331_s4 = inlined_call_operand.vmem [shape: f32[1,64], index: 4, kind: input, shape index: {}]   ;;  %s2332_s5 = inlined_call_operand.vmem [shape: bf16[98,64], index: 5, kind: output, shape index: {}]  }
   0x1   :  { %v1613_v0 = vld [vmem:[%s2327_s1 + $0x78] sm:$0xff]   ;;  %v1617_v4 = vld [vmem:[%s2327_s1 + $0x70] sm:$0xff]   ;;  %v1621_v8 = vld [vmem:[%s2327_s1 + $0x68] sm:$0xff]   ;;  %vm1239_vm3 = vcmask 516096  }
   0x2   :  { %v1614_v1 = vld [vmem:[%s2327_s1 + $0x38] sm:$0xff]   ;;  %1384 = vmatprep.subr.bf16.mxu0 %v1613_v0  ;;  %v1618_v5 = vld [vmem:[%s2327_s1 + $0x30] sm:$0xff]   ;;  %v1622_v9 = vld [vmem:[%s2327_s1 + $0x28] sm:$0xff]  }
   0x3   :  { %v1615_v2 = vld [vmem:[%s2327_s1 + $0xf8] sm:$0xff]   ;;  %1385 = vmatpush3.bf16.msra.mxu0 %v1614_v1  ;;  %v1619_v6 = vld [vmem:[%s2327_s1 + $0xf0] sm:$0xff]   ;;  %v1623_v10 = vld [vmem:[%s2327_s1 + $0xe8] sm:$0xff]  }
   0x4   :  { %v1616_v3 = vld [vmem:[%s2327_s1 + $0xb8] sm:$0xff]   ;;  %1442 = vmatprep.subr.bf16.mxu1 %v1615_v2  ;;  %1386 = vmatprep.subr.bf16.mxu0 %v1617_v4  ;;  %v1620_v7 = vld [vmem:[%s2327_s1 + $0xb0] sm:$0xff]   ;;  %v1624_v11 = vld [vmem:[%s2327_s1 + $0xa8] sm:$0xff]  }
   0x5   :  { %1443 = vmatpush3.bf16.msra.mxu1 %v1616_v3  ;;  %v1625_v12 = vld [vmem:[%s2327_s1 + $0x60] sm:$0xff]   ;;  %v1629_v16 = vld [vmem:[%s2327_s1 + $0x58] sm:$0xff]   ;;  %v1633_v20 = vld [vmem:[%s2327_s1 + $0x50] sm:$0xff]  }
   0x6   :  { %1444 = vmatprep.subr.bf16.mxu1 %v1619_v6  ;;  %v1626_v13 = vld [vmem:[%s2327_s1 + $0x20] sm:$0xff]   ;;  %v1630_v17 = vld [vmem:[%s2327_s1 + $0x18] sm:$0xff]   ;;  %v1634_v21 = vld [vmem:[%s2327_s1 + $0x10] sm:$0xff]  }
   0x7   :  { %1387 = vmatpush3.bf16.msra.mxu0 %v1618_v5  ;;  %v1627_v14 = vld [vmem:[%s2327_s1 + $0xe0] sm:$0xff]   ;;  %v1631_v18 = vld [vmem:[%s2327_s1 + $0xd8] sm:$0xff]   ;;  %v1635_v22 = vld [vmem:[%s2327_s1 + $0xd0] sm:$0xff]  }
   0x8   :  { %1388 = vmatprep.subr.bf16.mxu0 %v1621_v8  ;;  %v1628_v15 = vld [vmem:[%s2327_s1 + $0xa0] sm:$0xff]   ;;  %v1632_v19 = vld [vmem:[%s2327_s1 + $0x98] sm:$0xff]   ;;  %v1636_v23 = vld [vmem:[%s2327_s1 + $0x90] sm:$0xff]  }
   0x9   :  { %1445 = vmatpush3.bf16.msra.mxu1 %v1620_v7  ;;  %v1637_v24 = vld [vmem:[%s2327_s1 + $0x48] sm:$0xff]   ;;  %v1641_v28 = vld [vmem:[%s2327_s1 + $0x40] sm:$0xff]   ;;  %v1651_v37 = vld [vmem:[%s2327_s1 + $0x178] sm:$0xff]  }
   0xa   :  { %1446 = vmatprep.subr.bf16.mxu1 %v1623_v10  ;;  %v1638_v25 = vld [vmem:[%s2327_s1 + $0x8] sm:$0xff]   ;;  %v1642_v29 = vld [vmem:[%s2327_s1] sm:$0xff]   ;;  %v1652_v38 = vld [vmem:[%s2327_s1 + $0x138] sm:$0xff]  }
   0xb   :  { %1389 = vmatpush3.bf16.msra.mxu0 %v1622_v9  ;;  %v1639_v26 = vld [vmem:[%s2327_s1 + $0xc8] sm:$0xff]   ;;  %v1643_v30 = vld [vmem:[%s2327_s1 + $0xc0] sm:$0xff]   ;;  %v1653_v39 = vld [vmem:[%s2328_s0 + $0x3c] ss:$28 sps:$4 sm:$0xff]  }
   0xc   :  { %1390 = vmatprep.subr.bf16.mxu0 %v1625_v12  ;;  %v1640_v27 = vld [vmem:[%s2327_s1 + $0x88] sm:$0xff]   ;;  %v1644_v31 = vld [vmem:[%s2327_s1 + $0x80] sm:$0xff]   ;;  %v1655_v40 = vld [vmem:[%s2327_s1 + $0x170] sm:$0xff]  }
   0xd   :  { %1447 = vmatpush3.bf16.msra.mxu1 %v1624_v11  ;;  %v1645_v32 = vld [vmem:[%s2328_s0] ss:$28 sps:$4 sm:$0xff]   ;;  %v1648_v34 = vld [vmem:[%s2328_s0 + $0x8] ss:$28 sps:$4 sm:$0xff]   ;;  %v1657_v42 = vld [vmem:[%s2328_s0 + $0x38] ss:$28 sps:$4 sm:$0xff]  }
   0xe   :  { %1448 = vmatprep.subr.bf16.mxu1 %v1627_v14  ;;  %v1647_v33 = vld [vmem:[%s2328_s0 + $0x4] ss:$28 sps:$4 sm:$0xff]   ;;  %v1650_v35 = vld [vmem:[%s2328_s0 + $0xc] ss:$28 sps:$4 sm:$0xff]   ;;  %v1660_v44 = vld [vmem:[%s2327_s1 + $0x130] sm:$0xff]  }
   0xf   :  { %1391 = vmatpush3.bf16.msra.mxu0 %v1626_v13  ;;  %800 = vmatprep.mubr.bf16.mxu0 %v1647_v33  ;;  %v1656_v41 = vld [vmem:[%s2327_s1 + $0x1a8] sm:$0xff]   ;;  %v1658_v43 = vld [vmem:[%s2328_s0 + $0x44] ss:$28 sps:$4 sm:$0xff]   ;;  %v1663_v47 = vld [vmem:[%s2328_s0 + $0x74] ss:$28 sps:$4 sm:$0xff]  }
  0x10   :  { %1392 = vmatprep.subr.bf16.mxu0 %v1629_v16  ;;  %888 = vmatprep.mubr.bf16.mxu1 %v1650_v35  ;;  %v1661_v45 = vld [vmem:[%s2328_s0 + $0x40] ss:$28 sps:$4 sm:$0xff]   ;;  %v1662_v46 = vld [vmem:[%s2327_s1 + $0x168] sm:$0xff]   ;;  %v1669_v51 = vld [vmem:[%s2328_s0 + $0x78] ss:$28 sps:$4 sm:$0xff]  }
  0x11   :  { %1449 = vmatpush3.bf16.msra.mxu1 %v1628_v15  ;;  %v1665_v48 = vld [vmem:[%s2327_s1 + $0x128] sm:$0xff]   ;;  %v1667_v50 = vld [vmem:[%s2328_s0 + $0x7c] ss:$28 sps:$4 sm:$0xff]   ;;  %v1670_v52 = vld [vmem:[%s2327_s1 + $0x1a0] sm:$0xff]  }
  0x12   :  { %1450 = vmatprep.subr.bf16.mxu1 %v1631_v18  ;;  %v1666_v49 = vld [vmem:[%s2328_s0 + $0x70] ss:$28 sps:$4 sm:$0xff]   ;;  %v1671_v53 = vld [vmem:[%s2327_s1 + $0x160] sm:$0xff]   ;;  %v1679_v57 = vld [vmem:[%s2327_s1 + $0x198] sm:$0xff]  }
  0x13   :  { %1393 = vmatpush3.bf16.msra.mxu0 %v1630_v17  ;;  %v1672_v54 = vld [vmem:[%s2327_s1 + $0x120] sm:$0xff]   ;;  %v1673_v55 = vld [vmem:[%s2328_s0 + $0xac] ss:$28 sps:$4 sm:$0xff]   ;;  %v1676_v56 = vld [vmem:[%s2328_s0 + $0xb4] ss:$28 sps:$4 sm:$0xff]  }
  0x14   :  { %1394 = vmatprep.subr.bf16.mxu0 %v1633_v20  ;;  %v1680_v58 = vld [vmem:[%s2327_s1 + $0x158] sm:$0xff]   ;;  %v1675_v60 = vld [vmem:[%s2328_s0 + $0xa8] ss:$28 sps:$4 sm:$0xff]   ;;  %v1678_v61 = vld [vmem:[%s2328_s0 + $0xb0] ss:$28 sps:$4 sm:$0xff]  }
  0x15   :  { %1451 = vmatpush3.bf16.msra.mxu1 %v1632_v19  ;;  %v1681_v59 = vld [vmem:[%s2327_s1 + $0x118] sm:$0xff]   ;;  %v1682_v62 = vld [vmem:[%s2328_s0 + $0xe4] ss:$28 sps:$4 sm:$0xff]   ;;  %v1685_v63 = vld [vmem:[%s2328_s0 + $0xec] ss:$28 sps:$4 sm:$0xff]  }
  0x16   :  { %1452 = vmatprep.subr.bf16.mxu1 %v1635_v22  ;;  %v1688_v0 = vld [vmem:[%s2327_s1 + $0x150] sm:$0xff]   ;;  %v1684_v3 = vld [vmem:[%s2328_s0 + $0xe0] ss:$28 sps:$4 sm:$0xff]   ;;  %v1687_v4 = vld [vmem:[%s2328_s0 + $0xe8] ss:$28 sps:$4 sm:$0xff]  }
  0x17   :  { %1395 = vmatpush3.bf16.msra.mxu0 %v1634_v21  ;;  %v1689_v1 = vld [vmem:[%s2327_s1 + $0x190] sm:$0xff]   ;;  %v1691_v5 = vld [vmem:[%s2328_s0 + $0x11c] ss:$28 sps:$4 sm:$0xff]   ;;  %v1694_v6 = vld [vmem:[%s2328_s0 + $0x124] ss:$28 sps:$4 sm:$0xff]  }
  0x18   :  { %1396 = vmatprep.subr.bf16.mxu0 %v1637_v24  ;;  %v1690_v2 = vld [vmem:[%s2327_s1 + $0x110] sm:$0xff]   ;;  %v1697_v7 = vld [vmem:[%s2327_s1 + $0x148] sm:$0xff]   ;;  %v1704_v11 = vld [vmem:[%s2327_s1 + $0x140] sm:$0xff]  }
  0x19   :  { %1453 = vmatpush3.bf16.msra.mxu1 %v1636_v23  ;;  %v1698_v8 = vld [vmem:[%s2327_s1 + $0x108] sm:$0xff]   ;;  %v69_v10 = vld [vmem:[%s2328_s0 + $0x150] sm:$0x11]  ;;  %v1705_v12 = vld [vmem:[%s2327_s1 + $0x100] sm:$0xff]  }
  0x1a   :  { %1454 = vmatprep.subr.bf16.mxu1 %v1639_v26  ;;  %v1699_v9 = vld [vmem:[%s2327_s1 + $0x188] sm:$0xff]   ;;  %v1706_v13 = vld [vmem:[%s2327_s1 + $0x180] sm:$0xff]   ;;  %v70_v14 = vld [vmem:[%s2328_s0 + $0x158] sm:$0x11]  ;;  %v1289_v17 = vcombine.high %v69_v10, %v69_v10  ;;  %v1288_v19 = vcombine.low %v69_v10, %v69_v10 }
  0x1b   :  { %1397 = vmatpush3.bf16.msra.mxu0 %v1638_v25  ;;  %v1693_v15 = vld [vmem:[%s2328_s0 + $0x118] ss:$28 sps:$4 sm:$0xff]   ;;  %v1696_v16 = vld [vmem:[%s2328_s0 + $0x120] ss:$28 sps:$4 sm:$0xff]   ;;  %v1291_v18 = vcombine.high %v70_v14, %v70_v14  ;;  %v1290_v20 = vcombine.low %v70_v14, %v70_v14  ;;  %v1707_v22 = vld [vmem:[%s2328_s0 + $0x10] ss:$28 sps:$4 sm:$0xff]  }
  0x1c   :  { %1398 = vmatprep.subr.bf16.mxu0 %v1641_v28  ;;  %v1709_v21 = vld [vmem:[%s2328_s0 + $0x14] ss:$28 sps:$4 sm:$0xff]   ;;  %v1711_v24 = vld [vmem:[%s2328_s0 + $0x4c] ss:$28 sps:$4 sm:$0xff]   ;;  %v1717_v28 = vld [vmem:[%s2328_s0 + $0x80] ss:$28 sps:$4 sm:$0xff]  }
  0x1d   :  { %1455 = vmatpush3.bf16.msra.mxu1 %v1640_v27  ;;  %v1710_v23 = vld [vmem:[%s2328_s0 + $0x18] ss:$28 sps:$4 sm:$0xff]   ;;  %v1713_v25 = vld [vmem:[%s2328_s0 + $0x48] ss:$28 sps:$4 sm:$0xff]   ;;  %v1714_v26 = vld [vmem:[%s2328_s0 + $0x50] ss:$28 sps:$4 sm:$0xff]  }
  0x1e   :  { %1456 = vmatprep.subr.bf16.mxu1 %v1643_v30  ;;  %v1715_v27 = vld [vmem:[%s2328_s0 + $0x84] ss:$28 sps:$4 sm:$0xff]   ;;  %v1719_v30 = vld [vmem:[%s2328_s0 + $0xbc] ss:$28 sps:$4 sm:$0xff]   ;;  %v1723_v33 = vld [vmem:[%s2328_s0 + $0xf4] ss:$28 sps:$4 sm:$0xff]  }
  0x1f   :  { %1399 = vmatpush3.bf16.msra.mxu0 %v1642_v29  ;;  %v1718_v29 = vld [vmem:[%s2328_s0 + $0x88] ss:$28 sps:$4 sm:$0xff]   ;;  %v1726_v35 = vld [vmem:[%s2328_s0 + $0xf8] ss:$28 sps:$4 sm:$0xff]  }
  0x20   :  { %1500 = vmatprep.subr.bf16.mxu0 %v1651_v37  ;;  %v1727_v37 = vld [vmem:[%s2328_s0 + $0x12c] ss:$28 sps:$4 sm:$0xff]  }
  0x21   :  { %1457 = vmatpush3.bf16.msra.mxu1 %v1644_v31  ;;  %v1721_v31 = vld [vmem:[%s2328_s0 + $0xb8] ss:$28 sps:$4 sm:$0xff]  }
  0x22   :  { %1571 = vmatprep.subr.bf16.mxu1 %v1734_v36  ;;  %801 = vmatmul.mubr.bf16.vlgmr.msra.gmra.mxu0 %v1645_v32  ;;  %v1722_v32 = vld [vmem:[%s2328_s0 + $0xc0] ss:$28 sps:$4 sm:$0xff]  }
  0x23   :  { %1501 = vmatpush3.bf16.msra.mxu0 %v1652_v38  ;;  %808 = vmatprep.mubr.bf16.mxu0 %v1653_v39  ;;  %v71_v38 = vld [vmem:[%s2328_s0 + $0x160] sm:$0x11] }
  0x24   :  { %889 = vmatmul.mubr.bf16.vlgmr.msra.gmra.mxu1 %v1648_v34  ;;  %1502 = vmatprep.subr.bf16.mxu0 %v1655_v40  ;;  %v1725_v34 = vld [vmem:[%s2328_s0 + $0xf0] ss:$28 sps:$4 sm:$0xff]   ;;  %v1729_v39 = vld [vmem:[%s2328_s0 + $0x128] ss:$28 sps:$4 sm:$0xff]  }
  0x25   :  { %1572 = vmatpush3.bf16.msra.mxu1 %v1656_v41  ;;  %896 = vmatprep.mubr.bf16.mxu1 %v1658_v43  ;;  %v1730_v40 = vld [vmem:[%s2328_s0 + $0x130] ss:$28 sps:$4 sm:$0xff]   ;;  %v1293_v41 = vcombine.high %v71_v38, %v71_v38  ;;  %v1733_v43 = vld [vmem:[%s2328_s0 + $0x168] ss:$0 sps:$4 sm:$0x11]  }
  0x26   :  { %1573 = vmatprep.subr.bf16.mxu1 %v1734_v36 }
  0x27   :  { %1503 = vmatpush3.bf16.msra.mxu0 %v1660_v44 }
  0x28   :  { %1504 = vmatprep.subr.bf16.mxu0 %v1662_v46 }
  0x29   :  { %1574 = vmatpush3.bf16.msra.mxu1 %v1670_v52 }
  0x2a   :  { %809 = vmatmul.mubr.bf16.gmra.mxu0 %v1657_v42  ;;  %1575 = vmatprep.subr.bf16.mxu1 %v1734_v36  ;;  %v1292_v42 = vcombine.low %v71_v38, %v71_v38 }
  0x2b   :  { %816 = vmatprep.mubr.bf16.mxu0 %v1663_v47  ;;  %1505 = vmatpush3.bf16.msra.mxu0 %v1665_v48 }
  0x2c   :  { %897 = vmatmul.mubr.bf16.gmra.mxu1 %v1661_v45  ;;  %1506 = vmatprep.subr.bf16.mxu0 %v1671_v53 }
  0x2d   :  { %904 = vmatprep.mubr.bf16.mxu1 %v1667_v50  ;;  %1576 = vmatpush3.bf16.msra.mxu1 %v1679_v57 }
  0x2e   :  { %1577 = vmatprep.subr.bf16.mxu1 %v1734_v36 }
  0x2f   :  { %1507 = vmatpush3.bf16.msra.mxu0 %v1672_v54 }
  0x30   :  { %1508 = vmatprep.subr.bf16.mxu0 %v1680_v58 }
  0x31   :  { %1578 = vmatpush3.bf16.msra.mxu1 %v1689_v1 }
  0x32   :  { %817 = vmatmul.mubr.bf16.gmra.mxu0 %v1666_v49  ;;  %1579 = vmatprep.subr.bf16.mxu1 %v1734_v36 }
  0x33   :  { %824 = vmatprep.mubr.bf16.mxu0 %v1673_v55  ;;  %1509 = vmatpush3.bf16.msra.mxu0 %v1681_v59 }
  0x34   :  { %905 = vmatmul.mubr.bf16.gmra.mxu1 %v1669_v51  ;;  %1510 = vmatprep.subr.bf16.mxu0 %v1688_v0 }
  0x35   :  { %912 = vmatprep.mubr.bf16.mxu1 %v1676_v56  ;;  %1580 = vmatpush3.bf16.msra.mxu1 %v1699_v9 }
  0x36   :  { %1581 = vmatprep.subr.bf16.mxu1 %v1734_v36 }
  0x37   :  { %1511 = vmatpush3.bf16.msra.mxu0 %v1690_v2 }
  0x38   :  { %1512 = vmatprep.subr.bf16.mxu0 %v1697_v7 }
  0x39   :  { %1582 = vmatpush3.bf16.msra.mxu1 %v1706_v13 }
  0x3a   :  { %825 = vmatmul.mubr.bf16.gmra.mxu0 %v1675_v60 }
  0x3b   :  { %832 = vmatprep.mubr.bf16.mxu0 %v1682_v62  ;;  %1513 = vmatpush3.bf16.msra.mxu0 %v1698_v8 }
  0x3c   :  { %913 = vmatmul.mubr.bf16.gmra.mxu1 %v1678_v61  ;;  %1514 = vmatprep.subr.bf16.mxu0 %v1704_v11 }
  0x3d   :  { %920 = vmatprep.mubr.bf16.mxu1 %v1685_v63 }
  0x3f   :  { %1515 = vmatpush3.bf16.msra.mxu0 %v1705_v12 }
  0x42   :  { %833 = vmatmul.mubr.bf16.gmra.mxu0 %v1684_v3 }
  0x43   :  { %840 = vmatprep.mubr.bf16.mxu0 %v1691_v5 }
  0x44   :  { %921 = vmatmul.mubr.bf16.gmra.mxu1 %v1687_v4 }
  0x45   :  { %928 = vmatprep.mubr.bf16.mxu1 %v1694_v6 }
  0x4a   :  { %841 = vmatmul.mubr.bf16.gmra.mxu0 %v1693_v15 }
  0x4b   :  { %848 = vmatprep.mubr.bf16.mxu0 %v1289_v17 }
  0x4c   :  { %929 = vmatmul.mubr.bf16.gmra.mxu1 %v1696_v16 }
  0x4d   :  { %936 = vmatprep.mubr.bf16.mxu1 %v1291_v18 }
  0x52   :  { %849 = vmatmul.mubr.bf16.gmra.mxu0 %v1288_v19 }
  0x53   :  { %976 = vmatprep.mubr.bf16.mxu0 %v1709_v21 }
  0x54   :  { %937 = vmatmul.mubr.bf16.gmra.mxu1 %v1290_v20 }
  0x55   :  { %1583 = vmatprep.mubr.msk.bf16.mxu1 %vm1735_vm0, %v1734_v36 }
  0x5a   :  { %977 = vmatmul.mubr.bf16.vlgmr.msra.gmra.mxu0 %v1707_v22 }
  0x5b   :  { %984 = vmatprep.mubr.bf16.mxu0 %v1711_v24 }
  0x5c   :  { %1584 = vmatmul.mubr.msk.bf16.vlgmr.msra.gmra.mxu1 %vm746_vm1, %v1710_v23 }
  0x5d   :  { %1587 = vmatprep.mubr.msk.bf16.mxu1 %vm1735_vm0, %v1734_v36 }
  0x62   :  { %985 = vmatmul.mubr.bf16.gmra.mxu0 %v1713_v25 }
  0x63   :  { %992 = vmatprep.mubr.bf16.mxu0 %v1715_v27 }
  0x64   :  { %1588 = vmatmul.mubr.msk.bf16.gmra.mxu1 %vm746_vm1, %v1714_v26 }
  0x65   :  { %1591 = vmatprep.mubr.msk.bf16.mxu1 %vm1735_vm0, %v1734_v36 }
  0x6a   :  { %993 = vmatmul.mubr.bf16.gmra.mxu0 %v1717_v28 }
  0x6b   :  { %1000 = vmatprep.mubr.bf16.mxu0 %v1719_v30 }
  0x6c   :  { %1592 = vmatmul.mubr.msk.bf16.gmra.mxu1 %vm746_vm1, %v1718_v29 }
  0x6d   :  { %1595 = vmatprep.mubr.msk.bf16.mxu1 %vm1735_vm0, %v1734_v36 }
  0x72   :  { %1001 = vmatmul.mubr.bf16.gmra.mxu0 %v1721_v31 }
  0x73   :  { %1008 = vmatprep.mubr.bf16.mxu0 %v1723_v33 }
  0x74   :  { %1596 = vmatmul.mubr.msk.bf16.gmra.mxu1 %vm746_vm1, %v1722_v32  ;;  %v2182_v32 = vld [vmem:[%s2329_s2] ss:$0 sm:$0xff] }
  0x75   :  { %1599 = vmatprep.mubr.msk.bf16.mxu1 %vm1735_vm0, %v1734_v36 }
  0x7a   :  { %1009 = vmatmul.mubr.bf16.gmra.mxu0 %v1725_v34 }
  0x7b   :  { %1016 = vmatprep.mubr.bf16.mxu0 %v1727_v37 }
  0x7c   :  { %1600 = vmatmul.mubr.msk.bf16.gmra.mxu1 %vm746_vm1, %v1726_v35 }
  0x7d   :  { %1603 = vmatprep.mubr.msk.bf16.mxu1 %vm1735_vm0, %v1734_v36 }
  0x82   :  { %1017 = vmatmul.mubr.bf16.gmra.mxu0 %v1729_v39 }
  0x83   :  { %1024 = vmatprep.mubr.bf16.mxu0 %v1293_v41 }
  0x84   :  { %1604 = vmatmul.mubr.msk.bf16.gmra.mxu1 %vm746_vm1, %v1730_v40 }
  0x85   :  { %1607 = vmatprep.mubr.msk.bf16.mxu1 %vm1735_vm0, %v1734_v36 }
  0x8a   :  { %1025 = vmatmul.mubr.bf16.gmra.mxu0 %v1292_v42 }
  0x8c   :  { %1608 = vmatmul.mubr.msk.bf16.gmra.mxu1 %vm746_vm1, %v1733_v43 }
  0xe2   :  { %v1400_v44 = vpop.f32.mrf.mxu0 }
  0xe4   :  { %v1458_v45 = vpop.f32.mrf.mxu1  ;;  %v1401_v46 = vpop.f32.mrf.mxu0 }
  0xe5   :  { %v1402_v30 = vadd.f32 %v1401_v46, %v1400_v44 }
  0xe6   :  { %v1459_v47 = vpop.f32.mrf.mxu1  ;;  %v1403_v48 = vpop.f32.mrf.mxu0 }
  0xe7   :  { %v803_v38 = vadd.f32 %v1402_v30, %v2182_v32  ;;  %v1460_v39 = vadd.f32 %v1459_v47, %v1458_v45 }
  0xe8   :  { %v2093_v49 = vpop.f32.mrf.mxu1  ;;  %v1404_v50 = vpop.f32.mrf.mxu0 }
  0xe9   :  { %v1405_v35 = vadd.f32 %v1404_v50, %v1403_v48  ;;  %v891_v46 = vadd.f32 %v1460_v39, %v803_v38 }
  0xea   :  { %v2095_v51 = vpop.f32.mrf.mxu1  ;;  %v1406_v52 = vpop.f32.mrf.mxu0 }
  0xeb   :  { %v806_v43 = vadd.f32 %v1405_v35, %v2182_v32 }
  0xec   :  { %v2097_v36 = vpop.f32.mrf.mxu1  ;;  %v1407_v53 = vpop.f32.mrf.mxu0 }
  0xee   :  { %v2099_v54 = vpop.f32.mrf.mxu1  ;;  %v2101_v55 = vpop.f32.mrf.mxu0 }
  0xef   :  { %v1466_v35 = vadd.f32 %v2099_v54, %v2097_v36  ;;  %v2203_v36 = vld [vmem:[%s2331_s4] ss:$0 sm:$0xff] }
  0xf0   :  { %v2103_v56 = vpop.f32.mrf.mxu1  ;;  %v1410_v57 = vpop.f32.mrf.mxu0 }
  0xf1   :  { %v1411_v30 = vadd.f32 %v1410_v57, %v2101_v55 }
  0xf2   :  { %v2105_v58 = vpop.f32.mrf.mxu1  ;;  %v2107_v59 = vpop.f32.mrf.mxu0 }
  0xf3   :  { %v814_v55 = vadd.f32 %v1411_v30, %v2182_v32 }
  0xf4   :  { %v2109_v60 = vpop.f32.mrf.mxu1  ;;  %v2111_v61 = vpop.f32.mrf.mxu0 }
  0xf5   :  { %v1414_v57 = vadd.f32 %v2111_v61, %v2107_v59 }
  0xf6   :  { %v2113_v62 = vpop.f32.mrf.mxu1  ;;  %v2115_v63 = vpop.f32.mrf.mxu0 }
  0xf8   :  { %v2117_v0 = vpop.f32.mrf.mxu1  ;;  %v2119_v1 = vpop.f32.mrf.mxu0 }
  0xfa   :  { %v2121_v2 = vpop.f32.mrf.mxu1  ;;  %v2123_v3 = vpop.f32.mrf.mxu0 }
  0xfc   :  { %v2125_v4 = vpop.f32.mrf.mxu1  ;;  %v2127_v5 = vpop.f32.mrf.mxu0 }
  0xfe   :  { %v2129_v6 = vpop.f32.mrf.mxu1  ;;  %v2131_v7 = vpop.f32.mrf.mxu0 }
 0x100   :  { %v2133_v8 = vpop.f32.mrf.mxu1  ;;  %v2135_v9 = vpop.f32.mrf.mxu0 }
 0x102   :  { %v2137_v10 = vpop.f32.mrf.mxu1  ;;  %v2139_v11 = vpop.f32.mrf.mxu0 }
 0x104   :  { %v2141_v12 = vpop.f32.mrf.mxu1  ;;  %v2143_v13 = vpop.f32.mrf.mxu0 }
 0x106   :  { %v2145_v14 = vpop.f32.mrf.mxu1  ;;  %v2147_v15 = vpop.f32.mrf.mxu0 }
 0x108   :  { %v2149_v16 = vpop.f32.mrf.mxu1  ;;  %v2151_v17 = vpop.f32.mrf.mxu0 }
 0x10a   :  { %v2153_v18 = vpop.f32.mrf.mxu1  ;;  %v2155_v19 = vpop.f32.mrf.mxu0 }
 0x10c   :  { %v2157_v20 = vpop.f32.mrf.mxu1  ;;  %v2159_v21 = vpop.f32.mrf.mxu0 }
 0x10e   :  { %v2161_v22 = vpop.f32.mrf.mxu1  ;;  %v2163_v23 = vpop.f32.mrf.mxu0 }
 0x110   :  { %v2165_v24 = vpop.f32.mrf.mxu1  ;;  %v2167_v25 = vpop.f32.mrf.mxu0 }
 0x111   :  { %2333 = vst [vmem:[#allocation2_spill] sm:$0xff] %v2165_v24  ;;  %v1463_v24 = vadd.f32 %v2095_v51, %v2093_v49 }
 0x112   :  { %v2169_v26 = vpop.f32.mrf.mxu1  ;;  %v2171_v27 = vpop.f32.mrf.mxu0 }
 0x113   :  { %2334 = vst [vmem:[#allocation3_spill] sm:$0xff] %v2169_v26  ;;  %v894_v50 = vadd.f32 %v1463_v24, %v806_v43 }
 0x114   :  { %v2173_v28 = vpop.f32.mrf.mxu1  ;;  %v2175_v29 = vpop.f32.mrf.mxu0 }
 0x115   :  { %2335 = vst [vmem:[#allocation4_spill] sm:$0xff] %v2173_v28 }
 0x116   :  { %v2177_v31 = vpop.f32.mrf.mxu1  ;;  %v1439_v33 = vpop.f32.mrf.mxu0 }
 0x117   :  { %2336 = vst [vmem:[#allocation5_spill] sm:$0xff] %v2177_v31  ;;  %v1408_v31 = vadd.f32 %v1407_v53, %v1406_v52  ;;  %v2195_v53 = vld [vmem:[%s2330_s3] ss:$0 sm:$0xff] }
 0x118   :  { %v1497_v34 = vpop.f32.mrf.mxu1  ;;  %v1440_v37 = vpop.f32.mrf.mxu0 }
 0x119   :  { %v811_v47 = vadd.f32 %v1408_v31, %v2182_v32 }
 0x11a   :  { %v1498_v40 = vpop.f32.mrf.mxu1  ;;  %v1516_v41 = vpop.f32.mrf.mxu0 }
 0x11c   :  { %v1066_v42 = vpop.f32.mrf.mxu1  ;;  %v1517_v44 = vpop.f32.mrf.mxu0 }
 0x11d   :  { %v1518_v28 = vadd.f32 %v1517_v44, %v1516_v41 }
 0x11e   :  { %v1585_v26 = vpop.f32.mrf.mxu1  ;;  %v1519_v33 = vpop.f32.mrf.mxu0 }
 0x11f   :  { %v979_v34 = vadd.f32 %v1518_v28, %v891_v46  ;;  %v899_v28 = vadd.f32 %v1466_v35, %v811_v47 }
 0x120   :  { %v1069_v48 = vpop.f32.mrf.mxu1  ;;  %v1520_v45 = vpop.f32.mrf.mxu0 }
 0x121   :  { %v1067_v37 = vadd.f32 %v1066_v42, %v979_v34  ;;  %v1521_v38 = vadd.f32 %v1520_v45, %v1519_v33  ;;  %v1469_v42 = vadd.f32 %v2105_v58, %v2103_v56  ;;  %v819_v34 = vadd.f32 %v1414_v57, %v2182_v32 }
 0x122   :  { %v1586_v52 = vpop.f32.mrf.mxu1  ;;  %v1522_v49 = vpop.f32.mrf.mxu0 }
 0x123   :  { %v1120_v51 = vmax.f32 %v1067_v37, 0.0  ;;  %v982_v26 = vadd.f32 %v1521_v38, %v894_v50  ;;  %v902_v33 = vadd.f32 %v1469_v42, %v814_v55  ;;  %v1472_v50 = vadd.f32 %v2113_v62, %v2109_v60 }
 0x124   :  { %v1074_v24 = vpop.f32.mrf.mxu1  ;;  %v1523_v54 = vpop.f32.mrf.mxu0 }
 0x125   :  { %v1140_v31 = vmul.f32 %v2195_v53, %v1120_v51  ;;  %v1070_v39 = vadd.f32 %v1069_v48, %v982_v26  ;;  %v1524_v40 = vadd.f32 %v1523_v54, %v1522_v49  ;;  %v1417_v48 = vadd.f32 %v2119_v1, %v2115_v63 }
 0x126   :  { %v1589_v41 = vpop.f32.mrf.mxu1  ;;  %v1525_v43 = vpop.f32.mrf.mxu0  ;;  %v907_v49 = vadd.f32 %v1472_v50, %v819_v34  ;;  %v1420_v1 = vadd.f32 %v2127_v5, %v2123_v3 }
 0x127   :  { %v1160_v44 = vadd.f32 %v2203_v36, %v1140_v31  ;;  %v1121_v59 = vmax.f32 %v1070_v39, 0.0  ;;  %v987_v61 = vadd.f32 %v1524_v40, %v899_v28  ;;  %v822_v63 = vadd.f32 %v1417_v48, %v2182_v32 }
 0x128   :  { %v1077_v46 = vpop.f32.mrf.mxu1  ;;  %v1526_v30 = vpop.f32.mrf.mxu0  ;;  %v1475_v28 = vadd.f32 %v2121_v2, %v2117_v0  ;;  %v827_v42 = vadd.f32 %v1420_v1, %v2182_v32  ;;  %v1423_v0 = vadd.f32 %v2135_v9, %v2131_v7  ;;  %v1426_v9 = vadd.f32 %v2143_v13, %v2139_v11 }
 0x129   :  { %v1371_v45 = vpack.c.bf16 %v1160_v44, %v1160_v44  ;;  %v1141_v56 = vmul.f32 %v2195_v53, %v1121_v59  ;;  %v1075_v58 = vadd.f32 %v1074_v24, %v987_v61  ;;  %v1527_v47 = vadd.f32 %v1526_v30, %v1525_v43 }
 0x12a   :  { %v1590_v35 = vpop.f32.mrf.mxu1  ;;  %v1528_v37 = vpop.f32.mrf.mxu0  ;;  %v910_v41 = vadd.f32 %v1475_v28, %v822_v63  ;;  %v1478_v43 = vadd.f32 %v2129_v6, %v2125_v4  ;;  %v830_v7 = vadd.f32 %v1423_v0, %v2182_v32  ;;  %v835_v63 = vadd.f32 %v1426_v9, %v2182_v32 }
 0x12b   :  { %1227 = vst.msk [vmem:[%s2332_s5] sm:$0xf] %vm1226_vm2, %v1371_v45  ;;  %v1161_v38 = vadd.f32 %v2203_v36, %v1141_v56  ;;  %v1122_v52 = vmax.f32 %v1075_v58, 0.0  ;;  %v990_v60 = vadd.f32 %v1527_v47, %v902_v33  ;;  %v1484_v1 = vadd.f32 %v2145_v14, %v2141_v12 }
 0x12c   :  { %v1082_v62 = vpop.f32.mrf.mxu1  ;;  %v1529_v51 = vpop.f32.mrf.mxu0  ;;  %v915_v30 = vadd.f32 %v1478_v43, %v827_v42  ;;  %v1487_v0 = vadd.f32 %v2153_v18, %v2149_v16  ;;  %v1435_v16 = vadd.f32 %v2167_v25, %v2163_v23  ;;  %v1438_v25 = vadd.f32 %v2175_v29, %v2171_v27 }
 0x12d   :  { %v1372_v26 = vpack.c.bf16 %v1161_v38, %v1161_v38  ;;  %v1142_v24 = vmul.f32 %v2195_v53, %v1122_v52  ;;  %v1078_v55 = vadd.f32 %v1077_v46, %v990_v60  ;;  %v1530_v57 = vadd.f32 %v1529_v51, %v1528_v37 }
 0x12e   :  { %v1593_v54 = vpop.f32.mrf.mxu1  ;;  %v1531_v31 = vpop.f32.mrf.mxu0  ;;  %v1481_v38 = vadd.f32 %v2137_v10, %v2133_v8  ;;  %v1429_v8 = vadd.f32 %v2151_v17, %v2147_v15  ;;  %v1432_v17 = vadd.f32 %v2159_v21, %v2155_v19  ;;  %v846_v23 = vadd.f32 %v1435_v16, %v2182_v32 }
 0x12f   :  { %1228 = vst.msk [vmem:[%s2332_s5 + $0x4] sm:$0xf] %vm1226_vm2, %v1372_v26  ;;  %v1162_v39 = vadd.f32 %v2203_v36, %v1142_v24  ;;  %v1123_v40 = vmax.f32 %v1078_v55, 0.0  ;;  %v995_v3 = vadd.f32 %v1530_v57, %v907_v49 }
 0x130   :  { %v1085_v5 = vpop.f32.mrf.mxu1  ;;  %v1532_v2 = vpop.f32.mrf.mxu0  ;;  %v918_v49 = vadd.f32 %v1481_v38, %v830_v7  ;;  %v838_v15 = vadd.f32 %v1429_v8, %v2182_v32  ;;  %v2339_v8 = vld [vmem:[#allocation4_spill] sm:$0xff] }
 0x131   :  { %v1373_v44 = vpack.c.bf16 %v1162_v39, %v1162_v39  ;;  %v1143_v59 = vmul.f32 %v2195_v53, %v1123_v40  ;;  %v1083_v61 = vadd.f32 %v1082_v62, %v995_v3  ;;  %v1533_v46 = vadd.f32 %v1532_v2, %v1531_v31 }
 0x132   :  { %v1594_v33 = vpop.f32.mrf.mxu1  ;;  %v1534_v34 = vpop.f32.mrf.mxu0  ;;  %v923_v39 = vadd.f32 %v1484_v1, %v835_v63  ;;  %v851_v1 = vadd.f32 %v1438_v25, %v2182_v32 }
 0x133   :  { %1229 = vst.msk [vmem:[%s2332_s5 + $0x8] sm:$0xf] %vm1226_vm2, %v1373_v44  ;;  %v1163_v50 = vadd.f32 %v2203_v36, %v1143_v59  ;;  %v1124_v48 = vmax.f32 %v1083_v61, 0.0  ;;  %v998_v4 = vadd.f32 %v1533_v46, %v910_v41  ;;  %v926_v61 = vadd.f32 %v1487_v0, %v838_v15 }
 0x134   :  { %v1090_v6 = vpop.f32.mrf.mxu1  ;;  %v1535_v45 = vpop.f32.mrf.mxu0  ;;  %v843_v46 = vadd.f32 %v1432_v17, %v2182_v32  ;;  %v1490_v33 = vadd.f32 %v2161_v22, %v2157_v20 }
 0x135   :  { %v1374_v56 = vpack.c.bf16 %v1163_v50, %v1163_v50  ;;  %v1144_v58 = vmul.f32 %v2195_v53, %v1124_v48  ;;  %v1086_v47 = vadd.f32 %v1085_v5, %v998_v4  ;;  %v1536_v35 = vadd.f32 %v1535_v45, %v1534_v34 }
 0x136   :  { %v1597_v37 = vpop.f32.mrf.mxu1  ;;  %v1537_v52 = vpop.f32.mrf.mxu0  ;;  %v931_v45 = vadd.f32 %v1490_v33, %v843_v46 }
 0x137   :  { %1230 = vst.msk [vmem:[%s2332_s5 + $0xc] sm:$0xf] %vm1226_vm2, %v1374_v56  ;;  %v1164_v60 = vadd.f32 %v2203_v36, %v1144_v58  ;;  %v1125_v62 = vmax.f32 %v1086_v47, 0.0  ;;  %v1003_v11 = vadd.f32 %v1536_v35, %v915_v30 }
 0x138   :  { %v1093_v13 = vpop.f32.mrf.mxu1  ;;  %v1538_v10 = vpop.f32.mrf.mxu0 }
 0x139   :  { %v1375_v51 = vpack.c.bf16 %v1164_v60, %v1164_v60  ;;  %v1145_v26 = vmul.f32 %v2195_v53, %v1125_v62  ;;  %v1091_v24 = vadd.f32 %v1090_v6, %v1003_v11  ;;  %v1539_v55 = vadd.f32 %v1538_v10, %v1537_v52  ;;  %v2337_v52 = vld [vmem:[#allocation2_spill] sm:$0xff]  ;;  %v2338_v60 = vld [vmem:[#allocation3_spill] sm:$0xff]  ;;  %v2340_v10 = vld [vmem:[#allocation5_spill] sm:$0xff] }
 0x13a   :  { %v1598_v57 = vpop.f32.mrf.mxu1  ;;  %v1540_v54 = vpop.f32.mrf.mxu0  ;;  %v1493_v62 = vadd.f32 %v2338_v60, %v2337_v52 }
 0x13b   :  { %1231 = vst.msk [vmem:[%s2332_s5 + $0x10] sm:$0xf] %vm1226_vm2, %v1375_v51  ;;  %v1165_v28 = vadd.f32 %v2203_v36, %v1145_v26  ;;  %v1126_v31 = vmax.f32 %v1091_v24, 0.0  ;;  %v1006_v12 = vadd.f32 %v1539_v55, %v918_v49  ;;  %v1496_v51 = vadd.f32 %v2340_v10, %v2339_v8 }
 0x13c   :  { %v1098_v14 = vpop.f32.mrf.mxu1  ;;  %v1541_v40 = vpop.f32.mrf.mxu0  ;;  %v934_v63 = vadd.f32 %v1493_v62, %v846_v23 }
 0x13d   :  { %v1376_v3 = vpack.c.bf16 %v1165_v28, %v1165_v28  ;;  %v1146_v5 = vmul.f32 %v2195_v53, %v1126_v31  ;;  %v1094_v41 = vadd.f32 %v1093_v13, %v1006_v12  ;;  %v1542_v42 = vadd.f32 %v1541_v40, %v1540_v54 }
 0x13e   :  { %v1601_v43 = vpop.f32.mrf.mxu1  ;;  %v1543_v2 = vpop.f32.mrf.mxu0  ;;  %v939_v15 = vadd.f32 %v1496_v51, %v851_v1 }
 0x13f   :  { %1232 = vst.msk [vmem:[%s2332_s5 + $0x14] sm:$0xf] %vm1226_vm2, %v1376_v3  ;;  %v1166_v44 = vadd.f32 %v2203_v36, %v1146_v5  ;;  %v1127_v59 = vmax.f32 %v1094_v41, 0.0  ;;  %v1011_v19 = vadd.f32 %v1542_v42, %v923_v39 }
 0x140   :  { %v1101_v21 = vpop.f32.mrf.mxu1  ;;  %v1544_v18 = vpop.f32.mrf.mxu0 }
 0x141   :  { %v1377_v34 = vpack.c.bf16 %v1166_v44, %v1166_v44  ;;  %v1147_v50 = vmul.f32 %v2195_v53, %v1127_v59  ;;  %v1099_v48 = vadd.f32 %v1098_v14, %v1011_v19  ;;  %v1545_v4 = vadd.f32 %v1544_v18, %v1543_v2 }
 0x142   :  { %v1602_v6 = vpop.f32.mrf.mxu1  ;;  %v1546_v30 = vpop.f32.mrf.mxu0 }
 0x143   :  { %1233 = vst.msk [vmem:[%s2332_s5 + $0x18] sm:$0xf] %vm1226_vm2, %v1377_v34  ;;  %v1167_v7 = vadd.f32 %v2203_v36, %v1147_v50  ;;  %v1128_v9 = vmax.f32 %v1099_v48, 0.0  ;;  %v1014_v20 = vadd.f32 %v1545_v4, %v926_v61 }
 0x144   :  { %v1106_v22 = vpop.f32.mrf.mxu1  ;;  %v1547_v56 = vpop.f32.mrf.mxu0 }
 0x145   :  { %v1378_v58 = vpack.c.bf16 %v1167_v7, %v1167_v7  ;;  %v1148_v47 = vmul.f32 %v2195_v53, %v1128_v9  ;;  %v1102_v35 = vadd.f32 %v1101_v21, %v1014_v20  ;;  %v1548_v37 = vadd.f32 %v1547_v56, %v1546_v30 }
 0x146   :  { %v1605_v38 = vpop.f32.mrf.mxu1  ;;  %v1549_v11 = vpop.f32.mrf.mxu0 }
 0x147   :  { %1234 = vst.msk [vmem:[%s2332_s5 + $0x1c] sm:$0xf] %vm1226_vm2, %v1378_v58  ;;  %v1168_v13 = vadd.f32 %v2203_v36, %v1148_v47  ;;  %v1129_v49 = vmax.f32 %v1102_v35, 0.0  ;;  %v1019_v27 = vadd.f32 %v1548_v37, %v931_v45 }
 0x148   :  { %v1109_v29 = vpop.f32.mrf.mxu1  ;;  %v1550_v26 = vpop.f32.mrf.mxu0 }
 0x149   :  { %v1379_v24 = vpack.c.bf16 %v1168_v13, %v1168_v13  ;;  %v1149_v55 = vmul.f32 %v2195_v53, %v1129_v49  ;;  %v1107_v57 = vadd.f32 %v1106_v22, %v1019_v27  ;;  %v1551_v54 = vadd.f32 %v1550_v26, %v1549_v11 }
 0x14a   :  { %v1606_v28 = vpop.f32.mrf.mxu1  ;;  %v1552_v31 = vpop.f32.mrf.mxu0 }
 0x14b   :  { %1235 = vst.msk [vmem:[%s2332_s5 + $0x20] sm:$0xf] %vm1226_vm2, %v1379_v24  ;;  %v1169_v12 = vadd.f32 %v2203_v36, %v1149_v55  ;;  %v1130_v14 = vmax.f32 %v1107_v57, 0.0  ;;  %v1022_v32 = vadd.f32 %v1551_v54, %v934_v63 }
 0x14c   :  { %v1114_v39 = vpop.f32.mrf.mxu1  ;;  %v1553_v17 = vpop.f32.mrf.mxu0 }
 0x14d   :  { %v1380_v40 = vpack.c.bf16 %v1169_v12, %v1169_v12  ;;  %v1150_v3 = vmul.f32 %v2195_v53, %v1130_v14  ;;  %v1110_v5 = vadd.f32 %v1109_v29, %v1022_v32  ;;  %v1554_v41 = vadd.f32 %v1553_v17, %v1552_v31 }
 0x14e   :  { %v1609_v42 = vpop.f32.mrf.mxu1  ;;  %v1555_v43 = vpop.f32.mrf.mxu0 }
 0x14f   :  { %1236 = vst.msk [vmem:[%s2332_s5 + $0x24] sm:$0xf] %vm1226_vm2, %v1380_v40  ;;  %v1170_v0 = vadd.f32 %v2203_v36, %v1150_v3  ;;  %v1131_v2 = vmax.f32 %v1110_v5, 0.0  ;;  %v1027_v44 = vadd.f32 %v1554_v41, %v939_v15 }
 0x150   :  { %v1117_v59 = vpop.f32.mrf.mxu1  ;;  %v1556_v19 = vpop.f32.mrf.mxu0 }
 0x151   :  { %v1381_v21 = vpack.c.bf16 %v1170_v0, %v1170_v0  ;;  %v1151_v61 = vmul.f32 %v2195_v53, %v1131_v2  ;;  %v1115_v46 = vadd.f32 %v1114_v39, %v1027_v44 }
 0x152   :  { %v1610_v33 = vpop.f32.mrf.mxu1 }
 0x153   :  { %1237 = vst.msk [vmem:[%s2332_s5 + $0x28] sm:$0xf] %vm1226_vm2, %v1381_v21  ;;  %v1171_v16 = vadd.f32 %v2203_v36, %v1151_v61  ;;  %v1132_v18 = vmax.f32 %v1115_v46, 0.0 }
 0x155   :  { %v1382_v34 = vpack.c.bf16 %v1171_v16, %v1171_v16  ;;  %v1152_v50 = vmul.f32 %v2195_v53, %v1132_v18 }
 0x157   :  { %1238 = vst.msk [vmem:[%s2332_s5 + $0x2c] sm:$0xf] %vm1226_vm2, %v1382_v34  ;;  %v1172_v48 = vadd.f32 %v2203_v36, %v1152_v50 }
 0x159   :  { %v1383_v4 = vpack.c.bf16 %v1172_v48, %v1172_v48 }
 0x15b   :  { %1240 = vst.msk [vmem:[%s2332_s5 + $0x30] sm:$0x1] %vm1239_vm3, %v1383_v4 }

// kernel: half_alexnet_forward.11
= control target key start
LH: loop header
LB: loop body
LE: loop exit
PB: predicated region body
PF: predicated region fallthrough
CT: control target
= control target key end

     0   :  { %v115_v35 = vlaneseq  ;;  %v1320_v36 = vmov 1966171168   ;;  %s1726_s0 = inlined_call_operand.vmem [shape: bf16[2,576], index: 0, kind: input, shape index: {}]   ;;  %s1727_s1 = inlined_call_operand.vmem [shape: bf16[576,256], index: 1, kind: input, shape index: {}]   ;;  %s1728_s2 = inlined_call_operand.vmem [shape: f32[1,256], index: 2, kind: input, shape index: {}]   ;;  %s1729_s3 = inlined_call_operand.vmem [shape: f32[1,256], index: 3, kind: input, shape index: {}]   ;;  %s1730_s4 = inlined_call_operand.vmem [shape: f32[1,256], index: 4, kind: input, shape index: {}]   ;;  %s1731_s5 = inlined_call_operand.vmem [shape: bf16[256,128], index: 5, kind: input, shape index: {}]   ;;  %s1732_s6 = inlined_call_operand.vmem [shape: f32[1,128], index: 6, kind: input, shape index: {}]   ;;  %s1733_s7 = inlined_call_operand.vmem [shape: f32[1,128], index: 7, kind: input, shape index: {}]   ;;  %s1734_s8 = inlined_call_operand.vmem [shape: f32[1,128], index: 8, kind: input, shape index: {}]   ;;  %s1735_s9 = inlined_call_operand.vmem [shape: bf16[128,10], index: 9, kind: input, shape index: {}]   ;;  %s1736_s10 = inlined_call_operand.vmem [shape: f32[1,10], index: 10, kind: input, shape index: {}]   ;;  %s1737_s11 = inlined_call_operand.hbm [shape: f32[2,10], index: 11, kind: output, shape index: {}]  }
   0x1   :  { %v1165_v0 = vld [vmem:[%s1727_s1 + $0x74] ss:$8 sps:$4 sm:$0xff]   ;;  %v1167_v1 = vld [vmem:[%s1727_s1 + $0x70] ss:$8 sps:$4 sm:$0xff]   ;;  %v1171_v4 = vld [vmem:[%s1727_s1 + $0x64] ss:$8 sps:$4 sm:$0xff]   ;;  %v128_v37 = vunpack.c.l.s4 %v1320_v36 }
   0x2   :  { %533 = vmatprep.subr.bf16.mxu0 %v1165_v0  ;;  %v1168_v2 = vld [vmem:[%s1727_s1 + $0x174] ss:$8 sps:$4 sm:$0xff]   ;;  %v1170_v3 = vld [vmem:[%s1727_s1 + $0x170] ss:$8 sps:$4 sm:$0xff]   ;;  %v1173_v5 = vld [vmem:[%s1727_s1 + $0x60] ss:$8 sps:$4 sm:$0xff]  }
   0x3   :  { %534 = vmatpush1.bf16.msra.mxu0 %v1167_v1  ;;  %574 = vmatprep.subr.bf16.mxu1 %v1168_v2  ;;  %v1174_v6 = vld [vmem:[%s1727_s1 + $0x164] ss:$8 sps:$4 sm:$0xff]   ;;  %v1176_v7 = vld [vmem:[%s1727_s1 + $0x160] ss:$8 sps:$4 sm:$0xff]   ;;  %v1177_v8 = vld [vmem:[%s1727_s1 + $0x54] ss:$8 sps:$4 sm:$0xff]   ;;  %v129_v43 = vunpack.c.0.s8 %v128_v37 }
   0x4   :  { %575 = vmatpush1.bf16.msra.mxu1 %v1170_v3  ;;  %535 = vmatprep.subr.bf16.mxu0 %v1171_v4  ;;  %v1179_v9 = vld [vmem:[%s1727_s1 + $0x50] ss:$8 sps:$4 sm:$0xff]   ;;  %v1180_v10 = vld [vmem:[%s1727_s1 + $0x154] ss:$8 sps:$4 sm:$0xff]   ;;  %v1183_v11 = vld [vmem:[%s1727_s1 + $0x44] ss:$8 sps:$4 sm:$0xff]  }
   0x5   :  { %576 = vmatprep.subr.bf16.mxu1 %v1174_v6  ;;  %v1182_v12 = vld [vmem:[%s1727_s1 + $0x150] ss:$8 sps:$4 sm:$0xff]   ;;  %v1186_v13 = vld [vmem:[%s1727_s1 + $0x144] ss:$8 sps:$4 sm:$0xff]   ;;  %v1185_v14 = vld [vmem:[%s1727_s1 + $0x40] ss:$8 sps:$4 sm:$0xff]  }
   0x6   :  { %v1189_v15 = vld [vmem:[%s1727_s1 + $0x34] ss:$8 sps:$4 sm:$0xff]   ;;  %v1188_v16 = vld [vmem:[%s1727_s1 + $0x140] ss:$8 sps:$4 sm:$0xff]   ;;  %v1191_v18 = vld [vmem:[%s1727_s1 + $0x30] ss:$8 sps:$4 sm:$0xff]  }
   0x7   :  { %536 = vmatpush1.bf16.msra.mxu0 %v1173_v5  ;;  %v1192_v17 = vld [vmem:[%s1727_s1 + $0x134] ss:$8 sps:$4 sm:$0xff]   ;;  %v1195_v19 = vld [vmem:[%s1727_s1 + $0x24] ss:$8 sps:$4 sm:$0xff]   ;;  %v1194_v20 = vld [vmem:[%s1727_s1 + $0x130] ss:$8 sps:$4 sm:$0xff]  }
   0x8   :  { %537 = vmatprep.subr.bf16.mxu0 %v1177_v8  ;;  %577 = vmatpush1.bf16.msra.mxu1 %v1176_v7  ;;  %v1198_v21 = vld [vmem:[%s1727_s1 + $0x124] ss:$8 sps:$4 sm:$0xff]   ;;  %v1197_v22 = vld [vmem:[%s1727_s1 + $0x20] ss:$8 sps:$4 sm:$0xff]   ;;  %v1201_v23 = vld [vmem:[%s1727_s1 + $0x14] ss:$8 sps:$4 sm:$0xff]  }
   0x9   :  { %578 = vmatprep.subr.bf16.mxu1 %v1180_v10  ;;  %v1200_v24 = vld [vmem:[%s1727_s1 + $0x120] ss:$8 sps:$4 sm:$0xff]   ;;  %v1204_v25 = vld [vmem:[%s1727_s1 + $0x114] ss:$8 sps:$4 sm:$0xff]   ;;  %v1203_v26 = vld [vmem:[%s1727_s1 + $0x10] ss:$8 sps:$4 sm:$0xff]  }
   0xa   :  { %v1207_v27 = vld [vmem:[%s1727_s1 + $0x4] ss:$8 sps:$4 sm:$0xff]   ;;  %v1206_v28 = vld [vmem:[%s1727_s1 + $0x110] ss:$8 sps:$4 sm:$0xff]   ;;  %v1209_v30 = vld [vmem:[%s1727_s1] ss:$8 sps:$4 sm:$0xff]  }
   0xb   :  { %538 = vmatpush1.bf16.msra.mxu0 %v1179_v9  ;;  %v1210_v29 = vld [vmem:[%s1727_s1 + $0x104] ss:$8 sps:$4 sm:$0xff]   ;;  %v1213_v31 = vld [vmem:[%s1727_s1 + $0xf4] ss:$8 sps:$4 sm:$0xff]   ;;  %v1212_v32 = vld [vmem:[%s1727_s1 + $0x100] ss:$8 sps:$4 sm:$0xff]  }
   0xc   :  { %539 = vmatprep.subr.bf16.mxu0 %v1183_v11  ;;  %579 = vmatpush1.bf16.msra.mxu1 %v1182_v12  ;;  %v1216_v33 = vld [vmem:[%s1727_s1 + $0x1f4] ss:$8 sps:$4 sm:$0xff]   ;;  %v1215_v34 = vld [vmem:[%s1727_s1 + $0xf0] ss:$8 sps:$4 sm:$0xff]   ;;  %v1219_v38 = vld [vmem:[%s1727_s1 + $0xe4] ss:$8 sps:$4 sm:$0xff]  }
   0xd   :  { %580 = vmatprep.subr.bf16.mxu1 %v1186_v13  ;;  %v1218_v39 = vld [vmem:[%s1727_s1 + $0x1f0] ss:$8 sps:$4 sm:$0xff]   ;;  %v1222_v40 = vld [vmem:[%s1727_s1 + $0x1e4] ss:$8 sps:$4 sm:$0xff]   ;;  %v1221_v41 = vld [vmem:[%s1727_s1 + $0xe0] ss:$8 sps:$4 sm:$0xff]  }
   0xe   :  { %v1502_v42 = vshrl.u32 %v115_v35, 7  ;;  %v1225_v44 = vld [vmem:[%s1727_s1 + $0xd4] ss:$8 sps:$4 sm:$0xff]   ;;  %v1224_v45 = vld [vmem:[%s1727_s1 + $0x1e0] ss:$8 sps:$4 sm:$0xff]  }
   0xf   :  { %540 = vmatpush1.bf16.msra.mxu0 %v1185_v14  ;;  %v1228_v46 = vld [vmem:[%s1727_s1 + $0x1d4] ss:$8 sps:$4 sm:$0xff]   ;;  %v1227_v47 = vld [vmem:[%s1727_s1 + $0xd0] ss:$8 sps:$4 sm:$0xff]   ;;  %v1231_v49 = vld [vmem:[%s1727_s1 + $0xc4] ss:$8 sps:$4 sm:$0xff]  }
  0x10   :  { %541 = vmatprep.subr.bf16.mxu0 %v1189_v15  ;;  %581 = vmatpush1.bf16.msra.mxu1 %v1188_v16  ;;  %v1517_v48 = vsub.s32 %v129_v43, %v1502_v42  ;;  %v1230_v50 = vld [vmem:[%s1727_s1 + $0x1d0] ss:$8 sps:$4 sm:$0xff]   ;;  %v1234_v51 = vld [vmem:[%s1727_s1 + $0x1c4] ss:$8 sps:$4 sm:$0xff]   ;;  %v1233_v53 = vld [vmem:[%s1727_s1 + $0xc0] ss:$8 sps:$4 sm:$0xff]  }
  0x11   :  { %582 = vmatprep.subr.bf16.mxu1 %v1192_v17  ;;  %v1531_v52 = vld [vmem:[%s1726_s0] sm:$0x1f]  ;;  %v1237_v55 = vld [vmem:[%s1727_s1 + $0xb4] ss:$8 sps:$4 sm:$0xff]   ;;  %v1239_v58 = vld [vmem:[%s1727_s1 + $0xb0] ss:$8 sps:$4 sm:$0xff]  }
  0x12   :  { %v133_v54 = vrot.slane %v1531_v52, %v1517_v48  ;;  %v1236_v56 = vld [vmem:[%s1727_s1 + $0x1c0] ss:$8 sps:$4 sm:$0xff]   ;;  %v1240_v59 = vld [vmem:[%s1727_s1 + $0x1b4] ss:$8 sps:$4 sm:$0xff]   ;;  %v1242_v60 = vld [vmem:[%s1727_s1 + $0x1b0] ss:$8 sps:$4 sm:$0xff]  }
  0x13   :  { %542 = vmatpush1.bf16.msra.mxu0 %v1191_v18  ;;  %v1243_v62 = vld [vmem:[%s1727_s1 + $0xa4] ss:$8 sps:$4 sm:$0xff]   ;;  %v1245_v63 = vld [vmem:[%s1727_s1 + $0xa0] ss:$8 sps:$4 sm:$0xff]   ;;  %v1249_v2 = vld [vmem:[%s1727_s1 + $0x94] ss:$8 sps:$4 sm:$0xff]  }
  0x14   :  { %543 = vmatprep.subr.bf16.mxu0 %v1195_v19  ;;  %583 = vmatpush1.bf16.msra.mxu1 %v1194_v20  ;;  %v141_v57 = vcombine.high %v133_v54, %v133_v54  ;;  %v1246_v1 = vld [vmem:[%s1727_s1 + $0x1a4] ss:$8 sps:$4 sm:$0xff]   ;;  %v1248_v3 = vld [vmem:[%s1727_s1 + $0x1a0] ss:$8 sps:$4 sm:$0xff]   ;;  %v1252_v4 = vld [vmem:[%s1727_s1 + $0x194] ss:$8 sps:$4 sm:$0xff]   ;;  %v148_v12 = vrot.slane %v133_v54, %v1517_v48 }
  0x15   :  { %584 = vmatprep.subr.bf16.mxu1 %v1198_v21  ;;  %v1251_v5 = vld [vmem:[%s1727_s1 + $0x90] ss:$8 sps:$4 sm:$0xff]   ;;  %v1255_v6 = vld [vmem:[%s1727_s1 + $0x84] ss:$8 sps:$4 sm:$0xff]   ;;  %v1257_v9 = vld [vmem:[%s1727_s1 + $0x80] ss:$8 sps:$4 sm:$0xff]  }
  0x16   :  { %v162_v61 = vrot.slane %v141_v57, %v1517_v48  ;;  %v1254_v7 = vld [vmem:[%s1727_s1 + $0x190] ss:$8 sps:$4 sm:$0xff]   ;;  %v1258_v8 = vld [vmem:[%s1727_s1 + $0x184] ss:$8 sps:$4 sm:$0xff]   ;;  %v1264_v10 = vld [vmem:[%s1727_s1 + $0x234] ss:$8 sps:$4 sm:$0xff]   ;;  %v163_v16 = vcombine.high %v148_v12, %v148_v12 }
  0x17   :  { %544 = vmatpush1.bf16.msra.mxu0 %v1197_v22  ;;  %v1261_v11 = vld [vmem:[%s1727_s1 + $0x180] ss:$8 sps:$4 sm:$0xff]   ;;  %v1274_v13 = vld [vmem:[%s1731_s5 + $0x78] sm:$0xff]   ;;  %v1267_v15 = vld [vmem:[%s1727_s1 + $0x224] ss:$8 sps:$4 sm:$0xff]  }
  0x18   :  { %545 = vmatprep.subr.bf16.mxu0 %v1201_v23  ;;  %585 = vmatpush1.bf16.msra.mxu1 %v1200_v24  ;;  %v164_v0 = vcombine.high %v162_v61, %v162_v61  ;;  %v1262_v14 = vld [vmem:[%s1727_s1 + $0x230] ss:$8 sps:$4 sm:$0xff]  }
  0x19   :  { %586 = vmatprep.subr.bf16.mxu1 %v1204_v25  ;;  %565 = vmatprep.mubr.bf16.mxu0 %v162_v61  ;;  %v1275_v17 = vld [vmem:[%s1731_s5 + $0x38] sm:$0xff]  }
  0x1a   :  { %606 = vmatprep.mubr.bf16.mxu1 %v164_v0 }
  0x1b   :  { %546 = vmatpush1.bf16.msra.mxu0 %v1203_v26 }
  0x1c   :  { %547 = vmatprep.subr.bf16.mxu0 %v1207_v27  ;;  %587 = vmatpush1.bf16.msra.mxu1 %v1206_v28 }
  0x1d   :  { %588 = vmatprep.subr.bf16.mxu1 %v1210_v29 }
  0x1f   :  { %548 = vmatpush1.bf16.msra.mxu0 %v1209_v30 }
  0x20   :  { %549 = vmatprep.subr.bf16.mxu0 %v1213_v31  ;;  %589 = vmatpush1.bf16.msra.mxu1 %v1212_v32 }
  0x21   :  { %590 = vmatprep.subr.bf16.mxu1 %v1216_v33 }
  0x23   :  { %550 = vmatpush2.bf16.msra.mxu0 %v1215_v34 }
  0x24   :  { %551 = vmatprep.subr.bf16.mxu0 %v1219_v38  ;;  %591 = vmatpush2.bf16.msra.mxu1 %v1218_v39 }
  0x25   :  { %592 = vmatprep.subr.bf16.mxu1 %v1222_v40 }
  0x27   :  { %552 = vmatpush2.bf16.msra.mxu0 %v1221_v41 }
  0x28   :  { %553 = vmatprep.subr.bf16.mxu0 %v1225_v44  ;;  %593 = vmatpush2.bf16.msra.mxu1 %v1224_v45 }
  0x29   :  { %594 = vmatprep.subr.bf16.mxu1 %v1228_v46 }
  0x2b   :  { %554 = vmatpush2.bf16.msra.mxu0 %v1227_v47 }
  0x2c   :  { %555 = vmatprep.subr.bf16.mxu0 %v1231_v49  ;;  %595 = vmatpush2.bf16.msra.mxu1 %v1230_v50 }
  0x2d   :  { %596 = vmatprep.subr.bf16.mxu1 %v1234_v51 }
  0x2f   :  { %556 = vmatpush2.bf16.msra.mxu0 %v1233_v53 }
  0x30   :  { %557 = vmatprep.subr.bf16.mxu0 %v1237_v55  ;;  %597 = vmatpush2.bf16.msra.mxu1 %v1236_v56 }
  0x31   :  { %598 = vmatprep.subr.bf16.mxu1 %v1240_v59 }
  0x33   :  { %558 = vmatpush2.bf16.msra.mxu0 %v1239_v58 }
  0x34   :  { %559 = vmatprep.subr.bf16.mxu0 %v1243_v62  ;;  %599 = vmatpush2.bf16.msra.mxu1 %v1242_v60 }
  0x35   :  { %600 = vmatprep.subr.bf16.mxu1 %v1246_v1 }
  0x37   :  { %560 = vmatpush2.bf16.msra.mxu0 %v1245_v63 }
  0x38   :  { %561 = vmatprep.subr.bf16.mxu0 %v1249_v2  ;;  %601 = vmatpush2.bf16.msra.mxu1 %v1248_v3 }
  0x39   :  { %602 = vmatprep.subr.bf16.mxu1 %v1252_v4 }
  0x3b   :  { %562 = vmatpush2.bf16.msra.mxu0 %v1251_v5 }
  0x3c   :  { %563 = vmatprep.subr.bf16.mxu0 %v1255_v6  ;;  %603 = vmatpush2.bf16.msra.mxu1 %v1254_v7 }
  0x3d   :  { %604 = vmatprep.subr.bf16.mxu1 %v1258_v8 }
  0x3f   :  { %564 = vmatpush2.bf16.msra.mxu0 %v1257_v9 }
  0x40   :  { %623 = vmatprep.subr.bf16.mxu0 %v1264_v10  ;;  %605 = vmatpush2.bf16.msra.mxu1 %v1261_v11 }
  0x41   :  { %16 = vsyncpa [#allocation3], 0  ;;  %1109 = vmatprep.subr.bf16.mxu1 %v1274_v13  ;;  %v1265_v18 = vld [vmem:[%s1727_s1 + $0x220] ss:$8 sps:$4 sm:$0xff]   ;;  %v1321_v19 = vmov 0   ;;  %v126_v21 = vcombine.high %v1531_v52, %v1531_v52  ;;  %vm529_vm0 = vcmask 523264  }
  0x42   :  { %566 = vmatmul.mubr.bf16.vlgmr.msra.gmra.mxu0 %v148_v12  ;;  %v1270_v20 = vld [vmem:[%s1727_s1 + $0x214] ss:$8 sps:$4 sm:$0xff]   ;;  %v1268_v22 = vld [vmem:[%s1727_s1 + $0x210] ss:$8 sps:$4 sm:$0xff]   ;;  %v1273_v23 = vld [vmem:[%s1727_s1 + $0x204] ss:$8 sps:$4 sm:$0xff]  }
  0x43   :  { %624 = vmatpush1.bf16.msra.mxu0 %v1262_v14  ;;  %647 = vmatprep.mubr.bf16.mxu0 %v1321_v19  ;;  %v140_v24 = vrot.slane %v126_v21, %v1517_v48  ;;  %v1271_v25 = vld [vmem:[%s1727_s1 + $0x200] ss:$8 sps:$4 sm:$0xff]   ;;  %v1276_v27 = vld [vmem:[%s1731_s5 + $0x70] sm:$0xff]   ;;  %v1282_v33 = vld [vmem:[%s1731_s5 + $0x58] sm:$0xff]   ;;  %v1322_v43 = vmov 0.0   ;;  %v117_v50 = vsub.s32 0, %v1502_v42 }
  0x44   :  { %607 = vmatmul.mubr.bf16.vlgmr.msra.gmra.mxu1 %v163_v16  ;;  %625 = vmatprep.subr.bf16.mxu0 %v1267_v15  ;;  %v1277_v28 = vld [vmem:[%s1731_s5 + $0x30] sm:$0xff]   ;;  %v1278_v29 = vld [vmem:[%s1731_s5 + $0x68] sm:$0xff]   ;;  %v1280_v31 = vld [vmem:[%s1731_s5 + $0x60] sm:$0xff]   ;;  %v121_v54 = vsub.s32 1, %v1502_v42  ;;  %vm1323_vm1 = vmmov 0   ;;  %s1324_s21 = smov [#allocation2]  }
  0x45   :  { %1110 = vmatpush3.bf16.msra.mxu1 %v1275_v17  ;;  %v155_v26 = vrot.slane %v140_v24, %v1517_v48  ;;  %v1279_v30 = vld [vmem:[%s1731_s5 + $0x28] sm:$0xff]   ;;  %v1281_v32 = vld [vmem:[%s1731_s5 + $0x20] sm:$0xff]   ;;  %v1283_v34 = vld [vmem:[%s1731_s5 + $0x18] sm:$0xff]   ;;  %s1000_s0 = sshll.u32 %s1324_s21, 4  ;;  %vm992_vm2 = vcmask 74752   ;;  %s1001_s0 = int_to_ptr.vmem [resolvable:$true] %s1000_s0 }
  0x46   :  { %1111 = vmatprep.subr.bf16.mxu1 %v1276_v27  ;;  %v1284_v35 = vld [vmem:[%s1731_s5 + $0x50] sm:$0xff]   ;;  %v1286_v37 = vld [vmem:[%s1731_s5 + $0x48] sm:$0xff]   ;;  %v1288_v39 = vld [vmem:[%s1731_s5 + $0x40] sm:$0xff]   ;;  %p1303_p1 = scmp.lt.s32.totalorder %s1001_s0, %s1001_s0 }
  0x47   :  { %626 = vmatpush1.bf16.msra.mxu0 %v1265_v18  ;;  %v1285_v36 = vld [vmem:[%s1731_s5 + $0x10] sm:$0xff]   ;;  %v1287_v38 = vld [vmem:[%s1731_s5 + $0x8] sm:$0xff]   ;;  %v1289_v40 = vld [vmem:[%s1731_s5] sm:$0xff]  }
  0x48   :  { %627 = vmatprep.subr.bf16.mxu0 %v1270_v20  ;;  %v1290_v41 = vld [vmem:[%s1735_s9 + $0x38] sm:$0xff]   ;;  %v1291_v44 = vld [vmem:[%s1735_s9 + $0x30] sm:$0xff]   ;;  %v1292_v45 = vld [vmem:[%s1735_s9 + $0x28] sm:$0xff]  }
  0x49   :  { %1112 = vmatpush3.bf16.msra.mxu1 %v1277_v28  ;;  %v1293_v46 = vld [vmem:[%s1735_s9 + $0x20] sm:$0xff]   ;;  %v1294_v19 = vld [vmem:[%s1735_s9 + $0x18] sm:$0xff]   ;;  %v1295_v20 = vld [vmem:[%s1735_s9 + $0x10] sm:$0xff]  }
  0x4a   :  { %1113 = vmatprep.subr.bf16.mxu1 %v1278_v29  ;;  %v113_v51 = vld [vmem:[%s1728_s2] sm:$0x3]  ;;  %v1296_v21 = vld [vmem:[%s1735_s9 + $0x8] sm:$0xff]  }
  0x4b   :  { %628 = vmatpush1.bf16.msra.mxu0 %v1268_v22  ;;  %v118_v57 = vrot.slane %v113_v51, %v117_v50  ;;  %v122_v59 = vrot.slane %v113_v51, %v121_v54  ;;  %v658_v62 = vld [vmem:[%s1729_s3] sm:$0x3] }
  0x4c   :  { %629 = vmatprep.subr.bf16.mxu0 %v1273_v23  ;;  %v663_v3 = vrot.slane %v658_v62, %v117_v50  ;;  %v672_v42 = vld [vmem:[%s1730_s4] sm:$0x3]  ;;  %v667_v7 = vrot.slane %v658_v62, %v121_v54 }
  0x4d   :  { %1114 = vmatpush3.bf16.msra.mxu1 %v1279_v30  ;;  %v677_v8 = vrot.slane %v672_v42, %v117_v50  ;;  %v681_v12 = vrot.slane %v672_v42, %v121_v54  ;;  %v1297_v22 = vld [vmem:[%s1735_s9] sm:$0xff]  }
  0x4e   :  { %1115 = vmatprep.subr.bf16.mxu1 %v1280_v31  ;;  %v1081_v24 = vld [vmem:[%s1732_s6] ss:$0 sm:$0xff] }
  0x4f   :  { %630 = vmatpush1.bf16.msra.mxu0 %v1271_v25  ;;  %v1098_v29 = vld [vmem:[%s1733_s7] ss:$0 sm:$0xff]  ;;  %s1298_s7 = scalar_lea.vmem %s1001_s0, 32 }
  0x50   :  { %1140 = vmatprep.subr.bf16.mxu0 %v1322_v43  ;;  %p1299_p0 = scmp.ne.s32.totalorder %s1001_s0, %s1298_s7  ;;  %p1304_p2 = scmp.lt.s32.totalorder %s1298_s7, %s1298_s7 }
  0x51   :  { %1116 = vmatpush3.bf16.msra.mxu1 %v1281_v32  ;;  %v1099_v32 = vld [vmem:[%s1734_s8] ss:$0 sm:$0xff] }
  0x52   :  { %1080 = vmatmul.mubr.msk.bf16.vlgmr.msra.gmra.mxu0 %vm529_vm0, %v155_v26  ;;  %1117 = vmatprep.subr.bf16.mxu1 %v1282_v33  ;;  %p1305_p3 = por %p1304_p2, %p1303_p1 }
  0x53   :  { %1141 = vmatpush3.bf16.msra.mxu0 %v1290_v41  ;;  %1156 = vmatprep.mubr.msk.bf16.mxu0 %vm1323_vm1, %v1322_v43 }
  0x54   :  { %1142 = vmatprep.subr.bf16.mxu0 %v1322_v43  ;;  %p1306_p4 = pnand %p1305_p3, %p1299_p0 }
  0x55   :  { %1118 = vmatpush3.bf16.msra.mxu1 %v1283_v34 }
  0x56   :  { %1119 = vmatprep.subr.bf16.mxu1 %v1284_v35 }
  0x57   :  { %1143 = vmatpush3.bf16.msra.mxu0 %v1291_v44 }
  0x58   :  { %1144 = vmatprep.subr.bf16.mxu0 %v1322_v43 }
  0x59   :  { %1120 = vmatpush3.bf16.msra.mxu1 %v1285_v36  ;;  %v1100_v36 = vld [vmem:[%s1736_s10] ss:$0 sm:$0xff] }
  0x5a   :  { %1121 = vmatprep.subr.bf16.mxu1 %v1286_v37 }
  0x5b   :  { %1145 = vmatpush3.bf16.msra.mxu0 %v1292_v45 }
  0x5c   :  { %1146 = vmatprep.subr.bf16.mxu0 %v1322_v43 }
  0x5d   :  { %1122 = vmatpush3.bf16.msra.mxu1 %v1287_v38 }
  0x5e   :  { %1123 = vmatprep.subr.bf16.mxu1 %v1288_v39 }
  0x5f   :  { %1147 = vmatpush3.bf16.msra.mxu0 %v1293_v46 }
  0x60   :  { %1148 = vmatprep.subr.bf16.mxu0 %v1322_v43 }
  0x61   :  { %1124 = vmatpush3.bf16.msra.mxu1 %v1289_v40 }
  0x63   :  { %1149 = vmatpush3.bf16.msra.mxu0 %v1294_v19 }
  0x64   :  { %1150 = vmatprep.subr.bf16.mxu0 %v1322_v43 }
  0x67   :  { %1151 = vmatpush3.bf16.msra.mxu0 %v1295_v20 }
  0x68   :  { %1152 = vmatprep.subr.bf16.mxu0 %v1322_v43 }
  0x6b   :  { %1153 = vmatpush3.bf16.msra.mxu0 %v1296_v21 }
  0x6c   :  { %1154 = vmatprep.subr.bf16.mxu0 %v1322_v43 }
  0x6f   :  { %1155 = vmatpush3.bf16.msra.mxu0 %v1297_v22 }
 0x102   :  { %v567_v47 = vpop.f32.mrf.mxu0 }
 0x103   :  { %v568_v60 = vadd.f32 %v567_v47, %v118_v57 }
 0x104   :  { %v569_v48 = vpop.f32.mrf.mxu0  ;;  %v608_v49 = vpop.f32.mrf.mxu1 }
 0x105   :  { %v570_v61 = vadd.f32 %v569_v48, %v122_v59  ;;  %v609_v63 = vadd.f32 %v608_v49, %v568_v60 }
 0x106   :  { %v571_v52 = vpop.f32.mrf.mxu0  ;;  %v610_v53 = vpop.f32.mrf.mxu1 }
 0x107   :  { %v611_v1 = vadd.f32 %v610_v53, %v570_v61 }
 0x108   :  { %v572_v55 = vpop.f32.mrf.mxu0  ;;  %v612_v56 = vpop.f32.mrf.mxu1 }
 0x10a   :  { %v613_v58 = vpop.f32.mrf.mxu1 }
 0x112   :  { %v649_v0 = vpop.f32.mrf.mxu0 }
 0x113   :  { %v650_v2 = vadd.f32 %v649_v0, %v609_v63 }
 0x114   :  { %v651_v4 = vpop.f32.mrf.mxu0 }
 0x115   :  { %v656_v5 = vmax.f32 %v650_v2, 0.0  ;;  %v652_v6 = vadd.f32 %v651_v4, %v611_v1 }
 0x116   :  { %v653_v9 = vpop.f32.mrf.mxu0 }
 0x117   :  { %v670_v10 = vmul.f32 %v663_v3, %v656_v5  ;;  %v657_v11 = vmax.f32 %v652_v6, 0.0 }
 0x118   :  { %v654_v13 = vpop.f32.mrf.mxu0 }
 0x119   :  { %v671_v14 = vmul.f32 %v667_v7, %v657_v11  ;;  %v684_v15 = vadd.f32 %v677_v8, %v670_v10 }
 0x11b   :  { %v685_v16 = vadd.f32 %v681_v12, %v671_v14  ;;  %v686_v18 = vpack.c.bf16 %v684_v15, %v684_v15 }
 0x11d   :  { %v687_v17 = vpack.c.bf16 %v685_v16, %v685_v16 }
 0x11f   :  { %855 = vmatprep.mubr.bf16.mxu1 %v687_v17 }
 0x120   :  { %856 = vmatmul.mubr.bf16.vlgmr.msra.gmra.mxu1 %v686_v18 }
 0x1e0   :  { %v1125_v23 = vpop.f32.mrf.mxu1 }
 0x1e2   :  { %v1126_v25 = vpop.f32.mrf.mxu1 }
 0x1e3   :  { %v1127_v26 = vadd.f32 %v1126_v25, %v1125_v23 }
 0x1e4   :  { %v1128_v27 = vpop.f32.mrf.mxu1 }
 0x1e5   :  { %v858_v28 = vadd.f32 %v1127_v26, %v1081_v24 }
 0x1e6   :  { %v1129_v30 = vpop.f32.mrf.mxu1 }
 0x1e7   :  { %v863_v31 = vmax.f32 %v858_v28, 0.0 }
 0x1e9   :  { %v871_v33 = vmul.f32 %v1098_v29, %v863_v31 }
 0x1eb   :  { %v879_v34 = vadd.f32 %v1099_v32, %v871_v33 }
 0x1ed   :  { %v880_v35 = vpack.c.bf16 %v879_v34, %v879_v34 }
 0x1ef   :  { %1157 = vmatmul.mubr.bf16.vlgmr.msra.gmra.mxu0 %v880_v35 }
 0x2af   :  { %v986_v37 = vpop.f32.mrf.mxu0 }
 0x2b0   :  { %v987_v38 = vadd.f32 %v1100_v36, %v986_v37 }
 0x2b1   :  { %v1158_v39 = vpop.f32.mrf.mxu0 }
 0x2b2   :  { %993 = vst.msk [vmem:[#allocation2] sm:$0x3] %vm992_vm2, %v987_v38 }
 0x2b3   :  { %v989_v40 = vpop.f32.mrf.mxu0 }
 0x2b4   :  { %1309 = shalt.err (!%p1306_p4)
}
 0x2b5   :  { %1003 = dma.vmem_to_hbm [thread:$0]  %s1001_s0, 32, %s1737_s11, [#allocation3]   ;;  %v1159_v41 = vpop.f32.mrf.mxu0 }
 0x2b6   :  { %1318 = dma.done.wait [#allocation3], 32  }
 0x2b7   :  { %1319 = vsyncadd [#allocation3], 4294967264 }
 0x2b8   :  { %1007 = vsyncpa [#allocation3], 1 }

</bundles_post_ra>
